<compile_context>
chip_gen: v7x
topology: tpu7x:2x2x1
jax: 0.10.0
libtpu: 0.0.40
codegen_flags: <defaults>
</compile_context>

<pallas_src>
import functools

import jax
import jax.numpy as jnp
from jax import lax
from jax.experimental import pallas as pl
from jax.experimental.pallas import tpu as pltpu


# --------------------------------------------------------------------------- #
# Fused decoder-layer kernel (one batch element per grid step)
# --------------------------------------------------------------------------- #
def _idefics_decoder_layer_kernel(
    x_ref,      # (S, H)      hidden_states for this batch row
    mask_ref,   # (S, S)      additive attention mask (0 / large negative)
    cos_ref,    # (S, d)      RoPE cos rows gathered at position_ids
    sin_ref,    # (S, d)      RoPE sin rows gathered at position_ids
    ln1_ref,    # (1, H)      input_layernorm weight
    ln2_ref,    # (1, H)      post_attention_layernorm weight
    wqkv_ref,   # (NH, H, 3d) fused q/k/v projection, head-major
    wo_ref,     # (NH, d, H)  o_proj split per head
    wgu_ref,    # (H, 2I)     fused gate/up projection
    wd_ref,     # (I, H)      down_proj
    out_ref,    # (S, H)
    acc_ref,    # (S, H) f32 scratch: attention-output accumulator
    *,
    num_heads,
    scaling,
    eps,
):
    f32 = jnp.float32
    d = cos_ref.shape[-1]
    half = d // 2
    inter = wd_ref.shape[0]
    w_dtype = wqkv_ref.dtype

    x = x_ref[...].astype(f32)                    # (S, H)
    mask = mask_ref[...].astype(f32)              # (S, S)
    cos = cos_ref[...].astype(f32)                # (S, d)
    sin = sin_ref[...].astype(f32)                # (S, d)

    # ---------------- input RMSNorm (f32 math, as PyTorch) ----------------
    var = jnp.mean(x * x, axis=-1, keepdims=True)
    h = ln1_ref[...].astype(f32) * (x * lax.rsqrt(var + eps))   # (S, H)
    h_mm = h.astype(w_dtype)        # activations in weight dtype for the MXU

    # rotate_half sign pattern: first half -1, second half +1 (hoisted)
    lane = lax.broadcasted_iota(jnp.int32, (1, d), 1)
    rot_sign = jnp.where(lane < half, jnp.float32(-1.0), jnp.float32(1.0))

    acc_ref[...] = jnp.zeros_like(acc_ref)

    # ---------------- per-head attention (streamed, not unrolled) ----------
    def head_body(hd, carry):
        w_h = wqkv_ref[hd]                                   # (H, 3d)
        qkv = jnp.dot(h_mm, w_h, preferred_element_type=f32)  # (S, 3d)
        q_h = qkv[:, :d]
        k_h = qkv[:, d:2 * d]
        v_h = qkv[:, 2 * d:]

        # RoPE: rotate_half via XLU roll + sign mask; fold 1/sqrt(d) into q.
        q_rot = pltpu.roll(q_h, shift=half, axis=1) * rot_sign
        k_rot = pltpu.roll(k_h, shift=half, axis=1) * rot_sign
        q_h = (q_h * cos + q_rot * sin) * scaling
        k_h = k_h * cos + k_rot * sin

        # scores = q @ k^T (already scaled) + mask; softmax in f32
        s = lax.dot_general(q_h, k_h, (((1,), (1,)), ((), ())),
                            preferred_element_type=f32) + mask   # (S, S)
        s = s - jnp.max(s, axis=-1, keepdims=True)
        p = jnp.exp(s)
        denom = jnp.sum(p, axis=-1, keepdims=True)

        ctx = jnp.dot(p, v_h, preferred_element_type=f32)        # (S, d)
        ctx = ctx * pl.reciprocal(denom, approx=True)            # normalize late

        # this head's slice of o_proj, accumulated into (S, H)
        acc_ref[...] += jnp.dot(ctx.astype(w_dtype), wo_ref[hd],
                                preferred_element_type=f32)
        return carry

    lax.fori_loop(0, num_heads, head_body, 0)

    # ---------------- residual + post-attention RMSNorm ----------------
    h2 = x + acc_ref[...]
    var2 = jnp.mean(h2 * h2, axis=-1, keepdims=True)
    h2n = ln2_ref[...].astype(f32) * (h2 * lax.rsqrt(var2 + eps))
    h2n_mm = h2n.astype(w_dtype)

    # ---------------- SwiGLU MLP (fused gate/up) ----------------
    gu = jnp.dot(h2n_mm, wgu_ref[...], preferred_element_type=f32)  # (S, 2I)
    g = gu[:, :inter]
    u = gu[:, inter:]
    act = g * (1.0 / (1.0 + jnp.exp(-g))) * u                       # silu(g)*u
    mlp = jnp.dot(act.astype(w_dtype), wd_ref[...],
                  preferred_element_type=f32)                       # (S, H)

    out_ref[...] = (h2 + mlp).astype(out_ref.dtype)


@functools.partial(jax.jit, static_argnames=("num_heads", "rms_eps"))
def _decoder_layer_forward(x, mask, cos_b, sin_b, ln1, ln2,
                           wqkv, wo_h, wgu, wd, *, num_heads, rms_eps):
    B, S, H = x.shape
    d = cos_b.shape[-1]
    I2 = wgu.shape[1]          # 2 * intermediate_size
    inter = wd.shape[0]
    d3 = wqkv.shape[-1]

    kernel = functools.partial(
        _idefics_decoder_layer_kernel,
        num_heads=num_heads,
        scaling=float(d) ** -0.5,
        eps=float(rms_eps))

    # Explicit scoped-VMEM budget from the actual block footprint
    # (activations double-buffered across grid steps, weights resident).
    a_it = x.dtype.itemsize
    w_it = wqkv.dtype.itemsize
    act_bytes = (S * H + S * S + 2 * S * d + S * H) * a_it
    w_bytes = (wqkv.size + wo_h.size + wgu.size + wd.size
               + ln1.size + ln2.size) * w_it
    scratch_bytes = S * H * 4
    vmem_limit = int(min(100 * (1 << 20),
                         max(32 * (1 << 20),
                             2 * (act_bytes + w_bytes) + scratch_bytes
                             + (4 << 20))))

    return pl.pallas_call(
        kernel,
        out_shape=jax.ShapeDtypeStruct((B, S, H), x.dtype),
        grid=(B,),
        in_specs=[
            pl.BlockSpec((None, S, H), lambda b: (b, 0, 0)),           # x
            pl.BlockSpec((None, None, S, S), lambda b: (b, 0, 0, 0)),  # mask
            pl.BlockSpec((None, S, d), lambda b: (b, 0, 0)),           # cos
            pl.BlockSpec((None, S, d), lambda b: (b, 0, 0)),           # sin
            pl.BlockSpec((1, H), lambda b: (0, 0)),                    # ln1
            pl.BlockSpec((1, H), lambda b: (0, 0)),                    # ln2
            pl.BlockSpec((num_heads, H, d3), lambda b: (0, 0, 0)),     # wqkv
            pl.BlockSpec((num_heads, d, H), lambda b: (0, 0, 0)),      # wo
            pl.BlockSpec((H, I2), lambda b: (0, 0)),                   # w_gate_up
            pl.BlockSpec((inter, H), lambda b: (0, 0)),                # w_down
        ],
        out_specs=pl.BlockSpec((None, S, H), lambda b: (b, 0, 0)),
        scratch_shapes=[pltpu.VMEM((S, H), jnp.float32)],
        compiler_params=pltpu.CompilerParams(
            dimension_semantics=("parallel",),
            vmem_limit_bytes=vmem_limit),
    )(x, mask, cos_b, sin_b, ln1, ln2, wqkv, wo_h, wgu, wd)


# --------------------------------------------------------------------------- #
# Module wrapper (parameters + memoized RoPE buffer + glue)
# --------------------------------------------------------------------------- #
class IdeficsDecoderLayerPallas:
    """JAX/Pallas port of transformers IdeficsDecoderLayer (inference path)."""

    def __init__(self, hidden_size, num_heads, intermediate_size,
                 rms_norm_eps=1e-6, max_position_embeddings=2048,
                 rope_base=10000.0, dtype=jnp.float32, key=None):
        assert hidden_size % num_heads == 0
        self.hidden_size = hidden_size
        self.num_heads = num_heads
        self.head_dim = hidden_size // num_heads
        self.intermediate_size = intermediate_size
        self.rms_eps = float(rms_norm_eps)
        self.dtype = dtype

        if key is None:
            key = jax.random.PRNGKey(0)
        ks = jax.random.split(key, 9)
        scale = 0.05
        H, I, NH, d = hidden_size, intermediate_size, num_heads, self.head_dim

        # Raw weights in (in, out) layout: kernel/reference compute x @ W,
        # which is the same linear map as nn.Linear's x @ W^T.
        self.wq = (scale * jax.random.normal(ks[0], (H, H))).astype(dtype)
        self.wk = (scale * jax.random.normal(ks[1], (H, H))).astype(dtype)
        self.wv = (scale * jax.random.normal(ks[2], (H, H))).astype(dtype)
        self.wo = (scale * jax.random.normal(ks[3], (H, H))).astype(dtype)
        self.wg = (scale * jax.random.normal(ks[4], (H, I))).astype(dtype)
        self.wu = (scale * jax.random.normal(ks[5], (H, I))).astype(dtype)
        self.wd = (scale * jax.random.normal(ks[6], (I, H))).astype(dtype)
        self.ln1_w = (1.0 + 0.05 * jax.random.normal(ks[7], (1, H))).astype(dtype)
        self.ln2_w = (1.0 + 0.05 * jax.random.normal(ks[8], (1, H))).astype(dtype)

        # Fused / head-major layouts consumed by the kernel.
        def head_major(w):      # (H, H) -> (NH, H, d)  columns of head hd
            return jnp.transpose(w.reshape(H, NH, d), (1, 0, 2))

        self.wqkv_h = jnp.concatenate(
            [head_major(self.wq), head_major(self.wk), head_major(self.wv)],
            axis=-1)                                    # (NH, H, 3d)
        self.wo_h = self.wo.reshape(NH, d, H)           # rows of head hd
        self.wgu = jnp.concatenate([self.wg, self.wu], axis=1)   # (H, 2I)

        # RoPE cos/sin cache: built ONCE here (buffer semantics, as in PyTorch).
        inv_freq = 1.0 / (rope_base ** (jnp.arange(0, d, 2, dtype=jnp.float32) / d))
        t = jnp.arange(max_position_embeddings, dtype=jnp.float32)
        freqs = jnp.einsum("i,j->ij", t, inv_freq)
        emb = jnp.concatenate([freqs, freqs], axis=-1)
        self.cos_cached = jnp.cos(emb).astype(dtype)    # (max_pos, head_dim)
        self.sin_cached = jnp.sin(emb).astype(dtype)

    def __call__(self, hidden_states, attention_mask=None, position_ids=None):
        B, S, H = hidden_states.shape
        if position_ids is None:
            position_ids = jnp.broadcast_to(
                jnp.arange(S, dtype=jnp.int32)[None, :], (B, S))
        if attention_mask is None:
            # HF passes the additive causal/padding mask from the model;
            # callers should normally supply one.
            attention_mask = jnp.zeros((B, 1, S, S), hidden_states.dtype)
        cos_b = self.cos_cached[position_ids].astype(hidden_states.dtype)  # (B,S,d)
        sin_b = self.sin_cached[position_ids].astype(hidden_states.dtype)
        return _decoder_layer_forward(
            hidden_states, attention_mask, cos_b, sin_b,
            self.ln1_w, self.ln2_w,
            self.wqkv_h, self.wo_h, self.wgu, self.wd,
            num_heads=self.num_heads, rms_eps=self.rms_eps)


# --------------------------------------------------------------------------- #
# Pure-JAX reference (mirrors the PyTorch forward)
# --------------------------------------------------------------------------- #
def _reference_forward(x, mask, cos_b, sin_b, ln1, ln2,
                       wq, wk, wv, wo, wg, wu, wd, num_heads, eps):
    B, S, H = x.shape
    d = H // num_heads
    f32 = jnp.float32

    def rms(h, w):
        var = jnp.mean(h.astype(f32) ** 2, axis=-1, keepdims=True)
        return w * (h * jax.lax.rsqrt(var + eps))

    def rot_half(t):
        return jnp.concatenate([-t[..., d // 2:], t[..., :d // 2]], axis=-1)

    residual = x
    h = rms(x, ln1)
    q = (h @ wq).reshape(B, S, num_heads, d).transpose(0, 2, 1, 3)
    k = (h @ wk).reshape(B, S, num_heads, d).transpose(0, 2, 1, 3)
    v = (h @ wv).reshape(B, S, num_heads, d).transpose(0, 2, 1, 3)

    cos = cos_b[:, None, :, :]
    sin = sin_b[:, None, :, :]
    q = q * cos + rot_half(q) * sin
    k = k * cos + rot_half(k) * sin

    scores = jnp.einsum("bhqd,bhkd->bhqk", q, k) * (d ** -0.5) + mask
    probs = jax.nn.softmax(scores.astype(f32), axis=-1).astype(x.dtype)
    attn = jnp.einsum("bhqk,bhkd->bhqd", probs, v)
    attn = attn.transpose(0, 2, 1, 3).reshape(B, S, H) @ wo

    h2 = residual + attn
    h2n = rms(h2, ln2)
    g = h2n @ wg
    u = h2n @ wu
    mlp = (g * jax.nn.sigmoid(g) * u) @ wd
    return h2 + mlp


if __name__ == "__main__":
    key = jax.random.PRNGKey(0)
    # Small but tiling-friendly: head_dim=128 (real Idefics head size),
    # lane-dense H, sublane-aligned S.
    B, S, H, NH, I = 2, 64, 512, 4, 1024
    kx, kp = jax.random.split(key)

    x = jax.random.normal(kx, (B, S, H), dtype=jnp.float32)
    layer = IdeficsDecoderLayerPallas(
        hidden_size=H, num_heads=NH, intermediate_size=I,
        max_position_embeddings=128, key=kp)

    # Causal additive mask (B, 1, S, S): 0 on/below diagonal, -1e9 above.
    causal = jnp.where(jnp.tril(jnp.ones((S, S), dtype=bool)), 0.0, -1e9)
    mask = jnp.broadcast_to(causal.astype(jnp.float32), (B, 1, S, S))
    pos = jnp.broadcast_to(jnp.arange(S, dtype=jnp.int32)[None, :], (B, S))

    out = layer(x, attention_mask=mask, position_ids=pos)
    out = jax.block_until_ready(out)

    ref = _reference_forward(
        x, mask, layer.cos_cached[pos], layer.sin_cached[pos],
        layer.ln1_w, layer.ln2_w,
        layer.wq, layer.wk, layer.wv, layer.wo,
        layer.wg, layer.wu, layer.wd, NH, layer.rms_eps)

    assert out.shape == (B, S, H) and out.dtype == x.dtype
    max_err = float(jnp.max(jnp.abs(out - ref)))
    assert jnp.allclose(out, ref, atol=2e-2, rtol=2e-2), f"max err {max_err}"

    print("KERNEL_OK")
</pallas_src>

<mosaic_0001>
module attributes {stable_mosaic.version = 11 : i64} {
  func.func @_idefics_decoder_layer_kernel(%arg0: i32, %arg1: memref<1x64x512xf32, #tpu.memory_space<vmem>>, %arg2: memref<1x1x64x64xf32, #tpu.memory_space<vmem>>, %arg3: memref<1x64x128xf32, #tpu.memory_space<vmem>>, %arg4: memref<1x64x128xf32, #tpu.memory_space<vmem>>, %arg5: memref<1x512xf32, #tpu.memory_space<vmem>>, %arg6: memref<1x512xf32, #tpu.memory_space<vmem>>, %arg7: memref<4x512x384xf32, #tpu.memory_space<vmem>>, %arg8: memref<4x128x512xf32, #tpu.memory_space<vmem>>, %arg9: memref<512x2048xf32, #tpu.memory_space<vmem>>, %arg10: memref<1024x512xf32, #tpu.memory_space<vmem>>, %arg11: memref<1x64x512xf32, #tpu.memory_space<vmem>>, %arg12: memref<64x512xf32, #tpu.memory_space<vmem>>) attributes {dimension_semantics = [#tpu.dimension_semantics<parallel>], iteration_bounds = array<i64: 2>, scalar_prefetch = 0 : i64, scratch_operands = 1 : i64, tpu.core_type = #tpu.core_type<tc>, window_params = [{transform_indices = @transform_0, window_bounds = array<i64: 1, 64, 512>}, {transform_indices = @transform_1, window_bounds = array<i64: 1, 1, 64, 64>}, {transform_indices = @transform_2, window_bounds = array<i64: 1, 64, 128>}, {transform_indices = @transform_3, window_bounds = array<i64: 1, 64, 128>}, {pipeline_mode = #tpu.pipeline_mode<synchronous>, transform_indices = @transform_4, window_bounds = array<i64: 1, 512>}, {pipeline_mode = #tpu.pipeline_mode<synchronous>, transform_indices = @transform_5, window_bounds = array<i64: 1, 512>}, {pipeline_mode = #tpu.pipeline_mode<synchronous>, transform_indices = @transform_6, window_bounds = array<i64: 4, 512, 384>}, {pipeline_mode = #tpu.pipeline_mode<synchronous>, transform_indices = @transform_7, window_bounds = array<i64: 4, 128, 512>}, {pipeline_mode = #tpu.pipeline_mode<synchronous>, transform_indices = @transform_8, window_bounds = array<i64: 512, 2048>}, {pipeline_mode = #tpu.pipeline_mode<synchronous>, transform_indices = @transform_9, window_bounds = array<i64: 1024, 512>}, {transform_indices = @transform_10, window_bounds = array<i64: 1, 64, 512>}]} {
    %c0 = arith.constant 0 : index
    %c0_0 = arith.constant 0 : index
    %c0_1 = arith.constant 0 : index
    %0 = vector.load %arg1[%c0, %c0_0, %c0_1] : memref<1x64x512xf32, #tpu.memory_space<vmem>>, vector<1x64x512xf32>
    %1 = vector.shape_cast %0 : vector<1x64x512xf32> to vector<64x512xf32>
    %c0_2 = arith.constant 0 : index
    %c0_3 = arith.constant 0 : index
    %c0_4 = arith.constant 0 : index
    %c0_5 = arith.constant 0 : index
    %2 = vector.load %arg2[%c0_2, %c0_3, %c0_4, %c0_5] : memref<1x1x64x64xf32, #tpu.memory_space<vmem>>, vector<1x1x64x64xf32>
    %3 = vector.shape_cast %2 : vector<1x1x64x64xf32> to vector<64x64xf32>
    %c0_6 = arith.constant 0 : index
    %c0_7 = arith.constant 0 : index
    %c0_8 = arith.constant 0 : index
    %4 = vector.load %arg3[%c0_6, %c0_7, %c0_8] : memref<1x64x128xf32, #tpu.memory_space<vmem>>, vector<1x64x128xf32>
    %5 = vector.shape_cast %4 : vector<1x64x128xf32> to vector<64x128xf32>
    %c0_9 = arith.constant 0 : index
    %c0_10 = arith.constant 0 : index
    %c0_11 = arith.constant 0 : index
    %6 = vector.load %arg4[%c0_9, %c0_10, %c0_11] : memref<1x64x128xf32, #tpu.memory_space<vmem>>, vector<1x64x128xf32>
    %7 = vector.shape_cast %6 : vector<1x64x128xf32> to vector<64x128xf32>
    %8 = arith.mulf %1, %1 : vector<64x512xf32>
    %cst = arith.constant dense<0.000000e+00> : vector<64xf32>
    %9 = vector.multi_reduction <add>, %8, %cst [1] : vector<64x512xf32> to vector<64xf32>
    %10 = vector.shape_cast %9 : vector<64xf32> to vector<64x1xf32>
    %cst_12 = arith.constant 5.120000e+02 : f32
    %11 = vector.broadcast %cst_12 : f32 to vector<64x1xf32>
    %12 = arith.divf %10, %11 : vector<64x1xf32>
    %c0_13 = arith.constant 0 : index
    %c0_14 = arith.constant 0 : index
    %13 = vector.load %arg5[%c0_13, %c0_14] : memref<1x512xf32, #tpu.memory_space<vmem>>, vector<1x512xf32>
    %cst_15 = arith.constant 9.99999997E-7 : f32
    %14 = vector.broadcast %cst_15 : f32 to vector<64x1xf32>
    %15 = arith.addf %12, %14 : vector<64x1xf32>
    %16 = math.rsqrt %15 : vector<64x1xf32>
    %17 = vector.broadcast %16 : vector<64x1xf32> to vector<64x512xf32>
    %18 = arith.mulf %1, %17 : vector<64x512xf32>
    %19 = vector.broadcast %13 : vector<1x512xf32> to vector<64x512xf32>
    %20 = arith.mulf %19, %18 : vector<64x512xf32>
    %21 = tpu.iota {dimensions = array<i32: 1>} : vector<1x128xi32>
    %c64_i32 = arith.constant 64 : i32
    %22 = vector.broadcast %c64_i32 : i32 to vector<1x128xi32>
    %23 = arith.cmpi slt, %21, %22 : vector<1x128xi32>
    %cst_16 = arith.constant -1.000000e+00 : f32
    %cst_17 = arith.constant 1.000000e+00 : f32
    %24 = vector.broadcast %cst_16 : f32 to vector<1x128xf32>
    %25 = vector.broadcast %cst_17 : f32 to vector<1x128xf32>
    %26 = arith.select %23, %24, %25 : vector<1x128xi1>, vector<1x128xf32>
    %cst_18 = arith.constant 0.000000e+00 : f32
    %27 = vector.broadcast %cst_18 : f32 to vector<64x512xf32>
    %c0_19 = arith.constant 0 : index
    %c0_20 = arith.constant 0 : index
    %28 = vector.load %arg12[%c0_19, %c0_20] : memref<64x512xf32, #tpu.memory_space<vmem>>, vector<64x512xf32>
    tpu.vector_store %arg12[%c0_19, %c0_20], %27 {strides = array<i32>} : memref<64x512xf32, #tpu.memory_space<vmem>>, vector<64x512xf32>,
    %c0_i32 = arith.constant 0 : i32
    %c4_i32 = arith.constant 4 : i32
    %29 = arith.addi %c0_i32, %c4_i32 : i32
    %c1_i32 = arith.constant 1 : i32
    scf.for %arg13 = %c0_i32 to %29 step %c1_i32  : i32 {
      %64 = arith.index_cast %arg13 : i32 to index
      %c0_41 = arith.constant 0 : index
      %c0_42 = arith.constant 0 : index
      %65 = vector.load %arg7[%64, %c0_41, %c0_42] : memref<4x512x384xf32, #tpu.memory_space<vmem>>, vector<1x512x384xf32>
      %66 = vector.shape_cast %65 : vector<1x512x384xf32> to vector<512x384xf32>
      %cst_43 = arith.constant dense<0.000000e+00> : vector<64x384xf32>
      %67 = tpu.matmul %20, %66, %cst_43 {dimension_numbers = #tpu.dot_dimension_numbers<[1], [0], [0], [1], [0, 0, 1, 1], [], []>} : vector<64x512xf32>, vector<512x384xf32>, vector<64x384xf32> -> vector<64x384xf32>
      %68 = vector.extract_strided_slice %67 {offsets = [0, 0], sizes = [64, 128], strides = [1, 1]} : vector<64x384xf32> to vector<64x128xf32>
      %69 = vector.extract_strided_slice %67 {offsets = [0, 128], sizes = [64, 128], strides = [1, 1]} : vector<64x384xf32> to vector<64x128xf32>
      %70 = vector.extract_strided_slice %67 {offsets = [0, 256], sizes = [64, 128], strides = [1, 1]} : vector<64x384xf32> to vector<64x128xf32>
      %c64_i32_44 = arith.constant 64 : i32
      %71 = tpu.dynamic_rotate %68 by %c64_i32_44 dim 1 : vector<64x128xf32>, i32 -> vector<64x128xf32>
      %72 = vector.broadcast %26 : vector<1x128xf32> to vector<64x128xf32>
      %73 = arith.mulf %71, %72 : vector<64x128xf32>
      %c64_i32_45 = arith.constant 64 : i32
      %74 = tpu.dynamic_rotate %69 by %c64_i32_45 dim 1 : vector<64x128xf32>, i32 -> vector<64x128xf32>
      %75 = vector.broadcast %26 : vector<1x128xf32> to vector<64x128xf32>
      %76 = arith.mulf %74, %75 : vector<64x128xf32>
      %77 = arith.mulf %68, %5 : vector<64x128xf32>
      %78 = arith.mulf %73, %7 : vector<64x128xf32>
      %79 = arith.addf %77, %78 : vector<64x128xf32>
      %cst_46 = arith.constant 0.0883883461 : f32
      %80 = vector.broadcast %cst_46 : f32 to vector<64x128xf32>
      %81 = arith.mulf %79, %80 : vector<64x128xf32>
      %82 = arith.mulf %69, %5 : vector<64x128xf32>
      %83 = arith.mulf %76, %7 : vector<64x128xf32>
      %84 = arith.addf %82, %83 : vector<64x128xf32>
      %cst_47 = arith.constant dense<0.000000e+00> : vector<64x64xf32>
      %85 = tpu.matmul %81, %84, %cst_47 {dimension_numbers = #tpu.dot_dimension_numbers<[1], [1], [0], [0], [0, 0, 1, 0], [], []>} : vector<64x128xf32>, vector<64x128xf32>, vector<64x64xf32> -> vector<64x64xf32>
      %86 = arith.addf %85, %3 : vector<64x64xf32>
      %cst_48 = arith.constant dense<0xFF800000> : vector<64xf32>
      %87 = vector.multi_reduction <maximumf>, %86, %cst_48 [1] : vector<64x64xf32> to vector<64xf32>
      %88 = vector.shape_cast %87 : vector<64xf32> to vector<64x1xf32>
      %89 = vector.broadcast %88 : vector<64x1xf32> to vector<64x64xf32>
      %90 = arith.subf %86, %89 : vector<64x64xf32>
      %91 = math.exp %90 : vector<64x64xf32>
      %cst_49 = arith.constant dense<0.000000e+00> : vector<64xf32>
      %92 = vector.multi_reduction <add>, %91, %cst_49 [1] : vector<64x64xf32> to vector<64xf32>
      %93 = vector.shape_cast %92 : vector<64xf32> to vector<64x1xf32>
      %cst_50 = arith.constant dense<0.000000e+00> : vector<64x128xf32>
      %94 = tpu.matmul %91, %70, %cst_50 {dimension_numbers = #tpu.dot_dimension_numbers<[1], [0], [0], [1], [0, 0, 1, 1], [], []>} : vector<64x64xf32>, vector<64x128xf32>, vector<64x128xf32> -> vector<64x128xf32>
      %95 = tpu.reciprocal %93 {approx = true} : vector<64x1xf32> -> vector<64x1xf32>
      %96 = vector.broadcast %95 : vector<64x1xf32> to vector<64x128xf32>
      %97 = arith.mulf %94, %96 : vector<64x128xf32>
      %c0_51 = arith.constant 0 : index
      %c0_52 = arith.constant 0 : index
      %98 = vector.load %arg12[%c0_51, %c0_52] : memref<64x512xf32, #tpu.memory_space<vmem>>, vector<64x512xf32>
      %99 = arith.index_cast %arg13 : i32 to index
      %c0_53 = arith.constant 0 : index
      %c0_54 = arith.constant 0 : index
      %100 = vector.load %arg8[%99, %c0_53, %c0_54] : memref<4x128x512xf32, #tpu.memory_space<vmem>>, vector<1x128x512xf32>
      %101 = vector.shape_cast %100 : vector<1x128x512xf32> to vector<128x512xf32>
      %cst_55 = arith.constant dense<0.000000e+00> : vector<64x512xf32>
      %102 = tpu.matmul %97, %101, %cst_55 {dimension_numbers = #tpu.dot_dimension_numbers<[1], [0], [0], [1], [0, 0, 1, 1], [], []>} : vector<64x128xf32>, vector<128x512xf32>, vector<64x512xf32> -> vector<64x512xf32>
      %103 = arith.addf %98, %102 : vector<64x512xf32>
      %c0_56 = arith.constant 0 : index
      %c0_57 = arith.constant 0 : index
      %104 = vector.load %arg12[%c0_56, %c0_57] : memref<64x512xf32, #tpu.memory_space<vmem>>, vector<64x512xf32>
      tpu.vector_store %arg12[%c0_56, %c0_57], %103 {strides = array<i32>} : memref<64x512xf32, #tpu.memory_space<vmem>>, vector<64x512xf32>,
    }
    %c4_i32_21 = arith.constant 4 : i32
    %c0_22 = arith.constant 0 : index
    %c0_23 = arith.constant 0 : index
    %30 = vector.load %arg12[%c0_22, %c0_23] : memref<64x512xf32, #tpu.memory_space<vmem>>, vector<64x512xf32>
    %31 = arith.addf %1, %30 : vector<64x512xf32>
    %32 = arith.mulf %31, %31 : vector<64x512xf32>
    %cst_24 = arith.constant dense<0.000000e+00> : vector<64xf32>
    %33 = vector.multi_reduction <add>, %32, %cst_24 [1] : vector<64x512xf32> to vector<64xf32>
    %34 = vector.shape_cast %33 : vector<64xf32> to vector<64x1xf32>
    %cst_25 = arith.constant 5.120000e+02 : f32
    %35 = vector.broadcast %cst_25 : f32 to vector<64x1xf32>
    %36 = arith.divf %34, %35 : vector<64x1xf32>
    %c0_26 = arith.constant 0 : index
    %c0_27 = arith.constant 0 : index
    %37 = vector.load %arg6[%c0_26, %c0_27] : memref<1x512xf32, #tpu.memory_space<vmem>>, vector<1x512xf32>
    %cst_28 = arith.constant 9.99999997E-7 : f32
    %38 = vector.broadcast %cst_28 : f32 to vector<64x1xf32>
    %39 = arith.addf %36, %38 : vector<64x1xf32>
    %40 = math.rsqrt %39 : vector<64x1xf32>
    %41 = vector.broadcast %40 : vector<64x1xf32> to vector<64x512xf32>
    %42 = arith.mulf %31, %41 : vector<64x512xf32>
    %43 = vector.broadcast %37 : vector<1x512xf32> to vector<64x512xf32>
    %44 = arith.mulf %43, %42 : vector<64x512xf32>
    %c0_29 = arith.constant 0 : index
    %c0_30 = arith.constant 0 : index
    %45 = vector.load %arg9[%c0_29, %c0_30] : memref<512x2048xf32, #tpu.memory_space<vmem>>, vector<512x2048xf32>
    %cst_31 = arith.constant dense<0.000000e+00> : vector<64x2048xf32>
    %46 = tpu.matmul %44, %45, %cst_31 {dimension_numbers = #tpu.dot_dimension_numbers<[1], [0], [0], [1], [0, 0, 1, 1], [], []>} : vector<64x512xf32>, vector<512x2048xf32>, vector<64x2048xf32> -> vector<64x2048xf32>
    %47 = vector.extract_strided_slice %46 {offsets = [0, 0], sizes = [64, 1024], strides = [1, 1]} : vector<64x2048xf32> to vector<64x1024xf32>
    %48 = vector.extract_strided_slice %46 {offsets = [0, 1024], sizes = [64, 1024], strides = [1, 1]} : vector<64x2048xf32> to vector<64x1024xf32>
    %cst_32 = arith.constant 0.000000e+00 : f32
    %49 = vector.broadcast %cst_32 : f32 to vector<64x1024xf32>
    %50 = arith.subf %49, %47 : vector<64x1024xf32>
    %51 = math.exp %50 : vector<64x1024xf32>
    %cst_33 = arith.constant 1.000000e+00 : f32
    %52 = vector.broadcast %cst_33 : f32 to vector<64x1024xf32>
    %53 = arith.addf %52, %51 : vector<64x1024xf32>
    %cst_34 = arith.constant 1.000000e+00 : f32
    %54 = vector.broadcast %cst_34 : f32 to vector<64x1024xf32>
    %55 = arith.divf %54, %53 : vector<64x1024xf32>
    %56 = arith.mulf %47, %55 : vector<64x1024xf32>
    %57 = arith.mulf %56, %48 : vector<64x1024xf32>
    %c0_35 = arith.constant 0 : index
    %c0_36 = arith.constant 0 : index
    %58 = vector.load %arg10[%c0_35, %c0_36] : memref<1024x512xf32, #tpu.memory_space<vmem>>, vector<1024x512xf32>
    %cst_37 = arith.constant dense<0.000000e+00> : vector<64x512xf32>
    %59 = tpu.matmul %57, %58, %cst_37 {dimension_numbers = #tpu.dot_dimension_numbers<[1], [0], [0], [1], [0, 0, 1, 1], [], []>} : vector<64x1024xf32>, vector<1024x512xf32>, vector<64x512xf32> -> vector<64x512xf32>
    %60 = arith.addf %31, %59 : vector<64x512xf32>
    %c0_38 = arith.constant 0 : index
    %c0_39 = arith.constant 0 : index
    %c0_40 = arith.constant 0 : index
    %61 = vector.load %arg11[%c0_38, %c0_39, %c0_40] : memref<1x64x512xf32, #tpu.memory_space<vmem>>, vector<1x64x512xf32>
    %62 = vector.shape_cast %61 : vector<1x64x512xf32> to vector<64x512xf32>
    %63 = vector.shape_cast %60 : vector<64x512xf32> to vector<1x64x512xf32>
    tpu.vector_store %arg11[%c0_38, %c0_39, %c0_40], %63 {strides = array<i32>} : memref<1x64x512xf32, #tpu.memory_space<vmem>>, vector<1x64x512xf32>,
    return
  }
  func.func @transform_0(%arg0: i32) -> (i32, i32, i32) {
    %c0_i32 = arith.constant 0 : i32
    %c0_i32_0 = arith.constant 0 : i32
    %c0_i32_1 = arith.constant 0 : i32
    return %arg0, %c0_i32, %c0_i32_0 : i32, i32, i32
  }
  func.func @transform_1(%arg0: i32) -> (i32, i32, i32, i32) {
    %c0_i32 = arith.constant 0 : i32
    %c0_i32_0 = arith.constant 0 : i32
    %c0_i32_1 = arith.constant 0 : i32
    %c0_i32_2 = arith.constant 0 : i32
    return %arg0, %c0_i32, %c0_i32_0, %c0_i32_1 : i32, i32, i32, i32
  }
  func.func @transform_2(%arg0: i32) -> (i32, i32, i32) {
    %c0_i32 = arith.constant 0 : i32
    %c0_i32_0 = arith.constant 0 : i32
    %c0_i32_1 = arith.constant 0 : i32
    return %arg0, %c0_i32, %c0_i32_0 : i32, i32, i32
  }
  func.func @transform_3(%arg0: i32) -> (i32, i32, i32) {
    %c0_i32 = arith.constant 0 : i32
    %c0_i32_0 = arith.constant 0 : i32
    %c0_i32_1 = arith.constant 0 : i32
    return %arg0, %c0_i32, %c0_i32_0 : i32, i32, i32
  }
  func.func @transform_4(%arg0: i32) -> (i32, i32) {
    %c0_i32 = arith.constant 0 : i32
    %c0_i32_0 = arith.constant 0 : i32
    %c0_i32_1 = arith.constant 0 : i32
    return %c0_i32, %c0_i32_0 : i32, i32
  }
  func.func @transform_5(%arg0: i32) -> (i32, i32) {
    %c0_i32 = arith.constant 0 : i32
    %c0_i32_0 = arith.constant 0 : i32
    %c0_i32_1 = arith.constant 0 : i32
    return %c0_i32, %c0_i32_0 : i32, i32
  }
  func.func @transform_6(%arg0: i32) -> (i32, i32, i32) {
    %c0_i32 = arith.constant 0 : i32
    %c0_i32_0 = arith.constant 0 : i32
    %c0_i32_1 = arith.constant 0 : i32
    %c0_i32_2 = arith.constant 0 : i32
    return %c0_i32, %c0_i32_0, %c0_i32_1 : i32, i32, i32
  }
  func.func @transform_7(%arg0: i32) -> (i32, i32, i32) {
    %c0_i32 = arith.constant 0 : i32
    %c0_i32_0 = arith.constant 0 : i32
    %c0_i32_1 = arith.constant 0 : i32
    %c0_i32_2 = arith.constant 0 : i32
    return %c0_i32, %c0_i32_0, %c0_i32_1 : i32, i32, i32
  }
  func.func @transform_8(%arg0: i32) -> (i32, i32) {
    %c0_i32 = arith.constant 0 : i32
    %c0_i32_0 = arith.constant 0 : i32
    %c0_i32_1 = arith.constant 0 : i32
    return %c0_i32, %c0_i32_0 : i32, i32
  }
  func.func @transform_9(%arg0: i32) -> (i32, i32) {
    %c0_i32 = arith.constant 0 : i32
    %c0_i32_0 = arith.constant 0 : i32
    %c0_i32_1 = arith.constant 0 : i32
    return %c0_i32, %c0_i32_0 : i32, i32
  }
  func.func @transform_10(%arg0: i32) -> (i32, i32, i32) {
    %c0_i32 = arith.constant 0 : i32
    %c0_i32_0 = arith.constant 0 : i32
    %c0_i32_1 = arith.constant 0 : i32
    return %arg0, %c0_i32, %c0_i32_0 : i32, i32, i32
  }
}

</mosaic_0001>

<bundles_post_ra>
// kernel: _decoder_layer_forward.1
= control target key start
LH: loop header
LB: loop body
LE: loop exit
PB: predicated region body
PF: predicated region fallthrough
CT: control target
= control target key end

     0   :  { %s13649_s0 = inlined_call_operand.hbm [shape: f32[2,64,512], index: 0, kind: input, shape index: {}]   ;;  %s13650_s1 = inlined_call_operand.hbm [shape: f32[2,1,64,64], index: 1, kind: input, shape index: {}]   ;;  %s13651_s2 = inlined_call_operand.hbm [shape: f32[2,64,128], index: 2, kind: input, shape index: {}]   ;;  %s13652_s3 = inlined_call_operand.hbm [shape: f32[2,64,128], index: 3, kind: input, shape index: {}]   ;;  %s13653_s4 = inlined_call_operand.hbm [shape: f32[1,512], index: 4, kind: input, shape index: {}]   ;;  %s13654_s5 = inlined_call_operand.hbm [shape: f32[1,512], index: 5, kind: input, shape index: {}]   ;;  %s13655_s6 = inlined_call_operand.hbm [shape: f32[4,512,384], index: 6, kind: input, shape index: {}]   ;;  %s13656_s7 = inlined_call_operand.hbm [shape: f32[4,128,512], index: 7, kind: input, shape index: {}]   ;;  %s13657_s8 = inlined_call_operand.hbm [shape: f32[512,2048], index: 8, kind: input, shape index: {}]   ;;  %s13658_s9 = inlined_call_operand.hbm [shape: f32[1024,512], index: 9, kind: input, shape index: {}]   ;;  %s13659_s10 = inlined_call_operand.hbm [shape: f32[2,64,512], index: 10, kind: output, shape index: {}]  }
   0x1   :  { %13851 = sst [smem:[#allocation127_spill]] %s13650_s1 }
   0x2   :  { %13852 = sst [smem:[#allocation128_spill]] %s13653_s4 }
   0x3   :  { %13853 = sst [smem:[#allocation129_spill]] %s13654_s5 }
   0x4   :  { %13854 = sst [smem:[#allocation130_spill]] %s13656_s7 }
   0x5   :  { %13855 = sst [smem:[#allocation131_spill]] %s13659_s10 }
   0x6   :  { %15 = vsyncpa [#allocation4], 0 }
   0x7   :  { %17 = vsyncpa [#allocation4 + $0x1], 0 }
   0x8   :  { %18 = vsyncpa [#allocation7], 0 }
   0x9   :  { %20 = vsyncpa [#allocation7 + $0x1], 0 }
   0xa   :  { %21 = vsyncpa [#allocation10], 0 }
   0xb   :  { %23 = vsyncpa [#allocation10 + $0x1], 0 }
   0xc   :  { %24 = vsyncpa [#allocation13], 0 }
   0xd   :  { %25 = vsyncpa [#allocation16], 0 }
   0xe   :  { %26 = vsyncpa [#allocation19], 0 }
   0xf   :  { %27 = vsyncpa [#allocation5], 0 }
  0x10   :  { %29 = vsyncpa [#allocation5 + $0x1], 0  ;;  %s10861_s13 = smov 0   ;;  %s10863_s14 = smov 0  }
  0x11   :  { %s10865_s15 = smov 0   ;;  %s10867_s16 = smov 0  }
  0x12 LB: > { %13856 = sst [smem:[#allocation29_spill]] %s10764_s13  ;;  %s10782_s17 = smov [#allocation11]   ;;  %s10776_s16 = sphi %s10867_s16, %s14247_s16   ;;  %s10772_s15 = sphi %s10865_s15, %s14249_s15   ;;  %s10768_s14 = sphi %s10863_s14, %s14251_s14   ;;  %s10764_s13 = sphi %s10861_s13, %s14250_s13  }
  0x13   : > { %13857 = sst [smem:[#allocation30_spill]] %s10772_s15  ;;  %s309_s18 = sshll.u32 %s10782_s17, 4  ;;  %s310_s18 = int_to_ptr.vmem [resolvable:$true] %s309_s18 }
  0x14   : > { %s10882_s19 = sadd.s32 4294967295, %s10776_s16   ;;  %p7596_p0 = scmp.ge.s32.totalorder %s10776_s16, 1 }
  0x15   : > { %13858 = sst [smem:[#allocation31_spill]] %s10882_s19  ;;  %p13660_p1 = scmp.eq.s32.totalorder %s10882_s19, 0 }
  0x16   : > { %p296_p2 = scmp.lt.s32.totalorder %s10776_s16, 3  ;;  %s10783_s21 = smov [#allocation12]  }
  0x17   : > { %s320_s22 = sshll.u32 %s10783_s21, 4  ;;  %s10784_s23 = smov [#allocation15]   ;;  %s10894_s22 = int_to_ptr.vmem [resolvable:$true] %s320_s22 }
  0x18   : > { %p10887_p3 = pnand %p7596_p0, %p296_p2  ;;  %s343_s24 = sshll.u32 %s10784_s23, 4  ;;  %s10902_s24 = int_to_ptr.vmem [resolvable:$true] %s343_s24 }
  0x19   : > { %s13861_s4 = sld [smem:[#allocation128_spill]] }
  0x1a   : > { %s13859_s20 = scalar_select %p10887_p3, 1, 0 }
  0x1b   : > { %p9965_p5 = pneg %p10887_p3 }
  0x1d   : > { %p10898_p6 = pnand %p9965_p5, %p13660_p1 }
  0x1f   : > { %s13860_s25 = scalar_select %p10898_p6, 1, 0 }
  0x20   : > { %s10394_s28 = scalar_lea.hbm %s13861_s4, 64  ;;  %p10912_p8 = pneg %p10898_p6 }
  0x21   : > { %p10395_p7 = scmp.ne.s32.totalorder %s13861_s4, %s10394_s28  ;;  %p10401_p11 = scmp.lt.u32.totalorder %s10394_s28, %s13861_s4 }
  0x22   : > { %s13862_s11 = scalar_select %p10912_p8, 1, 0 }
  0x23   : > { %p10397_p9 = pnand %p10912_p8, %p10395_p7 }
  0x25   : > { %p10398_p10 = pneg %p10397_p9 }
  0x27   : > { %p10403_p12 = pnand %p10401_p11, %p10398_p10 }
  0x29   : > { %10406 = shalt.err (!%p10403_p12)
}
  0x2a   : > { %s10407_s21 = scalar_lea.vmem %s310_s18, 64  ;;  %p10415_p5 = scmp.lt.s32.totalorder %s310_s18, %s310_s18 }
  0x2b   : > { %p10408_p13 = scmp.ne.s32.totalorder %s310_s18, %s10407_s21  ;;  %p10416_p4 = scmp.lt.s32.totalorder %s10407_s21, %s10407_s21 }
  0x2d   : > { %p10410_p0 = pnand %p10408_p13, %p10912_p8  ;;  %p10417_p1 = por %p10416_p4, %p10415_p5 }
  0x2f   : > { %p10411_p2 = pneg %p10410_p0 }
  0x31   : > { %p10418_p3 = pnand %p10417_p1, %p10411_p2 }
  0x33   : > { %10421 = shalt.err (!%p10418_p3)
}
  0x34   : > { %9968 = dma.hbm_to_vmem [thread:$0]  (!%p10898_p6), %s13861_s4, 64, %s310_s18, [#allocation10]  }
  0x35   : > { %s13863_s5 = sld [smem:[#allocation129_spill]] }
  0x3b   : > { %s10422_s29 = scalar_lea.hbm %s13863_s5, 64 }
  0x3c   : > { %p10423_p7 = scmp.ne.s32.totalorder %s13863_s5, %s10422_s29  ;;  %p10429_p1 = scmp.lt.u32.totalorder %s10422_s29, %s13863_s5 }
  0x3e   : > { %p10425_p9 = pnand %p10423_p7, %p10912_p8 }
  0x40   : > { %p10426_p4 = pneg %p10425_p9 }
  0x42   : > { %p10431_p3 = pnand %p10429_p1, %p10426_p4 }
  0x44   : > { %10434 = shalt.err (!%p10431_p3)
}
  0x45   : > { %s10435_s18 = scalar_lea.vmem %s10894_s22, 64  ;;  %p10443_p13 = scmp.lt.s32.totalorder %s10894_s22, %s10894_s22 }
  0x46   : > { %p10436_p10 = scmp.ne.s32.totalorder %s10894_s22, %s10435_s18  ;;  %p10444_p0 = scmp.lt.s32.totalorder %s10435_s18, %s10435_s18 }
  0x48   : > { %p10438_p11 = pnand %p10436_p10, %p10912_p8  ;;  %p10445_p2 = por %p10444_p0, %p10443_p13 }
  0x4a   : > { %p10439_p12 = pneg %p10438_p11 }
  0x4c   : > { %p10446_p5 = pnand %p10445_p2, %p10439_p12 }
  0x4e   : > { %10449 = shalt.err (!%p10446_p5)
}
  0x4f   : > { %9971 = dma.hbm_to_vmem [thread:$0]  (!%p10898_p6), %s13863_s5, 64, %s10894_s22, [#allocation13]  }
  0x50   : > { %s13864_s7 = sld [smem:[#allocation130_spill]] }
  0x56   : > { %s10450_s29 = scalar_lea.hbm %s13864_s7, 32768 }
  0x57   : > { %p10451_p7 = scmp.ne.s32.totalorder %s13864_s7, %s10450_s29  ;;  %p10457_p1 = scmp.lt.u32.totalorder %s10450_s29, %s13864_s7 }
  0x59   : > { %p10453_p9 = pnand %p10451_p7, %p10912_p8 }
  0x5b   : > { %p10454_p4 = pneg %p10453_p9 }
  0x5d   : > { %p10459_p3 = pnand %p10457_p1, %p10454_p4 }
  0x5f   : > { %10462 = shalt.err (!%p10459_p3)
}
  0x60   : > { %s10463_s22 = scalar_lea.vmem %s10902_s24, 32768  ;;  %p10471_p13 = scmp.lt.s32.totalorder %s10902_s24, %s10902_s24 }
  0x61   : > { %p10464_p10 = scmp.ne.s32.totalorder %s10902_s24, %s10463_s22  ;;  %p10472_p0 = scmp.lt.s32.totalorder %s10463_s22, %s10463_s22 }
  0x63   : > { %p10466_p11 = pnand %p10464_p10, %p10912_p8  ;;  %p10473_p2 = por %p10472_p0, %p10471_p13 }
  0x65   : > { %p10467_p12 = pneg %p10466_p11 }
  0x67   : > { %p10474_p5 = pnand %p10473_p2, %p10467_p12 }
  0x69   : > { %10477 = shalt.err (!%p10474_p5)
}
  0x6a   : > { %s13662_s18 = smov 512   ;;  %s13664_s23 = smov 32  }
  0x6b   : > { %9977 = dma.hbm_to_vmem [thread:$0]  (!%p10898_p6), %s13864_s7, 32768, %s10902_s24, [#allocation16], %s13662_s18, %s13662_s18, %s13664_s23  }
  0x6c   : > { %s7595_s28 = sadd.s32 4294967294, %s10776_s16   ;;  %s10979_s29 = sadd.s32 1, %s10776_s16  }
  0x6d   : > { %13865 = sst [smem:[#allocation32_spill]] %s10979_s29  ;;  %s42_s30 = sadd.s32 1, %s10772_s15 }
  0x6e   : > { %s39_s12 = ssub.s32 %s10776_s16, %s10979_s29  ;;  %p49_p7 = scmp.ne.s32.totalorder %s10772_s15, %s10768_s14 }
  0x6f   : > { %p40_p9 = scmp.eq.s32.totalorder %s39_s12, 0  ;;  %p50_p4 = scmp.eq.s32.totalorder %s10776_s16, 0 }
  0x70   : > { %p55_p1 = scmp.ne.s32.totalorder %s10768_s14, %s10764_s13  ;;  %p283_p3 = scmp.eq.s32.totalorder %s10882_s19, 1 }
  0x71   : > { %s10991_s17 = scalar_select %p40_p9, %s10772_s15, %s42_s30  }
  0x72   : > { %p51_p10 = por %p50_p4, %p49_p7  ;;  %p13867_p11 = scmp.eq.s32.totalorder %s10882_s19, 0 }
  0x73   : > { %13866 = sst [smem:[#allocation33_spill]] %s10991_s17  ;;  %p10999_p13 = por %p283_p3, %p49_p7 }
  0x74   : > { %p10995_p12 = por %p13867_p11, %p55_p1  ;;  %p289_p0 = scmp.eq.s32.totalorder %s7595_s28, 1 }
  0x75   : > { %s13870_s21 = scalar_select %p10999_p13, 1, 0 }
  0x76   : > { %s13868_s24 = scalar_select %p10995_p12, 1, 0 }
  0x77   : > { %13871 = sst [smem:[#allocation35_spill]] %s13870_s21  ;;  %p10007_p2 = scmp.lt.s32.totalorder %s10776_s16, 2 }
  0x78   : > { %13869 = sst [smem:[#allocation34_spill]] %s13868_s24  ;;  %p11004_p5 = por %p289_p0, %p55_p1 }
  0x79   : > { %s11009_s26 = sand.u32 1, %s10772_s15   ;;  %p11011_p9 = pnand %p10007_p2, %p51_p10 }
  0x7a   : > { %s13872_s22 = scalar_select %p11004_p5, 1, 0 }
  0x7b   : > { %s13874_s27 = scalar_select %p11011_p9, 1, 0 }
  0x7c   : > { %13873 = sst [smem:[#allocation36_spill]] %s13872_s22  ;;  %s13672_s30 = sand.u32 1, %s10776_s16  }
  0x7d   : > { %s11017_s12 = sshll.u32 %s11009_s26, 6  ;;  %s11020_s18 = sshll.u32 %s10776_s16, 10 }
  0x7e   : > { %s408_s28 = scalar_lea.vmem [#allocation6], %s11017_s12  ;;  %s13875_s1 = sld [smem:[#allocation127_spill]] }
  0x7f   : > { %s415_s23 = sshll.u32 %s408_s28, 4  ;;  %s11033_s17 = scalar_lea.sflag [#allocation7], %s13672_s30  ;;  %s11029_s23 = int_to_ptr.vmem [resolvable:$true] %s415_s23 }
  0x80   : > { %p11039_p4 = pneg %p11011_p9 }
  0x82   : > { %s13876_s29 = scalar_select %p11039_p4, 1, 0 }
  0x84   : > { %s11027_s7 = scalar_lea.hbm %s13875_s1, %s11020_s18  ;;  %s10483_s28 = scalar_lea.hbm %s13875_s1, 2048 }
  0x85   : > { %s10478_s15 = scalar_lea.hbm %s11027_s7, 1024  ;;  %p10484_p10 = scmp.lt.u32.totalorder %s11027_s7, %s13875_s1 }
  0x86   : > { %p10479_p7 = scmp.ne.s32.totalorder %s11027_s7, %s10478_s15  ;;  %p10485_p11 = scmp.lt.u32.totalorder %s10483_s28, %s10478_s15 }
  0x87   : > { %p10487_p2 = scmp.lt.u32.totalorder %s10478_s15, %s11027_s7 }
  0x88   : > { %p10481_p1 = pnand %p11039_p4, %p10479_p7  ;;  %p10486_p0 = por %p10485_p11, %p10484_p10 }
  0x8a   : > { %p10482_p3 = pneg %p10481_p1  ;;  %p10488_p5 = por %p10487_p2, %p10486_p0 }
  0x8c   : > { %p10489_p13 = pnand %p10488_p5, %p10482_p3 }
  0x8e   : > { %10492 = shalt.err (!%p10489_p13)
}
  0x8f   : > { %s10493_s30 = scalar_lea.vmem %s11029_s23, 1024  ;;  %s10787_s4 = smov [#allocation6]  }
  0x90   : > { %p10494_p7 = scmp.ne.s32.totalorder %s11029_s23, %s10493_s30  ;;  %s10498_s5 = sshll.u32 %s10787_s4, 4  ;;  %s10499_s5 = int_to_ptr.vmem [resolvable:$false] %s10498_s5 }
  0x91   : > { %s10500_s13 = scalar_lea.vmem %s10499_s5, 2048  ;;  %p10501_p6 = scmp.lt.s32.totalorder %s11029_s23, %s10499_s5 }
  0x92   : > { %p10496_p1 = pnand %p10494_p7, %p11039_p4  ;;  %p10502_p8 = scmp.lt.s32.totalorder %s10500_s13, %s10493_s30 }
  0x94   : > { %p10497_p12 = pneg %p10496_p1  ;;  %p10503_p10 = por %p10502_p8, %p10501_p6 }
  0x96   : > { %p10504_p11 = pnand %p10503_p10, %p10497_p12 }
  0x98   : > { %10507 = shalt.err (!%p10504_p11)
}
  0x99   : > { %s13687_s15 = smov 128   ;;  %s13685_s22 = smov 8  }
  0x9a   : > { %9990 = dma.hbm_to_vmem [thread:$0]  (!%p11011_p9), %s11027_s7, 1024, %s11029_s23, %s11033_s17, %s13687_s15, %s13687_s15, %s13685_s22  }
  0x9b   : > { %s10790_s28 = smov [#allocation14]   ;;  %s10508_s13 = scalar_lea.hbm %s13655_s6, 98304 }
  0x9c   : > { %s330_s4 = sshll.u32 %s10790_s28, 4  ;;  %p10509_p6 = scmp.ne.s32.totalorder %s13655_s6, %s10508_s13  ;;  %s331_s4 = int_to_ptr.vmem [resolvable:$true] %s330_s4 }
  0x9d   : > { %p13877_p8 = scmp.ne.s32.totalorder %s13862_s11, 0  ;;  %p10515_p5 = scmp.lt.u32.totalorder %s10508_s13, %s13655_s6 }
  0x9f   : > { %p10511_p12 = pnand %p10509_p6, %p13877_p8 }
  0xa1   : > { %p10512_p13 = pneg %p10511_p12 }
  0xa3   : > { %p10517_p3 = pnand %p10515_p5, %p10512_p13 }
  0xa5   : > { %10520 = shalt.err (!%p10517_p3)
}
  0xa6   : > { %s10521_s7 = scalar_lea.vmem %s331_s4, 98304  ;;  %p10529_p1 = scmp.lt.s32.totalorder %s331_s4, %s331_s4 }
  0xa7   : > { %p10522_p0 = scmp.ne.s32.totalorder %s331_s4, %s10521_s7  ;;  %p10530_p10 = scmp.lt.s32.totalorder %s10521_s7, %s10521_s7 }
  0xa9   : > { %p10524_p2 = pnand %p10522_p0, %p13877_p8  ;;  %p10531_p11 = por %p10530_p10, %p10529_p1 }
  0xab   : > { %p10525_p7 = pneg %p10524_p2 }
  0xad   : > { %p10532_p9 = pnand %p10531_p11, %p10525_p7 }
  0xaf   : > { %10535 = shalt.err (!%p10532_p9)
}
  0xb0   : > { %s10791_s1 = smov 384   ;;  %s10792_s10 = smov 24  }
  0xb1   : > { %p13878_p6 = scmp.ne.s32.totalorder %s13860_s25, 0  ;;  %s10793_s21 = smov [#allocation17]  }
  0xb2   : > { %s356_s28 = sshll.u32 %s10793_s21, 4  ;;  %s10536_s13 = scalar_lea.hbm %s13657_s8, 131072  ;;  %s357_s28 = int_to_ptr.vmem [resolvable:$true] %s356_s28 }
  0xb3   : > { %9974 = dma.hbm_to_vmem [thread:$0]  (!%p13878_p6), %s13655_s6, 98304, %s331_s4, [#allocation13], %s10791_s1, %s10791_s1, %s10792_s10  }
  0xb4   : > { %p10537_p9 = scmp.ne.s32.totalorder %s13657_s8, %s10536_s13  ;;  %p10543_p5 = scmp.lt.u32.totalorder %s10536_s13, %s13657_s8 }
  0xb6   : > { %p10539_p12 = pnand %p10537_p9, %p13877_p8 }
  0xb8   : > { %p10540_p13 = pneg %p10539_p12 }
  0xba   : > { %p10545_p3 = pnand %p10543_p5, %p10540_p13 }
  0xbc   : > { %10548 = shalt.err (!%p10545_p3)
}
  0xbd   : > { %s10549_s4 = scalar_lea.vmem %s357_s28, 131072  ;;  %p10557_p1 = scmp.lt.s32.totalorder %s357_s28, %s357_s28 }
  0xbe   : > { %p10550_p0 = scmp.ne.s32.totalorder %s357_s28, %s10549_s4  ;;  %p10558_p10 = scmp.lt.s32.totalorder %s10549_s4, %s10549_s4 }
  0xc0   : > { %p10552_p2 = pnand %p10550_p0, %p13877_p8  ;;  %p10559_p11 = por %p10558_p10, %p10557_p1 }
  0xc2   : > { %p10553_p7 = pneg %p10552_p2 }
  0xc4   : > { %p10560_p4 = pnand %p10559_p11, %p10553_p7 }
  0xc6   : > { %10563 = shalt.err (!%p10560_p4)
}
  0xc7   : > { %s10794_s22 = smov 2048   ;;  %s13879_s1 = smov 128  }
  0xc8   : > { %9980 = dma.hbm_to_vmem [thread:$0]  (!%p13878_p6), %s13657_s8, 131072, %s357_s28, [#allocation16], %s10794_s22, %s10794_s22, %s13879_s1  }
  0xc9   : > { %s10795_s15 = smov [#allocation18]   ;;  %s7604_s23 = sshll.u32 %s11009_s26, 8 }
  0xca   : > { %s369_s19 = sshll.u32 %s10795_s15, 4  ;;  %s10564_s30 = scalar_lea.hbm %s13658_s9, 65536  ;;  %s370_s19 = int_to_ptr.vmem [resolvable:$true] %s369_s19 }
  0xcb   : > { %p10565_p4 = scmp.ne.s32.totalorder %s13658_s9, %s10564_s30  ;;  %p10571_p13 = scmp.lt.u32.totalorder %s10564_s30, %s13658_s9 }
  0xcd   : > { %p10567_p9 = pnand %p10565_p4, %p13877_p8 }
  0xcf   : > { %p10568_p12 = pneg %p10567_p9 }
  0xd1   : > { %p10573_p5 = pnand %p10571_p13, %p10568_p12 }
  0xd3   : > { %10576 = shalt.err (!%p10573_p5)
}
  0xd4   : > { %s10577_s28 = scalar_lea.vmem %s370_s19, 65536  ;;  %p10585_p7 = scmp.lt.s32.totalorder %s370_s19, %s370_s19 }
  0xd5   : > { %p10578_p3 = scmp.ne.s32.totalorder %s370_s19, %s10577_s28  ;;  %p10586_p1 = scmp.lt.s32.totalorder %s10577_s28, %s10577_s28 }
  0xd7   : > { %p10580_p0 = pnand %p10578_p3, %p13877_p8  ;;  %p10587_p10 = por %p10586_p1, %p10585_p7 }
  0xd9   : > { %p10581_p2 = pneg %p10580_p0 }
  0xdb   : > { %p10588_p11 = pnand %p10587_p10, %p10581_p2 }
  0xdd   : > { %10591 = shalt.err (!%p10588_p11)
}
  0xde   : > { %s13880_s22 = smov 32   ;;  %s13881_s24 = smov 512  }
  0xdf   : > { %9983 = dma.hbm_to_vmem [thread:$0]  (!%p13878_p6), %s13658_s9, 65536, %s370_s19, [#allocation19], %s13881_s24, %s13881_s24, %s13880_s22  }
  0xe0   : > { %s7644_s11 = sshll.u32 %s10776_s16, 12  ;;  %s387_s25 = scalar_lea.vmem [#allocation3], %s7604_s23 }
  0xe1   : > { %s11129_s13 = scalar_lea.hbm %s13649_s0, %s7644_s11  ;;  %s394_s7 = sshll.u32 %s387_s25, 4  ;;  %s11131_s7 = int_to_ptr.vmem [resolvable:$true] %s394_s7 }
  0xe2   : > { %s384_s4 = scalar_lea.sflag [#allocation4], %s11009_s26  ;;  %s10592_s10 = scalar_lea.hbm %s11129_s13, 4096 }
  0xe3   : > { %p10593_p8 = scmp.ne.s32.totalorder %s11129_s13, %s10592_s10  ;;  %p13882_p4 = scmp.ne.s32.totalorder %s13876_s29, 0 }
  0xe4   : > { %s10597_s15 = scalar_lea.hbm %s13649_s0, 8192  ;;  %p10598_p12 = scmp.lt.u32.totalorder %s11129_s13, %s13649_s0 }
  0xe5   : > { %p10595_p9 = pnand %p10593_p8, %p13882_p4  ;;  %p10599_p13 = scmp.lt.u32.totalorder %s10597_s15, %s10592_s10 }
  0xe6   : > { %p10601_p3 = scmp.lt.u32.totalorder %s10592_s10, %s11129_s13 }
  0xe7   : > { %p10596_p6 = pneg %p10595_p9  ;;  %p10600_p5 = por %p10599_p13, %p10598_p12 }
  0xe9   : > { %p10602_p0 = por %p10601_p3, %p10600_p5 }
  0xeb   : > { %p10603_p2 = pnand %p10602_p0, %p10596_p6 }
  0xed   : > { %10606 = shalt.err (!%p10603_p2)
}
  0xee   : > { %s10607_s23 = scalar_lea.vmem %s11131_s7, 4096  ;;  %s10796_s5 = smov [#allocation3]  }
  0xef   : > { %p10608_p7 = scmp.ne.s32.totalorder %s11131_s7, %s10607_s23  ;;  %s10612_s30 = sshll.u32 %s10796_s5, 4  ;;  %s10613_s30 = int_to_ptr.vmem [resolvable:$false] %s10612_s30 }
  0xf0   : > { %s10614_s25 = scalar_lea.vmem %s10613_s30, 8192  ;;  %p10615_p11 = scmp.lt.s32.totalorder %s11131_s7, %s10613_s30 }
  0xf1   : > { %p10610_p1 = pnand %p10608_p7, %p13882_p4  ;;  %p10616_p8 = scmp.lt.s32.totalorder %s10614_s25, %s10607_s23 }
  0xf3   : > { %p10611_p10 = pneg %p10610_p1  ;;  %p10617_p9 = por %p10616_p8, %p10615_p11 }
  0xf5   : > { %p10618_p12 = pnand %p10617_p9, %p10611_p10 }
  0xf7   : > { %10621 = shalt.err (!%p10618_p12)
}
  0xf8   : > { %p13883_p6 = scmp.ne.s32.totalorder %s13874_s27, 0  ;;  %s11164_s28 = scalar_lea.hbm %s13651_s2, %s11020_s18 }
  0xf9   : > { %s429_s15 = scalar_lea.vmem [#allocation8], %s11017_s12  ;;  %s10622_s26 = scalar_lea.hbm %s11164_s28, 1024 }
  0xfa   : > { %9987 = dma.hbm_to_vmem [thread:$0]  (!%p13883_p6), %s11129_s13, 4096, %s11131_s7, %s384_s4, %s13881_s24, %s13881_s24, %s13880_s22  }
  0xfb   : > { %s436_s21 = sshll.u32 %s429_s15, 4  ;;  %p10623_p13 = scmp.ne.s32.totalorder %s11164_s28, %s10622_s26  ;;  %s11167_s21 = int_to_ptr.vmem [resolvable:$true] %s436_s21 }
  0xfc   : > { %s10627_s24 = scalar_lea.hbm %s13651_s2, 2048  ;;  %p10628_p0 = scmp.lt.u32.totalorder %s11164_s28, %s13651_s2 }
  0xfd   : > { %p10625_p5 = pnand %p10623_p13, %p13882_p4  ;;  %p10629_p2 = scmp.lt.u32.totalorder %s10627_s24, %s10622_s26 }
  0xfe   : > { %p10631_p1 = scmp.lt.u32.totalorder %s10622_s26, %s11164_s28 }
  0xff   : > { %p10626_p3 = pneg %p10625_p5  ;;  %p10630_p7 = por %p10629_p2, %p10628_p0 }
 0x101   : > { %p10632_p10 = por %p10631_p1, %p10630_p7 }
 0x103   : > { %p10633_p11 = pnand %p10632_p10, %p10626_p3 }
 0x105   : > { %10636 = shalt.err (!%p10633_p11)
}
 0x106   : > { %s10637_s4 = scalar_lea.vmem %s11167_s21, 1024  ;;  %s10797_s23 = smov [#allocation8]  }
 0x107   : > { %p10638_p8 = scmp.ne.s32.totalorder %s11167_s21, %s10637_s4  ;;  %s10642_s5 = sshll.u32 %s10797_s23, 4  ;;  %s10643_s5 = int_to_ptr.vmem [resolvable:$false] %s10642_s5 }
 0x108   : > { %s10644_s30 = scalar_lea.vmem %s10643_s5, 2048  ;;  %p10645_p13 = scmp.lt.s32.totalorder %s11167_s21, %s10643_s5 }
 0x109   : > { %p10640_p9 = pnand %p10638_p8, %p13882_p4  ;;  %p10646_p5 = scmp.lt.s32.totalorder %s10644_s30, %s10637_s4 }
 0x10b   : > { %p10641_p12 = pneg %p10640_p9  ;;  %p10647_p0 = por %p10646_p5, %p10645_p13 }
 0x10d   : > { %p10648_p2 = pnand %p10647_p0, %p10641_p12 }
 0x10f   : > { %10651 = shalt.err (!%p10648_p2)
}
 0x110   : > { %s13884_s25 = smov 8   ;;  %s11198_s15 = scalar_lea.hbm %s13652_s3, %s11020_s18 }
 0x111   : > { %9993 = dma.hbm_to_vmem [thread:$0]  (!%p13883_p6), %s11164_s28, 1024, %s11167_s21, %s11033_s17, %s13879_s1, %s13879_s1, %s13884_s25  }
 0x112   : > { %s450_s26 = scalar_lea.vmem [#allocation9], %s11017_s12  ;;  %s13885_s22 = sand.u32 1, %s10776_s16  }
 0x113   : > { %s457_s11 = sshll.u32 %s450_s26, 4  ;;  %s11205_s24 = scalar_lea.sflag [#allocation10], %s13885_s22  ;;  %s11201_s11 = int_to_ptr.vmem [resolvable:$true] %s457_s11 }
 0x114   : > { %s10652_s13 = scalar_lea.hbm %s11198_s15, 1024  ;;  %s10657_s18 = scalar_lea.hbm %s13652_s3, 2048 }
 0x115   : > { %p10653_p3 = scmp.ne.s32.totalorder %s11198_s15, %s10652_s13  ;;  %p10658_p10 = scmp.lt.u32.totalorder %s11198_s15, %s13652_s3 }
 0x116   : > { %p10659_p11 = scmp.lt.u32.totalorder %s10657_s18, %s10652_s13  ;;  %p10661_p9 = scmp.lt.u32.totalorder %s10652_s13, %s11198_s15 }
 0x117   : > { %p10655_p7 = pnand %p10653_p3, %p13882_p4 }
 0x118   : > { %p10660_p8 = por %p10659_p11, %p10658_p10 }
 0x119   : > { %p10656_p1 = pneg %p10655_p7 }
 0x11a   : > { %p10662_p12 = por %p10661_p9, %p10660_p8 }
 0x11c   : > { %p10663_p13 = pnand %p10662_p12, %p10656_p1 }
 0x11e   : > { %10666 = shalt.err (!%p10663_p13)
}
 0x11f   : > { %s10667_s12 = scalar_lea.vmem %s11201_s11, 1024  ;;  %s10798_s4 = smov [#allocation9]  }
 0x120   : > { %p10668_p5 = scmp.ne.s32.totalorder %s11201_s11, %s10667_s12  ;;  %s10672_s23 = sshll.u32 %s10798_s4, 4  ;;  %s10673_s23 = int_to_ptr.vmem [resolvable:$false] %s10672_s23 }
 0x121   : > { %s10674_s5 = scalar_lea.vmem %s10673_s23, 2048  ;;  %p10675_p3 = scmp.lt.s32.totalorder %s11201_s11, %s10673_s23 }
 0x122   : > { %p10670_p0 = pnand %p10668_p5, %p13882_p4  ;;  %p10676_p7 = scmp.lt.s32.totalorder %s10674_s5, %s10667_s12 }
 0x124   : > { %p10671_p2 = pneg %p10670_p0  ;;  %p10677_p10 = por %p10676_p7, %p10675_p3 }
 0x126   : > { %p10678_p11 = pnand %p10677_p10, %p10671_p2 }
 0x128   : > { %10681 = shalt.err (!%p10678_p11)
}
 0x129   : > { %9996 = dma.hbm_to_vmem [thread:$0]  (!%p13883_p6), %s11198_s15, 1024, %s11201_s11, %s11205_s24, %s13879_s1, %s13879_s1, %s13884_s25  }
 0x12a   : > { %p13886_p4 = scmp.ne.s32.totalorder %s13859_s20, 0 }
 0x12c   : > { %469 = sbr.rel (%p13886_p4) target bundleno = 3054 (0xbee), region = 60 }
 0x133   : > { %s13887_s29 = sld [smem:[#allocation34_spill]]  ;;  %s11235_s30 = sand.u32 1, %s10768_s14  }
 0x134   : > { %s7617_s10 = sshll.u32 %s11235_s30, 8  ;;  %s472_s19 = scalar_lea.sflag [#allocation4], %s11235_s30 }
 0x135   : > { %s11241_s27 = scalar_lea.vmem [#allocation3], %s7617_s10 }
 0x139   : > { %p13888_p1 = scmp.ne.s32.totalorder %s13887_s29, 0 }
 0x13b   : > { %10731 = dma.done.wait (%p13888_p1), %s472_s19, 4096  }
 0x13c   : > { %10733 = vsyncadd (%p13888_p1), %s472_s19, 4294963200  ;;  %s13889_s1 = sld [smem:[#allocation31_spill]]  ;;  %s7618_s25 = sshll.u32 %s11235_s30, 6 }
 0x13d   : > { %s11249_s26 = scalar_lea.vmem [#allocation6], %s7618_s25 }
 0x142   : > { %s480_s20 = sand.u32 1, %s13889_s1  }
 0x143   : > { %s481_s15 = scalar_lea.sflag [#allocation7], %s480_s20 }
 0x144   : > { %10735 = dma.done.wait (%p13888_p1), %s481_s15, 2048  }
 0x145   : > { %10737 = vsyncadd (%p13888_p1), %s481_s15, 4294965248  ;;  %s11255_s11 = scalar_lea.vmem [#allocation8], %s7618_s25  ;;  %s499_s22 = scalar_lea.sflag [#allocation10], %s480_s20 }
 0x146   : > { %s11257_s24 = scalar_lea.vmem [#allocation9], %s7618_s25 }
 0x147   : > { %10739 = dma.done.wait (%p13888_p1), %s499_s22, 1024  }
 0x148   : > { %10741 = vsyncadd (%p13888_p1), %s499_s22, 4294966272  ;;  %p13890_p6 = scmp.eq.s32.totalorder %s13889_s1, 0 }
 0x14a   : > { %10743 = dma.done.wait (%p13890_p6), [#allocation10], 64   ;;  %p13891_p8 = pmov %p13890_p6 }
 0x14b   : > { %p13892_p9 = pmov %p13890_p6 }
 0x14c   : > { %10745 = vsyncadd (%p13891_p8), [#allocation10], 4294967232 }
 0x14d   : > { %10747 = dma.done.wait (%p13892_p9), [#allocation13], 98368   ;;  %p13893_p12 = pmov %p13890_p6 }
 0x14e   : > { %p13894_p13 = pmov %p13890_p6 }
 0x14f   : > { %10749 = vsyncadd (%p13893_p12), [#allocation13], 4294868928 }
 0x150   : > { %10751 = dma.done.wait (%p13894_p13), [#allocation16], 163840   ;;  %p13895_p5 = pmov %p13890_p6 }
 0x152   : > { %10753 = vsyncadd (%p13895_p5), [#allocation16], 4294803456  ;;  %p13896_p0 = pmov %p13895_p5 }
 0x154   : > { %10755 = dma.done.wait (%p13896_p0), [#allocation19], 65536   ;;  %p13897_p2 = pmov %p13896_p0 }
 0x155   : > { %v13693_v0 = vlaneseq  ;;  %v10799_v1 = vmov 0.0   ;;  %v10800_v3 = vmov 1.0   ;;  %v11283_v5 = vld [vmem:[%s11249_s26] sm:$0xff]  ;;  %v11286_v6 = vld [vmem:[%s11249_s26 + $0x8] sm:$0xff]  ;;  %v11289_v7 = vld [vmem:[%s11249_s26 + $0x10] sm:$0xff]  ;;  %s11667_s13 = scalar_lea.vmem [#allocation20], %s7617_s10 }
 0x156   : > { %10757 = vsyncadd (%p13897_p2), [#allocation19], 4294901760  ;;  %821 = vst [vmem:[#allocation2] sm:$0xff] %v10799_v1  ;;  %v11292_v8 = vld [vmem:[%s11249_s26 + $0x18] sm:$0xff]  ;;  %v11295_v9 = vld [vmem:[%s11249_s26 + $0x20] sm:$0xff]  ;;  %s11669_s17 = smov 0  }
 0x157   : > { %822 = vst [vmem:[#allocation2 + $0x8] sm:$0xff] %v10799_v1  ;;  %823 = vst [vmem:[#allocation2 + $0x10] sm:$0xff] %v10799_v1  ;;  %v818_v2 = vand.u32 127, %v13693_v0  ;;  %v11298_v10 = vld [vmem:[%s11249_s26 + $0x28] sm:$0xff]  ;;  %v11301_v11 = vld [vmem:[%s11249_s26 + $0x30] sm:$0xff] }
 0x158   : > { %824 = vst [vmem:[#allocation2 + $0x18] sm:$0xff] %v10799_v1  ;;  %825 = vst [vmem:[#allocation2 + $0x20] sm:$0xff] %v10799_v1  ;;  %v11304_v12 = vld [vmem:[%s11249_s26 + $0x38] sm:$0xff]  ;;  %v11307_v13 = vld [vmem:[%s11255_s11] sm:$0xff] }
 0x159   : > { %826 = vst [vmem:[#allocation2 + $0x28] sm:$0xff] %v10799_v1  ;;  %827 = vst [vmem:[#allocation2 + $0x30] sm:$0xff] %v10799_v1  ;;  %vm819_vm0 = vcmp.lt.s32.totalorder %v818_v2, 64  ;;  %v11310_v14 = vld [vmem:[%s11255_s11 + $0x8] sm:$0xff]  ;;  %v11313_v15 = vld [vmem:[%s11255_s11 + $0x10] sm:$0xff] }
 0x15a   : > { %828 = vst [vmem:[#allocation2 + $0x38] sm:$0xff] %v10799_v1  ;;  %829 = vst [vmem:[#allocation2 + $0x40] sm:$0xff] %v10799_v1  ;;  %v11280_v4 = vsel %vm819_vm0, -1.0, %v10800_v3  ;;  %v11316_v16 = vld [vmem:[%s11255_s11 + $0x18] sm:$0xff]  ;;  %v11319_v17 = vld [vmem:[%s11255_s11 + $0x20] sm:$0xff] }
 0x15b   : > { %830 = vst [vmem:[#allocation2 + $0x48] sm:$0xff] %v10799_v1  ;;  %831 = vst [vmem:[#allocation2 + $0x50] sm:$0xff] %v10799_v1  ;;  %v11322_v18 = vld [vmem:[%s11255_s11 + $0x28] sm:$0xff]  ;;  %v11325_v19 = vld [vmem:[%s11255_s11 + $0x30] sm:$0xff] }
 0x15c   : > { %832 = vst [vmem:[#allocation2 + $0x58] sm:$0xff] %v10799_v1  ;;  %833 = vst [vmem:[#allocation2 + $0x60] sm:$0xff] %v10799_v1  ;;  %v11328_v20 = vld [vmem:[%s11255_s11 + $0x38] sm:$0xff]  ;;  %v11331_v21 = vld [vmem:[%s11257_s24] sm:$0xff] }
 0x15d   : > { %834 = vst [vmem:[#allocation2 + $0x68] sm:$0xff] %v10799_v1  ;;  %835 = vst [vmem:[#allocation2 + $0x70] sm:$0xff] %v10799_v1  ;;  %v11334_v22 = vld [vmem:[%s11257_s24 + $0x8] sm:$0xff]  ;;  %v11337_v23 = vld [vmem:[%s11257_s24 + $0x10] sm:$0xff] }
 0x15e   : > { %836 = vst [vmem:[#allocation2 + $0x78] sm:$0xff] %v10799_v1  ;;  %837 = vst [vmem:[#allocation2 + $0x80] sm:$0xff] %v10799_v1  ;;  %v11340_v24 = vld [vmem:[%s11257_s24 + $0x18] sm:$0xff]  ;;  %v11343_v25 = vld [vmem:[%s11257_s24 + $0x20] sm:$0xff] }
 0x15f   : > { %838 = vst [vmem:[#allocation2 + $0x88] sm:$0xff] %v10799_v1  ;;  %839 = vst [vmem:[#allocation2 + $0x90] sm:$0xff] %v10799_v1  ;;  %v11346_v26 = vld [vmem:[%s11257_s24 + $0x28] sm:$0xff]  ;;  %v11349_v27 = vld [vmem:[%s11257_s24 + $0x30] sm:$0xff] }
 0x160   : > { %840 = vst [vmem:[#allocation2 + $0x98] sm:$0xff] %v10799_v1  ;;  %841 = vst [vmem:[#allocation2 + $0xa0] sm:$0xff] %v10799_v1  ;;  %v11352_v28 = vld [vmem:[%s11257_s24 + $0x38] sm:$0xff]  ;;  %v11355_v29 = vld [vmem:[%s11241_s27 + $0x40] sm:$0xff] }
 0x161   : > { %842 = vst [vmem:[#allocation2 + $0xa8] sm:$0xff] %v10799_v1  ;;  %843 = vst [vmem:[#allocation2 + $0xb0] sm:$0xff] %v10799_v1  ;;  %v11358_v30 = vld [vmem:[%s11241_s27 + $0x48] sm:$0xff]  ;;  %v11361_v31 = vld [vmem:[%s11241_s27 + $0x50] sm:$0xff]  ;;  %v642_v33 = vmul.f32 %v11355_v29, %v11355_v29 }
 0x162   : > { %844 = vst [vmem:[#allocation2 + $0xb8] sm:$0xff] %v10799_v1  ;;  %845 = vst [vmem:[#allocation2 + $0xc0] sm:$0xff] %v10799_v1  ;;  %v11364_v32 = vld [vmem:[%s11241_s27 + $0x58] sm:$0xff]  ;;  %v643_v34 = vmul.f32 %v11358_v30, %v11358_v30  ;;  %v644_v35 = vmul.f32 %v11361_v31, %v11361_v31  ;;  %v11373_v36 = vld [vmem:[%s11241_s27] sm:$0xff] }
 0x163   : > { %846 = vst [vmem:[#allocation2 + $0xc8] sm:$0xff] %v10799_v1  ;;  %847 = vst [vmem:[#allocation2 + $0xd0] sm:$0xff] %v10799_v1  ;;  %v11376_v37 = vld [vmem:[%s11241_s27 + $0x8] sm:$0xff]  ;;  %v645_v38 = vmul.f32 %v11364_v32, %v11364_v32  ;;  %v11381_v39 = vld [vmem:[%s11241_s27 + $0x10] sm:$0xff]  ;;  %v634_v41 = vmul.f32 %v11373_v36, %v11373_v36 }
 0x164   : > { %848 = vst [vmem:[#allocation2 + $0xd8] sm:$0xff] %v10799_v1  ;;  %849 = vst [vmem:[#allocation2 + $0xe0] sm:$0xff] %v10799_v1  ;;  %v11384_v40 = vld [vmem:[%s11241_s27 + $0x18] sm:$0xff]  ;;  %v635_v42 = vmul.f32 %v11376_v37, %v11376_v37  ;;  %v11391_v43 = vld [vmem:[%s11241_s27 + $0x60] sm:$0xff]  ;;  %v676_v44 = vadd.f32 %v643_v34, %v642_v33  ;;  %v636_v45 = vmul.f32 %v11381_v39, %v11381_v39 }
 0x165   : > { %850 = vst [vmem:[#allocation2 + $0xe8] sm:$0xff] %v10799_v1  ;;  %851 = vst [vmem:[#allocation2 + $0xf0] sm:$0xff] %v10799_v1  ;;  %v637_v46 = vmul.f32 %v11384_v40, %v11384_v40  ;;  %v11398_v47 = vld [vmem:[%s11241_s27 + $0x68] sm:$0xff]  ;;  %v11401_v48 = vld [vmem:[%s11241_s27 + $0x70] sm:$0xff]  ;;  %v646_v50 = vmul.f32 %v11391_v43, %v11391_v43 }
 0x166   : > { %852 = vst [vmem:[#allocation2 + $0xf8] sm:$0xff] %v10799_v1  ;;  %13898 = vst [vmem:[#allocation37_spill] sm:$0xff] %v11283_v5  ;;  %v11404_v49 = vld [vmem:[%s11241_s27 + $0x78] sm:$0xff]  ;;  %v666_v51 = vadd.f32 %v635_v42, %v634_v41  ;;  %v647_v52 = vmul.f32 %v11398_v47, %v11398_v47  ;;  %v648_v53 = vmul.f32 %v11401_v48, %v11401_v48  ;;  %v11415_v55 = vld [vmem:[%s11241_s27 + $0x20] sm:$0xff] }
 0x167   : > { %13899 = vst [vmem:[#allocation38_spill] sm:$0xff] %v11286_v6  ;;  %13900 = vst [vmem:[#allocation39_spill] sm:$0xff] %v11289_v7  ;;  %v649_v54 = vmul.f32 %v11404_v49, %v11404_v49  ;;  %v11418_v56 = vld [vmem:[%s11241_s27 + $0x28] sm:$0xff]  ;;  %v11421_v57 = vld [vmem:[%s11241_s27 + $0x30] sm:$0xff]  ;;  %v677_v58 = vadd.f32 %v676_v44, %v644_v35  ;;  %v638_v60 = vmul.f32 %v11415_v55, %v11415_v55 }
 0x168   : > { %13901 = vst [vmem:[#allocation40_spill] sm:$0xff] %v11292_v8  ;;  %13902 = vst [vmem:[#allocation41_spill] sm:$0xff] %v11295_v9  ;;  %v11424_v59 = vld [vmem:[%s11241_s27 + $0x38] sm:$0xff]  ;;  %v639_v61 = vmul.f32 %v11418_v56, %v11418_v56  ;;  %v640_v62 = vmul.f32 %v11421_v57, %v11421_v57  ;;  %v11433_v63 = vld [vmem:[%s11241_s27 + $0xa0] sm:$0xff]  ;;  %v667_v2 = vadd.f32 %v666_v51, %v636_v45 }
 0x169   : > { %13903 = vst [vmem:[#allocation42_spill] sm:$0xff] %v11298_v10  ;;  %13904 = vst [vmem:[#allocation43_spill] sm:$0xff] %v11301_v11  ;;  %v11436_v1 = vld [vmem:[%s11241_s27 + $0xa8] sm:$0xff]  ;;  %v681_v3 = vadd.f32 %v647_v52, %v646_v50  ;;  %v641_v33 = vmul.f32 %v11424_v59, %v11424_v59  ;;  %v11441_v34 = vld [vmem:[%s11241_s27 + $0xb0] sm:$0xff]  ;;  %v654_v41 = vmul.f32 %v11433_v63, %v11433_v63 }
 0x16a   : > { %13905 = vst [vmem:[#allocation44_spill] sm:$0xff] %v11304_v12  ;;  %13906 = vst [vmem:[#allocation45_spill] sm:$0xff] %v11307_v13  ;;  %v11444_v35 = vld [vmem:[%s11241_s27 + $0xb8] sm:$0xff]  ;;  %v11449_v42 = vld [vmem:[%s11241_s27 + $0x80] sm:$0xff]  ;;  %v678_v44 = vadd.f32 %v677_v58, %v645_v38  ;;  %v671_v0 = vadd.f32 %v639_v61, %v638_v60  ;;  %v655_v45 = vmul.f32 %v11436_v1, %v11436_v1 }
 0x16b   : > { %13907 = vst [vmem:[#allocation46_spill] sm:$0xff] %v11319_v17  ;;  %13908 = vst [vmem:[#allocation47_spill] sm:$0xff] %v11322_v18  ;;  %v656_v50 = vmul.f32 %v11441_v34, %v11441_v34  ;;  %v11456_v51 = vld [vmem:[%s11241_s27 + $0x88] sm:$0xff]  ;;  %v11459_v52 = vld [vmem:[%s11241_s27 + $0x90] sm:$0xff]  ;;  %v668_v11 = vadd.f32 %v667_v2, %v637_v46  ;;  %v682_v10 = vadd.f32 %v681_v3, %v648_v53 }
 0x16c   : > { %13909 = vst [vmem:[#allocation48_spill] sm:$0xff] %v11325_v19  ;;  %13910 = vst [vmem:[#allocation49_spill] sm:$0xff] %v11328_v20  ;;  %v11462_v12 = vld [vmem:[%s11241_s27 + $0x98] sm:$0xff]  ;;  %v657_v38 = vmul.f32 %v11444_v35, %v11444_v35  ;;  %v650_v58 = vmul.f32 %v11449_v42, %v11449_v42  ;;  %v11469_v60 = vld [vmem:[%s11241_s27 + $0xe0] sm:$0xff]  ;;  %679 = vadd.xlane.f32.xlu1 %v678_v44  ;;  %v672_v8 = vadd.f32 %v671_v0, %v640_v62 }
 0x16d   : > { %13911 = vst [vmem:[#allocation50_spill] sm:$0xff] %v11331_v21  ;;  %13912 = vst [vmem:[#allocation51_spill] sm:$0xff] %v11343_v25  ;;  %v11472_v61 = vld [vmem:[%s11241_s27 + $0xe8] sm:$0xff]  ;;  %v11475_v9 = vld [vmem:[%s11241_s27 + $0xf0] sm:$0xff]  ;;  %v691_v7 = vadd.f32 %v655_v45, %v654_v41  ;;  %v651_v46 = vmul.f32 %v11456_v51, %v11456_v51  ;;  %v652_v53 = vmul.f32 %v11459_v52, %v11459_v52  ;;  %669 = vadd.xlane.f32.xlu0 %v668_v11 }
 0x16e   : > { %13913 = vst [vmem:[#allocation52_spill] sm:$0xff] %v11346_v26  ;;  %13914 = vst [vmem:[#allocation53_spill] sm:$0xff] %v11349_v27  ;;  %v11482_v2 = vld [vmem:[%s11241_s27 + $0xc0] sm:$0xff]  ;;  %v11485_v3 = vld [vmem:[%s11241_s27 + $0xc8] sm:$0xff]  ;;  %v683_v5 = vadd.f32 %v682_v10, %v649_v54  ;;  %v653_v6 = vmul.f32 %v11462_v12, %v11462_v12  ;;  %v662_v0 = vmul.f32 %v11469_v60, %v11469_v60 }
 0x16f   : > { %13915 = vst [vmem:[#allocation54_spill] sm:$0xff] %v11352_v28  ;;  %13916 = vst [vmem:[#allocation55_spill] sm:$0xff] %v11355_v29  ;;  %v11490_v28 = vld [vmem:[%s11241_s27 + $0xf8] sm:$0xff]  ;;  %v663_v62 = vmul.f32 %v11472_v61, %v11472_v61  ;;  %v11497_v41 = vld [vmem:[%s11241_s27 + $0xd0] sm:$0xff]  ;;  %v673_v44 = vadd.f32 %v672_v8, %v641_v33  ;;  %v692_v45 = vadd.f32 %v691_v7, %v656_v50 }
 0x170   : > { %13917 = vst [vmem:[#allocation56_spill] sm:$0xff] %v11358_v30  ;;  %13918 = vst [vmem:[#allocation57_spill] sm:$0xff] %v11361_v31  ;;  %v686_v20 = vadd.f32 %v651_v46, %v650_v58  ;;  %v664_v11 = vmul.f32 %v11475_v9, %v11475_v9  ;;  %v11502_v10 = vld [vmem:[%s11241_s27 + $0xd8] sm:$0xff]  ;;  %v658_v19 = vmul.f32 %v11482_v2, %v11482_v2  ;;  %684 = vadd.xlane.f32.xlu1 %v683_v5 }
 0x171   : > { %13919 = vst [vmem:[#allocation58_spill] sm:$0xff] %v11364_v32  ;;  %13920 = vst [vmem:[#allocation59_spill] sm:$0xff] %v11391_v43  ;;  %v701_v54 = vadd.f32 %v663_v62, %v662_v0  ;;  %v659_v27 = vmul.f32 %v11485_v3, %v11485_v3  ;;  %v693_v26 = vadd.f32 %v692_v45, %v657_v38  ;;  %674 = vadd.xlane.f32.xlu0 %v673_v44 }
 0x172   : > { %13921 = vst [vmem:[#allocation60_spill] sm:$0xff] %v11398_v47  ;;  %13922 = vst [vmem:[#allocation61_spill] sm:$0xff] %v11401_v48  ;;  %v687_v18 = vadd.f32 %v686_v20, %v652_v53  ;;  %v665_v8 = vmul.f32 %v11490_v28, %v11490_v28  ;;  %v660_v7 = vmul.f32 %v11497_v41, %v11497_v41 }
 0x173   : > { %13923 = vst [vmem:[#allocation62_spill] sm:$0xff] %v11404_v49  ;;  %13924 = vst [vmem:[#allocation63_spill] sm:$0xff] %v11418_v56  ;;  %v702_v33 = vadd.f32 %v701_v54, %v664_v11  ;;  %v661_v50 = vmul.f32 %v11502_v10, %v11502_v10  ;;  %v696_v58 = vadd.f32 %v659_v27, %v658_v19  ;;  %v13943_v11 = vlaneseq }
 0x174   : > { %13925 = vst [vmem:[#allocation64_spill] sm:$0xff] %v11421_v57  ;;  %13926 = vst [vmem:[#allocation65_spill] sm:$0xff] %v11424_v59  ;;  %v688_v46 = vadd.f32 %v687_v18, %v653_v6  ;;  %694 = vadd.xlane.f32.xlu1 %v693_v26 }
 0x175   : > { %13927 = vst [vmem:[#allocation66_spill] sm:$0xff] %v11433_v63  ;;  %13928 = vst [vmem:[#allocation67_spill] sm:$0xff] %v11436_v1  ;;  %v697_v0 = vadd.f32 %v696_v58, %v660_v7  ;;  %v703_v62 = vadd.f32 %v702_v33, %v665_v8  ;;  %v11515_v54 = vshrl.u32 %v13943_v11, 7 }
 0x176   : > { %13929 = vst [vmem:[#allocation68_spill] sm:$0xff] %v11441_v34  ;;  %13930 = vst [vmem:[#allocation69_spill] sm:$0xff] %v11444_v35  ;;  %689 = vadd.xlane.f32.xlu0 %v688_v46  ;;  %v715_v46 = vld [vmem:[#allocation11] sm:$0xf] }
 0x177   : > { %13931 = vst [vmem:[#allocation70_spill] sm:$0xff] %v11449_v42  ;;  %13932 = vst [vmem:[#allocation71_spill] sm:$0xff] %v11456_v51  ;;  %v698_v5 = vadd.f32 %v697_v0, %v661_v50  ;;  %v13704_v7 = vsub.s32 0, %v11515_v54  ;;  %v13705_v33 = vsub.s32 1, %v11515_v54  ;;  %v13703_v0 = vsub.s32 2, %v11515_v54 }
 0x178   : > { %13933 = vst [vmem:[#allocation72_spill] sm:$0xff] %v11459_v52  ;;  %13934 = vst [vmem:[#allocation73_spill] sm:$0xff] %v11462_v12  ;;  %704 = vadd.xlane.f32.xlu1 %v703_v62  ;;  %v13702_v62 = vsub.s32 3, %v11515_v54 }
 0x179   : > { %13935 = vst [vmem:[#allocation74_spill] sm:$0xff] %v11469_v60  ;;  %13936 = vst [vmem:[#allocation75_spill] sm:$0xff] %v11472_v61  ;;  %v11531_v11 = vrot.slane %v715_v46, %v13703_v0 }
 0x17a   : > { %13937 = vst [vmem:[#allocation76_spill] sm:$0xff] %v11475_v9  ;;  %13938 = vst [vmem:[#allocation77_spill] sm:$0xff] %v11482_v2  ;;  %699 = vadd.xlane.f32.xlu0 %v698_v5 }
 0x17b   : > { %13939 = vst [vmem:[#allocation78_spill] sm:$0xff] %v11485_v3  ;;  %13940 = vst [vmem:[#allocation79_spill] sm:$0xff] %v11490_v28 }
 0x17c   : > { %13941 = vst [vmem:[#allocation80_spill] sm:$0xff] %v11497_v41  ;;  %13942 = vst [vmem:[#allocation81_spill] sm:$0xff] %v11502_v10 }
 0x17d   : > { %13944 = vst [vmem:[#allocation82_spill] sm:$0xff] %v11515_v54 }
 0x1f9   : > { %v680_v20 = vpop.xlane.xlu1 %679 }
 0x1fa   : > { %v709_v38 = vmul.f32 0.001953125, %v680_v20  ;;  %v670_v53 = vpop.xlane.xlu0 %669 }
 0x1fb   : > { %v707_v45 = vmul.f32 0.001953125, %v670_v53 }
 0x1fc   : > { %v718_v17 = vadd.f32 1e-06, %v709_v38  ;;  %v11523_v38 = vrot.slane %v715_v46, %v13704_v7 }
 0x1fd   : > { %v716_v25 = vadd.f32 1e-06, %v707_v45  ;;  %v685_v44 = vpop.xlane.xlu1 %684 }
 0x1fe   : > { %10074 = vrsqrt.f32 %v718_v17  ;;  %v710_v19 = vmul.f32 0.001953125, %v685_v44  ;;  %v675_v6 = vpop.xlane.xlu0 %674  ;;  %v11527_v44 = vrot.slane %v715_v46, %v13705_v33 }
 0x1ff   : > { %10076 = vrsqrt.f32 %v716_v25  ;;  %v708_v18 = vmul.f32 0.001953125, %v675_v6 }
 0x200   : > { %v719_v26 = vadd.f32 1e-06, %v710_v19  ;;  %v11535_v19 = vrot.slane %v715_v46, %v13702_v62 }
 0x201   : > { %v717_v27 = vadd.f32 1e-06, %v708_v18  ;;  %v695_v8 = vpop.xlane.xlu1 %694 }
 0x202   : > { %10078 = vrsqrt.f32 %v719_v26  ;;  %v712_v50 = vmul.f32 0.001953125, %v695_v8 }
 0x203   : > { %v690_v58 = vpop.xlane.xlu0 %689  ;;  %10080 = vrsqrt.f32 %v717_v27 }
 0x204   : > { %v711_v17 = vmul.f32 0.001953125, %v690_v58  ;;  %v721_v5 = vadd.f32 1e-06, %v712_v50 }
 0x205   : > { %v705_v20 = vpop.xlane.xlu1 %704 }
 0x206   : > { %v720_v25 = vadd.f32 1e-06, %v711_v17  ;;  %10082 = vrsqrt.f32 %v721_v5  ;;  %v714_v53 = vmul.f32 0.001953125, %v705_v20 }
 0x207   : > { %v700_v45 = vpop.xlane.xlu0 %699 }
 0x208   : > { %10084 = vrsqrt.f32 %v720_v25  ;;  %v10075_v6 = vpop.eup %10074  ;;  %v723_v18 = vadd.f32 1e-06, %v714_v53  ;;  %v713_v26 = vmul.f32 0.001953125, %v700_v45 }
 0x209   : > { %v10077_v27 = vpop.eup %10076  ;;  %v740_v8 = vmul.f32 %v10075_v6, %v11355_v29  ;;  %v741_v50 = vmul.f32 %v10075_v6, %v11358_v30  ;;  %v742_v58 = vmul.f32 %v10075_v6, %v11361_v31  ;;  %v743_v17 = vmul.f32 %v10075_v6, %v11364_v32 }
 0x20a   : > { %v732_v5 = vmul.f32 %v10077_v27, %v11373_v36  ;;  %v733_v20 = vmul.f32 %v10077_v27, %v11376_v37  ;;  %v734_v46 = vmul.f32 %v10077_v27, %v11381_v39  ;;  %v735_v25 = vmul.f32 %v10077_v27, %v11384_v40 }
 0x20b   : > { %v11546_v53 = vmul.f32 %v11523_v38, %v740_v8  ;;  %v11549_v45 = vmul.f32 %v11527_v44, %v741_v50  ;;  %v11552_v62 = vmul.f32 %v11531_v11, %v742_v58  ;;  %v11555_v0 = vmul.f32 %v11535_v19, %v743_v17 }
 0x20c   : > { %v10079_v6 = vpop.eup %10078  ;;  %v11558_v7 = vmul.f32 %v11523_v38, %v732_v5  ;;  %v11561_v33 = vmul.f32 %v11527_v44, %v733_v20  ;;  %v11564_v27 = vmul.f32 %v11531_v11, %v734_v46  ;;  %v11567_v8 = vmul.f32 %v11535_v19, %v735_v25 }
 0x20d   : > { %13945 = vst [vmem:[#allocation83_spill] sm:$0xff] %v11549_v45  ;;  %13946 = vst [vmem:[#allocation84_spill] sm:$0xff] %v11555_v0  ;;  %v10081_v50 = vpop.eup %10080  ;;  %v744_v58 = vmul.f32 %v10079_v6, %v11391_v43  ;;  %v745_v54 = vmul.f32 %v10079_v6, %v11398_v47  ;;  %v746_v17 = vmul.f32 %v10079_v6, %v11401_v48  ;;  %10086 = vrsqrt.f32 %v723_v18 }
 0x20e   : > { %13947 = vst [vmem:[#allocation85_spill] sm:$0xff] %v11558_v7  ;;  %13948 = vst [vmem:[#allocation86_spill] sm:$0xff] %v11561_v33  ;;  %v747_v32 = vmul.f32 %v10079_v6, %v11404_v49  ;;  %v736_v5 = vmul.f32 %v10081_v50, %v11415_v55  ;;  %v737_v20 = vmul.f32 %v10081_v50, %v11418_v56 }
 0x20f   : > { %13949 = vst [vmem:[#allocation87_spill] sm:$0xff] %v11564_v27  ;;  %13950 = vst [vmem:[#allocation88_spill] sm:$0xff] %v11567_v8  ;;  %v738_v31 = vmul.f32 %v10081_v50, %v11421_v57  ;;  %v739_v46 = vmul.f32 %v10081_v50, %v11424_v59  ;;  %v11578_v25 = vmul.f32 %v11523_v38, %v744_v58 }
 0x210   : > { %v11581_v30 = vmul.f32 %v11527_v44, %v745_v54  ;;  %v11584_v47 = vmul.f32 %v11531_v11, %v746_v17  ;;  %v11587_v48 = vmul.f32 %v11535_v19, %v747_v32  ;;  %v10083_v6 = vpop.eup %10082  ;;  %v11590_v49 = vmul.f32 %v11523_v38, %v736_v5 }
 0x211   : > { %13951 = vst [vmem:[#allocation89_spill] sm:$0xff] %v11578_v25  ;;  %v11593_v43 = vmul.f32 %v11527_v44, %v737_v20  ;;  %v11596_v50 = vmul.f32 %v11531_v11, %v738_v31  ;;  %v11599_v58 = vmul.f32 %v11535_v19, %v739_v46  ;;  %v752_v17 = vmul.f32 %v10083_v6, %v11433_v63 }
 0x212   : > { %13952 = vst [vmem:[#allocation90_spill] sm:$0xff] %v11581_v30  ;;  %v10085_v54 = vpop.eup %10084  ;;  %v753_v29 = vmul.f32 %v10083_v6, %v11436_v1  ;;  %v754_v32 = vmul.f32 %v10083_v6, %v11441_v34  ;;  %v755_v59 = vmul.f32 %v10083_v6, %v11444_v35 }
 0x213   : > { %13953 = vst [vmem:[#allocation91_spill] sm:$0xff] %v11593_v43  ;;  %v748_v5 = vmul.f32 %v10085_v54, %v11449_v42  ;;  %v749_v20 = vmul.f32 %v10085_v54, %v11456_v51  ;;  %v750_v57 = vmul.f32 %v10085_v54, %v11459_v52  ;;  %v751_v31 = vmul.f32 %v10085_v54, %v11462_v12 }
 0x214   : > { %v11610_v46 = vmul.f32 %v11523_v38, %v752_v17  ;;  %v11613_v56 = vmul.f32 %v11527_v44, %v753_v29  ;;  %v11616_v1 = vmul.f32 %v11531_v11, %v754_v32  ;;  %v11619_v34 = vmul.f32 %v11535_v19, %v755_v59 }
 0x215   : > { %v11622_v6 = vmul.f32 %v11523_v38, %v748_v5  ;;  %v11625_v35 = vmul.f32 %v11527_v44, %v749_v20  ;;  %v11628_v54 = vmul.f32 %v11531_v11, %v750_v57  ;;  %v11631_v17 = vmul.f32 %v11535_v19, %v751_v31 }
 0x216   : > { %13954 = vst [vmem:[#allocation92_spill] sm:$0xff] %v11610_v46  ;;  %13955 = vst [vmem:[#allocation93_spill] sm:$0xff] %v11616_v1  ;;  %v722_v29 = vadd.f32 1e-06, %v713_v26 }
 0x217   : > { %13956 = vst [vmem:[#allocation94_spill] sm:$0xff] %v11619_v34  ;;  %13957 = vst [vmem:[#allocation95_spill] sm:$0xff] %v11622_v6  ;;  %v10087_v32 = vpop.eup %10086 }
 0x218   : > { %13958 = vst [vmem:[#allocation96_spill] sm:$0xff] %v11625_v35  ;;  %13959 = vst [vmem:[#allocation97_spill] sm:$0xff] %v11631_v17  ;;  %10088 = vrsqrt.f32 %v722_v29  ;;  %v760_v63 = vmul.f32 %v10087_v32, %v11469_v60  ;;  %v761_v59 = vmul.f32 %v10087_v32, %v11472_v61  ;;  %v762_v5 = vmul.f32 %v10087_v32, %v11475_v9 }
 0x219   : > { %v763_v20 = vmul.f32 %v10087_v32, %v11490_v28 }
 0x21a   : > { %v11638_v57 = vmul.f32 %v11523_v38, %v760_v63  ;;  %v11641_v31 = vmul.f32 %v11527_v44, %v761_v59  ;;  %v11644_v18 = vmul.f32 %v11531_v11, %v762_v5 }
 0x21b   : > { %v11647_v26 = vmul.f32 %v11535_v19, %v763_v20 }
 0x21c   : > { %13960 = vst [vmem:[#allocation98_spill] sm:$0xff] %v11641_v31  ;;  %13961 = vst [vmem:[#allocation99_spill] sm:$0xff] %v11644_v18 }
 0x21d   : > { %13962 = vst [vmem:[#allocation100_spill] sm:$0xff] %v11647_v26 }
 0x222   : > { %v10089_v12 = vpop.eup %10088 }
 0x223   : > { %v756_v29 = vmul.f32 %v10089_v12, %v11482_v2  ;;  %v757_v61 = vmul.f32 %v10089_v12, %v11485_v3  ;;  %v758_v9 = vmul.f32 %v10089_v12, %v11497_v41  ;;  %v759_v32 = vmul.f32 %v10089_v12, %v11502_v10 }
 0x225   : > { %v11654_v63 = vmul.f32 %v11523_v38, %v756_v29  ;;  %v11657_v59 = vmul.f32 %v11527_v44, %v757_v61  ;;  %v11660_v5 = vmul.f32 %v11531_v11, %v758_v9  ;;  %v11663_v20 = vmul.f32 %v11535_v19, %v759_v32 }
 0x227   : > { %13963 = vst [vmem:[#allocation101_spill] sm:$0xff] %v11660_v5  ;;  %13964 = vst [vmem:[#allocation102_spill] sm:$0xff] %v11663_v20 }
 0x228 LB: >> { %v13965_v21 = vld [vmem:[#allocation50_spill] sm:$0xff]  ;;  %v13966_v46 = vld [vmem:[#allocation92_spill] sm:$0xff]  ;;  %v13967_v13 = vld [vmem:[#allocation45_spill] sm:$0xff]  ;;  %s7648_s28 = smul.u32 1536, %s10780_s17  ;;  %s10801_s21 = smov 64   ;;  %vm1699_vm1 = vcmask 523264   ;;  %s10780_s17 = sphi %s11669_s17, %s858_s17  }
 0x229   : >> { %v13968_v45 = vld [vmem:[#allocation83_spill] sm:$0xff]  ;;  %v13970_v35 = vld [vmem:[#allocation96_spill] sm:$0xff]  ;;  %v13971_v34 = vld [vmem:[#allocation94_spill] sm:$0xff]  ;;  %s7649_s7 = sshll.u32 %s10780_s17, 9  ;;  %s858_s17 = sadd.s32 1, %s10780_s17  }
 0x22a   : >> { %v13969_v43 = vld [vmem:[#allocation91_spill] sm:$0xff]  ;;  %v13972_v31 = vld [vmem:[#allocation98_spill] sm:$0xff]  ;;  %v13975_v26 = vld [vmem:[#allocation100_spill] sm:$0xff]  ;;  %s11677_s18 = scalar_lea.vmem [#allocation14], %s7648_s28  ;;  %s12069_s12 = scalar_lea.vmem [#allocation15], %s7649_s7 }
 0x22b   : >> { %v13973_v30 = vld [vmem:[#allocation90_spill] sm:$0xff]  ;;  %v13974_v27 = vld [vmem:[#allocation87_spill] sm:$0xff]  ;;  %v13976_v25 = vld [vmem:[#allocation89_spill] sm:$0xff]  ;;  %p855_p3 = scmp.ge.s32.totalorder %s858_s17, 4  }
 0x22c   : >> { %v13978_v18 = vld [vmem:[#allocation99_spill] sm:$0xff]  ;;  %v13979_v17 = vld [vmem:[#allocation97_spill] sm:$0xff]  ;;  %v13980_v8 = vld [vmem:[#allocation88_spill] sm:$0xff]  ;;  %s14229_s4 = sld [smem:[#allocation31_spill]] (%p855_p3)  ;;  %s7390_s5 = sshll.u32 (%p855_p3), %s11667_s13, 4  ;;  %s13599_s5 = int_to_ptr.vmem [resolvable:$true] %s7390_s5 }
 0x22d   : >> { %v13981_v7 = vld [vmem:[#allocation85_spill] sm:$0xff]  ;;  %v13982_v6 = vld [vmem:[#allocation95_spill] sm:$0xff]  ;;  %v13985_v0 = vld [vmem:[#allocation84_spill] sm:$0xff]  ;;  %s14237_s29 = sld [smem:[#allocation35_spill]] (%p855_p3)  ;;  %s14239_s27 = sld [smem:[#allocation131_spill]] (%p855_p3) }
 0x22e   : >> { %v13977_v20 = vld [vmem:[#allocation102_spill] sm:$0xff]  ;;  %v13983_v5 = vld [vmem:[#allocation101_spill] sm:$0xff]  ;;  %v866_v12 = vld [vmem:[%s11677_s18 + $0x20] sm:$0xff]  ;;  %s7377_s20 = scalar_lea.sflag (%p855_p3), [#allocation5], %s11235_s30  ;;  %s10682_s25 = scalar_lea.vmem (%p855_p3), %s13599_s5, 4096 }
 0x22f   : >> { %v13984_v1 = vld [vmem:[#allocation93_spill] sm:$0xff]  ;;  %v13986_v33 = vld [vmem:[#allocation86_spill] sm:$0xff]  ;;  %v862_v61 = vld [vmem:[%s11677_s18] sm:$0xff]  ;;  %p10683_p7 = scmp.ne.s32.totalorder (%p855_p3), %s13599_s5, %s10682_s25  ;;  %s10803_s15 = smov (%p855_p3), [#allocation20]  }
 0x230   : >> { %1118 = vmatprep.mubr.f32.mxu0 %v13986_v33  ;;  %1344 = vmatprep.mubr.f32.mxu1 %v13986_v33  ;;  %v863_v9 = vld [vmem:[%s11677_s18 + $0x8] sm:$0xff]  ;;  %v865_v44 = vld [vmem:[%s11677_s18 + $0x18] sm:$0xff]  ;;  %v872_v19 = vld [vmem:[%s11677_s18 + $0x50] sm:$0xff]  ;;  %s10686_s26 = sshll.u32 (%p855_p3), %s10803_s15, 4  ;;  %s10687_s26 = int_to_ptr.vmem [resolvable:$false] %s10686_s26 }
 0x231   : >> { %v7851_v38 = vpack.c.bf16 %v866_v12, %v863_v9  ;;  %v869_v11 = vld [vmem:[%s11677_s18 + $0x38] sm:$0xff]  ;;  %v7853_v29 = vpack.c.bf16 %v865_v44, %v862_v61  ;;  %v868_v33 = vld [vmem:[%s11677_s18 + $0x30] sm:$0xff]  ;;  %v871_v28 = vld [vmem:[%s11677_s18 + $0x48] sm:$0xff]  ;;  %s10688_s11 = scalar_lea.vmem (%p855_p3), %s10687_s26, 8192  ;;  %p10689_p1 = scmp.lt.s32.totalorder (%p855_p3), %s13599_s5, %s10687_s26 }
 0x232   : >> { %v7855_v32 = vpack.c.bf16 %v872_v19, %v869_v11  ;;  %v875_v60 = vld [vmem:[%s11677_s18 + $0x68] sm:$0xff]  ;;  %v878_v10 = vld [vmem:[%s11677_s18 + $0x80] sm:$0xff]  ;;  %v7857_v41 = vpack.c.bf16 %v871_v28, %v868_v33  ;;  %v877_v3 = vld [vmem:[%s11677_s18 + $0x78] sm:$0xff]  ;;  %s7650_s23 = sshll.u32 (%p855_p3), %s14229_s4, 12  ;;  %p10690_p6 = scmp.lt.s32.totalorder (%p855_p3), %s10688_s11, %s10682_s25 }
 0x233   : >> { %7852 = vmatprep.subr.bf16.mxu0 %v7851_v38  ;;  %v7859_v9 = vpack.c.bf16 %v878_v10, %v875_v60  ;;  %v874_v12 = vld [vmem:[%s11677_s18 + $0x60] sm:$0xff]  ;;  %v881_v2 = vld [vmem:[%s11677_s18 + $0x98] sm:$0xff]  ;;  %v884_v61 = vld [vmem:[%s11677_s18 + $0xb0] sm:$0xff]  ;;  %s13597_s1 = scalar_lea.hbm (%p855_p3), %s14239_s27, %s7650_s23  ;;  %p14242_p10 = scmp.ne.s32.totalorder (%p855_p3), %s14237_s29, 0 }
 0x234   : >> { %7854 = vmatpush1.bf16.msra.mxu0 %v7853_v29  ;;  %v7861_v44 = vpack.c.bf16 %v877_v3, %v874_v12  ;;  %v7863_v11 = vpack.c.bf16 %v884_v61, %v881_v2  ;;  %v880_v38 = vld [vmem:[%s11677_s18 + $0x90] sm:$0xff]  ;;  %v883_v19 = vld [vmem:[%s11677_s18 + $0xa8] sm:$0xff]  ;;  %v890_v28 = vld [vmem:[%s11677_s18 + $0xe0] sm:$0xff]  ;;  %p10691_p8 = por (%p855_p3), %p10690_p6, %p10689_p1 }
 0x235   : >> { %7856 = vmatprep.subr.bf16.mxu0 %v7855_v32  ;;  %v887_v29 = vld [vmem:[%s11677_s18 + $0xc8] sm:$0xff]  ;;  %v7865_v60 = vpack.c.bf16 %v883_v19, %v880_v38  ;;  %v886_v33 = vld [vmem:[%s11677_s18 + $0xc0] sm:$0xff]  ;;  %v889_v32 = vld [vmem:[%s11677_s18 + $0xd8] sm:$0xff]  ;;  %p10684_p11 = pnand (%p855_p3), %p10683_p7, %p14242_p10 }
 0x236   : >> { %v7867_v10 = vpack.c.bf16 %v890_v28, %v887_v29  ;;  %v896_v3 = vld [vmem:[%s11677_s18 + $0x110] sm:$0xff]  ;;  %v7869_v2 = vpack.c.bf16 %v889_v32, %v886_v33  ;;  %v895_v61 = vld [vmem:[%s11677_s18 + $0x108] sm:$0xff]  ;;  %v898_v29 = vld [vmem:[%s11677_s18 + $0x120] sm:$0xff] }
 0x237   : >> { %v892_v12 = vld [vmem:[%s11677_s18 + $0xf0] sm:$0xff]  ;;  %v901_v28 = vld [vmem:[%s11677_s18 + $0x138] sm:$0xff]  ;;  %v974_v51 = vld [vmem:[%s11677_s18 + $0x380] sm:$0xff]  ;;  %p10685_p4 = pneg (%p855_p3), %p10684_p11 }
 0x238   : >> { %7858 = vmatpush1.bf16.msra.mxu0 %v7857_v41  ;;  %v893_v41 = vld [vmem:[%s11677_s18 + $0xf8] sm:$0xff]  ;;  %v7873_v38 = vpack.c.bf16 %v895_v61, %v892_v12  ;;  %v7877_v33 = vpack.c.bf16 %v901_v28, %v898_v29 }
 0x239   : >> { %7860 = vmatprep.subr.bf16.mxu0 %v7859_v9  ;;  %v7871_v9 = vpack.c.bf16 %v896_v3, %v893_v41  ;;  %v904_v41 = vld [vmem:[%s11677_s18 + $0x150] sm:$0xff]  ;;  %v907_v3 = vld [vmem:[%s11677_s18 + $0x168] sm:$0xff]  ;;  %v965_v52 = vld [vmem:[%s11677_s18 + $0x338] sm:$0xff]  ;;  %p10692_p9 = pnand (%p855_p3), %p10691_p8, %p10685_p4 }
 0x23a   : >> { %v7881_v12 = vpack.c.bf16 %v907_v3, %v904_v41 }
 0x23c   : >> { %7862 = vmatpush1.bf16.msra.mxu0 %v7861_v44  ;;  %v899_v44 = vld [vmem:[%s11677_s18 + $0x128] sm:$0xff] }
 0x23d   : >> { %7864 = vmatprep.subr.bf16.mxu0 %v7863_v11  ;;  %v902_v11 = vld [vmem:[%s11677_s18 + $0x140] sm:$0xff] }
 0x23e   : >> { %v7875_v19 = vpack.c.bf16 %v902_v11, %v899_v44  ;;  %v910_v44 = vld [vmem:[%s11677_s18 + $0x180] sm:$0xff]  ;;  %v913_v11 = vld [vmem:[%s11677_s18 + $0x198] sm:$0xff] }
 0x23f   : >> { %v7885_v29 = vpack.c.bf16 %v913_v11, %v910_v44 }
 0x240   : >> { %7866 = vmatpush1.bf16.msra.mxu0 %v7865_v60  ;;  %v905_v60 = vld [vmem:[%s11677_s18 + $0x158] sm:$0xff] }
 0x241   : >> { %7868 = vmatprep.subr.bf16.mxu0 %v7867_v10  ;;  %v908_v10 = vld [vmem:[%s11677_s18 + $0x170] sm:$0xff] }
 0x242   : >> { %v7879_v32 = vpack.c.bf16 %v908_v10, %v905_v60  ;;  %v916_v60 = vld [vmem:[%s11677_s18 + $0x1b0] sm:$0xff]  ;;  %v919_v10 = vld [vmem:[%s11677_s18 + $0x1c8] sm:$0xff] }
 0x243   : >> { %v7889_v41 = vpack.c.bf16 %v919_v10, %v916_v60 }
 0x244   : >> { %7870 = vmatpush1.bf16.msra.mxu0 %v7869_v2  ;;  %v911_v2 = vld [vmem:[%s11677_s18 + $0x188] sm:$0xff] }
 0x245   : >> { %7872 = vmatprep.subr.bf16.mxu0 %v7871_v9  ;;  %v914_v9 = vld [vmem:[%s11677_s18 + $0x1a0] sm:$0xff] }
 0x246   : >> { %v7883_v61 = vpack.c.bf16 %v914_v9, %v911_v2  ;;  %v922_v2 = vld [vmem:[%s11677_s18 + $0x1e0] sm:$0xff]  ;;  %v925_v9 = vld [vmem:[%s11677_s18 + $0x1f8] sm:$0xff] }
 0x247   : >> { %v7893_v44 = vpack.c.bf16 %v925_v9, %v922_v2 }
 0x248   : >> { %7874 = vmatpush1.bf16.msra.mxu0 %v7873_v38  ;;  %v917_v38 = vld [vmem:[%s11677_s18 + $0x1b8] sm:$0xff] }
 0x249   : >> { %7876 = vmatprep.subr.bf16.mxu0 %v7875_v19  ;;  %v920_v19 = vld [vmem:[%s11677_s18 + $0x1d0] sm:$0xff] }
 0x24a   : >> { %v7887_v28 = vpack.c.bf16 %v920_v19, %v917_v38  ;;  %v928_v38 = vld [vmem:[%s11677_s18 + $0x210] sm:$0xff]  ;;  %v931_v19 = vld [vmem:[%s11677_s18 + $0x228] sm:$0xff] }
 0x24b   : >> { %v7897_v60 = vpack.c.bf16 %v931_v19, %v928_v38 }
 0x24c   : >> { %7878 = vmatpush1.bf16.msra.mxu0 %v7877_v33  ;;  %v923_v33 = vld [vmem:[%s11677_s18 + $0x1e8] sm:$0xff] }
 0x24d   : >> { %7880 = vmatprep.subr.bf16.mxu0 %v7879_v32  ;;  %v926_v32 = vld [vmem:[%s11677_s18 + $0x200] sm:$0xff] }
 0x24e   : >> { %v7891_v3 = vpack.c.bf16 %v926_v32, %v923_v33  ;;  %v934_v33 = vld [vmem:[%s11677_s18 + $0x240] sm:$0xff]  ;;  %v937_v32 = vld [vmem:[%s11677_s18 + $0x258] sm:$0xff] }
 0x24f   : >> { %v7901_v2 = vpack.c.bf16 %v937_v32, %v934_v33 }
 0x250   : >> { %7882 = vmatpush1.bf16.msra.mxu0 %v7881_v12  ;;  %v929_v12 = vld [vmem:[%s11677_s18 + $0x218] sm:$0xff] }
 0x251   : >> { %7884 = vmatprep.subr.bf16.mxu0 %v7883_v61  ;;  %v932_v61 = vld [vmem:[%s11677_s18 + $0x230] sm:$0xff] }
 0x252   : >> { %v7895_v11 = vpack.c.bf16 %v932_v61, %v929_v12  ;;  %v940_v12 = vld [vmem:[%s11677_s18 + $0x270] sm:$0xff]  ;;  %v943_v61 = vld [vmem:[%s11677_s18 + $0x288] sm:$0xff] }
 0x253   : >> { %v7905_v38 = vpack.c.bf16 %v943_v61, %v940_v12 }
 0x254   : >> { %7886 = vmatpush1.bf16.msra.mxu0 %v7885_v29  ;;  %v935_v29 = vld [vmem:[%s11677_s18 + $0x248] sm:$0xff] }
 0x255   : >> { %7888 = vmatprep.subr.bf16.mxu0 %v7887_v28  ;;  %v938_v28 = vld [vmem:[%s11677_s18 + $0x260] sm:$0xff] }
 0x256   : >> { %v7899_v10 = vpack.c.bf16 %v938_v28, %v935_v29  ;;  %v946_v29 = vld [vmem:[%s11677_s18 + $0x2a0] sm:$0xff]  ;;  %v949_v28 = vld [vmem:[%s11677_s18 + $0x2b8] sm:$0xff] }
 0x257   : >> { %v7909_v33 = vpack.c.bf16 %v949_v28, %v946_v29  ;;  %v964_v28 = vld [vmem:[%s11677_s18 + $0x330] sm:$0xff] }
 0x258   : >> { %7890 = vmatpush1.bf16.msra.mxu0 %v7889_v41  ;;  %v941_v41 = vld [vmem:[%s11677_s18 + $0x278] sm:$0xff] }
 0x259   : >> { %7892 = vmatprep.subr.bf16.mxu0 %v7891_v3  ;;  %v944_v3 = vld [vmem:[%s11677_s18 + $0x290] sm:$0xff] }
 0x25a   : >> { %v7903_v9 = vpack.c.bf16 %v944_v3, %v941_v41  ;;  %v952_v41 = vld [vmem:[%s11677_s18 + $0x2d0] sm:$0xff]  ;;  %v955_v3 = vld [vmem:[%s11677_s18 + $0x2e8] sm:$0xff] }
 0x25b   : >> { %v7913_v12 = vpack.c.bf16 %v955_v3, %v952_v41  ;;  %v970_v41 = vld [vmem:[%s11677_s18 + $0x360] sm:$0xff]  ;;  %v973_v3 = vld [vmem:[%s11677_s18 + $0x378] sm:$0xff] }
 0x25c   : >> { %7894 = vmatpush1.bf16.msra.mxu0 %v7893_v44  ;;  %v947_v44 = vld [vmem:[%s11677_s18 + $0x2a8] sm:$0xff] }
 0x25d   : >> { %7896 = vmatprep.subr.bf16.mxu0 %v7895_v11  ;;  %v950_v11 = vld [vmem:[%s11677_s18 + $0x2c0] sm:$0xff] }
 0x25e   : >> { %v7907_v19 = vpack.c.bf16 %v950_v11, %v947_v44  ;;  %v958_v44 = vld [vmem:[%s11677_s18 + $0x300] sm:$0xff]  ;;  %v961_v11 = vld [vmem:[%s11677_s18 + $0x318] sm:$0xff] }
 0x260   : >> { %7898 = vmatpush1.bf16.msra.mxu0 %v7897_v60  ;;  %v953_v60 = vld [vmem:[%s11677_s18 + $0x2d8] sm:$0xff] }
 0x261   : >> { %7900 = vmatprep.subr.bf16.mxu0 %v7899_v10  ;;  %v956_v10 = vld [vmem:[%s11677_s18 + $0x2f0] sm:$0xff] }
 0x262   : >> { %v7911_v32 = vpack.c.bf16 %v956_v10, %v953_v60  ;;  %v967_v60 = vld [vmem:[%s11677_s18 + $0x348] sm:$0xff] }
 0x263   : >> { %v971_v10 = vld [vmem:[%s11677_s18 + $0x368] sm:$0xff] }
 0x264   : >> { %7902 = vmatpush1.bf16.msra.mxu0 %v7901_v2  ;;  %v959_v2 = vld [vmem:[%s11677_s18 + $0x308] sm:$0xff] }
 0x265   : >> { %7904 = vmatprep.subr.bf16.mxu0 %v7903_v9  ;;  %v962_v9 = vld [vmem:[%s11677_s18 + $0x320] sm:$0xff] }
 0x266   : >> { %v7915_v61 = vpack.c.bf16 %v962_v9, %v959_v2  ;;  %v977_v2 = vld [vmem:[%s11677_s18 + $0x398] sm:$0xff]  ;;  %v7925_v9 = vpack.c.bf16 %v973_v3, %v970_v41  ;;  %v988_v41 = vld [vmem:[%s11677_s18 + $0x3f0] sm:$0xff]  ;;  %v991_v3 = vld [vmem:[%s11677_s18 + $0x408] sm:$0xff] }
 0x268   : >> { %7906 = vmatpush1.bf16.msra.mxu0 %v7905_v38  ;;  %v968_v38 = vld [vmem:[%s11677_s18 + $0x350] sm:$0xff] }
 0x269   : >> { %7908 = vmatprep.subr.bf16.mxu0 %v7907_v19  ;;  %v7917_v19 = vpack.c.bf16 %v961_v11, %v958_v44  ;;  %v7919_v29 = vpack.c.bf16 %v968_v38, %v965_v52  ;;  %v980_v52 = vld [vmem:[%s11677_s18 + $0x3b0] sm:$0xff]  ;;  %v979_v44 = vld [vmem:[%s11677_s18 + $0x3a8] sm:$0xff] }
 0x26a   : >> { %v983_v11 = vld [vmem:[%s11677_s18 + $0x3c8] sm:$0xff] }
 0x26c   : >> { %7910 = vmatpush1.bf16.msra.mxu0 %v7909_v33  ;;  %v7921_v33 = vpack.c.bf16 %v967_v60, %v964_v28  ;;  %v985_v28 = vld [vmem:[%s11677_s18 + $0x3d8] sm:$0xff] }
 0x26d   : >> { %7912 = vmatprep.subr.bf16.mxu0 %v7911_v32  ;;  %v7923_v32 = vpack.c.bf16 %v974_v51, %v971_v10  ;;  %v986_v51 = vld [vmem:[%s11677_s18 + $0x3e0] sm:$0xff]  ;;  %v989_v60 = vld [vmem:[%s11677_s18 + $0x3f8] sm:$0xff]  ;;  %v992_v10 = vld [vmem:[%s11677_s18 + $0x410] sm:$0xff] }
 0x270   : >> { %7914 = vmatpush1.bf16.msra.mxu0 %v7913_v12  ;;  %v7927_v12 = vpack.c.bf16 %v980_v52, %v977_v2  ;;  %v995_v2 = vld [vmem:[%s11677_s18 + $0x428] sm:$0xff]  ;;  %v998_v52 = vld [vmem:[%s11677_s18 + $0x440] sm:$0xff] }
 0x271   : >> { %7916 = vmatprep.subr.bf16.mxu0 %v7915_v61  ;;  %v976_v61 = vld [vmem:[%s11677_s18 + $0x390] sm:$0xff] }
 0x272   : >> { %v7929_v38 = vpack.c.bf16 %v979_v44, %v976_v61  ;;  %v994_v61 = vld [vmem:[%s11677_s18 + $0x420] sm:$0xff]  ;;  %v997_v44 = vld [vmem:[%s11677_s18 + $0x438] sm:$0xff] }
 0x273   : >> { %1119 = vmatmul.mubr.f32.vlgmr.msra.gmra.mrb[0].mxu0 %v13981_v7 }
 0x274   : >> { %7918 = vmatpush1.bf16.msra.mxu0 %v7917_v19  ;;  %1124 = vmatprep.mubr.f32.mxu0 %v13969_v43  ;;  %v7931_v19 = vpack.c.bf16 %v986_v51, %v983_v11  ;;  %v1001_v11 = vld [vmem:[%s11677_s18 + $0x458] sm:$0xff]  ;;  %v1004_v51 = vld [vmem:[%s11677_s18 + $0x470] sm:$0xff] }
 0x275   : >> { %7920 = vmatprep.subr.bf16.mxu0 %v7919_v29  ;;  %v982_v29 = vld [vmem:[%s11677_s18 + $0x3c0] sm:$0xff] }
 0x277   : >> { %1125 = vmatmul.mubr.f32.gmra.mrb[2].mxu0 %v11590_v49 }
 0x278   : >> { %7922 = vmatpush1.bf16.msra.mxu0 %v7921_v33  ;;  %1130 = vmatprep.mubr.f32.mxu0 %v13968_v45  ;;  %v7933_v33 = vpack.c.bf16 %v985_v28, %v982_v29  ;;  %v1000_v29 = vld [vmem:[%s11677_s18 + $0x450] sm:$0xff]  ;;  %v1003_v28 = vld [vmem:[%s11677_s18 + $0x468] sm:$0xff] }
 0x279   : >> { %7924 = vmatprep.subr.bf16.mxu0 %v7923_v32  ;;  %v7935_v32 = vpack.c.bf16 %v992_v10, %v989_v60  ;;  %v1007_v60 = vld [vmem:[%s11677_s18 + $0x488] sm:$0xff]  ;;  %v1010_v10 = vld [vmem:[%s11677_s18 + $0x4a0] sm:$0xff] }
 0x27b   : >> { %1131 = vmatmul.mubr.f32.gmra.mrb[4].mxu0 %v11546_v53 }
 0x27c   : >> { %7926 = vmatpush1.bf16.msra.mxu0 %v7925_v9  ;;  %1136 = vmatprep.mubr.f32.mxu0 %v13973_v30  ;;  %v7937_v9 = vpack.c.bf16 %v991_v3, %v988_v41  ;;  %v1006_v41 = vld [vmem:[%s11677_s18 + $0x480] sm:$0xff]  ;;  %v1009_v3 = vld [vmem:[%s11677_s18 + $0x498] sm:$0xff] }
 0x27d   : >> { %7928 = vmatprep.subr.bf16.mxu0 %v7927_v12  ;;  %v7939_v12 = vpack.c.bf16 %v998_v52, %v995_v2  ;;  %v1013_v2 = vld [vmem:[%s11677_s18 + $0x4b8] sm:$0xff]  ;;  %v1016_v52 = vld [vmem:[%s11677_s18 + $0x4d0] sm:$0xff] }
 0x27f   : >> { %1137 = vmatmul.mubr.f32.gmra.mrb[6].mxu0 %v13976_v25 }
 0x280   : >> { %7930 = vmatpush1.bf16.msra.mxu0 %v7929_v38  ;;  %1142 = vmatprep.mubr.f32.mxu0 %v13970_v35  ;;  %v7941_v38 = vpack.c.bf16 %v997_v44, %v994_v61  ;;  %v1012_v61 = vld [vmem:[%s11677_s18 + $0x4b0] sm:$0xff]  ;;  %v1015_v44 = vld [vmem:[%s11677_s18 + $0x4c8] sm:$0xff] }
 0x281   : >> { %7932 = vmatprep.subr.bf16.mxu0 %v7931_v19  ;;  %v7943_v19 = vpack.c.bf16 %v1004_v51, %v1001_v11  ;;  %v1019_v11 = vld [vmem:[%s11677_s18 + $0x4e8] sm:$0xff]  ;;  %v1022_v51 = vld [vmem:[%s11677_s18 + $0x500] sm:$0xff] }
 0x283   : >> { %1143 = vmatmul.mubr.f32.gmra.mrb[8].mxu0 %v13982_v6 }
 0x284   : >> { %7934 = vmatpush1.bf16.msra.mxu0 %v7933_v33  ;;  %1148 = vmatprep.mubr.f32.mxu0 %v11613_v56  ;;  %v7945_v33 = vpack.c.bf16 %v1003_v28, %v1000_v29  ;;  %v1018_v29 = vld [vmem:[%s11677_s18 + $0x4e0] sm:$0xff]  ;;  %v1021_v28 = vld [vmem:[%s11677_s18 + $0x4f8] sm:$0xff] }
 0x285   : >> { %7936 = vmatprep.subr.bf16.mxu0 %v7935_v32  ;;  %v7947_v32 = vpack.c.bf16 %v1010_v10, %v1007_v60  ;;  %v1025_v60 = vld [vmem:[%s11677_s18 + $0x518] sm:$0xff]  ;;  %v1028_v10 = vld [vmem:[%s11677_s18 + $0x530] sm:$0xff] }
 0x287   : >> { %1149 = vmatmul.mubr.f32.gmra.mrb[10].mxu0 %v13966_v46 }
 0x288   : >> { %7938 = vmatpush1.bf16.msra.mxu0 %v7937_v9  ;;  %1154 = vmatprep.mubr.f32.mxu0 %v11657_v59  ;;  %v7949_v9 = vpack.c.bf16 %v1009_v3, %v1006_v41  ;;  %v1024_v41 = vld [vmem:[%s11677_s18 + $0x510] sm:$0xff]  ;;  %v1027_v3 = vld [vmem:[%s11677_s18 + $0x528] sm:$0xff] }
 0x289   : >> { %7940 = vmatprep.subr.bf16.mxu0 %v7939_v12  ;;  %v7951_v12 = vpack.c.bf16 %v1016_v52, %v1013_v2  ;;  %v1031_v2 = vld [vmem:[%s11677_s18 + $0x548] sm:$0xff]  ;;  %v1034_v52 = vld [vmem:[%s11677_s18 + $0x560] sm:$0xff] }
 0x28b   : >> { %1155 = vmatmul.mubr.f32.gmra.mrb[12].mxu0 %v11654_v63 }
 0x28c   : >> { %7942 = vmatpush1.bf16.msra.mxu0 %v7941_v38  ;;  %1160 = vmatprep.mubr.f32.mxu0 %v13972_v31  ;;  %v7953_v38 = vpack.c.bf16 %v1015_v44, %v1012_v61  ;;  %v1030_v61 = vld [vmem:[%s11677_s18 + $0x540] sm:$0xff]  ;;  %v1033_v44 = vld [vmem:[%s11677_s18 + $0x558] sm:$0xff] }
 0x28d   : >> { %7944 = vmatprep.subr.bf16.mxu0 %v7943_v19  ;;  %v7955_v19 = vpack.c.bf16 %v1022_v51, %v1019_v11  ;;  %v1037_v11 = vld [vmem:[%s11677_s18 + $0x578] sm:$0xff]  ;;  %v1040_v51 = vld [vmem:[%s11677_s18 + $0x590] sm:$0xff] }
 0x28f   : >> { %1161 = vmatmul.mubr.f32.gmra.mrb[14].mxu0 %v11638_v57 }
 0x290   : >> { %7946 = vmatpush1.bf16.msra.mxu0 %v7945_v33  ;;  %1231 = vmatprep.mubr.f32.mxu0 %v13980_v8  ;;  %v7957_v33 = vpack.c.bf16 %v1021_v28, %v1018_v29  ;;  %v1036_v29 = vld [vmem:[%s11677_s18 + $0x570] sm:$0xff]  ;;  %v1039_v28 = vld [vmem:[%s11677_s18 + $0x588] sm:$0xff] }
 0x291   : >> { %7948 = vmatprep.subr.bf16.mxu0 %v7947_v32  ;;  %v7959_v32 = vpack.c.bf16 %v1028_v10, %v1025_v60  ;;  %v1043_v60 = vld [vmem:[%s11677_s18 + $0x5a8] sm:$0xff]  ;;  %v1046_v10 = vld [vmem:[%s11677_s18 + $0x5c0] sm:$0xff] }
 0x294   : >> { %7950 = vmatpush1.bf16.msra.mxu0 %v7949_v9  ;;  %v7961_v9 = vpack.c.bf16 %v1027_v3, %v1024_v41  ;;  %v1042_v41 = vld [vmem:[%s11677_s18 + $0x5a0] sm:$0xff]  ;;  %v1045_v3 = vld [vmem:[%s11677_s18 + $0x5b8] sm:$0xff] }
 0x295   : >> { %7952 = vmatprep.subr.bf16.mxu0 %v7951_v12  ;;  %v7963_v12 = vpack.c.bf16 %v1034_v52, %v1031_v2  ;;  %v1049_v2 = vld [vmem:[%s11677_s18 + $0x5d8] sm:$0xff]  ;;  %v1052_v52 = vld [vmem:[%s11677_s18 + $0x5f0] sm:$0xff]  ;;  %v7973_v42 = vpack.c.bf16 %v1045_v3, %v1042_v41 }
 0x296   : >> { %v924_v3 = vld [vmem:[%s11677_s18 + $0x1f0] sm:$0xff] }
 0x298   : >> { %7954 = vmatpush1.bf16.msra.mxu0 %v7953_v38  ;;  %v7965_v38 = vpack.c.bf16 %v1033_v44, %v1030_v61  ;;  %v1051_v61 = vld [vmem:[%s11677_s18 + $0x5e8] sm:$0xff] }
 0x299   : >> { %7956 = vmatprep.subr.bf16.mxu0 %v7955_v19  ;;  %v7967_v19 = vpack.c.bf16 %v1040_v51, %v1037_v11  ;;  %v915_v11 = vld [vmem:[%s11677_s18 + $0x1a8] sm:$0xff] }
 0x29c   : >> { %7958 = vmatpush1.bf16.msra.mxu0 %v7957_v33  ;;  %v7969_v33 = vpack.c.bf16 %v1039_v28, %v1036_v29  ;;  %v918_v28 = vld [vmem:[%s11677_s18 + $0x1c0] sm:$0xff] }
 0x29d   : >> { %7960 = vmatprep.subr.bf16.mxu0 %v7959_v32  ;;  %v7971_v32 = vpack.c.bf16 %v1046_v10, %v1043_v60  ;;  %v921_v60 = vld [vmem:[%s11677_s18 + $0x1d8] sm:$0xff] }
 0x29e   : >> { %v7983_v10 = vpack.c.bf16 %v921_v60, %v918_v28  ;;  %v939_v28 = vld [vmem:[%s11677_s18 + $0x268] sm:$0xff] }
 0x2a0   : >> { %7962 = vmatpush1.bf16.msra.mxu0 %v7961_v9  ;;  %v7975_v9 = vpack.c.bf16 %v1052_v52, %v1049_v2  ;;  %v927_v2 = vld [vmem:[%s11677_s18 + $0x208] sm:$0xff] }
 0x2a1   : >> { %7964 = vmatprep.subr.bf16.mxu0 %v7963_v12  ;;  %v1048_v12 = vld [vmem:[%s11677_s18 + $0x5d0] sm:$0xff]  ;;  %v7987_v52 = vpack.c.bf16 %v927_v2, %v924_v3  ;;  %v945_v3 = vld [vmem:[%s11677_s18 + $0x298] sm:$0xff] }
 0x2a2   : >> { %v7977_v44 = vpack.c.bf16 %v1051_v61, %v1048_v12  ;;  %v879_v12 = vld [vmem:[%s11677_s18 + $0x88] sm:$0xff] }
 0x2a4   : >> { %7966 = vmatpush1.bf16.msra.mxu0 %v7965_v38  ;;  %v864_v38 = vld [vmem:[%s11677_s18 + $0x10] sm:$0xff] }
 0x2a5   : >> { %7968 = vmatprep.subr.bf16.mxu0 %v7967_v19  ;;  %v867_v19 = vld [vmem:[%s11677_s18 + $0x28] sm:$0xff] }
 0x2a6   : >> { %v7981_v29 = vpack.c.bf16 %v867_v19, %v864_v38  ;;  %v885_v38 = vld [vmem:[%s11677_s18 + $0xb8] sm:$0xff] }
 0x2a8   : >> { %7970 = vmatpush1.bf16.msra.mxu0 %v7969_v33  ;;  %v870_v33 = vld [vmem:[%s11677_s18 + $0x40] sm:$0xff] }
 0x2a9   : >> { %7972 = vmatprep.subr.bf16.mxu0 %v7971_v32  ;;  %v873_v32 = vld [vmem:[%s11677_s18 + $0x58] sm:$0xff] }
 0x2aa   : >> { %v7985_v41 = vpack.c.bf16 %v873_v32, %v870_v33  ;;  %v891_v33 = vld [vmem:[%s11677_s18 + $0xe8] sm:$0xff] }
 0x2ac   : >> { %7974 = vmatpush1.bf16.msra.mxu0 %v7973_v42  ;;  %v912_v42 = vld [vmem:[%s11677_s18 + $0x190] sm:$0xff] }
 0x2ad   : >> { %7976 = vmatprep.subr.bf16.mxu0 %v7975_v9  ;;  %v7979_v51 = vpack.c.bf16 %v915_v11, %v912_v42  ;;  %v876_v9 = vld [vmem:[%s11677_s18 + $0x70] sm:$0xff]  ;;  %v933_v42 = vld [vmem:[%s11677_s18 + $0x238] sm:$0xff] }
 0x2ae   : >> { %v7989_v61 = vpack.c.bf16 %v879_v12, %v876_v9  ;;  %v897_v9 = vld [vmem:[%s11677_s18 + $0x118] sm:$0xff] }
 0x2af   : >> { %7980 = vmatprep.subr.bf16.mxu1 %v7979_v51  ;;  %v882_v51 = vld [vmem:[%s11677_s18 + $0xa0] sm:$0xff] }
 0x2b0   : >> { %7978 = vmatpush1.bf16.msra.mxu0 %v7977_v44  ;;  %7982 = vmatpush3.bf16.msra.mxu1 %v7981_v29  ;;  %v930_v44 = vld [vmem:[%s11677_s18 + $0x220] sm:$0xff]  ;;  %v7993_v19 = vpack.c.bf16 %v885_v38, %v882_v51  ;;  %v936_v29 = vld [vmem:[%s11677_s18 + $0x250] sm:$0xff]  ;;  %v903_v51 = vld [vmem:[%s11677_s18 + $0x148] sm:$0xff] }
 0x2b1   : >> { %7984 = vmatprep.subr.bf16.mxu1 %v7983_v10  ;;  %v7991_v11 = vpack.c.bf16 %v933_v42, %v930_v44  ;;  %v7995_v60 = vpack.c.bf16 %v939_v28, %v936_v29  ;;  %v888_v10 = vld [vmem:[%s11677_s18 + $0xd0] sm:$0xff]  ;;  %v951_v44 = vld [vmem:[%s11677_s18 + $0x2c8] sm:$0xff]  ;;  %v957_v29 = vld [vmem:[%s11677_s18 + $0x2f8] sm:$0xff] }
 0x2b2   : >> { %v7997_v32 = vpack.c.bf16 %v891_v33, %v888_v10  ;;  %v906_v28 = vld [vmem:[%s11677_s18 + $0x160] sm:$0xff]  ;;  %v909_v10 = vld [vmem:[%s11677_s18 + $0x178] sm:$0xff]  ;;  %v1008_v33 = vld [vmem:[%s11677_s18 + $0x490] sm:$0xff] }
 0x2b3   : >> { %1232 = vmatmul.mubr.f32.vlgmr.msra.gmra.mrb[0].mxu0 %v13974_v27 }
 0x2b4   : >> { %1237 = vmatprep.mubr.f32.mxu0 %v11599_v58  ;;  %7986 = vmatpush3.bf16.msra.mxu1 %v7985_v41  ;;  %v942_v41 = vld [vmem:[%s11677_s18 + $0x280] sm:$0xff] }
 0x2b5   : >> { %7988 = vmatprep.subr.bf16.mxu1 %v7987_v52  ;;  %v7999_v2 = vpack.c.bf16 %v945_v3, %v942_v41  ;;  %v894_v52 = vld [vmem:[%s11677_s18 + $0x100] sm:$0xff]  ;;  %v8009_v41 = vpack.c.bf16 %v909_v10, %v906_v28  ;;  %v972_v28 = vld [vmem:[%s11677_s18 + $0x370] sm:$0xff] }
 0x2b6   : >> { %v8001_v12 = vpack.c.bf16 %v897_v9, %v894_v52  ;;  %v963_v52 = vld [vmem:[%s11677_s18 + $0x328] sm:$0xff]  ;;  %v1014_v9 = vld [vmem:[%s11677_s18 + $0x4c0] sm:$0xff] }
 0x2b7   : >> { %1238 = vmatmul.mubr.f32.gmra.mrb[2].mxu0 %v11596_v50  ;;  %v1026_v10 = vld [vmem:[%s11677_s18 + $0x520] sm:$0xff] }
 0x2b8   : >> { %1243 = vmatprep.mubr.f32.mxu0 %v13985_v0  ;;  %7990 = vmatpush3.bf16.msra.mxu1 %v7989_v61  ;;  %v948_v61 = vld [vmem:[%s11677_s18 + $0x2b0] sm:$0xff] }
 0x2b9   : >> { %7992 = vmatprep.subr.bf16.mxu1 %v7991_v11  ;;  %v8003_v42 = vpack.c.bf16 %v951_v44, %v948_v61  ;;  %v900_v11 = vld [vmem:[%s11677_s18 + $0x130] sm:$0xff] }
 0x2ba   : >> { %v8005_v38 = vpack.c.bf16 %v903_v51, %v900_v11  ;;  %v969_v11 = vld [vmem:[%s11677_s18 + $0x358] sm:$0xff]  ;;  %v1020_v51 = vld [vmem:[%s11677_s18 + $0x4f0] sm:$0xff] }
 0x2bb   : >> { %1244 = vmatmul.mubr.f32.gmra.mrb[4].mxu0 %v11552_v62 }
 0x2bc   : >> { %1249 = vmatprep.mubr.f32.mxu0 %v11587_v48  ;;  %7994 = vmatpush3.bf16.msra.mxu1 %v7993_v19  ;;  %v954_v19 = vld [vmem:[%s11677_s18 + $0x2e0] sm:$0xff] }
 0x2bd   : >> { %7996 = vmatprep.subr.bf16.mxu1 %v7995_v60  ;;  %v8007_v60 = vpack.c.bf16 %v957_v29, %v954_v19  ;;  %v1023_v19 = vld [vmem:[%s11677_s18 + $0x508] sm:$0xff] }
 0x2be   : >> { %v8019_v29 = vpack.c.bf16 %v1023_v19, %v1020_v51  ;;  %v1041_v51 = vld [vmem:[%s11677_s18 + $0x598] sm:$0xff] }
 0x2bf   : >> { %1250 = vmatmul.mubr.f32.gmra.mrb[6].mxu0 %v11584_v47 }
 0x2c0   : >> { %1255 = vmatprep.mubr.f32.mxu0 %v13979_v17  ;;  %7998 = vmatpush3.bf16.msra.mxu1 %v7997_v32  ;;  %v1011_v32 = vld [vmem:[%s11677_s18 + $0x4a8] sm:$0xff] }
 0x2c1   : >> { %8000 = vmatprep.subr.bf16.mxu1 %v7999_v2  ;;  %v8011_v3 = vpack.c.bf16 %v1011_v32, %v1008_v33  ;;  %v960_v2 = vld [vmem:[%s11677_s18 + $0x310] sm:$0xff]  ;;  %v1029_v33 = vld [vmem:[%s11677_s18 + $0x538] sm:$0xff] }
 0x2c2   : >> { %v8013_v61 = vpack.c.bf16 %v963_v52, %v960_v2  ;;  %v981_v2 = vld [vmem:[%s11677_s18 + $0x3b8] sm:$0xff]  ;;  %v1032_v52 = vld [vmem:[%s11677_s18 + $0x550] sm:$0xff] }
 0x2c3   : >> { %1256 = vmatmul.mubr.f32.gmra.mrb[8].mxu0 %v11628_v54 }
 0x2c4   : >> { %1261 = vmatprep.mubr.f32.mxu0 %v13971_v34  ;;  %8002 = vmatpush3.bf16.msra.mxu1 %v8001_v12  ;;  %v1017_v12 = vld [vmem:[%s11677_s18 + $0x4d8] sm:$0xff] }
 0x2c5   : >> { %8004 = vmatprep.subr.bf16.mxu1 %v8003_v42  ;;  %v8015_v44 = vpack.c.bf16 %v1017_v12, %v1014_v9  ;;  %v966_v42 = vld [vmem:[%s11677_s18 + $0x340] sm:$0xff]  ;;  %v1035_v9 = vld [vmem:[%s11677_s18 + $0x568] sm:$0xff] }
 0x2c7   : >> { %1262 = vmatmul.mubr.f32.gmra.mrb[10].mxu0 %v13984_v1 }
 0x2c8   : >> { %1267 = vmatprep.mubr.f32.mxu0 %v13977_v20  ;;  %8006 = vmatpush3.bf16.msra.mxu1 %v8005_v38  ;;  %v8017_v38 = vpack.c.bf16 %v969_v11, %v966_v42  ;;  %v987_v42 = vld [vmem:[%s11677_s18 + $0x3e8] sm:$0xff]  ;;  %v1038_v11 = vld [vmem:[%s11677_s18 + $0x580] sm:$0xff] }
 0x2c9   : >> { %8008 = vmatprep.subr.bf16.mxu1 %v8007_v60  ;;  %v975_v60 = vld [vmem:[%s11677_s18 + $0x388] sm:$0xff] }
 0x2ca   : >> { %v8021_v32 = vpack.c.bf16 %v975_v60, %v972_v28  ;;  %v993_v28 = vld [vmem:[%s11677_s18 + $0x418] sm:$0xff]  ;;  %v1044_v60 = vld [vmem:[%s11677_s18 + $0x5b0] sm:$0xff] }
 0x2cb   : >> { %1268 = vmatmul.mubr.f32.gmra.mrb[12].mxu0 %v13983_v5 }
 0x2cc   : >> { %1273 = vmatprep.mubr.f32.mxu0 %v13975_v26  ;;  %8010 = vmatpush3.bf16.msra.mxu1 %v8009_v41  ;;  %v8023_v41 = vpack.c.bf16 %v1029_v33, %v1026_v10  ;;  %v1047_v10 = vld [vmem:[%s11677_s18 + $0x5c8] sm:$0xff] }
 0x2cd   : >> { %8012 = vmatprep.subr.bf16.mxu1 %v8011_v3  ;;  %v978_v3 = vld [vmem:[%s11677_s18 + $0x3a0] sm:$0xff] }
 0x2ce   : >> { %v8025_v12 = vpack.c.bf16 %v981_v2, %v978_v3  ;;  %v999_v3 = vld [vmem:[%s11677_s18 + $0x448] sm:$0xff]  ;;  %v1050_v2 = vld [vmem:[%s11677_s18 + $0x5e0] sm:$0xff] }
 0x2cf   : >> { %1274 = vmatmul.mubr.f32.gmra.mrb[14].mxu0 %v13978_v18  ;;  %1345 = vmatmul.mubr.f32.vlgmr.msra.gmra.mrb[0].mxu1 %v13981_v7 }
 0x2d0   : >> { %8014 = vmatpush3.bf16.msra.mxu1 %v8013_v61  ;;  %1349 = vmatprep.mubr.f32.mxu1 %v13969_v43  ;;  %v8027_v61 = vpack.c.bf16 %v1035_v9, %v1032_v52  ;;  %v1053_v52 = vld [vmem:[%s11677_s18 + $0x5f8] sm:$0xff] }
 0x2d1   : >> { %8016 = vmatprep.subr.bf16.mxu1 %v8015_v44  ;;  %v984_v44 = vld [vmem:[%s11677_s18 + $0x3d0] sm:$0xff] }
 0x2d2   : >> { %v8029_v19 = vpack.c.bf16 %v987_v42, %v984_v44  ;;  %v1005_v44 = vld [vmem:[%s11677_s18 + $0x478] sm:$0xff] }
 0x2d3   : >> { %1350 = vmatmul.mubr.f32.gmra.mrb[2].mxu1 %v11590_v49 }
 0x2d4   : >> { %8018 = vmatpush3.bf16.msra.mxu1 %v8017_v38  ;;  %1354 = vmatprep.mubr.f32.mxu1 %v13968_v45  ;;  %v8031_v38 = vpack.c.bf16 %v1041_v51, %v1038_v11 }
 0x2d5   : >> { %8020 = vmatprep.subr.bf16.mxu1 %v8019_v29  ;;  %v990_v29 = vld [vmem:[%s11677_s18 + $0x400] sm:$0xff] }
 0x2d6   : >> { %v8033_v33 = vpack.c.bf16 %v993_v28, %v990_v29 }
 0x2d7   : >> { %1355 = vmatmul.mubr.f32.gmra.mrb[4].mxu1 %v11546_v53 }
 0x2d8   : >> { %8022 = vmatpush3.bf16.msra.mxu1 %v8021_v32  ;;  %1359 = vmatprep.mubr.f32.mxu1 %v13973_v30  ;;  %v8035_v32 = vpack.c.bf16 %v1047_v10, %v1044_v60  ;;  %v13990_v30 = vld [vmem:[#allocation52_spill] sm:$0xff] }
 0x2d9   : >> { %8024 = vmatprep.subr.bf16.mxu1 %v8023_v41  ;;  %v996_v41 = vld [vmem:[%s11677_s18 + $0x430] sm:$0xff] }
 0x2da   : >> { %v8037_v9 = vpack.c.bf16 %v999_v3, %v996_v41 }
 0x2db   : >> { %1360 = vmatmul.mubr.f32.gmra.mrb[6].mxu1 %v13976_v25 }
 0x2dc   : >> { %8026 = vmatpush3.bf16.msra.mxu1 %v8025_v12  ;;  %1364 = vmatprep.mubr.f32.mxu1 %v13970_v35  ;;  %v8039_v12 = vpack.c.bf16 %v1053_v52, %v1050_v2 }
 0x2dd   : >> { %8028 = vmatprep.subr.bf16.mxu1 %v8027_v61  ;;  %v1002_v61 = vld [vmem:[%s11677_s18 + $0x460] sm:$0xff] }
 0x2de   : >> { %v8041_v42 = vpack.c.bf16 %v1005_v44, %v1002_v61 }
 0x2df   : >> { %1365 = vmatmul.mubr.f32.gmra.mrb[8].mxu1 %v13982_v6 }
 0x2e0   : >> { %8030 = vmatpush3.bf16.msra.mxu1 %v8029_v19  ;;  %1369 = vmatprep.mubr.f32.mxu1 %v11613_v56 }
 0x2e1   : >> { %8032 = vmatprep.subr.bf16.mxu1 %v8031_v38 }
 0x2e3   : >> { %1370 = vmatmul.mubr.f32.gmra.mrb[10].mxu1 %v13966_v46 }
 0x2e4   : >> { %8034 = vmatpush3.bf16.msra.mxu1 %v8033_v33  ;;  %1374 = vmatprep.mubr.f32.mxu1 %v11657_v59 }
 0x2e5   : >> { %8036 = vmatprep.subr.bf16.mxu1 %v8035_v32 }
 0x2e7   : >> { %1375 = vmatmul.mubr.f32.gmra.mrb[12].mxu1 %v11654_v63 }
 0x2e8   : >> { %8038 = vmatpush3.bf16.msra.mxu1 %v8037_v9  ;;  %1379 = vmatprep.mubr.f32.mxu1 %v13972_v31 }
 0x2e9   : >> { %8040 = vmatprep.subr.bf16.mxu1 %v8039_v12 }
 0x2eb   : >> { %1380 = vmatmul.mubr.f32.gmra.mrb[14].mxu1 %v11638_v57  ;;  %v14016_v57 = vld [vmem:[#allocation56_spill] sm:$0xff] (%p855_p3) }
 0x2ec   : >> { %8042 = vmatpush3.bf16.msra.mxu1 %v8041_v42  ;;  %1449 = vmatprep.mubr.f32.mxu1 %v13980_v8 }
 0x2ef   : >> { %1450 = vmatmul.mubr.f32.vlgmr.msra.gmra.mrb[16].mxu1 %v13974_v27 }
 0x2f0   : >> { %1454 = vmatprep.mubr.f32.mxu1 %v11599_v58  ;;  %v14014_v58 = vld [vmem:[#allocation55_spill] sm:$0xff] (%p855_p3) }
 0x2f3   : >> { %1455 = vmatmul.mubr.f32.gmra.mrb[18].mxu1 %v11596_v50 }
 0x2f4   : >> { %1459 = vmatprep.mubr.f32.mxu1 %v13985_v0 }
 0x2f7   : >> { %1460 = vmatmul.mubr.f32.gmra.mrb[20].mxu1 %v11552_v62 }
 0x2f8   : >> { %1464 = vmatprep.mubr.f32.mxu1 %v11587_v48  ;;  %v14012_v48 = vld [vmem:[#allocation65_spill] sm:$0xff] (%p855_p3) }
 0x2fb   : >> { %1465 = vmatmul.mubr.f32.gmra.mrb[22].mxu1 %v11584_v47 }
 0x2fc   : >> { %1469 = vmatprep.mubr.f32.mxu1 %v13979_v17 }
 0x2ff   : >> { %1470 = vmatmul.mubr.f32.gmra.mrb[24].mxu1 %v11628_v54 }
 0x300   : >> { %1474 = vmatprep.mubr.f32.mxu1 %v13971_v34 }
 0x303   : >> { %1475 = vmatmul.mubr.f32.gmra.mrb[26].mxu1 %v13984_v1 }
 0x304   : >> { %1479 = vmatprep.mubr.f32.mxu1 %v13977_v20 }
 0x307   : >> { %1480 = vmatmul.mubr.f32.gmra.mrb[28].mxu1 %v13983_v5 }
 0x308   : >> { %1484 = vmatprep.mubr.f32.mxu1 %v13975_v26 }
 0x30b   : >> { %1485 = vmatmul.mubr.f32.gmra.mrb[30].mxu1 %v13978_v18 }
 0x386   : >> { %v11933_v11 = vpop.f32.mrb[0].mxu0 }
 0x387   : >> { %v1235_v51 = vpop.f32.mrb[1].mxu0 }
 0x388   : >> { %1514 = vrot.lane.b32.xlu0 %v1235_v51, %s10801_s21  ;;  %v1570_v5 = vmul.f32 %v1235_v51, %v13967_v13 }
 0x38a   : >> { %v11935_v19 = vpop.f32.mrb[2].mxu0 }
 0x38b   : >> { %v1241_v38 = vpop.f32.mrb[3].mxu0 }
 0x38c   : >> { %1516 = vrot.lane.b32.xlu0 %v1241_v38, %s10801_s21  ;;  %v1571_v6 = vmul.f32 %v1241_v38, %v11310_v14 }
 0x38e   : >> { %v11937_v29 = vpop.f32.mrb[4].mxu0 }
 0x38f   : >> { %v1247_v28 = vpop.f32.mrb[5].mxu0 }
 0x390   : >> { %1518 = vrot.lane.b32.xlu1 %v1247_v28, %s10801_s21 }
 0x392   : >> { %v11939_v60 = vpop.f32.mrb[6].mxu0 }
 0x393   : >> { %v1253_v10 = vpop.f32.mrb[7].mxu0 }
 0x394   : >> { %1520 = vrot.lane.b32.xlu1 %v1253_v10, %s10801_s21  ;;  %v1573_v51 = vmul.f32 %v1253_v10, %v11316_v16 }
 0x396   : >> { %v11941_v33 = vpop.f32.mrb[8].mxu0 }
 0x397   : >> { %v1259_v32 = vpop.f32.mrb[9].mxu0 }
 0x398   : >> { %1522 = vrot.lane.b32.xlu0 %v1259_v32, %s10801_s21 }
 0x39a   : >> { %v11943_v41 = vpop.f32.mrb[10].mxu0 }
 0x39b   : >> { %v1265_v3 = vpop.f32.mrb[11].mxu0 }
 0x39c   : >> { %1524 = vrot.lane.b32.xlu1 %v1265_v3, %s10801_s21 }
 0x39e   : >> { %v11945_v2 = vpop.f32.mrb[12].mxu0 }
 0x39f   : >> { %v11947_v52 = vpop.f32.mrb[13].mxu0 }
 0x3a0   : >> { %1526 = vrot.lane.b32.xlu0 %v11947_v52, %s10801_s21 }
 0x3a2   : >> { %v11950_v9 = vpop.f32.mrb[14].mxu0 }
 0x3a3   : >> { %v11952_v12 = vpop.f32.mrb[15].mxu0 }
 0x3a4   : >> { %1490 = vrot.lane.b32.xlu0 %v11933_v11, %s10801_s21  ;;  %1528 = vrot.lane.b32.xlu1 %v11952_v12, %s10801_s21 }
 0x3a8   : >> { %1494 = vrot.lane.b32.xlu0 %v11937_v29, %s10801_s21  ;;  %1492 = vrot.lane.b32.xlu1 %v11935_v19, %s10801_s21 }
 0x3ac   : >> { %1498 = vrot.lane.b32.xlu0 %v11941_v33, %s10801_s21  ;;  %1496 = vrot.lane.b32.xlu1 %v11939_v60, %s10801_s21 }
 0x3b0   : >> { %1502 = vrot.lane.b32.xlu0 %v11945_v2, %s10801_s21  ;;  %1500 = vrot.lane.b32.xlu1 %v11943_v41, %s10801_s21 }
 0x3b4   : >> { %1504 = vrot.lane.b32.xlu1 %v11950_v9, %s10801_s21 }
 0x3fa   : >> { %v1515_v61 = vpop.permute.xlu0 %1514 }
 0x3fb   : >> { %v1530_v44 = vmul.f32 %v1515_v61, %v11280_v4 }
 0x3fd   : >> { %v1578_v0 = vmul.f32 %v1530_v44, %v13965_v21  ;;  %v1572_v44 = vmul.f32 %v1247_v28, %v11313_v15  ;;  %v13989_v28 = vld [vmem:[#allocation47_spill] sm:$0xff] }
 0x3fe   : >> { %v1517_v42 = vpop.permute.xlu0 %1516  ;;  %v1575_v10 = vmul.f32 %v1265_v3, %v13989_v28 }
 0x3ff   : >> { %v1531_v1 = vmul.f32 %v1517_v42, %v11280_v4  ;;  %v1586_v17 = vadd.f32 %v1578_v0, %v1570_v5 }
 0x401   : >> { %v1579_v7 = vmul.f32 %v1531_v1, %v11334_v22 }
 0x402   : >> { %v1519_v8 = vpop.permute.xlu1 %1518 }
 0x403   : >> { %v1587_v18 = vadd.f32 %v1579_v7, %v1571_v6  ;;  %v1532_v20 = vmul.f32 %v1519_v8, %v11280_v4 }
 0x405   : >> { %v8043_v25 = vpack.c.bf16 %v1587_v18, %v1586_v17  ;;  %v1580_v61 = vmul.f32 %v1532_v20, %v11337_v23  ;;  %v13987_v17 = vld [vmem:[#allocation51_spill] sm:$0xff] }
 0x406   : >> { %v1521_v26 = vpop.permute.xlu1 %1520 }
 0x407   : >> { %v1533_v27 = vmul.f32 %v1521_v26, %v11280_v4  ;;  %8044 = vmatprep.subr.bf16.mxu1 %v8043_v25  ;;  %v1588_v42 = vadd.f32 %v1580_v61, %v1572_v44  ;;  %v13988_v26 = vld [vmem:[#allocation46_spill] sm:$0xff] }
 0x408   : >> { %8046 = vmatpush3.bf16.xpose.msra.mxu1 %v8043_v25  ;;  %v7683_v25 = vpop.f32.mrb[0].mxu1  ;;  %v1574_v20 = vmul.f32 %v1259_v32, %v13988_v26 }
 0x409   : >> { %v1581_v38 = vmul.f32 %v1533_v27, %v11340_v24  ;;  %v7684_v31 = vpop.f32.mrb[1].mxu1 }
 0x40a   : >> { %v1523_v1 = vpop.permute.xlu0 %1522  ;;  %v11981_v44 = vadd.f32 %v7684_v31, %v7683_v25  ;;  %v13992_v31 = vld [vmem:[#allocation48_spill] sm:$0xff] }
 0x40b   : >> { %v1589_v0 = vadd.f32 %v1581_v38, %v1573_v51  ;;  %v1534_v7 = vmul.f32 %v1523_v1, %v11280_v4 }
 0x40d   : >> { %v8047_v8 = vpack.c.bf16 %v1589_v0, %v1588_v42  ;;  %v1582_v18 = vmul.f32 %v1534_v7, %v13987_v17  ;;  %v7686_v42 = vpop.f32.mrb[2].mxu1 }
 0x40e   : >> { %v1525_v6 = vpop.permute.xlu1 %1524  ;;  %v7687_v7 = vpop.f32.mrb[3].mxu1 }
 0x40f   : >> { %v1535_v5 = vmul.f32 %v1525_v6, %v11280_v4  ;;  %8048 = vmatprep.subr.bf16.mxu1 %v8047_v8  ;;  %v1590_v51 = vadd.f32 %v1582_v18, %v1574_v20  ;;  %v13991_v6 = vld [vmem:[#allocation53_spill] sm:$0xff]  ;;  %v11985_v32 = vadd.f32 %v7687_v7, %v7686_v42  ;;  %v1576_v18 = vmul.f32 %v11947_v52, %v13992_v31  ;;  %v7689_v25 = vpop.f32.mrb[4].mxu1 }
 0x410   : >> { %8050 = vmatpush3.bf16.xpose.msra.mxu1 %v8047_v8  ;;  %v1538_v20 = vmul.f32 %v11933_v11, %v13967_v13 }
 0x411   : >> { %v1583_v27 = vmul.f32 %v1535_v5, %v13990_v30 }
 0x412   : >> { %v1527_v61 = vpop.permute.xlu0 %1526 }
 0x413   : >> { %v1591_v38 = vadd.f32 %v1583_v27, %v1575_v10  ;;  %v1536_v1 = vmul.f32 %v1527_v61, %v11280_v4  ;;  %v13993_v10 = vld [vmem:[#allocation49_spill] sm:$0xff] }
 0x414   : >> { %v1577_v27 = vmul.f32 %v11952_v12, %v13993_v10 }
 0x415   : >> { %v8051_v0 = vpack.c.bf16 %v1591_v38, %v1590_v51  ;;  %v1584_v8 = vmul.f32 %v1536_v1, %v13991_v6  ;;  %v13994_v51 = vld [vmem:[#allocation54_spill] sm:$0xff]  ;;  %v7690_v1 = vpop.f32.mrb[5].mxu1 }
 0x416   : >> { %v1491_v34 = vpop.permute.xlu0 %1490  ;;  %v1529_v35 = vpop.permute.xlu1 %1528  ;;  %v11997_v7 = vadd.f32 %v7690_v1, %v7689_v25  ;;  %v1539_v25 = vmul.f32 %v11935_v19, %v11310_v14  ;;  %v14008_v14 = vld [vmem:[#allocation63_spill] sm:$0xff] (%p855_p3) }
 0x417   : >> { %v1506_v3 = vmul.f32 %v1491_v34, %v11280_v4  ;;  %v1537_v5 = vmul.f32 %v1529_v35, %v11280_v4  ;;  %8052 = vmatprep.subr.bf16.mxu1 %v8051_v0  ;;  %v1592_v34 = vadd.f32 %v1584_v8, %v1576_v18  ;;  %v7692_v11 = vpop.f32.mrb[6].mxu1 }
 0x418   : >> { %8054 = vmatpush3.bf16.xpose.msra.mxu1 %v8051_v0 }
 0x419   : >> { %v1546_v61 = vmul.f32 %v1506_v3, %v13965_v21  ;;  %v1585_v38 = vmul.f32 %v1537_v5, %v13994_v51  ;;  %v7693_v3 = vpop.f32.mrb[7].mxu1 }
 0x41a   : >> { %v1495_v42 = vpop.permute.xlu0 %1494  ;;  %v1493_v35 = vpop.permute.xlu1 %1492  ;;  %v12003_v18 = vadd.f32 %v7693_v3, %v7692_v11 }
 0x41b   : >> { %v1554_v43 = vadd.f32 %v1546_v61, %v1538_v20  ;;  %v1593_v52 = vadd.f32 %v1585_v38, %v1577_v27  ;;  %v1508_v0 = vmul.f32 %v1495_v42, %v11280_v4  ;;  %v1507_v45 = vmul.f32 %v1493_v35, %v11280_v4 }
 0x41d   : >> { %v1562_v13 = vmul.f32 0.088388346, %v1554_v43  ;;  %v1547_v12 = vmul.f32 %v1507_v45, %v11334_v22  ;;  %v8055_v46 = vpack.c.bf16 %v1593_v52, %v1592_v34  ;;  %v1548_v5 = vmul.f32 %v1508_v0, %v11337_v23  ;;  %v7695_v45 = vpop.f32.mrb[8].mxu1 }
 0x41e   : >> { %v1499_v21 = vpop.permute.xlu0 %1498  ;;  %v1497_v8 = vpop.permute.xlu1 %1496  ;;  %v1540_v43 = vmul.f32 %v11937_v29, %v11313_v15 }
 0x41f   : >> { %v1510_v20 = vmul.f32 %v1499_v21, %v11280_v4  ;;  %v1509_v27 = vmul.f32 %v1497_v8, %v11280_v4  ;;  %8056 = vmatprep.subr.bf16.mxu1 %v8055_v46  ;;  %7811 = vmatprep.mubr.f32.mxu1 %v1562_v13  ;;  %v1555_v61 = vadd.f32 %v1547_v12, %v1539_v25  ;;  %v7696_v1 = vpop.f32.mrb[9].mxu1 }
 0x420   : >> { %8058 = vmatpush3.bf16.xpose.msra.mxu1 %v8055_v46  ;;  %v1556_v34 = vadd.f32 %v1548_v5, %v1540_v43  ;;  %v12013_v52 = vadd.f32 %v7696_v1, %v7695_v45  ;;  %v1541_v21 = vmul.f32 %v11939_v60, %v11316_v16  ;;  %v1542_v46 = vmul.f32 %v11941_v33, %v13988_v26  ;;  %v7698_v29 = vpop.f32.mrb[10].mxu1 }
 0x421   : >> { %v1549_v38 = vmul.f32 %v1509_v27, %v11340_v24  ;;  %v1550_v42 = vmul.f32 %v1510_v20, %v13987_v17  ;;  %v1563_v11 = vmul.f32 0.088388346, %v1555_v61  ;;  %v7699_v5 = vpop.f32.mrb[11].mxu1  ;;  %v1543_v60 = vmul.f32 %v11943_v41, %v13989_v28  ;;  %v14018_v28 = vld [vmem:[#allocation57_spill] sm:$0xff] (%p855_p3) }
 0x422   : >> { %v1503_v35 = vpop.permute.xlu0 %1502  ;;  %v1501_v19 = vpop.permute.xlu1 %1500  ;;  %v1564_v8 = vmul.f32 0.088388346, %v1556_v34  ;;  %v7700_v43 = vadd.f32 %v7699_v5, %v7698_v29  ;;  %v1544_v33 = vmul.f32 %v11945_v2, %v13992_v31  ;;  %v14020_v31 = vld [vmem:[#allocation58_spill] sm:$0xff] (%p855_p3) }
 0x423   : >> { %v1512_v0 = vmul.f32 %v1503_v35, %v11280_v4  ;;  %v1511_v13 = vmul.f32 %v1501_v19, %v11280_v4  ;;  %v1557_v12 = vadd.f32 %v1549_v38, %v1541_v21  ;;  %v1558_v25 = vadd.f32 %v1550_v42, %v1542_v46  ;;  %v7701_v61 = vpop.f32.mrb[12].mxu1 }
 0x424   : >> { %v7702_v42 = vpop.f32.mrb[13].mxu1 }
 0x425   : >> { %v1551_v3 = vmul.f32 %v1511_v13, %v13990_v30  ;;  %v1552_v20 = vmul.f32 %v1512_v0, %v13991_v6  ;;  %v1565_v38 = vmul.f32 0.088388346, %v1557_v12  ;;  %v1566_v35 = vmul.f32 0.088388346, %v1558_v25  ;;  %v7704_v41 = vpop.f32.mrb[14].mxu1  ;;  %v14010_v30 = vld [vmem:[#allocation64_spill] sm:$0xff] (%p855_p3) }
 0x426   : >> { %v1505_v27 = vpop.permute.xlu1 %1504  ;;  %v7703_v21 = vadd.f32 %v7702_v42, %v7701_v61  ;;  %v1545_v0 = vmul.f32 %v11950_v9, %v13993_v10  ;;  %v7705_v29 = vpop.f32.mrb[15].mxu1 }
 0x427   : >> { %v1513_v45 = vmul.f32 %v1505_v27, %v11280_v4  ;;  %7812 = vmatmul.mubr.f32.vlgmr.msra.gmra.mrb[32].mxu1 %v1563_v11  ;;  %v1559_v1 = vadd.f32 %v1551_v3, %v1543_v60  ;;  %v1560_v19 = vadd.f32 %v1552_v20, %v1544_v33  ;;  %v7706_v11 = vadd.f32 %v7705_v29, %v7704_v41  ;;  %v7739_v12 = vpop.f32.mrb[16].mxu1 }
 0x428   : >> { %7814 = vmatprep.mubr.f32.mxu1 %v1564_v8  ;;  %v7740_v5 = vpop.f32.mrb[17].mxu1 }
 0x429   : >> { %v1553_v34 = vmul.f32 %v1513_v45, %v13994_v51  ;;  %v1567_v13 = vmul.f32 0.088388346, %v1559_v1  ;;  %v1568_v2 = vmul.f32 0.088388346, %v1560_v19  ;;  %v7741_v8 = vadd.f32 %v7740_v5, %v7739_v12  ;;  %v7742_v20 = vpop.f32.mrb[18].mxu1 }
 0x42a   : >> { %v7743_v27 = vpop.f32.mrb[19].mxu1 }
 0x42b   : >> { %7815 = vmatmul.mubr.f32.gmra.mrb[34].mxu1 %v1565_v38  ;;  %v1561_v46 = vadd.f32 %v1553_v34, %v1545_v0  ;;  %v1452_v25 = vadd.f32 %v7741_v8, %v11981_v44  ;;  %v7744_v9 = vadd.f32 %v7743_v27, %v7742_v20  ;;  %v7745_v45 = vpop.f32.mrb[20].mxu1 }
 0x42c   : >> { %7817 = vmatprep.mubr.f32.mxu1 %v1566_v35  ;;  %v7746_v33 = vpop.f32.mrb[21].mxu1 }
 0x42d   : >> { %v1569_v3 = vmul.f32 0.088388346, %v1561_v46  ;;  %v1457_v60 = vadd.f32 %v7744_v9, %v11985_v32  ;;  %v7747_v38 = vadd.f32 %v7746_v33, %v7745_v45  ;;  %v7748_v34 = vpop.f32.mrb[22].mxu1  ;;  %v13995_v45 = vld [vmem:[#allocation38_spill] sm:$0xff] }
 0x42e   : >> { %v7749_v42 = vpop.f32.mrb[23].mxu1 }
 0x42f   : >> { %7818 = vmatmul.mubr.f32.gmra.mrb[36].mxu1 %v1567_v13  ;;  %v8059_v61 = vpack.c.bf16 %v1457_v60, %v1452_v25  ;;  %v1462_v1 = vadd.f32 %v7747_v38, %v11997_v7  ;;  %v7750_v35 = vadd.f32 %v7749_v42, %v7748_v34  ;;  %v7751_v0 = vpop.f32.mrb[24].mxu1 }
 0x430   : >> { %7820 = vmatprep.mubr.f32.mxu1 %v1568_v2  ;;  %v7752_v44 = vpop.f32.mrb[25].mxu1 }
 0x431   : >> { %8060 = vmatprep.subr.bf16.mxu1 %v8059_v61  ;;  %v1467_v19 = vadd.f32 %v7750_v35, %v12003_v18  ;;  %v7753_v41 = vadd.f32 %v7752_v44, %v7751_v0  ;;  %v7754_v32 = vpop.f32.mrb[26].mxu1  ;;  %v13997_v35 = vld [vmem:[#allocation39_spill] sm:$0xff] }
 0x432   : >> { %8062 = vmatpush3.bf16.msra.mxu1 %v8059_v61  ;;  %v7755_v29 = vpop.f32.mrb[27].mxu1 }
 0x433   : >> { %7821 = vmatmul.mubr.f32.gmra.mrb[38].mxu1 %v1569_v3  ;;  %v8063_v13 = vpack.c.bf16 %v1467_v19, %v1462_v1  ;;  %v1472_v46 = vadd.f32 %v7753_v41, %v12013_v52  ;;  %v7756_v2 = vadd.f32 %v7755_v29, %v7754_v32  ;;  %v7757_v3 = vpop.f32.mrb[28].mxu1  ;;  %v13998_v19 = vld [vmem:[#allocation40_spill] sm:$0xff]  ;;  %v14000_v29 = vld [vmem:[#allocation42_spill] sm:$0xff] }
 0x434   : >> { %v7758_v7 = vpop.f32.mrb[29].mxu1 }
 0x435   : >> { %8064 = vmatprep.subr.bf16.mxu1 %v8063_v13  ;;  %v1477_v12 = vadd.f32 %v7756_v2, %v7700_v43  ;;  %v7759_v5 = vadd.f32 %v7758_v7, %v7757_v3  ;;  %v7760_v20 = vpop.f32.mrb[30].mxu1  ;;  %v13996_v43 = vld [vmem:[#allocation37_spill] sm:$0xff] }
 0x436   : >> { %8066 = vmatpush3.bf16.msra.mxu1 %v8063_v13  ;;  %v7761_v18 = vpop.f32.mrb[31].mxu1 }
 0x437   : >> { %v8067_v8 = vpack.c.bf16 %v1477_v12, %v1472_v46  ;;  %v1482_v25 = vadd.f32 %v7759_v5, %v7703_v21  ;;  %v7762_v27 = vadd.f32 %v7761_v18, %v7760_v20  ;;  %v13999_v46 = vld [vmem:[#allocation41_spill] sm:$0xff]  ;;  %v14002_v20 = vld [vmem:[#allocation44_spill] sm:$0xff] }
 0x439   : >> { %8068 = vmatprep.subr.bf16.mxu1 %v8067_v8  ;;  %v1487_v9 = vadd.f32 %v7762_v27, %v7706_v11 }
 0x43a   : >> { %8070 = vmatpush3.bf16.msra.mxu1 %v8067_v8  ;;  %v14001_v8 = vld [vmem:[#allocation43_spill] sm:$0xff] }
 0x43b   : >> { %v8071_v60 = vpack.c.bf16 %v1487_v9, %v1482_v25 }
 0x43d   : >> { %8072 = vmatprep.subr.bf16.mxu1 %v8071_v60 }
 0x43e   : >> { %8074 = vmatpush3.bf16.msra.mxu1 %v8071_v60 }
 0x4fa   : >> { %v7813_v52 = vpop.f32.mrb[32].mxu1 }
 0x4fb   : >> { %v1666_v33 = vadd.f32 %v7813_v52, %v13995_v45  ;;  %v1660_v61 = vpop.f32.mrb[33].mxu1 }
 0x4fc   : >> { %v1661_v38 = vadd.f32 %v1660_v61, %v13996_v43 }
 0x4fd   : >> { %v1703_v1 = vsel %vm1699_vm1, %v1666_v33, -inf }
 0x4fe   : >> { %1704 = vmax.xlane.f32.xlu1 %v1703_v1  ;;  %v7816_v21 = vpop.f32.mrb[34].mxu1  ;;  %v1700_v34 = vsel %vm1699_vm1, %v1661_v38, -inf }
 0x4ff   : >> { %v1670_v42 = vpop.f32.mrb[35].mxu1  ;;  %1701 = vmax.xlane.f32.xlu0 %v1700_v34  ;;  %v1676_v0 = vadd.f32 %v7816_v21, %v13998_v19 }
 0x500   : >> { %v1671_v11 = vadd.f32 %v1670_v42, %v13997_v35 }
 0x501   : >> { %v1709_v7 = vsel %vm1699_vm1, %v1676_v0, -inf }
 0x502   : >> { %v7819_v44 = vpop.f32.mrb[36].mxu1  ;;  %v1706_v41 = vsel %vm1699_vm1, %v1671_v11, -inf }
 0x503   : >> { %v1680_v13 = vpop.f32.mrb[37].mxu1  ;;  %1707 = vmax.xlane.f32.xlu0 %v1706_v41  ;;  %v1686_v2 = vadd.f32 %v7819_v44, %v14000_v29 }
 0x504   : >> { %v1681_v32 = vadd.f32 %v1680_v13, %v13999_v46 }
 0x505   : >> { %v1715_v9 = vsel %vm1699_vm1, %v1686_v2, -inf }
 0x506   : >> { %v7822_v12 = vpop.f32.mrb[38].mxu1  ;;  %v1712_v3 = vsel %vm1699_vm1, %v1681_v32, -inf }
 0x507   : >> { %v1690_v5 = vpop.f32.mrb[39].mxu1  ;;  %1713 = vmax.xlane.f32.xlu1 %v1712_v3  ;;  %1710 = vmax.xlane.f32.xlu0 %v1709_v7  ;;  %v1696_v18 = vadd.f32 %v7822_v12, %v14002_v20 }
 0x508   : >> { %v1691_v25 = vadd.f32 %v1690_v5, %v14001_v8 }
 0x509   : >> { %v1721_v60 = vsel %vm1699_vm1, %v1696_v18, -inf }
 0x50a   : >> { %v1718_v27 = vsel %vm1699_vm1, %v1691_v25, -inf }
 0x50b   : >> { %1719 = vmax.xlane.f32.xlu1 %v1718_v27  ;;  %1716 = vmax.xlane.f32.xlu0 %v1715_v9 }
 0x50f   : >> { %1722 = vmax.xlane.f32.xlu0 %v1721_v60 }
 0x58b   : >> { %v1705_v52 = vpop.xlane.xlu1 %1704 }
 0x58c   : >> { %v1725_v45 = vsub.f32 %v1666_v33, %v1705_v52  ;;  %v1702_v61 = vpop.xlane.xlu0 %1701 }
 0x58d   : >> { %v1724_v43 = vsub.f32 %v1661_v38, %v1702_v61 }
 0x58e   : >> { %v1734_v1 = vmul.f32 1.442695, %v1725_v45 }
 0x58f   : >> { %v1732_v21 = vmul.f32 1.442695, %v1724_v43 }
 0x590   : >> { %10090 = vpow2.f32 %v1734_v1  ;;  %v1708_v34 = vpop.xlane.xlu0 %1707 }
 0x591   : >> { %10092 = vpow2.f32 %v1732_v21  ;;  %v1726_v42 = vsub.f32 %v1671_v11, %v1708_v34 }
 0x593   : >> { %v1736_v35 = vmul.f32 1.442695, %v1726_v42 }
 0x594   : >> { %v1714_v19 = vpop.xlane.xlu1 %1713  ;;  %v1711_v44 = vpop.xlane.xlu0 %1710 }
 0x595   : >> { %10094 = vpow2.f32 %v1736_v35  ;;  %v1728_v41 = vsub.f32 %v1681_v32, %v1714_v19  ;;  %v1727_v13 = vsub.f32 %v1676_v0, %v1711_v44  ;;  %v1953_v35 = vld [vmem:[%s12069_s12 + $0x8] sm:$0xff]  ;;  %v1955_v44 = vld [vmem:[%s12069_s12 + $0x18] sm:$0xff] }
 0x596   : >> { %v1957_v19 = vld [vmem:[%s12069_s12 + $0x28] sm:$0xff] }
 0x597   : >> { %v1740_v46 = vmul.f32 1.442695, %v1728_v41  ;;  %v1738_v29 = vmul.f32 1.442695, %v1727_v13  ;;  %v8075_v41 = vpack.c.bf16 %v1957_v19, %v1953_v35  ;;  %v1959_v13 = vld [vmem:[%s12069_s12 + $0x38] sm:$0xff]  ;;  %v1970_v35 = vld [vmem:[%s12069_s12 + $0x90] sm:$0xff] }
 0x598   : >> { %v1720_v12 = vpop.xlane.xlu1 %1719  ;;  %v1717_v3 = vpop.xlane.xlu0 %1716  ;;  %v1974_v19 = vld [vmem:[%s12069_s12 + $0xb0] sm:$0xff] }
 0x599   : >> { %10096 = vpow2.f32 %v1740_v46  ;;  %v1730_v33 = vsub.f32 %v1691_v25, %v1720_v12  ;;  %v1729_v7 = vsub.f32 %v1686_v2, %v1717_v3  ;;  %v1952_v46 = vld [vmem:[%s12069_s12] sm:$0xff]  ;;  %v12077_v12 = vpack.c.bf16 %v1959_v13, %v1955_v44  ;;  %8076 = vmatprep.subr.bf16.mxu1 %v8075_v41  ;;  %v1977_v41 = vld [vmem:[%s12069_s12 + $0xc8] sm:$0xff] }
 0x59a   : >> { %v10091_v38 = vpop.eup %10090  ;;  %10098 = vpow2.f32 %v1738_v29  ;;  %v1956_v29 = vld [vmem:[%s12069_s12 + $0x20] sm:$0xff]  ;;  %v1981_v13 = vld [vmem:[%s12069_s12 + $0xe8] sm:$0xff] }
 0x59b   : >> { %v10093_v5 = vpop.eup %10092  ;;  %v1744_v8 = vmul.f32 1.442695, %v1730_v33  ;;  %v1742_v20 = vmul.f32 1.442695, %v1729_v7  ;;  %v1751_v11 = vsel %vm1699_vm1, %v10091_v38, 0.0  ;;  %v8077_v3 = vpack.c.bf16 %v1956_v29, %v1952_v46  ;;  %v1954_v33 = vld [vmem:[%s12069_s12 + $0x10] sm:$0xff]  ;;  %8108 = vmatprep.subr.bf16.mxu0 %v12077_v12 }
 0x59c   : >> { %1752 = vadd.xlane.f32.xlu0 %v1751_v11  ;;  %7839 = vmatprep.mubr.msk.f32.mxu1 %vm1699_vm1, %v10093_v5  ;;  %v1723_v27 = vpop.xlane.xlu0 %1722  ;;  %v1748_v0 = vsel %vm1699_vm1, %v10093_v5, 0.0  ;;  %v1958_v7 = vld [vmem:[%s12069_s12 + $0x30] sm:$0xff]  ;;  %v1967_v11 = vld [vmem:[%s12069_s12 + $0x78] sm:$0xff]  ;;  %v12112_v29 = vpack.c.bf16 %v1974_v19, %v1970_v35  ;;  %v1997_v35 = vld [vmem:[%s12069_s12 + $0x168] sm:$0xff] }
 0x59d   : >> { %10100 = vpow2.f32 %v1744_v8  ;;  %v1731_v32 = vsub.f32 %v1696_v18, %v1723_v27  ;;  %7840 = vmatmul.mubr.msk.f32.vlgmr.msra.gmra.mrb[40].mxu1 %vm1699_vm1, %v10091_v38  ;;  %1749 = vadd.xlane.f32.xlu1 %v1748_v0  ;;  %v1961_v38 = vld [vmem:[%s12069_s12 + $0x48] sm:$0xff]  ;;  %v12082_v5 = vpack.c.bf16 %v1958_v7, %v1954_v33  ;;  %v1979_v46 = vld [vmem:[%s12069_s12 + $0xd8] sm:$0xff]  ;;  %v1976_v7 = vld [vmem:[%s12069_s12 + $0xc0] sm:$0xff] }
 0x59e   : >> { %10102 = vpow2.f32 %v1742_v20  ;;  %v1965_v8 = vld [vmem:[%s12069_s12 + $0x68] sm:$0xff]  ;;  %v1963_v20 = vld [vmem:[%s12069_s12 + $0x58] sm:$0xff]  ;;  %8078 = vmatpush1.bf16.msra.mxu1 %v8077_v3  ;;  %v8087_v3 = vpack.c.bf16 %v1981_v13, %v1977_v41 }
 0x59f   : >> { %v10095_v2 = vpop.eup %10094  ;;  %v1746_v25 = vmul.f32 1.442695, %v1731_v32  ;;  %v8079_v27 = vpack.c.bf16 %v1965_v8, %v1961_v38  ;;  %v12088_v0 = vpack.c.bf16 %v1967_v11, %v1963_v20  ;;  %v1960_v32 = vld [vmem:[%s12069_s12 + $0x40] sm:$0xff]  ;;  %8110 = vmatpush1.bf16.msra.mxu0 %v12082_v5  ;;  %v1983_v33 = vld [vmem:[%s12069_s12 + $0xf8] sm:$0xff]  ;;  %v1978_v20 = vld [vmem:[%s12069_s12 + $0xd0] sm:$0xff] }
 0x5a0   : >> { %7842 = vmatprep.mubr.msk.f32.mxu1 %vm1699_vm1, %v10095_v2  ;;  %v1754_v9 = vsel %vm1699_vm1, %v10095_v2, 0.0  ;;  %v1964_v2 = vld [vmem:[%s12069_s12 + $0x60] sm:$0xff]  ;;  %v12118_v8 = vpack.c.bf16 %v1983_v33, %v1979_v46  ;;  %v1982_v11 = vld [vmem:[%s12069_s12 + $0xf0] sm:$0xff]  ;;  %v1995_v19 = vld [vmem:[%s12069_s12 + $0x158] sm:$0xff] }
 0x5a1   : >> { %10104 = vpow2.f32 %v1746_v25  ;;  %1755 = vadd.xlane.f32.xlu1 %v1754_v9  ;;  %v1962_v25 = vld [vmem:[%s12069_s12 + $0x50] sm:$0xff]  ;;  %v8081_v9 = vpack.c.bf16 %v1964_v2, %v1960_v32  ;;  %8080 = vmatprep.subr.bf16.mxu1 %v8079_v27  ;;  %v1980_v38 = vld [vmem:[%s12069_s12 + $0xe0] sm:$0xff]  ;;  %v1985_v27 = vld [vmem:[%s12069_s12 + $0x108] sm:$0xff] }
 0x5a2   : >> { %8112 = vmatprep.subr.bf16.mxu0 %v12088_v0  ;;  %v1989_v32 = vld [vmem:[%s12069_s12 + $0x128] sm:$0xff]  ;;  %v1987_v2 = vld [vmem:[%s12069_s12 + $0x118] sm:$0xff]  ;;  %v1996_v33 = vld [vmem:[%s12069_s12 + $0x160] sm:$0xff] }
 0x5a3   : >> { %v10097_v60 = vpop.eup %10096  ;;  %8082 = vmatpush1.bf16.msra.mxu1 %v8081_v9  ;;  %v8089_v9 = vpack.c.bf16 %v1980_v38, %v1976_v7  ;;  %v1994_v7 = vld [vmem:[%s12069_s12 + $0x150] sm:$0xff] }
 0x5a4   : >> { %v10099_v52 = vpop.eup %10098  ;;  %v1760_v45 = vsel %vm1699_vm1, %v10097_v60, 0.0 }
 0x5a5   : >> { %7843 = vmatmul.mubr.msk.f32.gmra.mrb[42].mxu1 %vm1699_vm1, %v10099_v52  ;;  %1761 = vadd.xlane.f32.xlu1 %v1760_v45  ;;  %v1757_v18 = vsel %vm1699_vm1, %v10099_v52, 0.0  ;;  %v1969_v52 = vld [vmem:[%s12069_s12 + $0x88] sm:$0xff] }
 0x5a6   : >> { %7845 = vmatprep.mubr.msk.f32.mxu1 %vm1699_vm1, %v10097_v60  ;;  %1758 = vadd.xlane.f32.xlu0 %v1757_v18  ;;  %v1966_v60 = vld [vmem:[%s12069_s12 + $0x70] sm:$0xff]  ;;  %v1973_v45 = vld [vmem:[%s12069_s12 + $0xa8] sm:$0xff] }
 0x5a7   : >> { %v10101_v61 = vpop.eup %10100  ;;  %v12098_v18 = vpack.c.bf16 %v1966_v60, %v1962_v25  ;;  %v1991_v25 = vld [vmem:[%s12069_s12 + $0x138] sm:$0xff]  ;;  %v12127_v60 = vpack.c.bf16 %v1982_v11, %v1978_v20  ;;  %v1998_v20 = vld [vmem:[%s12069_s12 + $0x170] sm:$0xff]  ;;  %v2001_v11 = vld [vmem:[%s12069_s12 + $0x188] sm:$0xff] }
 0x5a8   : >> { %v10103_v43 = vpop.eup %10102  ;;  %v1766_v1 = vsel %vm1699_vm1, %v10101_v61, 0.0 }
 0x5a9   : >> { %7846 = vmatmul.mubr.msk.f32.gmra.mrb[44].mxu1 %vm1699_vm1, %v10103_v43  ;;  %1767 = vadd.xlane.f32.xlu1 %v1766_v1  ;;  %v1763_v21 = vsel %vm1699_vm1, %v10103_v43, 0.0  ;;  %v1971_v43 = vld [vmem:[%s12069_s12 + $0x98] sm:$0xff] }
 0x5aa   : >> { %7848 = vmatprep.mubr.msk.f32.mxu1 %vm1699_vm1, %v10101_v61  ;;  %1764 = vadd.xlane.f32.xlu0 %v1763_v21  ;;  %v8083_v61 = vpack.c.bf16 %v1973_v45, %v1969_v52  ;;  %v1975_v1 = vld [vmem:[%s12069_s12 + $0xb8] sm:$0xff]  ;;  %v1968_v21 = vld [vmem:[%s12069_s12 + $0x80] sm:$0xff]  ;;  %v8091_v52 = vpack.c.bf16 %v1989_v32, %v1985_v27  ;;  %v2005_v27 = vld [vmem:[%s12069_s12 + $0x1a8] sm:$0xff] }
 0x5ab   : >> { %v10105_v34 = vpop.eup %10104  ;;  %8114 = vmatpush1.bf16.msra.mxu0 %v12098_v18  ;;  %v1984_v45 = vld [vmem:[%s12069_s12 + $0x100] sm:$0xff]  ;;  %v2003_v32 = vld [vmem:[%s12069_s12 + $0x198] sm:$0xff] }
 0x5ac   : >> { %v1769_v42 = vsel %vm1699_vm1, %v10105_v34, 0.0  ;;  %8084 = vmatprep.subr.bf16.mxu1 %v8083_v61  ;;  %v1988_v61 = vld [vmem:[%s12069_s12 + $0x120] sm:$0xff] }
 0x5ad   : >> { %7849 = vmatmul.mubr.msk.f32.gmra.mrb[46].mxu1 %vm1699_vm1, %v10105_v34  ;;  %v12103_v34 = vpack.c.bf16 %v1975_v1, %v1971_v43  ;;  %v1986_v43 = vld [vmem:[%s12069_s12 + $0x110] sm:$0xff]  ;;  %v12133_v1 = vpack.c.bf16 %v1991_v25, %v1987_v2  ;;  %v8093_v41 = vpack.c.bf16 %v1988_v61, %v1984_v45  ;;  %v2007_v2 = vld [vmem:[%s12069_s12 + $0x1b8] sm:$0xff]  ;;  %v2000_v45 = vld [vmem:[%s12069_s12 + $0x180] sm:$0xff] }
 0x5ae   : >> { %1770 = vadd.xlane.f32.xlu0 %v1769_v42  ;;  %v1972_v42 = vld [vmem:[%s12069_s12 + $0xa0] sm:$0xff] }
 0x5af   : >> { %v8085_v44 = vpack.c.bf16 %v1972_v42, %v1968_v21  ;;  %8116 = vmatprep.subr.bf16.mxu0 %v12103_v34  ;;  %v1990_v21 = vld [vmem:[%s12069_s12 + $0x130] sm:$0xff]  ;;  %v1993_v42 = vld [vmem:[%s12069_s12 + $0x148] sm:$0xff]  ;;  %v2004_v61 = vld [vmem:[%s12069_s12 + $0x1a0] sm:$0xff] }
 0x5b0   : >> { %8118 = vmatpush1.bf16.msra.mxu0 %v12112_v29  ;;  %v12141_v13 = vpack.c.bf16 %v1990_v21, %v1986_v43  ;;  %v8095_v46 = vpack.c.bf16 %v1997_v35, %v1993_v42  ;;  %v12160_v43 = vpack.c.bf16 %v2007_v2, %v2003_v32  ;;  %v2002_v21 = vld [vmem:[%s12069_s12 + $0x190] sm:$0xff]  ;;  %v8101_v35 = vpack.c.bf16 %v2004_v61, %v2000_v45 }
 0x5b1   : >> { %8086 = vmatpush1.bf16.msra.mxu1 %v8085_v44  ;;  %8120 = vmatprep.subr.bf16.mxu0 %v12118_v8  ;;  %v1999_v44 = vld [vmem:[%s12069_s12 + $0x178] sm:$0xff]  ;;  %v2006_v42 = vld [vmem:[%s12069_s12 + $0x1b0] sm:$0xff] }
 0x5b2   : >> { %8088 = vmatprep.subr.bf16.mxu1 %v8087_v3  ;;  %v1992_v3 = vld [vmem:[%s12069_s12 + $0x140] sm:$0xff]  ;;  %v12147_v38 = vpack.c.bf16 %v1999_v44, %v1995_v19  ;;  %v12165_v19 = vpack.c.bf16 %v2006_v42, %v2002_v21  ;;  %v2009_v44 = vld [vmem:[%s12069_s12 + $0x1c8] sm:$0xff]  ;;  %v2010_v32 = vld [vmem:[%s12069_s12 + $0x1d0] sm:$0xff] }
 0x5b3   : >> { %v8097_v25 = vpack.c.bf16 %v1996_v33, %v1992_v3  ;;  %v2015_v33 = vld [vmem:[%s12069_s12 + $0x1f8] sm:$0xff]  ;;  %v2014_v2 = vld [vmem:[%s12069_s12 + $0x1f0] sm:$0xff] }
 0x5b4   : >> { %8122 = vmatpush1.bf16.msra.mxu0 %v12127_v60 }
 0x5b5   : >> { %8090 = vmatpush1.bf16.msra.mxu1 %v8089_v9  ;;  %8124 = vmatprep.subr.bf16.mxu0 %v12133_v1  ;;  %v12155_v9 = vpack.c.bf16 %v1998_v20, %v1994_v7  ;;  %v2008_v7 = vld [vmem:[%s12069_s12 + $0x1c0] sm:$0xff] }
 0x5b6   : >> { %8092 = vmatprep.subr.bf16.mxu1 %v8091_v52  ;;  %v8099_v52 = vpack.c.bf16 %v2005_v27, %v2001_v11  ;;  %v2012_v20 = vld [vmem:[%s12069_s12 + $0x1e0] sm:$0xff] }
 0x5b7   : >> { %v8105_v27 = vpack.c.bf16 %v2012_v20, %v2008_v7 }
 0x5b8   : >> { %8126 = vmatpush1.bf16.msra.mxu0 %v12141_v13 }
 0x5b9   : >> { %8094 = vmatpush1.bf16.msra.mxu1 %v8093_v41  ;;  %8128 = vmatprep.subr.bf16.mxu0 %v12147_v38  ;;  %v2013_v41 = vld [vmem:[%s12069_s12 + $0x1e8] sm:$0xff] }
 0x5ba   : >> { %8096 = vmatprep.subr.bf16.mxu1 %v8095_v46  ;;  %v2011_v46 = vld [vmem:[%s12069_s12 + $0x1d8] sm:$0xff]  ;;  %v8103_v3 = vpack.c.bf16 %v2013_v41, %v2009_v44 }
 0x5bb   : >> { %v12175_v11 = vpack.c.bf16 %v2015_v33, %v2011_v46 }
 0x5bc   : >> { %8130 = vmatpush1.bf16.msra.mxu0 %v12155_v9 }
 0x5bd   : >> { %8098 = vmatpush1.bf16.msra.mxu1 %v8097_v25  ;;  %8132 = vmatprep.subr.bf16.mxu0 %v12160_v43  ;;  %v12179_v25 = vpack.c.bf16 %v2014_v2, %v2010_v32 }
 0x5be   : >> { %8100 = vmatprep.subr.bf16.mxu1 %v8099_v52  ;;  %v10802_v52 = vmov 0.0  }
 0x5bf   : >> { %2080 = vmatprep.mubr.f32.mxu1 %v10802_v52  ;;  %2193 = vmatprep.mubr.f32.mxu0 %v10802_v52 }
 0x5c0   : >> { %8134 = vmatpush1.bf16.msra.mxu0 %v12165_v19 }
 0x5c1   : >> { %8102 = vmatpush1.bf16.msra.mxu1 %v8101_v35  ;;  %8136 = vmatprep.subr.bf16.mxu0 %v12175_v11 }
 0x5c2   : >> { %8104 = vmatprep.subr.bf16.mxu1 %v8103_v3 }
 0x5c4   : >> { %8138 = vmatpush1.bf16.msra.mxu0 %v12179_v25 }
 0x5c5   : >> { %8106 = vmatpush1.bf16.msra.mxu1 %v8105_v27 }
 0x5c6   : >> { %9675 = vmatprep.subr.bf16.mxu1 %v12077_v12 }
 0x629   : >> { %v1753_v61 = vpop.xlane.xlu0 %1752 }
 0x62a   : >> { %v1750_v45 = vpop.xlane.xlu1 %1749 }
 0x62b   : >> { %10106 = vrcp.f32 %v1750_v45 }
 0x62c   : >> { %10108 = vrcp.f32 %v1753_v61 }
 0x62e   : >> { %v1756_v21 = vpop.xlane.xlu1 %1755 }
 0x62f   : >> { %10110 = vrcp.f32 %v1756_v21 }
 0x632   : >> { %v1762_v3 = vpop.xlane.xlu1 %1761 }
 0x633   : >> { %v1759_v42 = vpop.xlane.xlu0 %1758 }
 0x634   : >> { %10112 = vrcp.f32 %v1759_v42 }
 0x635   : >> { %v10107_v44 = vpop.eup %10106  ;;  %10114 = vrcp.f32 %v1762_v3 }
 0x636   : >> { %v10109_v33 = vpop.eup %10108 }
 0x637   : >> { %v1765_v7 = vpop.xlane.xlu0 %1764 }
 0x638   : >> { %10116 = vrcp.f32 %v1765_v7 }
 0x639   : >> { %v10111_v27 = vpop.eup %10110 }
 0x670   : >> { %v7841_v35 = vpop.f32.mrb[40].mxu1 }
 0x671   : >> { %v1862_v41 = vpop.f32.mrb[41].mxu1  ;;  %v1910_v12 = vmul.f32 %v10109_v33, %v7841_v35 }
 0x672   : >> { %v1909_v46 = vmul.f32 %v10107_v44, %v1862_v41 }
 0x674   : >> { %2081 = vmatmul.mubr.f32.vlgmr.msra.gmra.mrb[48].mxu1 %v1909_v46  ;;  %2194 = vmatmul.mubr.f32.vlgmr.msra.gmra.mrb[16].mxu0 %v1909_v46  ;;  %v1920_v46 = vld [vmem:[#allocation2 + $0x18] sm:$0xff] }
 0x675   : >> { %9683 = vmatpush1.bf16.msra.mxu1 %v12082_v5  ;;  %2086 = vmatprep.mubr.f32.mxu1 %v10802_v52  ;;  %v1768_v5 = vpop.xlane.xlu1 %1767 }
 0x676   : >> { %2199 = vmatprep.mubr.f32.mxu0 %v10802_v52  ;;  %9676 = vmatprep.subr.bf16.mxu1 %v12088_v0  ;;  %v10113_v0 = vpop.eup %10112  ;;  %10118 = vrcp.f32 %v1768_v5  ;;  %v1924_v5 = vld [vmem:[#allocation2 + $0x38] sm:$0xff] }
 0x678   : >> { %v7844_v20 = vpop.f32.mrb[42].mxu1  ;;  %2087 = vmatmul.mubr.f32.gmra.mrb[50].mxu1 %v1910_v12  ;;  %2200 = vmatmul.mubr.f32.gmra.mrb[18].mxu0 %v1910_v12 }
 0x679   : >> { %v1872_v32 = vpop.f32.mrb[43].mxu1  ;;  %9684 = vmatpush1.bf16.msra.mxu1 %v12098_v18  ;;  %2092 = vmatprep.mubr.f32.mxu1 %v10802_v52  ;;  %v1912_v21 = vmul.f32 %v10113_v0, %v7844_v20  ;;  %v1771_v18 = vpop.xlane.xlu0 %1770 }
 0x67a   : >> { %v1911_v2 = vmul.f32 %v10111_v27, %v1872_v32  ;;  %2205 = vmatprep.mubr.f32.mxu0 %v10802_v52  ;;  %9677 = vmatprep.subr.bf16.mxu1 %v12103_v34  ;;  %v10115_v34 = vpop.eup %10114  ;;  %10120 = vrcp.f32 %v1771_v18  ;;  %v1921_v32 = vld [vmem:[#allocation2 + $0x20] sm:$0xff] }
 0x67c   : >> { %v7847_v45 = vpop.f32.mrb[44].mxu1  ;;  %2093 = vmatmul.mubr.f32.gmra.mrb[52].mxu1 %v1911_v2  ;;  %2206 = vmatmul.mubr.f32.gmra.mrb[20].mxu0 %v1911_v2  ;;  %v1922_v2 = vld [vmem:[#allocation2 + $0x28] sm:$0xff] }
 0x67d   : >> { %v1882_v61 = vpop.f32.mrb[45].mxu1  ;;  %9685 = vmatpush1.bf16.msra.mxu1 %v12112_v29  ;;  %2098 = vmatprep.mubr.f32.mxu1 %v10802_v52  ;;  %v10117_v29 = vpop.eup %10116 }
 0x67e   : >> { %2211 = vmatprep.mubr.f32.mxu0 %v10802_v52  ;;  %9678 = vmatprep.subr.bf16.mxu1 %v12118_v8  ;;  %v1913_v44 = vmul.f32 %v10115_v34, %v1882_v61  ;;  %v1914_v8 = vmul.f32 %v10117_v29, %v7847_v45  ;;  %v1926_v29 = vld [vmem:[#allocation2 + $0x48] sm:$0xff] }
 0x680   : >> { %v7850_v42 = vpop.f32.mrb[46].mxu1  ;;  %2099 = vmatmul.mubr.f32.gmra.mrb[54].mxu1 %v1912_v21  ;;  %2212 = vmatmul.mubr.f32.gmra.mrb[22].mxu0 %v1912_v21 }
 0x681   : >> { %v1892_v35 = vpop.f32.mrb[47].mxu1  ;;  %9686 = vmatpush1.bf16.msra.mxu1 %v12127_v60  ;;  %2104 = vmatprep.mubr.f32.mxu1 %v10802_v52  ;;  %v10119_v60 = vpop.eup %10118 }
 0x682   : >> { %2217 = vmatprep.mubr.f32.mxu0 %v10802_v52  ;;  %9679 = vmatprep.subr.bf16.mxu1 %v12133_v1  ;;  %v1915_v1 = vmul.f32 %v10119_v60, %v1892_v35  ;;  %v1925_v35 = vld [vmem:[#allocation2 + $0x40] sm:$0xff] }
 0x684   : >> { %2105 = vmatmul.mubr.f32.gmra.mrb[56].mxu1 %v1913_v44  ;;  %2218 = vmatmul.mubr.f32.gmra.mrb[24].mxu0 %v1913_v44  ;;  %v10121_v41 = vpop.eup %10120  ;;  %v1927_v44 = vld [vmem:[#allocation2 + $0x50] sm:$0xff] }
 0x685   : >> { %9687 = vmatpush1.bf16.msra.mxu1 %v12141_v13  ;;  %2110 = vmatprep.mubr.f32.mxu1 %v10802_v52  ;;  %v1916_v13 = vmul.f32 %v10121_v41, %v7850_v42 }
 0x686   : >> { %2223 = vmatprep.mubr.f32.mxu0 %v10802_v52  ;;  %9680 = vmatprep.subr.bf16.mxu1 %v12147_v38  ;;  %v1917_v38 = vld [vmem:[#allocation2] sm:$0xff] }
 0x688   : >> { %2111 = vmatmul.mubr.f32.gmra.mrb[58].mxu1 %v1914_v8  ;;  %2224 = vmatmul.mubr.f32.gmra.mrb[26].mxu0 %v1914_v8  ;;  %v1928_v8 = vld [vmem:[#allocation2 + $0x58] sm:$0xff] }
 0x689   : >> { %9688 = vmatpush1.bf16.msra.mxu1 %v12155_v9  ;;  %2116 = vmatprep.mubr.f32.mxu1 %v10802_v52  ;;  %v1919_v9 = vld [vmem:[#allocation2 + $0x10] sm:$0xff] }
 0x68a   : >> { %9681 = vmatprep.subr.bf16.mxu1 %v12160_v43  ;;  %v1918_v43 = vld [vmem:[#allocation2 + $0x8] sm:$0xff] }
 0x68c   : >> { %2117 = vmatmul.mubr.f32.gmra.mrb[60].mxu1 %v1915_v1 }
 0x68d   : >> { %9689 = vmatpush1.bf16.msra.mxu1 %v12165_v19  ;;  %2122 = vmatprep.mubr.f32.mxu1 %v10802_v52 }
 0x68e   : >> { %9682 = vmatprep.subr.bf16.mxu1 %v12175_v11 }
 0x690   : >> { %2123 = vmatmul.mubr.f32.gmra.mrb[62].mxu1 %v1916_v13 }
 0x691   : >> { %9690 = vmatpush1.bf16.msra.mxu1 %v12179_v25  ;;  %2229 = vmatprep.mubr.f32.mxu1 %v10802_v52  ;;  %v1923_v25 = vld [vmem:[#allocation2 + $0x30] sm:$0xff] }
 0x694   : >> { %2230 = vmatmul.mubr.f32.vlgmr.msra.gmra.mrb[64].mxu1 %v1915_v1 }
 0x695   : >> { %2235 = vmatprep.mubr.f32.mxu1 %v10802_v52 }
 0x698   : >> { %2236 = vmatmul.mubr.f32.gmra.mrb[66].mxu1 %v1916_v13 }
 0x747   : >> { %v2082_v3 = vpop.f32.mrb[48].mxu1  ;;  %v2195_v19 = vpop.f32.mrb[16].mxu0 }
 0x748   : >> { %v2242_v33 = vadd.f32 %v2082_v3, %v1917_v38  ;;  %v2244_v12 = vadd.f32 %v2195_v19, %v1919_v9  ;;  %v2084_v7 = vpop.f32.mrb[49].mxu1  ;;  %v2197_v20 = vpop.f32.mrb[17].mxu0  ;;  %v1929_v3 = vld [vmem:[#allocation2 + $0x60] sm:$0xff]  ;;  %v1931_v19 = vld [vmem:[#allocation2 + $0x70] sm:$0xff] }
 0x749   : >> { %v2243_v11 = vadd.f32 %v2084_v7, %v1918_v43  ;;  %v2245_v27 = vadd.f32 %v2197_v20, %v1920_v46 }
 0x74a   : >> { %2274 = vst [vmem:[#allocation2] sm:$0xff] %v2242_v33  ;;  %2276 = vst [vmem:[#allocation2 + $0x10] sm:$0xff] %v2244_v12  ;;  %v1930_v33 = vld [vmem:[#allocation2 + $0x68] sm:$0xff]  ;;  %v1932_v12 = vld [vmem:[#allocation2 + $0x78] sm:$0xff] }
 0x74b   : >> { %2275 = vst [vmem:[#allocation2 + $0x8] sm:$0xff] %v2243_v11  ;;  %2277 = vst [vmem:[#allocation2 + $0x18] sm:$0xff] %v2245_v27  ;;  %v2088_v52 = vpop.f32.mrb[50].mxu1  ;;  %v2201_v45 = vpop.f32.mrb[18].mxu0 }
 0x74c   : >> { %v2246_v0 = vadd.f32 %v2088_v52, %v1921_v32  ;;  %v2248_v61 = vadd.f32 %v2201_v45, %v1923_v25  ;;  %v2090_v21 = vpop.f32.mrb[51].mxu1  ;;  %v2203_v18 = vpop.f32.mrb[19].mxu0  ;;  %v1933_v52 = vld [vmem:[#allocation2 + $0x80] sm:$0xff]  ;;  %v1935_v45 = vld [vmem:[#allocation2 + $0x90] sm:$0xff] }
 0x74d   : >> { %v2247_v42 = vadd.f32 %v2090_v21, %v1922_v2  ;;  %v2249_v34 = vadd.f32 %v2203_v18, %v1924_v5 }
 0x74e   : >> { %2278 = vst [vmem:[#allocation2 + $0x20] sm:$0xff] %v2246_v0  ;;  %2280 = vst [vmem:[#allocation2 + $0x30] sm:$0xff] %v2248_v61  ;;  %v1934_v0 = vld [vmem:[#allocation2 + $0x88] sm:$0xff]  ;;  %v1936_v61 = vld [vmem:[#allocation2 + $0x98] sm:$0xff] }
 0x74f   : >> { %2279 = vst [vmem:[#allocation2 + $0x28] sm:$0xff] %v2247_v42  ;;  %2281 = vst [vmem:[#allocation2 + $0x38] sm:$0xff] %v2249_v34  ;;  %v2094_v60 = vpop.f32.mrb[52].mxu1  ;;  %v2207_v1 = vpop.f32.mrb[20].mxu0 }
 0x750   : >> { %v2250_v41 = vadd.f32 %v2094_v60, %v1925_v35  ;;  %v2252_v13 = vadd.f32 %v2207_v1, %v1927_v44  ;;  %v2096_v38 = vpop.f32.mrb[53].mxu1  ;;  %v2209_v9 = vpop.f32.mrb[21].mxu0  ;;  %v1937_v60 = vld [vmem:[#allocation2 + $0xa0] sm:$0xff]  ;;  %v1939_v1 = vld [vmem:[#allocation2 + $0xb0] sm:$0xff] }
 0x751   : >> { %v2251_v43 = vadd.f32 %v2096_v38, %v1926_v29  ;;  %v2253_v46 = vadd.f32 %v2209_v9, %v1928_v8 }
 0x752   : >> { %2282 = vst [vmem:[#allocation2 + $0x40] sm:$0xff] %v2250_v41  ;;  %2284 = vst [vmem:[#allocation2 + $0x50] sm:$0xff] %v2252_v13  ;;  %v1938_v41 = vld [vmem:[#allocation2 + $0xa8] sm:$0xff]  ;;  %v1940_v13 = vld [vmem:[#allocation2 + $0xb8] sm:$0xff] }
 0x753   : >> { %2283 = vst [vmem:[#allocation2 + $0x48] sm:$0xff] %v2251_v43  ;;  %2285 = vst [vmem:[#allocation2 + $0x58] sm:$0xff] %v2253_v46  ;;  %v2100_v7 = vpop.f32.mrb[54].mxu1  ;;  %v2213_v20 = vpop.f32.mrb[22].mxu0 }
 0x754   : >> { %v2254_v11 = vadd.f32 %v2100_v7, %v1929_v3  ;;  %v2256_v27 = vadd.f32 %v2213_v20, %v1931_v19  ;;  %v2102_v32 = vpop.f32.mrb[55].mxu1  ;;  %v2215_v25 = vpop.f32.mrb[23].mxu0  ;;  %v1941_v7 = vld [vmem:[#allocation2 + $0xc0] sm:$0xff]  ;;  %v1942_v20 = vld [vmem:[#allocation2 + $0xc8] sm:$0xff] }
 0x755   : >> { %v2255_v2 = vadd.f32 %v2102_v32, %v1930_v33  ;;  %v2257_v5 = vadd.f32 %v2215_v25, %v1932_v12 }
 0x756   : >> { %2286 = vst [vmem:[#allocation2 + $0x60] sm:$0xff] %v2254_v11  ;;  %2288 = vst [vmem:[#allocation2 + $0x70] sm:$0xff] %v2256_v27 }
 0x757   : >> { %2287 = vst [vmem:[#allocation2 + $0x68] sm:$0xff] %v2255_v2  ;;  %2289 = vst [vmem:[#allocation2 + $0x78] sm:$0xff] %v2257_v5  ;;  %v2106_v21 = vpop.f32.mrb[56].mxu1  ;;  %v2219_v18 = vpop.f32.mrb[24].mxu0  ;;  %v1945_v2 = vld [vmem:[#allocation2 + $0xe0] sm:$0xff]  ;;  %v1946_v5 = vld [vmem:[#allocation2 + $0xe8] sm:$0xff] }
 0x758   : >> { %v2258_v42 = vadd.f32 %v2106_v21, %v1933_v52  ;;  %v2260_v34 = vadd.f32 %v2219_v18, %v1935_v45  ;;  %v2108_v35 = vpop.f32.mrb[57].mxu1  ;;  %v2221_v44 = vpop.f32.mrb[25].mxu0  ;;  %v1943_v21 = vld [vmem:[#allocation2 + $0xd0] sm:$0xff]  ;;  %v1944_v18 = vld [vmem:[#allocation2 + $0xd8] sm:$0xff] }
 0x759   : >> { %v2259_v29 = vadd.f32 %v2108_v35, %v1934_v0  ;;  %v2261_v8 = vadd.f32 %v2221_v44, %v1936_v61  ;;  %v2314_v16 = vld [vmem:[#allocation2 + $0x40] sm:$0xff] (%p855_p3) }
 0x75a   : >> { %2290 = vst [vmem:[#allocation2 + $0x80] sm:$0xff] %v2258_v42  ;;  %2292 = vst [vmem:[#allocation2 + $0x90] sm:$0xff] %v2260_v34  ;;  %v12257_v54 = vadd.f32 (%p855_p3), %v2314_v16, %v14014_v58 }
 0x75b   : >> { %2291 = vst [vmem:[#allocation2 + $0x88] sm:$0xff] %v2259_v29  ;;  %2293 = vst [vmem:[#allocation2 + $0x98] sm:$0xff] %v2261_v8  ;;  %v2112_v38 = vpop.f32.mrb[58].mxu1  ;;  %v2225_v9 = vpop.f32.mrb[26].mxu0  ;;  %v1947_v29 = vld [vmem:[#allocation2 + $0xf0] sm:$0xff]  ;;  %v1948_v8 = vld [vmem:[#allocation2 + $0xf8] sm:$0xff] }
 0x75c   : >> { %v2262_v43 = vadd.f32 %v2112_v38, %v1937_v60  ;;  %v2264_v46 = vadd.f32 %v2225_v9, %v1939_v1  ;;  %v2114_v3 = vpop.f32.mrb[59].mxu1  ;;  %v2227_v19 = vpop.f32.mrb[27].mxu0  ;;  %v2306_v38 = vld [vmem:[#allocation2] sm:$0xff] (%p855_p3)  ;;  %v2307_v9 = vld [vmem:[#allocation2 + $0x8] sm:$0xff] (%p855_p3)  ;;  %14015 = vst [vmem:[#allocation45_spill] sm:$0xff] (%p855_p3), %v12257_v54 }
 0x75d   : >> { %v2263_v33 = vadd.f32 %v2114_v3, %v1938_v41  ;;  %v2265_v12 = vadd.f32 %v2227_v19, %v1940_v13  ;;  %v12219_v3 = vadd.f32 (%p855_p3), %v2306_v38, %v11373_v36  ;;  %v12222_v19 = vadd.f32 (%p855_p3), %v2307_v9, %v11376_v37  ;;  %v2315_v37 = vld [vmem:[#allocation2 + $0x48] sm:$0xff] (%p855_p3)  ;;  %v2318_v62 = vld [vmem:[#allocation2 + $0x60] sm:$0xff] (%p855_p3)  ;;  %v2320_v51 = vld [vmem:[#allocation2 + $0x70] sm:$0xff] (%p855_p3) }
 0x75e   : >> { %2294 = vst [vmem:[#allocation2 + $0xa0] sm:$0xff] %v2262_v43  ;;  %2296 = vst [vmem:[#allocation2 + $0xb0] sm:$0xff] %v2264_v46  ;;  %v2308_v43 = vld [vmem:[#allocation2 + $0x10] sm:$0xff] (%p855_p3)  ;;  %v2309_v46 = vld [vmem:[#allocation2 + $0x18] sm:$0xff] (%p855_p3)  ;;  %v12260_v63 = vadd.f32 (%p855_p3), %v2315_v37, %v14016_v57 }
 0x75f   : >> { %2295 = vst [vmem:[#allocation2 + $0xa8] sm:$0xff] %v2263_v33  ;;  %2297 = vst [vmem:[#allocation2 + $0xb8] sm:$0xff] %v2265_v12  ;;  %v2118_v11 = vpop.f32.mrb[60].mxu1  ;;  %v12225_v33 = vadd.f32 (%p855_p3), %v2308_v43, %v11381_v39  ;;  %v2310_v12 = vld [vmem:[#allocation2 + $0x20] sm:$0xff] (%p855_p3)  ;;  %v2370_v22 = vmul.f32 (%p855_p3), %v12219_v3, %v12219_v3  ;;  %v2371_v23 = vmul.f32 (%p855_p3), %v12222_v19, %v12222_v19  ;;  %v2316_v39 = vld [vmem:[#allocation2 + $0x50] sm:$0xff] (%p855_p3) }
 0x760   : >> { %v2266_v27 = vadd.f32 %v2118_v11, %v1941_v7  ;;  %v2120_v32 = vpop.f32.mrb[61].mxu1  ;;  %14003 = vst [vmem:[#allocation37_spill] sm:$0xff] (%p855_p3), %v12219_v3  ;;  %14004 = vst [vmem:[#allocation38_spill] sm:$0xff] (%p855_p3), %v12222_v19  ;;  %v2311_v7 = vld [vmem:[#allocation2 + $0x28] sm:$0xff] (%p855_p3)  ;;  %v2312_v11 = vld [vmem:[#allocation2 + $0x30] sm:$0xff] (%p855_p3)  ;;  %v12231_v4 = vadd.f32 (%p855_p3), %v2310_v12, %v11415_v55  ;;  %v12265_v6 = vadd.f32 (%p855_p3), %v2316_v39, %v14018_v28 }
 0x761   : >> { %v2267_v25 = vadd.f32 %v2120_v32, %v1942_v20  ;;  %14005 = vst [vmem:[#allocation39_spill] sm:$0xff] (%p855_p3), %v12225_v33  ;;  %v12228_v20 = vadd.f32 (%p855_p3), %v2309_v46, %v11384_v40  ;;  %v12234_v15 = vadd.f32 (%p855_p3), %v2311_v7, %v14008_v14  ;;  %v2372_v24 = vmul.f32 (%p855_p3), %v12225_v33, %v12225_v33  ;;  %v2317_v40 = vld [vmem:[#allocation2 + $0x58] sm:$0xff] (%p855_p3)  ;;  %v2319_v59 = vld [vmem:[#allocation2 + $0x68] sm:$0xff] (%p855_p3)  ;;  %v14030_v12 = vld [vmem:[#allocation70_spill] sm:$0xff] (%p855_p3) }
 0x762   : >> { %2298 = vst [vmem:[#allocation2 + $0xc0] sm:$0xff] %v2266_v27  ;;  %v2313_v27 = vld [vmem:[#allocation2 + $0x38] sm:$0xff] (%p855_p3)  ;;  %14007 = vst [vmem:[#allocation41_spill] sm:$0xff] (%p855_p3), %v12231_v4  ;;  %v12243_v36 = vadd.f32 (%p855_p3), %v2312_v11, %v14010_v30  ;;  %v2374_v55 = vmul.f32 (%p855_p3), %v12231_v4, %v12231_v4  ;;  %v2402_v53 = vadd.f32 (%p855_p3), %v2371_v23, %v2370_v22  ;;  %v14034_v39 = vld [vmem:[#allocation72_spill] sm:$0xff] (%p855_p3) }
 0x763   : >> { %2299 = vst [vmem:[#allocation2 + $0xc8] sm:$0xff] %v2267_v25  ;;  %v2124_v52 = vpop.f32.mrb[62].mxu1  ;;  %14006 = vst [vmem:[#allocation40_spill] sm:$0xff] (%p855_p3), %v12228_v20  ;;  %v2373_v47 = vmul.f32 (%p855_p3), %v12228_v20, %v12228_v20  ;;  %v12248_v49 = vadd.f32 (%p855_p3), %v2313_v27, %v14012_v48  ;;  %v2375_v56 = vmul.f32 (%p855_p3), %v12234_v15, %v12234_v15  ;;  %v2321_v32 = vld [vmem:[#allocation2 + $0x78] sm:$0xff] (%p855_p3) }
 0x764   : >> { %v2270_v45 = vadd.f32 %v2124_v52, %v1945_v2  ;;  %v2126_v0 = vpop.f32.mrb[63].mxu1  ;;  %14009 = vst [vmem:[#allocation42_spill] sm:$0xff] (%p855_p3), %v12234_v15  ;;  %14011 = vst [vmem:[#allocation43_spill] sm:$0xff] (%p855_p3), %v12243_v36  ;;  %v2376_v50 = vmul.f32 (%p855_p3), %v12243_v36, %v12243_v36  ;;  %v12268_v10 = vadd.f32 (%p855_p3), %v2317_v40, %v14020_v31  ;;  %v14022_v52 = vld [vmem:[#allocation59_spill] sm:$0xff] (%p855_p3) }
 0x765   : >> { %v2271_v61 = vadd.f32 %v2126_v0, %v1946_v5  ;;  %14013 = vst [vmem:[#allocation44_spill] sm:$0xff] (%p855_p3), %v12248_v49  ;;  %14017 = vst [vmem:[#allocation46_spill] sm:$0xff] (%p855_p3), %v12260_v63  ;;  %v2377_v17 = vmul.f32 (%p855_p3), %v12248_v49, %v12248_v49  ;;  %v2407_v26 = vadd.f32 (%p855_p3), %v2375_v56, %v2374_v55  ;;  %v2322_v0 = vld [vmem:[#allocation2 + $0x80] sm:$0xff] (%p855_p3)  ;;  %v2325_v38 = vld [vmem:[#allocation2 + $0x98] sm:$0xff] (%p855_p3) }
 0x766   : >> { %2302 = vst [vmem:[#allocation2 + $0xe0] sm:$0xff] %v2270_v45  ;;  %14019 = vst [vmem:[#allocation47_spill] sm:$0xff] (%p855_p3), %v12265_v6  ;;  %v2403_v25 = vadd.f32 (%p855_p3), %v2402_v53, %v2372_v24  ;;  %v2378_v2 = vmul.f32 (%p855_p3), %v12257_v54, %v12257_v54  ;;  %v2379_v5 = vmul.f32 (%p855_p3), %v12260_v63, %v12260_v63  ;;  %v2326_v11 = vld [vmem:[#allocation2 + $0xa0] sm:$0xff] (%p855_p3)  ;;  %v2327_v27 = vld [vmem:[#allocation2 + $0xa8] sm:$0xff] (%p855_p3) }
 0x767   : >> { %2303 = vst [vmem:[#allocation2 + $0xe8] sm:$0xff] %v2271_v61  ;;  %v2231_v42 = vpop.f32.mrb[64].mxu1  ;;  %14021 = vst [vmem:[#allocation48_spill] sm:$0xff] (%p855_p3), %v12268_v10  ;;  %v12275_v45 = vadd.f32 (%p855_p3), %v2318_v62, %v14022_v52  ;;  %v2408_v61 = vadd.f32 (%p855_p3), %v2407_v26, %v2376_v50  ;;  %v12295_v7 = vadd.f32 (%p855_p3), %v2322_v0, %v14030_v12  ;;  %v14032_v23 = vld [vmem:[#allocation71_spill] sm:$0xff] (%p855_p3)  ;;  %v2328_v30 = vld [vmem:[#allocation2 + $0xb0] sm:$0xff] (%p855_p3) }
 0x768   : >> { %v2268_v34 = vadd.f32 %v2231_v42, %v1943_v21  ;;  %v2233_v35 = vpop.f32.mrb[65].mxu1  ;;  %v2380_v21 = vmul.f32 (%p855_p3), %v12265_v6, %v12265_v6  ;;  %v14024_v42 = vld [vmem:[#allocation60_spill] sm:$0xff] (%p855_p3)  ;;  %v2329_v56 = vld [vmem:[#allocation2 + $0xb8] sm:$0xff] (%p855_p3)  ;;  %v14038_v50 = vld [vmem:[#allocation66_spill] sm:$0xff] (%p855_p3) }
 0x769   : >> { %v2269_v44 = vadd.f32 %v2233_v35, %v1944_v18  ;;  %857 = sbr.rel (!%p855_p3) target bundleno = 552 (0x228), region = 175  ;;  %14023 = vst [vmem:[#allocation49_spill] sm:$0xff] (%p855_p3), %v12275_v45  ;;  %v2381_v18 = vmul.f32 (%p855_p3), %v12268_v10, %v12268_v10  ;;  %v2323_v35 = vld [vmem:[#allocation2 + $0x88] sm:$0xff] (%p855_p3)  ;;  %v2409_v9 = vadd.f32 (%p855_p3), %v2408_v61, %v2377_v17  ;;  %v2382_v43 = vmul.f32 (%p855_p3), %v12275_v45, %v12275_v45  ;;  %v14040_v57 = vld [vmem:[#allocation67_spill] sm:$0xff] (%p855_p3)  ;;  %v2330_v17 = vld [vmem:[#allocation2 + $0xc0] sm:$0xff] (%p855_p3) }
 0x76a   : >> { %2300 = vst [vmem:[#allocation2 + $0xd0] sm:$0xff] %v2268_v34  ;;  %v12282_v34 = vadd.f32 (%p855_p3), %v2319_v59, %v14024_v42  ;;  %14031 = vst [vmem:[#allocation53_spill] sm:$0xff] (%p855_p3), %v12295_v7  ;;  %v12302_v24 = vadd.f32 (%p855_p3), %v2323_v35, %v14032_v23  ;;  %v2386_v55 = vmul.f32 (%p855_p3), %v12295_v7, %v12295_v7  ;;  %v14044_v52 = vld [vmem:[#allocation69_spill] sm:$0xff] (%p855_p3) }
 0x76b   : >> { %2301 = vst [vmem:[#allocation2 + $0xd8] sm:$0xff] %v2269_v44  ;;  %v2237_v60 = vpop.f32.mrb[66].mxu1  ;;  %v2404_v44 = vadd.f32 (%p855_p3), %v2403_v25, %v2373_v47  ;;  %v14036_v47 = vld [vmem:[#allocation73_spill] sm:$0xff] (%p855_p3)  ;;  %v12315_v58 = vadd.f32 (%p855_p3), %v2326_v11, %v14038_v50  ;;  %v12318_v59 = vadd.f32 (%p855_p3), %v2327_v27, %v14040_v57  ;;  %v12328_v0 = vadd.f32 (%p855_p3), %v2329_v56, %v14044_v52  ;;  %v14056_v50 = vld [vmem:[#allocation75_spill] sm:$0xff] (%p855_p3) }
 0x76c   : >> { %v2272_v1 = vadd.f32 %v2237_v60, %v1947_v29  ;;  %v2239_v41 = vpop.f32.mrb[67].mxu1  ;;  %14025 = vst [vmem:[#allocation50_spill] sm:$0xff] (%p855_p3), %v12282_v34  ;;  %v2412_v29 = vadd.f32 (%p855_p3), %v2379_v5, %v2378_v2  ;;  %v2383_v46 = vmul.f32 (%p855_p3), %v12282_v34, %v12282_v34  ;;  %14033 = vst [vmem:[#allocation54_spill] sm:$0xff] (%p855_p3), %v12302_v24  ;;  %v2331_v25 = vld [vmem:[#allocation2 + $0xc8] sm:$0xff] (%p855_p3) }
 0x76d   : >> { %v2273_v13 = vadd.f32 %v2239_v41, %v1948_v8  ;;  %v14026_v8 = vld [vmem:[#allocation61_spill] sm:$0xff] (%p855_p3)  ;;  %2405 = vadd.xlane.f32.xlu0 (%p855_p3), %v2404_v44  ;;  %v12308_v48 = vadd.f32 (%p855_p3), %v2325_v38, %v14036_v47  ;;  %v2387_v53 = vmul.f32 (%p855_p3), %v12302_v24, %v12302_v24  ;;  %14039 = vst [vmem:[#allocation85_spill] sm:$0xff] (%p855_p3), %v12315_v58  ;;  %14041 = vst [vmem:[#allocation86_spill] sm:$0xff] (%p855_p3), %v12318_v59  ;;  %v2569_v47 = vld [vmem:[#allocation17 + $0x88] sm:$0xff] (%p855_p3) }
 0x76e   : >> { %2304 = vst [vmem:[#allocation2 + $0xf0] sm:$0xff] %v2272_v1  ;;  %v12285_v60 = vadd.f32 (%p855_p3), %v2320_v51, %v14026_v8  ;;  %v14028_v1 = vld [vmem:[#allocation62_spill] sm:$0xff] (%p855_p3)  ;;  %v2413_v14 = vadd.f32 (%p855_p3), %v2412_v29, %v2380_v21  ;;  %v2417_v37 = vadd.f32 (%p855_p3), %v2383_v46, %v2382_v43  ;;  %v14042_v51 = vld [vmem:[#allocation68_spill] sm:$0xff] (%p855_p3)  ;;  %14045 = vst [vmem:[#allocation88_spill] sm:$0xff] (%p855_p3), %v12328_v0 }
 0x76f   : >> { %2305 = vst [vmem:[#allocation2 + $0xf8] sm:$0xff] %v2273_v13  ;;  %v12288_v41 = vadd.f32 (%p855_p3), %v2321_v32, %v14028_v1  ;;  %v2324_v13 = vld [vmem:[#allocation2 + $0x90] sm:$0xff] (%p855_p3)  ;;  %14037 = vst [vmem:[#allocation84_spill] sm:$0xff] (%p855_p3), %v12308_v48  ;;  %v2389_v31 = vmul.f32 (%p855_p3), %v12308_v48, %v12308_v48  ;;  %v12325_v32 = vadd.f32 (%p855_p3), %v2328_v30, %v14042_v51  ;;  %v14046_v29 = vld [vmem:[#allocation77_spill] sm:$0xff] (%p855_p3) }
 0x770   : > { %14027 = vst [vmem:[#allocation51_spill] sm:$0xff] %v12285_v60  ;;  %v2384_v16 = vmul.f32 %v12285_v60, %v12285_v60  ;;  %v12305_v40 = vadd.f32 %v2324_v13, %v14034_v39  ;;  %v2414_v62 = vadd.f32 %v2413_v14, %v2381_v18  ;;  %v2422_v5 = vadd.f32 %v2387_v53, %v2386_v55  ;;  %v2334_v18 = vld [vmem:[#allocation2 + $0xe0] sm:$0xff]  ;;  %v2335_v1 = vld [vmem:[#allocation2 + $0xe8] sm:$0xff]  ;;  %v14054_v30 = vld [vmem:[#allocation74_spill] sm:$0xff] }
 0x771   : > { %14029 = vst [vmem:[#allocation52_spill] sm:$0xff] %v12288_v41  ;;  %v2385_v22 = vmul.f32 %v12288_v41, %v12288_v41  ;;  %14043 = vst [vmem:[#allocation87_spill] sm:$0xff] %v12325_v32  ;;  %v2332_v2 = vld [vmem:[#allocation2 + $0xd0] sm:$0xff]  ;;  %2410 = vadd.xlane.f32.xlu0 %v2409_v9  ;;  %v2390_v61 = vmul.f32 %v12315_v58, %v12315_v58  ;;  %v2391_v35 = vmul.f32 %v12318_v59, %v12318_v59  ;;  %v14050_v46 = vld [vmem:[#allocation80_spill] sm:$0xff] }
 0x772   : > { %14035 = vst [vmem:[#allocation83_spill] sm:$0xff] %v12305_v40  ;;  %v2418_v26 = vadd.f32 %v2417_v37, %v2384_v16  ;;  %v2388_v28 = vmul.f32 %v12305_v40, %v12305_v40  ;;  %2415 = vadd.xlane.f32.xlu1 %v2414_v62  ;;  %v2333_v21 = vld [vmem:[#allocation2 + $0xd8] sm:$0xff]  ;;  %v2392_v44 = vmul.f32 %v12325_v32, %v12325_v32  ;;  %v14048_v9 = vld [vmem:[#allocation78_spill] sm:$0xff]  ;;  %v14052_v16 = vld [vmem:[#allocation81_spill] sm:$0xff] }
 0x773   : > { %v12337_v8 = vadd.f32 %v2330_v17, %v14046_v29  ;;  %v2393_v38 = vmul.f32 %v12328_v0, %v12328_v0  ;;  %v12342_v43 = vadd.f32 %v2331_v25, %v14048_v9  ;;  %v12345_v12 = vadd.f32 %v2332_v2, %v14050_v46  ;;  %v2553_v39 = vld [vmem:[#allocation17 + $0x8] sm:$0xff]  ;;  %v2555_v55 = vld [vmem:[#allocation17 + $0x18] sm:$0xff] }
 0x774   : > { %v2419_v42 = vadd.f32 %v2418_v26, %v2385_v22  ;;  %v2423_v13 = vadd.f32 %v2422_v5, %v2388_v28  ;;  %v2427_v14 = vadd.f32 %v2391_v35, %v2390_v61  ;;  %v12348_v22 = vadd.f32 %v2333_v21, %v14052_v16  ;;  %v2571_v17 = vld [vmem:[#allocation17 + $0x98] sm:$0xff]  ;;  %v2552_v26 = vld [vmem:[#allocation17] sm:$0xff]  ;;  %v2554_v61 = vld [vmem:[#allocation17 + $0x10] sm:$0xff] }
 0x775   : > { %14047 = vst [vmem:[#allocation89_spill] sm:$0xff] %v12337_v8  ;;  %14049 = vst [vmem:[#allocation90_spill] sm:$0xff] %v12342_v43  ;;  %v2336_v11 = vld [vmem:[#allocation2 + $0xf0] sm:$0xff]  ;;  %v2394_v23 = vmul.f32 %v12337_v8, %v12337_v8  ;;  %v12353_v37 = vadd.f32 %v2334_v18, %v14054_v30  ;;  %v2395_v62 = vmul.f32 %v12342_v43, %v12342_v43  ;;  %v2568_v28 = vld [vmem:[#allocation17 + $0x80] sm:$0xff] }
 0x776   : > { %14051 = vst [vmem:[#allocation91_spill] sm:$0xff] %v12345_v12  ;;  %v2337_v27 = vld [vmem:[#allocation2 + $0xf8] sm:$0xff]  ;;  %14053 = vst [vmem:[#allocation92_spill] sm:$0xff] %v12348_v22  ;;  %2420 = vadd.xlane.f32.xlu1 %v2419_v42  ;;  %v2424_v56 = vadd.f32 %v2423_v13, %v2389_v31  ;;  %v2396_v53 = vmul.f32 %v12345_v12, %v12345_v12  ;;  %v12360_v57 = vadd.f32 %v2335_v1, %v14056_v50  ;;  %v14058_v2 = vld [vmem:[#allocation76_spill] sm:$0xff] }
 0x777   : > { %14055 = vst [vmem:[#allocation93_spill] sm:$0xff] %v12353_v37  ;;  %v2428_v51 = vadd.f32 %v2427_v14, %v2392_v44  ;;  %v2397_v25 = vmul.f32 %v12348_v22, %v12348_v22  ;;  %v12365_v5 = vadd.f32 %v2336_v11, %v14058_v2  ;;  %v14060_v31 = vld [vmem:[#allocation79_spill] sm:$0xff]  ;;  %v2585_v18 = vld [vmem:[#allocation17 + $0x108] sm:$0xff]  ;;  %v2432_v42 = vadd.f32 %v2395_v62, %v2394_v23  ;;  %v2587_v13 = vld [vmem:[#allocation17 + $0x118] sm:$0xff] }
 0x778   : > { %14057 = vst [vmem:[#allocation94_spill] sm:$0xff] %v12360_v57  ;;  %v12368_v52 = vadd.f32 %v2337_v27, %v14060_v31  ;;  %v2570_v21 = vld [vmem:[#allocation17 + $0x90] sm:$0xff]  ;;  %2425 = vadd.xlane.f32.xlu0 %v2424_v56  ;;  %v2398_v35 = vmul.f32 %v12353_v37, %v12353_v37  ;;  %v2399_v44 = vmul.f32 %v12360_v57, %v12360_v57  ;;  %v2601_v1 = vld [vmem:[#allocation17 + $0x188] sm:$0xff]  ;;  %v2603_v9 = vld [vmem:[#allocation17 + $0x198] sm:$0xff] }
 0x779   : > { %14059 = vst [vmem:[#allocation95_spill] sm:$0xff] %v12365_v5  ;;  %v8139_v29 = vpack.c.bf16 %v2569_v47, %v2553_v39  ;;  %v2429_v46 = vadd.f32 %v2428_v51, %v2393_v38  ;;  %v2400_v11 = vmul.f32 %v12365_v5, %v12365_v5  ;;  %v8267_v14 = vpack.c.bf16 %v2571_v17, %v2555_v55  ;;  %v2584_v16 = vld [vmem:[#allocation17 + $0x100] sm:$0xff]  ;;  %v2586_v30 = vld [vmem:[#allocation17 + $0x110] sm:$0xff]  ;;  %v2617_v47 = vld [vmem:[#allocation17 + $0x208] sm:$0xff] }
 0x77a   : > { %14061 = vst [vmem:[#allocation96_spill] sm:$0xff] %v12368_v52  ;;  %v2401_v27 = vmul.f32 %v12368_v52, %v12368_v52  ;;  %v2600_v23 = vld [vmem:[#allocation17 + $0x180] sm:$0xff]  ;;  %v2433_v56 = vadd.f32 %v2432_v42, %v2396_v53  ;;  %v2437_v62 = vadd.f32 %v2399_v44, %v2398_v35  ;;  %v8141_v50 = vpack.c.bf16 %v2568_v28, %v2552_v26  ;;  %v2602_v39 = vld [vmem:[#allocation17 + $0x190] sm:$0xff]  ;;  %v2633_v31 = vld [vmem:[#allocation17 + $0x288] sm:$0xff] }
 0x77b   : > { %8140 = vmatprep.subr.bf16.mxu0 %v8139_v29  ;;  %v8269_v2 = vpack.c.bf16 %v2570_v21, %v2554_v61  ;;  %2430 = vadd.xlane.f32.xlu1 %v2429_v46  ;;  %v8143_v38 = vpack.c.bf16 %v2601_v1, %v2585_v18  ;;  %v8271_v51 = vpack.c.bf16 %v2603_v9, %v2587_v13  ;;  %v2619_v22 = vld [vmem:[#allocation17 + $0x218] sm:$0xff]  ;;  %v2616_v26 = vld [vmem:[#allocation17 + $0x200] sm:$0xff]  ;;  %v2618_v61 = vld [vmem:[#allocation17 + $0x210] sm:$0xff] }
 0x77c   : > { %8268 = vmatprep.subr.bf16.mxu1 %v8267_v14  ;;  %v2635_v0 = vld [vmem:[#allocation17 + $0x298] sm:$0xff]  ;;  %v2434_v48 = vadd.f32 %v2433_v56, %v2397_v25  ;;  %v2438_v52 = vadd.f32 %v2437_v62, %v2400_v11  ;;  %8142 = vmatpush1.bf16.msra.mxu0 %v8141_v50  ;;  %v8145_v55 = vpack.c.bf16 %v2600_v23, %v2584_v16  ;;  %v2632_v28 = vld [vmem:[#allocation17 + $0x280] sm:$0xff]  ;;  %v2634_v35 = vld [vmem:[#allocation17 + $0x290] sm:$0xff] }
 0x77d   : > { %8270 = vmatpush1.bf16.msra.mxu1 %v8269_v2  ;;  %8144 = vmatprep.subr.bf16.mxu0 %v8143_v38  ;;  %v8273_v53 = vpack.c.bf16 %v2602_v39, %v2586_v30  ;;  %v8147_v17 = vpack.c.bf16 %v2633_v31, %v2617_v47  ;;  %v8275_v42 = vpack.c.bf16 %v2635_v0, %v2619_v22  ;;  %v2649_v18 = vld [vmem:[#allocation17 + $0x308] sm:$0xff]  ;;  %v2651_v29 = vld [vmem:[#allocation17 + $0x318] sm:$0xff]  ;;  %v2648_v46 = vld [vmem:[#allocation17 + $0x300] sm:$0xff] }
 0x77e   : > { %8272 = vmatprep.subr.bf16.mxu1 %v8271_v51  ;;  %2435 = vadd.xlane.f32.xlu0 %v2434_v48  ;;  %v2439_v21 = vadd.f32 %v2438_v52, %v2401_v27  ;;  %v2665_v44 = vld [vmem:[#allocation17 + $0x388] sm:$0xff]  ;;  %v2667_v1 = vld [vmem:[#allocation17 + $0x398] sm:$0xff]  ;;  %v8149_v25 = vpack.c.bf16 %v2632_v28, %v2616_v26  ;;  %v8277_v13 = vpack.c.bf16 %v2634_v35, %v2618_v61  ;;  %v2664_v11 = vld [vmem:[#allocation17 + $0x380] sm:$0xff] }
 0x77f   : > { %v8151_v9 = vpack.c.bf16 %v2665_v44, %v2649_v18  ;;  %v2650_v14 = vld [vmem:[#allocation17 + $0x310] sm:$0xff]  ;;  %v8279_v16 = vpack.c.bf16 %v2667_v1, %v2651_v29  ;;  %v2681_v52 = vld [vmem:[#allocation17 + $0x408] sm:$0xff]  ;;  %v2683_v22 = vld [vmem:[#allocation17 + $0x418] sm:$0xff]  ;;  %v8153_v23 = vpack.c.bf16 %v2664_v11, %v2648_v46 }
 0x780   : > { %2440 = vadd.xlane.f32.xlu1 %v2439_v21  ;;  %8146 = vmatpush1.bf16.msra.mxu0 %v8145_v55  ;;  %v2666_v48 = vld [vmem:[#allocation17 + $0x390] sm:$0xff]  ;;  %v2697_v0 = vld [vmem:[#allocation17 + $0x488] sm:$0xff]  ;;  %v2699_v27 = vld [vmem:[#allocation17 + $0x498] sm:$0xff] }
 0x781   : > { %8274 = vmatpush1.bf16.msra.mxu1 %v8273_v53  ;;  %8148 = vmatprep.subr.bf16.mxu0 %v8147_v17  ;;  %v8281_v30 = vpack.c.bf16 %v2666_v48, %v2650_v14  ;;  %v8155_v56 = vpack.c.bf16 %v2697_v0, %v2681_v52  ;;  %v2680_v62 = vld [vmem:[#allocation17 + $0x400] sm:$0xff]  ;;  %v2682_v2 = vld [vmem:[#allocation17 + $0x410] sm:$0xff]  ;;  %v8283_v39 = vpack.c.bf16 %v2699_v27, %v2683_v22  ;;  %v2713_v31 = vld [vmem:[#allocation17 + $0x508] sm:$0xff] }
 0x782   : > { %8276 = vmatprep.subr.bf16.mxu1 %v8275_v42  ;;  %v2696_v50 = vld [vmem:[#allocation17 + $0x480] sm:$0xff]  ;;  %v2698_v47 = vld [vmem:[#allocation17 + $0x490] sm:$0xff]  ;;  %v2729_v38 = vld [vmem:[#allocation17 + $0x588] sm:$0xff] }
 0x783   : > { %v2715_v51 = vld [vmem:[#allocation17 + $0x518] sm:$0xff]  ;;  %v8157_v53 = vpack.c.bf16 %v2696_v50, %v2680_v62  ;;  %v8285_v17 = vpack.c.bf16 %v2698_v47, %v2682_v2  ;;  %v8159_v26 = vpack.c.bf16 %v2729_v38, %v2713_v31  ;;  %v2712_v28 = vld [vmem:[#allocation17 + $0x500] sm:$0xff]  ;;  %v2714_v21 = vld [vmem:[#allocation17 + $0x510] sm:$0xff] }
 0x784   : > { %8150 = vmatpush1.bf16.msra.mxu0 %v8149_v25  ;;  %v2731_v55 = vld [vmem:[#allocation17 + $0x598] sm:$0xff]  ;;  %v2728_v61 = vld [vmem:[#allocation17 + $0x580] sm:$0xff]  ;;  %v2730_v35 = vld [vmem:[#allocation17 + $0x590] sm:$0xff] }
 0x785   : > { %8278 = vmatpush1.bf16.msra.mxu1 %v8277_v13  ;;  %8152 = vmatprep.subr.bf16.mxu0 %v8151_v9  ;;  %v8287_v42 = vpack.c.bf16 %v2731_v55, %v2715_v51  ;;  %v2745_v18 = vld [vmem:[#allocation17 + $0x608] sm:$0xff]  ;;  %v2747_v29 = vld [vmem:[#allocation17 + $0x618] sm:$0xff]  ;;  %v8161_v25 = vpack.c.bf16 %v2728_v61, %v2712_v28  ;;  %v8289_v13 = vpack.c.bf16 %v2730_v35, %v2714_v21  ;;  %v2744_v46 = vld [vmem:[#allocation17 + $0x600] sm:$0xff] }
 0x786   : > { %8280 = vmatprep.subr.bf16.mxu1 %v8279_v16  ;;  %v2761_v44 = vld [vmem:[#allocation17 + $0x688] sm:$0xff]  ;;  %v2763_v1 = vld [vmem:[#allocation17 + $0x698] sm:$0xff]  ;;  %v2760_v11 = vld [vmem:[#allocation17 + $0x680] sm:$0xff] }
 0x787   : > { %v8163_v9 = vpack.c.bf16 %v2761_v44, %v2745_v18  ;;  %v2746_v14 = vld [vmem:[#allocation17 + $0x610] sm:$0xff]  ;;  %v8291_v16 = vpack.c.bf16 %v2763_v1, %v2747_v29  ;;  %v2777_v52 = vld [vmem:[#allocation17 + $0x708] sm:$0xff]  ;;  %v2779_v22 = vld [vmem:[#allocation17 + $0x718] sm:$0xff] }
 0x788   : > { %8154 = vmatpush1.bf16.msra.mxu0 %v8153_v23  ;;  %v2762_v48 = vld [vmem:[#allocation17 + $0x690] sm:$0xff]  ;;  %v2793_v0 = vld [vmem:[#allocation17 + $0x788] sm:$0xff]  ;;  %v2795_v27 = vld [vmem:[#allocation17 + $0x798] sm:$0xff]  ;;  %v8165_v23 = vpack.c.bf16 %v2760_v11, %v2744_v46 }
 0x789   : > { %8282 = vmatpush1.bf16.msra.mxu1 %v8281_v30  ;;  %8156 = vmatprep.subr.bf16.mxu0 %v8155_v56  ;;  %v8293_v30 = vpack.c.bf16 %v2762_v48, %v2746_v14  ;;  %v8167_v56 = vpack.c.bf16 %v2793_v0, %v2777_v52  ;;  %v2776_v62 = vld [vmem:[#allocation17 + $0x700] sm:$0xff]  ;;  %v2778_v2 = vld [vmem:[#allocation17 + $0x710] sm:$0xff]  ;;  %v2809_v31 = vld [vmem:[#allocation17 + $0x808] sm:$0xff] }
 0x78a   : > { %8284 = vmatprep.subr.bf16.mxu1 %v8283_v39  ;;  %v2792_v50 = vld [vmem:[#allocation17 + $0x780] sm:$0xff]  ;;  %v8295_v39 = vpack.c.bf16 %v2795_v27, %v2779_v22  ;;  %v2794_v47 = vld [vmem:[#allocation17 + $0x790] sm:$0xff]  ;;  %v2825_v38 = vld [vmem:[#allocation17 + $0x888] sm:$0xff] }
 0x78b   : > { %v2811_v51 = vld [vmem:[#allocation17 + $0x818] sm:$0xff]  ;;  %v2808_v28 = vld [vmem:[#allocation17 + $0x800] sm:$0xff]  ;;  %v2810_v21 = vld [vmem:[#allocation17 + $0x810] sm:$0xff] }
 0x78c   : > { %8158 = vmatpush1.bf16.msra.mxu0 %v8157_v53  ;;  %v2827_v55 = vld [vmem:[#allocation17 + $0x898] sm:$0xff]  ;;  %v8169_v53 = vpack.c.bf16 %v2792_v50, %v2776_v62  ;;  %v2824_v61 = vld [vmem:[#allocation17 + $0x880] sm:$0xff]  ;;  %v2826_v35 = vld [vmem:[#allocation17 + $0x890] sm:$0xff] }
 0x78d   : > { %8286 = vmatpush1.bf16.msra.mxu1 %v8285_v17  ;;  %8160 = vmatprep.subr.bf16.mxu0 %v8159_v26  ;;  %v8297_v17 = vpack.c.bf16 %v2794_v47, %v2778_v2  ;;  %v8171_v26 = vpack.c.bf16 %v2825_v38, %v2809_v31  ;;  %v2841_v18 = vld [vmem:[#allocation17 + $0x908] sm:$0xff]  ;;  %v2843_v29 = vld [vmem:[#allocation17 + $0x918] sm:$0xff]  ;;  %v2840_v46 = vld [vmem:[#allocation17 + $0x900] sm:$0xff] }
 0x78e   : > { %8288 = vmatprep.subr.bf16.mxu1 %v8287_v42  ;;  %v8299_v42 = vpack.c.bf16 %v2827_v55, %v2811_v51  ;;  %v2857_v44 = vld [vmem:[#allocation17 + $0x988] sm:$0xff]  ;;  %v2859_v1 = vld [vmem:[#allocation17 + $0x998] sm:$0xff]  ;;  %v2856_v11 = vld [vmem:[#allocation17 + $0x980] sm:$0xff] }
 0x78f   : > { %v2842_v14 = vld [vmem:[#allocation17 + $0x910] sm:$0xff]  ;;  %v2873_v52 = vld [vmem:[#allocation17 + $0xa08] sm:$0xff]  ;;  %v2875_v22 = vld [vmem:[#allocation17 + $0xa18] sm:$0xff] }
 0x790   : > { %8162 = vmatpush1.bf16.msra.mxu0 %v8161_v25  ;;  %v8173_v25 = vpack.c.bf16 %v2824_v61, %v2808_v28  ;;  %v2858_v48 = vld [vmem:[#allocation17 + $0x990] sm:$0xff]  ;;  %v2889_v0 = vld [vmem:[#allocation17 + $0xa88] sm:$0xff]  ;;  %v2891_v27 = vld [vmem:[#allocation17 + $0xa98] sm:$0xff] }
 0x791   : > { %8290 = vmatpush1.bf16.msra.mxu1 %v8289_v13  ;;  %8164 = vmatprep.subr.bf16.mxu0 %v8163_v9  ;;  %v8301_v13 = vpack.c.bf16 %v2826_v35, %v2810_v21  ;;  %v8175_v9 = vpack.c.bf16 %v2857_v44, %v2841_v18  ;;  %v2872_v62 = vld [vmem:[#allocation17 + $0xa00] sm:$0xff]  ;;  %v2874_v2 = vld [vmem:[#allocation17 + $0xa10] sm:$0xff]  ;;  %v2905_v31 = vld [vmem:[#allocation17 + $0xb08] sm:$0xff] }
 0x792   : > { %8292 = vmatprep.subr.bf16.mxu1 %v8291_v16  ;;  %v8303_v16 = vpack.c.bf16 %v2859_v1, %v2843_v29  ;;  %v2888_v50 = vld [vmem:[#allocation17 + $0xa80] sm:$0xff]  ;;  %v2890_v47 = vld [vmem:[#allocation17 + $0xa90] sm:$0xff]  ;;  %v2921_v38 = vld [vmem:[#allocation17 + $0xb88] sm:$0xff] }
 0x793   : > { %v2907_v51 = vld [vmem:[#allocation17 + $0xb18] sm:$0xff]  ;;  %v2904_v28 = vld [vmem:[#allocation17 + $0xb00] sm:$0xff]  ;;  %v2906_v21 = vld [vmem:[#allocation17 + $0xb10] sm:$0xff] }
 0x794   : > { %8166 = vmatpush1.bf16.msra.mxu0 %v8165_v23  ;;  %v8177_v23 = vpack.c.bf16 %v2856_v11, %v2840_v46  ;;  %v2923_v55 = vld [vmem:[#allocation17 + $0xb98] sm:$0xff]  ;;  %v2920_v61 = vld [vmem:[#allocation17 + $0xb80] sm:$0xff]  ;;  %v2922_v35 = vld [vmem:[#allocation17 + $0xb90] sm:$0xff] }
 0x795   : > { %8294 = vmatpush1.bf16.msra.mxu1 %v8293_v30  ;;  %8168 = vmatprep.subr.bf16.mxu0 %v8167_v56  ;;  %v8305_v30 = vpack.c.bf16 %v2858_v48, %v2842_v14  ;;  %v8179_v56 = vpack.c.bf16 %v2889_v0, %v2873_v52  ;;  %v2937_v18 = vld [vmem:[#allocation17 + $0xc08] sm:$0xff]  ;;  %v2939_v29 = vld [vmem:[#allocation17 + $0xc18] sm:$0xff]  ;;  %v2936_v46 = vld [vmem:[#allocation17 + $0xc00] sm:$0xff] }
 0x796   : > { %8296 = vmatprep.subr.bf16.mxu1 %v8295_v39  ;;  %v8307_v39 = vpack.c.bf16 %v2891_v27, %v2875_v22  ;;  %v2953_v44 = vld [vmem:[#allocation17 + $0xc88] sm:$0xff]  ;;  %v2955_v1 = vld [vmem:[#allocation17 + $0xc98] sm:$0xff]  ;;  %v2952_v11 = vld [vmem:[#allocation17 + $0xc80] sm:$0xff] }
 0x797   : > { %v2938_v14 = vld [vmem:[#allocation17 + $0xc10] sm:$0xff]  ;;  %v2969_v52 = vld [vmem:[#allocation17 + $0xd08] sm:$0xff]  ;;  %v2971_v22 = vld [vmem:[#allocation17 + $0xd18] sm:$0xff] }
 0x798   : > { %8170 = vmatpush1.bf16.msra.mxu0 %v8169_v53  ;;  %v8181_v53 = vpack.c.bf16 %v2888_v50, %v2872_v62  ;;  %v2954_v48 = vld [vmem:[#allocation17 + $0xc90] sm:$0xff]  ;;  %v2985_v0 = vld [vmem:[#allocation17 + $0xd88] sm:$0xff]  ;;  %v2987_v27 = vld [vmem:[#allocation17 + $0xd98] sm:$0xff] }
 0x799   : > { %8298 = vmatpush1.bf16.msra.mxu1 %v8297_v17  ;;  %8172 = vmatprep.subr.bf16.mxu0 %v8171_v26  ;;  %v8309_v17 = vpack.c.bf16 %v2890_v47, %v2874_v2  ;;  %v8183_v26 = vpack.c.bf16 %v2921_v38, %v2905_v31  ;;  %v2968_v62 = vld [vmem:[#allocation17 + $0xd00] sm:$0xff]  ;;  %v2970_v2 = vld [vmem:[#allocation17 + $0xd10] sm:$0xff]  ;;  %v3001_v31 = vld [vmem:[#allocation17 + $0xe08] sm:$0xff] }
 0x79a   : > { %8300 = vmatprep.subr.bf16.mxu1 %v8299_v42  ;;  %v8311_v42 = vpack.c.bf16 %v2923_v55, %v2907_v51  ;;  %v2984_v50 = vld [vmem:[#allocation17 + $0xd80] sm:$0xff]  ;;  %v2986_v47 = vld [vmem:[#allocation17 + $0xd90] sm:$0xff]  ;;  %v3017_v38 = vld [vmem:[#allocation17 + $0xe88] sm:$0xff] }
 0x79b   : > { %v3003_v51 = vld [vmem:[#allocation17 + $0xe18] sm:$0xff] }
 0x79c   : > { %8174 = vmatpush1.bf16.msra.mxu0 %v8173_v25  ;;  %v8185_v25 = vpack.c.bf16 %v2920_v61, %v2904_v28  ;;  %v3019_v55 = vld [vmem:[#allocation17 + $0xe98] sm:$0xff]  ;;  %v3000_v28 = vld [vmem:[#allocation17 + $0xe00] sm:$0xff] }
 0x79d   : > { %8302 = vmatpush1.bf16.msra.mxu1 %v8301_v13  ;;  %8176 = vmatprep.subr.bf16.mxu0 %v8175_v9  ;;  %v8313_v13 = vpack.c.bf16 %v2922_v35, %v2906_v21  ;;  %v8187_v9 = vpack.c.bf16 %v2953_v44, %v2937_v18  ;;  %v3016_v61 = vld [vmem:[#allocation17 + $0xe80] sm:$0xff]  ;;  %v3002_v21 = vld [vmem:[#allocation17 + $0xe10] sm:$0xff]  ;;  %v3033_v18 = vld [vmem:[#allocation17 + $0xf08] sm:$0xff] }
 0x79e   : > { %8304 = vmatprep.subr.bf16.mxu1 %v8303_v16  ;;  %v8315_v16 = vpack.c.bf16 %v2955_v1, %v2939_v29  ;;  %v3018_v35 = vld [vmem:[#allocation17 + $0xe90] sm:$0xff]  ;;  %v3049_v44 = vld [vmem:[#allocation17 + $0xf88] sm:$0xff]  ;;  %v3035_v29 = vld [vmem:[#allocation17 + $0xf18] sm:$0xff] }
 0x79f   : > { %v3051_v1 = vld [vmem:[#allocation17 + $0xf98] sm:$0xff] }
 0x7a0   : > { %8178 = vmatpush1.bf16.msra.mxu0 %v8177_v23  ;;  %v8189_v23 = vpack.c.bf16 %v2952_v11, %v2936_v46  ;;  %v3032_v46 = vld [vmem:[#allocation17 + $0xf00] sm:$0xff] }
 0x7a1   : > { %8306 = vmatpush1.bf16.msra.mxu1 %v8305_v30  ;;  %8180 = vmatprep.subr.bf16.mxu0 %v8179_v56  ;;  %v8317_v30 = vpack.c.bf16 %v2954_v48, %v2938_v14  ;;  %v8191_v56 = vpack.c.bf16 %v2985_v0, %v2969_v52  ;;  %v3048_v11 = vld [vmem:[#allocation17 + $0xf80] sm:$0xff]  ;;  %v3034_v14 = vld [vmem:[#allocation17 + $0xf10] sm:$0xff]  ;;  %v3065_v52 = vld [vmem:[#allocation17 + $0x1008] sm:$0xff] }
 0x7a2   : > { %8308 = vmatprep.subr.bf16.mxu1 %v8307_v39  ;;  %v8319_v39 = vpack.c.bf16 %v2987_v27, %v2971_v22  ;;  %v3050_v48 = vld [vmem:[#allocation17 + $0xf90] sm:$0xff]  ;;  %v3081_v0 = vld [vmem:[#allocation17 + $0x1088] sm:$0xff]  ;;  %v3067_v22 = vld [vmem:[#allocation17 + $0x1018] sm:$0xff] }
 0x7a3   : > { %v3083_v27 = vld [vmem:[#allocation17 + $0x1098] sm:$0xff] }
 0x7a4   : > { %8182 = vmatpush1.bf16.msra.mxu0 %v8181_v53  ;;  %v8193_v53 = vpack.c.bf16 %v2984_v50, %v2968_v62  ;;  %v8331_v62 = vpack.c.bf16 %v3083_v27, %v3067_v22 }
 0x7a5   : > { %8310 = vmatpush1.bf16.msra.mxu1 %v8309_v17  ;;  %8184 = vmatprep.subr.bf16.mxu0 %v8183_v26  ;;  %v8321_v17 = vpack.c.bf16 %v2986_v47, %v2970_v2  ;;  %v8195_v26 = vpack.c.bf16 %v3017_v38, %v3001_v31 }
 0x7a6   : > { %8312 = vmatprep.subr.bf16.mxu1 %v8311_v42  ;;  %v8323_v42 = vpack.c.bf16 %v3019_v55, %v3003_v51 }
 0x7a8   : > { %8186 = vmatpush1.bf16.msra.mxu0 %v8185_v25  ;;  %v8197_v25 = vpack.c.bf16 %v3016_v61, %v3000_v28 }
 0x7a9   : > { %8314 = vmatpush1.bf16.msra.mxu1 %v8313_v13  ;;  %8188 = vmatprep.subr.bf16.mxu0 %v8187_v9  ;;  %v8325_v13 = vpack.c.bf16 %v3018_v35, %v3002_v21  ;;  %v8199_v9 = vpack.c.bf16 %v3049_v44, %v3033_v18  ;;  %v3064_v44 = vld [vmem:[#allocation17 + $0x1000] sm:$0xff] }
 0x7aa   : > { %8316 = vmatprep.subr.bf16.mxu1 %v8315_v16  ;;  %v8327_v16 = vpack.c.bf16 %v3051_v1, %v3035_v29  ;;  %v14062_v1 = vld [vmem:[#allocation82_spill] sm:$0xff] }
 0x7ab   : > { %v14065_v22 = vsub.s32 2, %v14062_v1 }
 0x7ac   : > { %8190 = vmatpush1.bf16.msra.mxu0 %v8189_v23  ;;  %v8201_v23 = vpack.c.bf16 %v3048_v11, %v3032_v46  ;;  %v3080_v11 = vld [vmem:[#allocation17 + $0x1080] sm:$0xff] }
 0x7ad   : > { %8318 = vmatpush1.bf16.msra.mxu1 %v8317_v30  ;;  %8192 = vmatprep.subr.bf16.mxu0 %v8191_v56  ;;  %v8329_v30 = vpack.c.bf16 %v3050_v48, %v3034_v14  ;;  %v8203_v56 = vpack.c.bf16 %v3081_v0, %v3065_v52  ;;  %v3066_v14 = vld [vmem:[#allocation17 + $0x1010] sm:$0xff]  ;;  %v3097_v52 = vld [vmem:[#allocation17 + $0x1108] sm:$0xff] }
 0x7ae   : > { %8320 = vmatprep.subr.bf16.mxu1 %v8319_v39  ;;  %v3113_v0 = vld [vmem:[#allocation17 + $0x1188] sm:$0xff] }
 0x7b0   : > { %8194 = vmatpush1.bf16.msra.mxu0 %v8193_v53 }
 0x7b1   : > { %8322 = vmatpush1.bf16.msra.mxu1 %v8321_v17  ;;  %8196 = vmatprep.subr.bf16.mxu0 %v8195_v26 }
 0x7b2   : > { %8324 = vmatprep.subr.bf16.mxu1 %v8323_v42  ;;  %v12378_v42 = vld [vmem:[#allocation12] sm:$0xf] }
 0x7b3   : > { %v12395_v27 = vrot.slane %v12378_v42, %v14065_v22 }
 0x7b4   : > { %8198 = vmatpush1.bf16.msra.mxu0 %v8197_v25  ;;  %v14063_v25 = vsub.s32 1, %v14062_v1 }
 0x7b5   : > { %8326 = vmatpush1.bf16.msra.mxu1 %v8325_v13  ;;  %8200 = vmatprep.subr.bf16.mxu0 %v8199_v9  ;;  %v14064_v9 = vsub.s32 0, %v14062_v1 }
 0x7b6   : > { %8328 = vmatprep.subr.bf16.mxu1 %v8327_v16  ;;  %v12383_v13 = vrot.slane %v12378_v42, %v14063_v25  ;;  %v3082_v16 = vld [vmem:[#allocation17 + $0x1090] sm:$0xff] }
 0x7b7   : > { %v12388_v46 = vrot.slane %v12378_v42, %v14064_v9 }
 0x7b8   : > { %8202 = vmatpush1.bf16.msra.mxu0 %v8201_v23 }
 0x7b9   : > { %8330 = vmatpush1.bf16.msra.mxu1 %v8329_v30  ;;  %8204 = vmatprep.subr.bf16.mxu0 %v8203_v56 }
 0x7ba   : > { %8332 = vmatprep.subr.bf16.mxu1 %v8331_v62  ;;  %v3099_v62 = vld [vmem:[#allocation17 + $0x1118] sm:$0xff] }
 0x7fa   : > { %v2406_v50 = vpop.xlane.xlu0 %2405 }
 0x7fb   : > { %v2442_v2 = vmul.f32 0.001953125, %v2406_v50  ;;  %v3115_v50 = vld [vmem:[#allocation17 + $0x1198] sm:$0xff] }
 0x7fd   : > { %v2451_v39 = vadd.f32 1e-06, %v2442_v2 }
 0x7fe   : > { %v2411_v47 = vpop.xlane.xlu0 %2410 }
 0x7ff   : > { %v2416_v31 = vpop.xlane.xlu1 %2415  ;;  %10122 = vrsqrt.f32 %v2451_v39  ;;  %v2443_v38 = vmul.f32 0.001953125, %v2411_v47  ;;  %v8205_v39 = vpack.c.bf16 %v3080_v11, %v3064_v44  ;;  %v8333_v47 = vpack.c.bf16 %v3082_v16, %v3066_v14 }
 0x800   : > { %v2444_v51 = vmul.f32 0.001953125, %v2416_v31 }
 0x801   : > { %v2452_v55 = vadd.f32 1e-06, %v2443_v38  ;;  %v3096_v38 = vld [vmem:[#allocation17 + $0x1100] sm:$0xff] }
 0x802   : > { %v2453_v53 = vadd.f32 1e-06, %v2444_v51  ;;  %v3112_v51 = vld [vmem:[#allocation17 + $0x1180] sm:$0xff] }
 0x803   : > { %v2421_v17 = vpop.xlane.xlu1 %2420  ;;  %10124 = vrsqrt.f32 %v2452_v55  ;;  %v8209_v16 = vpack.c.bf16 %v3112_v51, %v3096_v38  ;;  %v3128_v38 = vld [vmem:[#allocation17 + $0x1200] sm:$0xff] }
 0x804   : > { %v2445_v26 = vmul.f32 0.001953125, %v2421_v17  ;;  %10126 = vrsqrt.f32 %v2453_v53  ;;  %v3144_v51 = vld [vmem:[#allocation17 + $0x1280] sm:$0xff] }
 0x805   : > { %v2426_v28 = vpop.xlane.xlu0 %2425 }
 0x806   : > { %v2454_v61 = vadd.f32 1e-06, %v2445_v26  ;;  %v2446_v21 = vmul.f32 0.001953125, %v2426_v28  ;;  %v8207_v26 = vpack.c.bf16 %v3113_v0, %v3097_v52  ;;  %v3098_v28 = vld [vmem:[#allocation17 + $0x1110] sm:$0xff]  ;;  %v3129_v52 = vld [vmem:[#allocation17 + $0x1208] sm:$0xff] }
 0x807   : > { %v3145_v0 = vld [vmem:[#allocation17 + $0x1288] sm:$0xff] }
 0x808   : > { %10128 = vrsqrt.f32 %v2454_v61  ;;  %v2455_v35 = vadd.f32 1e-06, %v2446_v21  ;;  %v2431_v18 = vpop.xlane.xlu1 %2430  ;;  %v3114_v61 = vld [vmem:[#allocation17 + $0x1190] sm:$0xff] }
 0x809   : > { %v2447_v29 = vmul.f32 0.001953125, %v2431_v18  ;;  %v12390_v48 = vpop.eup %10122  ;;  %v8335_v18 = vpack.c.bf16 %v3115_v50, %v3099_v62  ;;  %v8337_v22 = vpack.c.bf16 %v3114_v61, %v3098_v28 }
 0x80a   : > { %10130 = vrsqrt.f32 %v2455_v35  ;;  %v2468_v30 = vmul.f32 %v12390_v48, %v12222_v19  ;;  %v2467_v56 = vmul.f32 %v12390_v48, %v12219_v3  ;;  %v2469_v55 = vmul.f32 %v12390_v48, %v12225_v33  ;;  %v3257_v33 = vld [vmem:[#allocation17 + $0x1608] sm:$0xff] }
 0x80b   : > { %v2456_v23 = vadd.f32 1e-06, %v2447_v29  ;;  %v2436_v2 = vpop.xlane.xlu0 %2435  ;;  %v3273_v3 = vld [vmem:[#allocation17 + $0x1688] sm:$0xff] }
 0x80c   : > { %v2448_v31 = vmul.f32 0.001953125, %v2436_v2  ;;  %v12404_v53 = vmul.f32 %v12383_v13, %v2468_v30  ;;  %v12407_v17 = vmul.f32 %v12388_v46, %v2467_v56  ;;  %v12412_v25 = vmul.f32 %v12395_v27, %v2469_v55  ;;  %v3131_v30 = vld [vmem:[#allocation17 + $0x1218] sm:$0xff]  ;;  %v3130_v55 = vld [vmem:[#allocation17 + $0x1210] sm:$0xff] }
 0x80d   : > { %10132 = vrsqrt.f32 %v2456_v23  ;;  %v2441_v21 = vpop.xlane.xlu1 %2440  ;;  %v12409_v35 = vpop.eup %10124  ;;  %v3147_v56 = vld [vmem:[#allocation17 + $0x1298] sm:$0xff] }
 0x80e   : > { %v2457_v44 = vadd.f32 1e-06, %v2448_v31  ;;  %v2449_v29 = vmul.f32 0.001953125, %v2441_v21  ;;  %v12414_v9 = vpop.eup %10126  ;;  %3640 = vmatprep.mubr.f32.mxu0 %v12404_v53  ;;  %3866 = vmatprep.mubr.f32.mxu1 %v12404_v53  ;;  %v2472_v11 = vmul.f32 %v12409_v35, %v12234_v15  ;;  %v2471_v14 = vmul.f32 %v12409_v35, %v12231_v4  ;;  %v3161_v21 = vld [vmem:[#allocation17 + $0x1308] sm:$0xff]  ;;  %v3176_v15 = vld [vmem:[#allocation17 + $0x1380] sm:$0xff] }
 0x80f   : > { %3641 = vmatmul.mubr.f32.vlgmr.msra.gmra.mrb[0].mxu0 %v12407_v17  ;;  %3867 = vmatmul.mubr.f32.vlgmr.msra.gmra.mrb[0].mxu1 %v12407_v17  ;;  %v2476_v23 = vmul.f32 %v12414_v9, %v12260_v63  ;;  %v2475_v62 = vmul.f32 %v12414_v9, %v12257_v54  ;;  %v3160_v54 = vld [vmem:[#allocation17 + $0x1300] sm:$0xff] }
 0x810   : > { %8206 = vmatpush1.bf16.msra.mxu0 %v8205_v39  ;;  %8334 = vmatpush1.bf16.msra.mxu1 %v8333_v47  ;;  %v12429_v50 = vmul.f32 %v12383_v13, %v2472_v11  ;;  %10134 = vrsqrt.f32 %v2457_v44  ;;  %v12432_v2 = vmul.f32 %v12388_v46, %v2471_v14  ;;  %v2458_v31 = vadd.f32 1e-06, %v2449_v29  ;;  %v3146_v47 = vld [vmem:[#allocation17 + $0x1290] sm:$0xff]  ;;  %v3177_v11 = vld [vmem:[#allocation17 + $0x1388] sm:$0xff] }
 0x811   : > { %8208 = vmatprep.subr.bf16.mxu0 %v8207_v26  ;;  %8336 = vmatprep.subr.bf16.mxu1 %v8335_v18  ;;  %v12437_v61 = vmul.f32 %v12383_v13, %v2476_v23  ;;  %v8211_v39 = vpack.c.bf16 %v3145_v0, %v3129_v52  ;;  %v2473_v44 = vmul.f32 %v12409_v35, %v12243_v36  ;;  %v3163_v52 = vld [vmem:[#allocation17 + $0x1318] sm:$0xff] }
 0x812   : > { %v12434_v28 = vpop.eup %10128  ;;  %3646 = vmatprep.mubr.f32.mxu0 %v12429_v50  ;;  %3872 = vmatprep.mubr.f32.mxu1 %v12429_v50  ;;  %v8339_v29 = vpack.c.bf16 %v3147_v56, %v3131_v30  ;;  %v12444_v14 = vmul.f32 %v12388_v46, %v2475_v62  ;;  %v3179_v0 = vld [vmem:[#allocation17 + $0x1398] sm:$0xff]  ;;  %v2477_v30 = vmul.f32 %v12414_v9, %v12265_v6  ;;  %10136 = vrsqrt.f32 %v2458_v31  ;;  %v3226_v6 = vld [vmem:[#allocation17 + $0x1510] sm:$0xff] }
 0x813   : > { %v2480_v26 = vmul.f32 %v12434_v28, %v12282_v34  ;;  %3647 = vmatmul.mubr.f32.gmra.mrb[2].mxu0 %v12432_v2  ;;  %3873 = vmatmul.mubr.f32.gmra.mrb[2].mxu1 %v12432_v2  ;;  %v2479_v23 = vmul.f32 %v12434_v28, %v12275_v45  ;;  %v12455_v63 = vmul.f32 %v12395_v27, %v2473_v44  ;;  %v3162_v45 = vld [vmem:[#allocation17 + $0x1310] sm:$0xff] }
 0x814   : > { %v12448_v18 = vpop.eup %10130  ;;  %8210 = vmatpush1.bf16.msra.mxu0 %v8209_v16  ;;  %8338 = vmatpush1.bf16.msra.mxu1 %v8337_v22  ;;  %v8213_v56 = vpack.c.bf16 %v3144_v51, %v3128_v38  ;;  %v8341_v62 = vpack.c.bf16 %v3146_v47, %v3130_v55  ;;  %v8215_v34 = vpack.c.bf16 %v3177_v11, %v3161_v21  ;;  %v3178_v44 = vld [vmem:[#allocation17 + $0x1390] sm:$0xff]  ;;  %v3193_v38 = vld [vmem:[#allocation17 + $0x1408] sm:$0xff]  ;;  %v3195_v11 = vld [vmem:[#allocation17 + $0x1418] sm:$0xff] }
 0x815   : > { %3652 = vmatprep.mubr.f32.mxu0 %v12437_v61  ;;  %8212 = vmatprep.subr.bf16.mxu0 %v8211_v39  ;;  %v12461_v36 = vmul.f32 %v12383_v13, %v2480_v26  ;;  %v2484_v4 = vmul.f32 %v12448_v18, %v12302_v24  ;;  %v12466_v16 = vmul.f32 %v12395_v27, %v2477_v30  ;;  %v3209_v51 = vld [vmem:[#allocation17 + $0x1488] sm:$0xff]  ;;  %v3211_v26 = vld [vmem:[#allocation17 + $0x1498] sm:$0xff]  ;;  %v3194_v30 = vld [vmem:[#allocation17 + $0x1410] sm:$0xff] }
 0x816   : > { %3878 = vmatprep.mubr.f32.mxu1 %v12437_v61  ;;  %8340 = vmatprep.subr.bf16.mxu1 %v8339_v29  ;;  %v8343_v31 = vpack.c.bf16 %v3179_v0, %v3163_v52  ;;  %v2483_v55 = vmul.f32 %v12448_v18, %v12295_v7  ;;  %v2481_v39 = vmul.f32 %v12434_v28, %v12285_v60  ;;  %v3192_v52 = vld [vmem:[#allocation17 + $0x1400] sm:$0xff] }
 0x817   : > { %v12468_v22 = vpop.eup %10132  ;;  %3653 = vmatmul.mubr.f32.gmra.mrb[4].mxu0 %v12444_v14  ;;  %3879 = vmatmul.mubr.f32.gmra.mrb[4].mxu1 %v12444_v14  ;;  %v12478_v47 = vmul.f32 %v12388_v46, %v2479_v23  ;;  %v8217_v21 = vpack.c.bf16 %v3176_v15, %v3160_v54  ;;  %v8345_v29 = vpack.c.bf16 %v3178_v44, %v3162_v45  ;;  %v3208_v0 = vld [vmem:[#allocation17 + $0x1480] sm:$0xff]  ;;  %v3210_v54 = vld [vmem:[#allocation17 + $0x1490] sm:$0xff] }
 0x818   : > { %8214 = vmatpush1.bf16.msra.mxu0 %v8213_v56  ;;  %8342 = vmatpush1.bf16.msra.mxu1 %v8341_v62  ;;  %v12481_v24 = vmul.f32 %v12395_v27, %v2481_v39  ;;  %v2485_v7 = vmul.f32 %v12448_v18, %v12305_v40  ;;  %v12487_v23 = vmul.f32 %v12383_v13, %v2484_v4  ;;  %v3225_v56 = vld [vmem:[#allocation17 + $0x1508] sm:$0xff]  ;;  %v3243_v4 = vld [vmem:[#allocation17 + $0x1598] sm:$0xff] }
 0x819   : > { %3658 = vmatprep.mubr.f32.mxu0 %v12461_v36  ;;  %8216 = vmatprep.subr.bf16.mxu0 %v8215_v34  ;;  %v8219_v15 = vpack.c.bf16 %v3209_v51, %v3193_v38  ;;  %v2488_v45 = vmul.f32 %v12468_v22, %v12318_v59  ;;  %v3241_v62 = vld [vmem:[#allocation17 + $0x1588] sm:$0xff]  ;;  %v8347_v39 = vpack.c.bf16 %v3211_v26, %v3195_v11  ;;  %v3227_v34 = vld [vmem:[#allocation17 + $0x1518] sm:$0xff]  ;;  %v3224_v51 = vld [vmem:[#allocation17 + $0x1500] sm:$0xff] }
 0x81a   : > { %v12491_v44 = vpop.eup %10134  ;;  %3884 = vmatprep.mubr.f32.mxu1 %v12461_v36  ;;  %8344 = vmatprep.subr.bf16.mxu1 %v8343_v31  ;;  %v12495_v40 = vmul.f32 %v12388_v46, %v2483_v55  ;;  %v2487_v38 = vmul.f32 %v12468_v22, %v12315_v58  ;;  %v3240_v59 = vld [vmem:[#allocation17 + $0x1580] sm:$0xff]  ;;  %v12502_v60 = vmul.f32 %v12395_v27, %v2485_v7  ;;  %v3242_v58 = vld [vmem:[#allocation17 + $0x1590] sm:$0xff] }
 0x81b   : > { %3659 = vmatmul.mubr.f32.gmra.mrb[6].mxu0 %v12478_v47  ;;  %3885 = vmatmul.mubr.f32.gmra.mrb[6].mxu1 %v12478_v47  ;;  %v2489_v31 = vmul.f32 %v12468_v22, %v12325_v32  ;;  %v8221_v55 = vpack.c.bf16 %v3208_v0, %v3192_v52  ;;  %v8349_v11 = vpack.c.bf16 %v3210_v54, %v3194_v30  ;;  %v3275_v54 = vld [vmem:[#allocation17 + $0x1698] sm:$0xff] }
 0x81c   : > { %8218 = vmatpush1.bf16.msra.mxu0 %v8217_v21  ;;  %8346 = vmatpush1.bf16.msra.mxu1 %v8345_v29  ;;  %v8223_v26 = vpack.c.bf16 %v3241_v62, %v3225_v56  ;;  %v12508_v19 = vmul.f32 %v12383_v13, %v2488_v45  ;;  %v2492_v7 = vmul.f32 %v12491_v44, %v12342_v43  ;;  %v12515_v21 = vpop.eup %10136 }
 0x81d   : > { %3664 = vmatprep.mubr.f32.mxu0 %v12487_v23  ;;  %8220 = vmatprep.subr.bf16.mxu0 %v8219_v15  ;;  %v12513_v32 = vmul.f32 %v12395_v27, %v2489_v31  ;;  %v8351_v29 = vpack.c.bf16 %v3243_v4, %v3227_v34  ;;  %v8225_v52 = vpack.c.bf16 %v3240_v59, %v3224_v51  ;;  %v3259_v15 = vld [vmem:[#allocation17 + $0x1618] sm:$0xff]  ;;  %v3258_v51 = vld [vmem:[#allocation17 + $0x1610] sm:$0xff] }
 0x81e   : > { %3890 = vmatprep.mubr.f32.mxu1 %v12487_v23  ;;  %8348 = vmatprep.subr.bf16.mxu1 %v8347_v39  ;;  %v2493_v0 = vmul.f32 %v12491_v44, %v12345_v12  ;;  %v12523_v30 = vmul.f32 %v12388_v46, %v2487_v38  ;;  %v2491_v45 = vmul.f32 %v12491_v44, %v12337_v8  ;;  %v3256_v39 = vld [vmem:[#allocation17 + $0x1600] sm:$0xff]  ;;  %v3274_v31 = vld [vmem:[#allocation17 + $0x1690] sm:$0xff]  ;;  %v2765_v8 = vld [vmem:[#allocation17 + $0x6a8] sm:$0xff] }
 0x81f   : > { %3665 = vmatmul.mubr.f32.gmra.mrb[8].mxu0 %v12495_v40  ;;  %3891 = vmatmul.mubr.f32.gmra.mrb[8].mxu1 %v12495_v40  ;;  %v2497_v56 = vmul.f32 %v12515_v21, %v12365_v5  ;;  %v8353_v59 = vpack.c.bf16 %v3242_v58, %v3226_v6  ;;  %v8227_v62 = vpack.c.bf16 %v3273_v3, %v3257_v33  ;;  %v3272_v38 = vld [vmem:[#allocation17 + $0x1680] sm:$0xff]  ;;  %v3289_v33 = vld [vmem:[#allocation17 + $0x1708] sm:$0xff] }
 0x820   : > { %8222 = vmatpush1.bf16.msra.mxu0 %v8221_v55  ;;  %8350 = vmatpush1.bf16.msra.mxu1 %v8349_v11  ;;  %v12530_v34 = vmul.f32 %v12395_v27, %v2493_v0  ;;  %v12534_v4 = vmul.f32 %v12383_v13, %v2492_v7  ;;  %v2496_v5 = vmul.f32 %v12515_v21, %v12360_v57  ;;  %v3305_v6 = vld [vmem:[#allocation17 + $0x1788] sm:$0xff]  ;;  %v3291_v11 = vld [vmem:[#allocation17 + $0x1718] sm:$0xff]  ;;  %v3306_v57 = vld [vmem:[#allocation17 + $0x1790] sm:$0xff] }
 0x821   : > { %3670 = vmatprep.mubr.f32.mxu0 %v12508_v19  ;;  %8224 = vmatprep.subr.bf16.mxu0 %v8223_v26  ;;  %v12539_v55 = vmul.f32 %v12395_v27, %v2497_v56  ;;  %v8355_v3 = vpack.c.bf16 %v3275_v54, %v3259_v15  ;;  %v12545_v58 = vmul.f32 %v12388_v46, %v2491_v45  ;;  %v3307_v26 = vld [vmem:[#allocation17 + $0x1798] sm:$0xff]  ;;  %v3304_v56 = vld [vmem:[#allocation17 + $0x1780] sm:$0xff]  ;;  %v3290_v45 = vld [vmem:[#allocation17 + $0x1710] sm:$0xff] }
 0x822   : > { %3896 = vmatprep.mubr.f32.mxu1 %v12508_v19  ;;  %8352 = vmatprep.subr.bf16.mxu1 %v8351_v29  ;;  %v2495_v7 = vmul.f32 %v12515_v21, %v12353_v37  ;;  %v8229_v27 = vpack.c.bf16 %v3272_v38, %v3256_v39  ;;  %v8357_v0 = vpack.c.bf16 %v3274_v31, %v3258_v51  ;;  %v3288_v29 = vld [vmem:[#allocation17 + $0x1700] sm:$0xff]  ;;  %v3321_v37 = vld [vmem:[#allocation17 + $0x1808] sm:$0xff]  ;;  %v3323_v39 = vld [vmem:[#allocation17 + $0x1818] sm:$0xff] }
 0x823   : > { %3671 = vmatmul.mubr.f32.gmra.mrb[10].mxu0 %v12523_v30  ;;  %3897 = vmatmul.mubr.f32.gmra.mrb[10].mxu1 %v12523_v30  ;;  %v12551_v15 = vmul.f32 %v12383_v13, %v2496_v5  ;;  %v8231_v54 = vpack.c.bf16 %v3305_v6, %v3289_v33  ;;  %v8359_v43 = vpack.c.bf16 %v3307_v26, %v3291_v11  ;;  %v14066_v13 = vsub.s32 3, %v14062_v1  ;;  %v3339_v38 = vld [vmem:[#allocation17 + $0x1898] sm:$0xff]  ;;  %v3336_v33 = vld [vmem:[#allocation17 + $0x1880] sm:$0xff]  ;;  %v3338_v6 = vld [vmem:[#allocation17 + $0x1890] sm:$0xff] }
 0x824   : > { %8226 = vmatpush1.bf16.msra.mxu0 %v8225_v52  ;;  %8354 = vmatpush1.bf16.msra.mxu1 %v8353_v59  ;;  %v12557_v52 = vmul.f32 %v12388_v46, %v2495_v7  ;;  %v2470_v5 = vmul.f32 %v12390_v48, %v12228_v20  ;;  %v8233_v51 = vpack.c.bf16 %v3304_v56, %v3288_v29  ;;  %v3322_v46 = vld [vmem:[#allocation17 + $0x1810] sm:$0xff]  ;;  %v3353_v48 = vld [vmem:[#allocation17 + $0x1908] sm:$0xff]  ;;  %v3355_v26 = vld [vmem:[#allocation17 + $0x1918] sm:$0xff] }
 0x825   : > { %3676 = vmatprep.mubr.f32.mxu0 %v12534_v4  ;;  %8228 = vmatprep.subr.bf16.mxu0 %v8227_v62  ;;  %v12564_v59 = vrot.slane %v12378_v42, %v14066_v13  ;;  %v3337_v62 = vld [vmem:[#allocation17 + $0x1888] sm:$0xff]  ;;  %v8361_v31 = vpack.c.bf16 %v3306_v57, %v3290_v45  ;;  %v8363_v1 = vpack.c.bf16 %v3339_v38, %v3323_v39  ;;  %v3371_v7 = vld [vmem:[#allocation17 + $0x1998] sm:$0xff]  ;;  %v3352_v29 = vld [vmem:[#allocation17 + $0x1900] sm:$0xff] }
 0x826   : > { %3902 = vmatprep.mubr.f32.mxu1 %v12534_v4  ;;  %8356 = vmatprep.subr.bf16.mxu1 %v8355_v3  ;;  %v3320_v3 = vld [vmem:[#allocation17 + $0x1800] sm:$0xff]  ;;  %v8235_v42 = vpack.c.bf16 %v3337_v62, %v3321_v37  ;;  %v3369_v11 = vld [vmem:[#allocation17 + $0x1988] sm:$0xff]  ;;  %v8367_v37 = vpack.c.bf16 %v3371_v7, %v3355_v26  ;;  %v3354_v56 = vld [vmem:[#allocation17 + $0x1910] sm:$0xff] }
 0x827   : > { %3677 = vmatmul.mubr.f32.gmra.mrb[12].mxu0 %v12545_v58  ;;  %3903 = vmatmul.mubr.f32.gmra.mrb[12].mxu1 %v12545_v58  ;;  %v12571_v57 = vmul.f32 %v12564_v59, %v2470_v5  ;;  %v3370_v45 = vld [vmem:[#allocation17 + $0x1990] sm:$0xff]  ;;  %v3385_v13 = vld [vmem:[#allocation17 + $0x1a08] sm:$0xff]  ;;  %v3387_v5 = vld [vmem:[#allocation17 + $0x1a18] sm:$0xff] }
 0x828   : > { %8230 = vmatpush1.bf16.msra.mxu0 %v8229_v27  ;;  %8358 = vmatpush1.bf16.msra.mxu1 %v8357_v0  ;;  %v8237_v27 = vpack.c.bf16 %v3336_v33, %v3320_v3  ;;  %v8365_v0 = vpack.c.bf16 %v3338_v6, %v3322_v46  ;;  %v3401_v62 = vld [vmem:[#allocation17 + $0x1a88] sm:$0xff]  ;;  %v3403_v39 = vld [vmem:[#allocation17 + $0x1a98] sm:$0xff]  ;;  %v3400_v3 = vld [vmem:[#allocation17 + $0x1a80] sm:$0xff] }
 0x829   : > { %3682 = vmatprep.mubr.f32.mxu0 %v12551_v15  ;;  %8232 = vmatprep.subr.bf16.mxu0 %v8231_v54  ;;  %v3368_v54 = vld [vmem:[#allocation17 + $0x1980] sm:$0xff]  ;;  %v8243_v33 = vpack.c.bf16 %v3401_v62, %v3385_v13  ;;  %v8371_v46 = vpack.c.bf16 %v3403_v39, %v3387_v5  ;;  %v3386_v6 = vld [vmem:[#allocation17 + $0x1a10] sm:$0xff]  ;;  %v3433_v26 = vld [vmem:[#allocation17 + $0x1b88] sm:$0xff] }
 0x82a   : > { %3908 = vmatprep.mubr.f32.mxu1 %v12551_v15  ;;  %8360 = vmatprep.subr.bf16.mxu1 %v8359_v43  ;;  %v8239_v43 = vpack.c.bf16 %v3369_v11, %v3353_v48  ;;  %v8241_v38 = vpack.c.bf16 %v3368_v54, %v3352_v29  ;;  %v3402_v48 = vld [vmem:[#allocation17 + $0x1a90] sm:$0xff]  ;;  %v3417_v11 = vld [vmem:[#allocation17 + $0x1b08] sm:$0xff]  ;;  %v3419_v7 = vld [vmem:[#allocation17 + $0x1b18] sm:$0xff] }
 0x82b   : > { %3683 = vmatmul.mubr.f32.gmra.mrb[14].mxu0 %v12557_v52  ;;  %3909 = vmatmul.mubr.f32.gmra.mrb[14].mxu1 %v12557_v52  ;;  %v8373_v12 = vpack.c.bf16 %v3402_v48, %v3386_v6  ;;  %v8247_v29 = vpack.c.bf16 %v3433_v26, %v3417_v11  ;;  %v3451_v13 = vld [vmem:[#allocation17 + $0x1c18] sm:$0xff]  ;;  %v3481_v6 = vld [vmem:[#allocation17 + $0x1d08] sm:$0xff]  ;;  %v3346_v20 = vld [vmem:[#allocation17 + $0x18d0] sm:$0xff] }
 0x82c   : > { %8234 = vmatpush1.bf16.msra.mxu0 %v8233_v51  ;;  %8362 = vmatpush1.bf16.msra.mxu1 %v8361_v31  ;;  %v8369_v51 = vpack.c.bf16 %v3370_v45, %v3354_v56  ;;  %v3384_v31 = vld [vmem:[#allocation17 + $0x1a00] sm:$0xff]  ;;  %v3449_v56 = vld [vmem:[#allocation17 + $0x1c08] sm:$0xff]  ;;  %v3467_v62 = vld [vmem:[#allocation17 + $0x1c98] sm:$0xff] }
 0x82d   : > { %3753 = vmatprep.mubr.f32.mxu0 %v12571_v57  ;;  %3979 = vmatprep.mubr.f32.mxu1 %v12571_v57  ;;  %v3465_v45 = vld [vmem:[#allocation17 + $0x1c88] sm:$0xff]  ;;  %v3483_v11 = vld [vmem:[#allocation17 + $0x1d18] sm:$0xff] }
 0x82e   : > { %8236 = vmatprep.subr.bf16.mxu0 %v8235_v42  ;;  %8364 = vmatprep.subr.bf16.mxu1 %v8363_v1  ;;  %v3435_v42 = vld [vmem:[#allocation17 + $0x1b98] sm:$0xff]  ;;  %v8245_v1 = vpack.c.bf16 %v3400_v3, %v3384_v31  ;;  %v8251_v31 = vpack.c.bf16 %v3465_v45, %v3449_v56  ;;  %v8379_v3 = vpack.c.bf16 %v3467_v62, %v3451_v13  ;;  %v3497_v48 = vld [vmem:[#allocation17 + $0x1d88] sm:$0xff] }
 0x82f   : > { %v8375_v54 = vpack.c.bf16 %v3435_v42, %v3419_v7  ;;  %v3499_v26 = vld [vmem:[#allocation17 + $0x1d98] sm:$0xff] }
 0x830   : > { %8238 = vmatpush1.bf16.msra.mxu0 %v8237_v27  ;;  %8366 = vmatpush1.bf16.msra.mxu1 %v8365_v0  ;;  %v3416_v27 = vld [vmem:[#allocation17 + $0x1b00] sm:$0xff]  ;;  %v3515_v56 = vld [vmem:[#allocation17 + $0x1e18] sm:$0xff] }
 0x831   : > { %8240 = vmatprep.subr.bf16.mxu0 %v8239_v43  ;;  %8368 = vmatprep.subr.bf16.mxu1 %v8367_v37  ;;  %v3432_v0 = vld [vmem:[#allocation17 + $0x1b80] sm:$0xff]  ;;  %v3418_v43 = vld [vmem:[#allocation17 + $0x1b10] sm:$0xff]  ;;  %v3531_v45 = vld [vmem:[#allocation17 + $0x1e98] sm:$0xff] }
 0x832   : > { %v3434_v37 = vld [vmem:[#allocation17 + $0x1b90] sm:$0xff]  ;;  %v8249_v5 = vpack.c.bf16 %v3432_v0, %v3416_v27  ;;  %v8255_v27 = vpack.c.bf16 %v3497_v48, %v3481_v6  ;;  %v8383_v0 = vpack.c.bf16 %v3499_v26, %v3483_v11  ;;  %v3547_v6 = vld [vmem:[#allocation17 + $0x1f18] sm:$0xff] }
 0x833   : > { %v8377_v39 = vpack.c.bf16 %v3434_v37, %v3418_v43  ;;  %v3513_v43 = vld [vmem:[#allocation17 + $0x1e08] sm:$0xff]  ;;  %v3563_v48 = vld [vmem:[#allocation17 + $0x1f98] sm:$0xff] }
 0x834   : > { %8242 = vmatpush1.bf16.msra.mxu0 %v8241_v38  ;;  %8370 = vmatpush1.bf16.msra.mxu1 %v8369_v51  ;;  %v3448_v38 = vld [vmem:[#allocation17 + $0x1c00] sm:$0xff]  ;;  %v3529_v37 = vld [vmem:[#allocation17 + $0x1e88] sm:$0xff] }
 0x835   : > { %8244 = vmatprep.subr.bf16.mxu0 %v8243_v33  ;;  %8372 = vmatprep.subr.bf16.mxu1 %v8371_v46  ;;  %v3464_v51 = vld [vmem:[#allocation17 + $0x1c80] sm:$0xff]  ;;  %v3450_v33 = vld [vmem:[#allocation17 + $0x1c10] sm:$0xff] }
 0x836   : > { %v3466_v46 = vld [vmem:[#allocation17 + $0x1c90] sm:$0xff]  ;;  %v8253_v7 = vpack.c.bf16 %v3464_v51, %v3448_v38  ;;  %v8259_v38 = vpack.c.bf16 %v3529_v37, %v3513_v43  ;;  %v8387_v51 = vpack.c.bf16 %v3531_v45, %v3515_v56  ;;  %v2559_v43 = vld [vmem:[#allocation17 + $0x38] sm:$0xff] }
 0x837   : > { %v8381_v42 = vpack.c.bf16 %v3466_v46, %v3450_v33  ;;  %v3545_v33 = vld [vmem:[#allocation17 + $0x1f08] sm:$0xff]  ;;  %v2575_v37 = vld [vmem:[#allocation17 + $0xb8] sm:$0xff] }
 0x838   : > { %8246 = vmatpush1.bf16.msra.mxu0 %v8245_v1  ;;  %8374 = vmatpush1.bf16.msra.mxu1 %v8373_v12  ;;  %v3480_v1 = vld [vmem:[#allocation17 + $0x1d00] sm:$0xff]  ;;  %v3561_v46 = vld [vmem:[#allocation17 + $0x1f88] sm:$0xff] }
 0x839   : > { %8248 = vmatprep.subr.bf16.mxu0 %v8247_v29  ;;  %8376 = vmatprep.subr.bf16.mxu1 %v8375_v54  ;;  %v3496_v12 = vld [vmem:[#allocation17 + $0x1d80] sm:$0xff]  ;;  %v3482_v29 = vld [vmem:[#allocation17 + $0x1d10] sm:$0xff] }
 0x83a   : > { %v3498_v54 = vld [vmem:[#allocation17 + $0x1d90] sm:$0xff]  ;;  %v8257_v13 = vpack.c.bf16 %v3496_v12, %v3480_v1  ;;  %v8263_v1 = vpack.c.bf16 %v3561_v46, %v3545_v33  ;;  %v8391_v12 = vpack.c.bf16 %v3563_v48, %v3547_v6  ;;  %v2605_v33 = vld [vmem:[#allocation17 + $0x1a8] sm:$0xff]  ;;  %v2591_v46 = vld [vmem:[#allocation17 + $0x138] sm:$0xff] }
 0x83b   : > { %v8385_v62 = vpack.c.bf16 %v3498_v54, %v3482_v29  ;;  %v2557_v29 = vld [vmem:[#allocation17 + $0x28] sm:$0xff]  ;;  %v2607_v6 = vld [vmem:[#allocation17 + $0x1b8] sm:$0xff] }
 0x83c   : > { %8250 = vmatpush1.bf16.msra.mxu0 %v8249_v5  ;;  %8378 = vmatpush1.bf16.msra.mxu1 %v8377_v39  ;;  %v3512_v5 = vld [vmem:[#allocation17 + $0x1e00] sm:$0xff]  ;;  %v2573_v54 = vld [vmem:[#allocation17 + $0xa8] sm:$0xff] }
 0x83d   : > { %8252 = vmatprep.subr.bf16.mxu0 %v8251_v31  ;;  %8380 = vmatprep.subr.bf16.mxu1 %v8379_v3  ;;  %v3528_v39 = vld [vmem:[#allocation17 + $0x1e80] sm:$0xff]  ;;  %v3514_v31 = vld [vmem:[#allocation17 + $0x1e10] sm:$0xff] }
 0x83e   : > { %v3530_v3 = vld [vmem:[#allocation17 + $0x1e90] sm:$0xff]  ;;  %v8261_v11 = vpack.c.bf16 %v3528_v39, %v3512_v5  ;;  %v2556_v5 = vld [vmem:[#allocation17 + $0x20] sm:$0xff] }
 0x83f   : > { %v8389_v26 = vpack.c.bf16 %v3530_v3, %v3514_v31  ;;  %v2572_v39 = vld [vmem:[#allocation17 + $0xa0] sm:$0xff]  ;;  %v2574_v31 = vld [vmem:[#allocation17 + $0xb0] sm:$0xff]  ;;  %v2589_v3 = vld [vmem:[#allocation17 + $0x128] sm:$0xff] }
 0x840   : > { %8254 = vmatpush1.bf16.msra.mxu0 %v8253_v7  ;;  %8382 = vmatpush1.bf16.msra.mxu1 %v8381_v42  ;;  %v3544_v7 = vld [vmem:[#allocation17 + $0x1f00] sm:$0xff]  ;;  %v8397_v48 = vpack.c.bf16 %v2572_v39, %v2556_v5  ;;  %v2622_v5 = vld [vmem:[#allocation17 + $0x230] sm:$0xff] }
 0x841   : > { %8256 = vmatprep.subr.bf16.mxu0 %v8255_v27  ;;  %8384 = vmatprep.subr.bf16.mxu1 %v8383_v0  ;;  %v3560_v42 = vld [vmem:[#allocation17 + $0x1f80] sm:$0xff]  ;;  %v3546_v27 = vld [vmem:[#allocation17 + $0x1f10] sm:$0xff] }
 0x842   : > { %v3562_v0 = vld [vmem:[#allocation17 + $0x1f90] sm:$0xff]  ;;  %v8265_v56 = vpack.c.bf16 %v3560_v42, %v3544_v7  ;;  %v2604_v7 = vld [vmem:[#allocation17 + $0x1a0] sm:$0xff] }
 0x843   : > { %v8393_v45 = vpack.c.bf16 %v3562_v0, %v3546_v27  ;;  %v2590_v42 = vld [vmem:[#allocation17 + $0x130] sm:$0xff]  ;;  %v2478_v27 = vmul.f32 %v12414_v9, %v12268_v10  ;;  %v2636_v9 = vld [vmem:[#allocation17 + $0x2a0] sm:$0xff] }
 0x844   : > { %8258 = vmatpush1.bf16.msra.mxu0 %v8257_v13  ;;  %8386 = vmatpush1.bf16.msra.mxu1 %v8385_v62  ;;  %v8395_v13 = vpack.c.bf16 %v2573_v54, %v2557_v29  ;;  %v8523_v62 = vpack.c.bf16 %v2575_v37, %v2559_v43  ;;  %v2606_v0 = vld [vmem:[#allocation17 + $0x1b0] sm:$0xff]  ;;  %v2621_v29 = vld [vmem:[#allocation17 + $0x228] sm:$0xff]  ;;  %v2623_v43 = vld [vmem:[#allocation17 + $0x238] sm:$0xff] }
 0x845   : > { %8260 = vmatprep.subr.bf16.mxu0 %v8259_v38  ;;  %8388 = vmatprep.subr.bf16.mxu1 %v8387_v51  ;;  %v2474_v38 = vmul.f32 %v12409_v35, %v12248_v49  ;;  %v2558_v51 = vld [vmem:[#allocation17 + $0x30] sm:$0xff]  ;;  %v8527_v35 = vpack.c.bf16 %v2607_v6, %v2591_v46  ;;  %v2637_v54 = vld [vmem:[#allocation17 + $0x2a8] sm:$0xff]  ;;  %v2639_v37 = vld [vmem:[#allocation17 + $0x2b8] sm:$0xff]  ;;  %v12587_v39 = vmul.f32 %v12564_v59, %v2478_v27 }
 0x846   : > { %v2655_v46 = vld [vmem:[#allocation17 + $0x338] sm:$0xff] }
 0x847   : > { %v2671_v6 = vld [vmem:[#allocation17 + $0x3b8] sm:$0xff] }
 0x848   : > { %8262 = vmatpush1.bf16.msra.mxu0 %v8261_v11  ;;  %8390 = vmatpush1.bf16.msra.mxu1 %v8389_v26  ;;  %v8525_v11 = vpack.c.bf16 %v2574_v31, %v2558_v51  ;;  %v2588_v26 = vld [vmem:[#allocation17 + $0x120] sm:$0xff]  ;;  %v2482_v51 = vmul.f32 %v12434_v28, %v12288_v41  ;;  %v2638_v31 = vld [vmem:[#allocation17 + $0x2b0] sm:$0xff]  ;;  %v14067_v27 = vld [vmem:[#allocation84_spill] sm:$0xff] }
 0x849   : > { %8264 = vmatprep.subr.bf16.mxu0 %v8263_v1  ;;  %8392 = vmatprep.subr.bf16.mxu1 %v8391_v12  ;;  %v12578_v1 = vmul.f32 %v12564_v59, %v2474_v38  ;;  %v8399_v12 = vpack.c.bf16 %v2605_v33, %v2589_v3  ;;  %v8531_v38 = vpack.c.bf16 %v2639_v37, %v2623_v43  ;;  %v2653_v3 = vld [vmem:[#allocation17 + $0x328] sm:$0xff]  ;;  %v2668_v28 = vld [vmem:[#allocation17 + $0x3a0] sm:$0xff]  ;;  %v2687_v37 = vld [vmem:[#allocation17 + $0x438] sm:$0xff] }
 0x84a   : > { %v2669_v33 = vld [vmem:[#allocation17 + $0x3a8] sm:$0xff] }
 0x84b   : > { %v2701_v43 = vld [vmem:[#allocation17 + $0x4a8] sm:$0xff] }
 0x84c   : > { %8266 = vmatpush1.bf16.msra.mxu0 %v8265_v56  ;;  %8394 = vmatpush1.bf16.msra.mxu1 %v8393_v45  ;;  %v8401_v56 = vpack.c.bf16 %v2604_v7, %v2588_v26  ;;  %v8529_v45 = vpack.c.bf16 %v2606_v0, %v2590_v42  ;;  %v8407_v26 = vpack.c.bf16 %v2669_v33, %v2653_v3  ;;  %v2652_v7 = vld [vmem:[#allocation17 + $0x320] sm:$0xff]  ;;  %v2654_v42 = vld [vmem:[#allocation17 + $0x330] sm:$0xff]  ;;  %v3345_v41 = vld [vmem:[#allocation17 + $0x18c8] sm:$0xff] }
 0x84d   : > { %8396 = vmatprep.subr.bf16.mxu0 %v8395_v13  ;;  %8524 = vmatprep.subr.bf16.mxu1 %v8523_v62  ;;  %v8403_v13 = vpack.c.bf16 %v2637_v54, %v2621_v29  ;;  %v2620_v62 = vld [vmem:[#allocation17 + $0x220] sm:$0xff]  ;;  %v2486_v0 = vmul.f32 %v12448_v18, %v14067_v27  ;;  %v2670_v29 = vld [vmem:[#allocation17 + $0x3b0] sm:$0xff]  ;;  %v2685_v54 = vld [vmem:[#allocation17 + $0x428] sm:$0xff] }
 0x84e   : > { %v2700_v18 = vld [vmem:[#allocation17 + $0x4a0] sm:$0xff]  ;;  %v2702_v33 = vld [vmem:[#allocation17 + $0x4b0] sm:$0xff] }
 0x84f   : > { %3754 = vmatmul.mubr.f32.vlgmr.msra.gmra.mrb[0].mxu0 %v12412_v25  ;;  %3980 = vmatmul.mubr.f32.vlgmr.msra.gmra.mrb[0].mxu1 %v12412_v25  ;;  %v3314_v27 = vld [vmem:[#allocation17 + $0x17d0] sm:$0xff] }
 0x850   : > { %3759 = vmatprep.mubr.f32.mxu0 %v12578_v1  ;;  %3985 = vmatprep.mubr.f32.mxu1 %v12578_v1 }
 0x851   : > { %8398 = vmatpush1.bf16.msra.mxu0 %v8397_v48  ;;  %8526 = vmatpush1.bf16.msra.mxu1 %v8525_v11  ;;  %v8405_v48 = vpack.c.bf16 %v2636_v9, %v2620_v62  ;;  %v8533_v11 = vpack.c.bf16 %v2638_v31, %v2622_v5  ;;  %v8411_v62 = vpack.c.bf16 %v2701_v43, %v2685_v54  ;;  %v2684_v9 = vld [vmem:[#allocation17 + $0x420] sm:$0xff]  ;;  %v2686_v5 = vld [vmem:[#allocation17 + $0x430] sm:$0xff]  ;;  %v14068_v31 = vld [vmem:[#allocation88_spill] sm:$0xff] }
 0x852   : > { %8400 = vmatprep.subr.bf16.mxu0 %v8399_v12  ;;  %8528 = vmatprep.subr.bf16.mxu1 %v8527_v35  ;;  %v12596_v12 = vmul.f32 %v12564_v59, %v2482_v51  ;;  %v8535_v35 = vpack.c.bf16 %v2671_v6, %v2655_v46  ;;  %v2490_v3 = vmul.f32 %v12468_v22, %v14068_v31  ;;  %v2717_v46 = vld [vmem:[#allocation17 + $0x528] sm:$0xff]  ;;  %v2732_v22 = vld [vmem:[#allocation17 + $0x5a0] sm:$0xff]  ;;  %v14069_v54 = vld [vmem:[#allocation92_spill] sm:$0xff] }
 0x853   : > { %3760 = vmatmul.mubr.f32.gmra.mrb[2].mxu0 %v12455_v63  ;;  %3986 = vmatmul.mubr.f32.gmra.mrb[2].mxu1 %v12455_v63  ;;  %v2733_v6 = vld [vmem:[#allocation17 + $0x5a8] sm:$0xff]  ;;  %v2494_v43 = vmul.f32 %v12491_v44, %v14069_v54  ;;  %v2764_v44 = vld [vmem:[#allocation17 + $0x6a0] sm:$0xff] }
 0x854   : > { %3765 = vmatprep.mubr.f32.mxu0 %v12587_v39  ;;  %3991 = vmatprep.mubr.f32.mxu1 %v12587_v39 }
 0x855   : > { %8402 = vmatpush1.bf16.msra.mxu0 %v8401_v56  ;;  %8530 = vmatpush1.bf16.msra.mxu1 %v8529_v45  ;;  %v2703_v56 = vld [vmem:[#allocation17 + $0x4b8] sm:$0xff]  ;;  %v8409_v45 = vpack.c.bf16 %v2668_v28, %v2652_v7  ;;  %v8541_v7 = vpack.c.bf16 %v2702_v33, %v2686_v5  ;;  %v8415_v28 = vpack.c.bf16 %v2733_v6, %v2717_v46  ;;  %v2748_v5 = vld [vmem:[#allocation17 + $0x620] sm:$0xff]  ;;  %v2750_v6 = vld [vmem:[#allocation17 + $0x630] sm:$0xff] }
 0x856   : > { %8404 = vmatprep.subr.bf16.mxu0 %v8403_v13  ;;  %8532 = vmatprep.subr.bf16.mxu1 %v8531_v38  ;;  %v8537_v13 = vpack.c.bf16 %v2670_v29, %v2654_v42  ;;  %v12605_v38 = vmul.f32 %v12564_v59, %v2486_v0  ;;  %v8539_v51 = vpack.c.bf16 %v2703_v56, %v2687_v37  ;;  %v2716_v42 = vld [vmem:[#allocation17 + $0x520] sm:$0xff]  ;;  %v2734_v37 = vld [vmem:[#allocation17 + $0x5b0] sm:$0xff]  ;;  %v2749_v56 = vld [vmem:[#allocation17 + $0x628] sm:$0xff] }
 0x857   : > { %3766 = vmatmul.mubr.f32.gmra.mrb[4].mxu0 %v12466_v16  ;;  %3992 = vmatmul.mubr.f32.gmra.mrb[4].mxu1 %v12466_v16  ;;  %v12614_v0 = vmul.f32 %v12564_v59, %v2490_v3  ;;  %v14070_v33 = vld [vmem:[#allocation96_spill] sm:$0xff] }
 0x858   : > { %3771 = vmatprep.mubr.f32.mxu0 %v12596_v12  ;;  %3997 = vmatprep.mubr.f32.mxu1 %v12596_v12  ;;  %v2498_v46 = vmul.f32 %v12515_v21, %v14070_v33  ;;  %v2796_v21 = vld [vmem:[#allocation17 + $0x7a0] sm:$0xff] }
 0x859   : > { %8406 = vmatpush1.bf16.msra.mxu0 %v8405_v48  ;;  %8534 = vmatpush1.bf16.msra.mxu1 %v8533_v11  ;;  %v2719_v48 = vld [vmem:[#allocation17 + $0x538] sm:$0xff] }
 0x85a   : > { %8408 = vmatprep.subr.bf16.mxu0 %v8407_v26  ;;  %8536 = vmatprep.subr.bf16.mxu1 %v8535_v35  ;;  %v2735_v11 = vld [vmem:[#allocation17 + $0x5b8] sm:$0xff]  ;;  %v8413_v26 = vpack.c.bf16 %v2700_v18, %v2684_v9  ;;  %v2718_v35 = vld [vmem:[#allocation17 + $0x530] sm:$0xff]  ;;  %v8419_v18 = vpack.c.bf16 %v2765_v8, %v2749_v56 }
 0x85b   : > { %3772 = vmatmul.mubr.f32.gmra.mrb[6].mxu0 %v12481_v24  ;;  %3998 = vmatmul.mubr.f32.gmra.mrb[6].mxu1 %v12481_v24  ;;  %v8543_v29 = vpack.c.bf16 %v2735_v11, %v2719_v48  ;;  %v8545_v9 = vpack.c.bf16 %v2734_v37, %v2718_v35  ;;  %v2766_v48 = vld [vmem:[#allocation17 + $0x6b0] sm:$0xff]  ;;  %v2781_v11 = vld [vmem:[#allocation17 + $0x728] sm:$0xff]  ;;  %v2783_v8 = vld [vmem:[#allocation17 + $0x738] sm:$0xff]  ;;  %v12632_v35 = vmul.f32 %v12564_v59, %v2498_v46 }
 0x85c   : > { %3777 = vmatprep.mubr.f32.mxu0 %v12605_v38  ;;  %4003 = vmatprep.mubr.f32.mxu1 %v12605_v38  ;;  %v2782_v37 = vld [vmem:[#allocation17 + $0x730] sm:$0xff] }
 0x85d   : > { %8410 = vmatpush1.bf16.msra.mxu0 %v8409_v45  ;;  %8538 = vmatpush1.bf16.msra.mxu1 %v8537_v13  ;;  %v2751_v45 = vld [vmem:[#allocation17 + $0x638] sm:$0xff]  ;;  %v2798_v56 = vld [vmem:[#allocation17 + $0x7b0] sm:$0xff] }
 0x85e   : > { %8412 = vmatprep.subr.bf16.mxu0 %v8411_v62  ;;  %8540 = vmatprep.subr.bf16.mxu1 %v8539_v51  ;;  %v2767_v13 = vld [vmem:[#allocation17 + $0x6b8] sm:$0xff]  ;;  %v8417_v62 = vpack.c.bf16 %v2732_v22, %v2716_v42  ;;  %v12623_v51 = vmul.f32 %v12564_v59, %v2494_v43  ;;  %v8549_v42 = vpack.c.bf16 %v2766_v48, %v2750_v6  ;;  %v2780_v22 = vld [vmem:[#allocation17 + $0x720] sm:$0xff]  ;;  %v2814_v6 = vld [vmem:[#allocation17 + $0x830] sm:$0xff] }
 0x85f   : > { %3778 = vmatmul.mubr.f32.gmra.mrb[8].mxu0 %v12502_v60  ;;  %4004 = vmatmul.mubr.f32.gmra.mrb[8].mxu1 %v12502_v60  ;;  %v8547_v3 = vpack.c.bf16 %v2767_v13, %v2751_v45  ;;  %v2813_v45 = vld [vmem:[#allocation17 + $0x828] sm:$0xff]  ;;  %v8425_v59 = vpack.c.bf16 %v2796_v21, %v2780_v22  ;;  %v2830_v48 = vld [vmem:[#allocation17 + $0x8b0] sm:$0xff]  ;;  %v2844_v22 = vld [vmem:[#allocation17 + $0x920] sm:$0xff] }
 0x860   : > { %3783 = vmatprep.mubr.f32.mxu0 %v12614_v0  ;;  %4009 = vmatprep.mubr.f32.mxu1 %v12614_v0  ;;  %v2829_v13 = vld [vmem:[#allocation17 + $0x8a8] sm:$0xff]  ;;  %v2860_v21 = vld [vmem:[#allocation17 + $0x9a0] sm:$0xff] }
 0x861   : > { %8414 = vmatpush1.bf16.msra.mxu0 %v8413_v26  ;;  %8542 = vmatpush1.bf16.msra.mxu1 %v8541_v7  ;;  %v2797_v26 = vld [vmem:[#allocation17 + $0x7a8] sm:$0xff]  ;;  %v2799_v7 = vld [vmem:[#allocation17 + $0x7b8] sm:$0xff]  ;;  %v8433_v33 = vpack.c.bf16 %v2860_v21, %v2844_v22 }
 0x862   : > { %8416 = vmatprep.subr.bf16.mxu0 %v8415_v28  ;;  %8544 = vmatprep.subr.bf16.mxu1 %v8543_v29  ;;  %v8421_v28 = vpack.c.bf16 %v2764_v44, %v2748_v5  ;;  %v8423_v29 = vpack.c.bf16 %v2797_v26, %v2781_v11  ;;  %v8551_v43 = vpack.c.bf16 %v2799_v7, %v2783_v8  ;;  %v2812_v5 = vld [vmem:[#allocation17 + $0x820] sm:$0xff]  ;;  %v2845_v11 = vld [vmem:[#allocation17 + $0x928] sm:$0xff]  ;;  %v2847_v8 = vld [vmem:[#allocation17 + $0x938] sm:$0xff] }
 0x863   : > { %3784 = vmatmul.mubr.f32.gmra.mrb[10].mxu0 %v12513_v32  ;;  %4010 = vmatmul.mubr.f32.gmra.mrb[10].mxu1 %v12513_v32  ;;  %v2828_v44 = vld [vmem:[#allocation17 + $0x8a0] sm:$0xff]  ;;  %v2861_v26 = vld [vmem:[#allocation17 + $0x9a8] sm:$0xff]  ;;  %v2863_v7 = vld [vmem:[#allocation17 + $0x9b8] sm:$0xff] }
 0x864   : > { %3789 = vmatprep.mubr.f32.mxu0 %v12623_v51  ;;  %4015 = vmatprep.mubr.f32.mxu1 %v12623_v51 }
 0x865   : > { %8418 = vmatpush1.bf16.msra.mxu0 %v8417_v62  ;;  %8546 = vmatpush1.bf16.msra.mxu1 %v8545_v9  ;;  %v2815_v62 = vld [vmem:[#allocation17 + $0x838] sm:$0xff] }
 0x866   : > { %8420 = vmatprep.subr.bf16.mxu0 %v8419_v18  ;;  %8548 = vmatprep.subr.bf16.mxu1 %v8547_v3  ;;  %v2831_v9 = vld [vmem:[#allocation17 + $0x8b8] sm:$0xff]  ;;  %v8553_v18 = vpack.c.bf16 %v2798_v56, %v2782_v37  ;;  %v8427_v3 = vpack.c.bf16 %v2829_v13, %v2813_v45  ;;  %v2846_v37 = vld [vmem:[#allocation17 + $0x930] sm:$0xff]  ;;  %v2877_v45 = vld [vmem:[#allocation17 + $0xa28] sm:$0xff] }
 0x867   : > { %3790 = vmatmul.mubr.f32.gmra.mrb[12].mxu0 %v12530_v34  ;;  %4016 = vmatmul.mubr.f32.gmra.mrb[12].mxu1 %v12530_v34  ;;  %v8555_v46 = vpack.c.bf16 %v2831_v9, %v2815_v62  ;;  %v2862_v56 = vld [vmem:[#allocation17 + $0x9b0] sm:$0xff]  ;;  %v2893_v13 = vld [vmem:[#allocation17 + $0xaa8] sm:$0xff]  ;;  %v2879_v62 = vld [vmem:[#allocation17 + $0xa38] sm:$0xff] }
 0x868   : > { %3795 = vmatprep.mubr.f32.mxu0 %v12632_v35  ;;  %4021 = vmatprep.mubr.f32.mxu1 %v12632_v35  ;;  %v2895_v9 = vld [vmem:[#allocation17 + $0xab8] sm:$0xff]  ;;  %v8561_v54 = vpack.c.bf16 %v2862_v56, %v2846_v37  ;;  %v2941_v37 = vld [vmem:[#allocation17 + $0xc28] sm:$0xff] }
 0x869   : > { %8422 = vmatpush1.bf16.msra.mxu0 %v8421_v28  ;;  %8550 = vmatpush1.bf16.msra.mxu1 %v8549_v42  ;;  %v8429_v28 = vpack.c.bf16 %v2828_v44, %v2812_v5  ;;  %v8557_v42 = vpack.c.bf16 %v2830_v48, %v2814_v6  ;;  %v8435_v5 = vpack.c.bf16 %v2893_v13, %v2877_v45  ;;  %v2909_v6 = vld [vmem:[#allocation17 + $0xb28] sm:$0xff]  ;;  %v2943_v45 = vld [vmem:[#allocation17 + $0xc38] sm:$0xff] }
 0x86a   : > { %8424 = vmatprep.subr.bf16.mxu0 %v8423_v29  ;;  %8552 = vmatprep.subr.bf16.mxu1 %v8551_v43  ;;  %v8431_v29 = vpack.c.bf16 %v2861_v26, %v2845_v11  ;;  %v8559_v43 = vpack.c.bf16 %v2863_v7, %v2847_v8  ;;  %v8563_v44 = vpack.c.bf16 %v2895_v9, %v2879_v62  ;;  %v2925_v48 = vld [vmem:[#allocation17 + $0xba8] sm:$0xff]  ;;  %v2911_v11 = vld [vmem:[#allocation17 + $0xb38] sm:$0xff] }
 0x86b   : > { %3796 = vmatmul.mubr.f32.gmra.mrb[14].mxu0 %v12539_v55  ;;  %4022 = vmatmul.mubr.f32.gmra.mrb[14].mxu1 %v12539_v55  ;;  %v2927_v26 = vld [vmem:[#allocation17 + $0xbb8] sm:$0xff]  ;;  %v8439_v22 = vpack.c.bf16 %v2925_v48, %v2909_v6  ;;  %v2957_v56 = vld [vmem:[#allocation17 + $0xca8] sm:$0xff] }
 0x86c   : > { %4092 = vmatprep.mubr.f32.mxu0 %v12404_v53  ;;  %4318 = vmatprep.mubr.f32.mxu1 %v12404_v53  ;;  %v8567_v21 = vpack.c.bf16 %v2927_v26, %v2911_v11  ;;  %v2959_v13 = vld [vmem:[#allocation17 + $0xcb8] sm:$0xff] }
 0x86d   : > { %8426 = vmatpush1.bf16.msra.mxu0 %v8425_v59  ;;  %8554 = vmatpush1.bf16.msra.mxu1 %v8553_v18  ;;  %v2876_v59 = vld [vmem:[#allocation17 + $0xa20] sm:$0xff]  ;;  %v2975_v6 = vld [vmem:[#allocation17 + $0xd38] sm:$0xff] }
 0x86e   : > { %8428 = vmatprep.subr.bf16.mxu0 %v8427_v3  ;;  %8556 = vmatprep.subr.bf16.mxu1 %v8555_v46  ;;  %v2892_v18 = vld [vmem:[#allocation17 + $0xaa0] sm:$0xff]  ;;  %v2878_v3 = vld [vmem:[#allocation17 + $0xa30] sm:$0xff]  ;;  %v2991_v48 = vld [vmem:[#allocation17 + $0xdb8] sm:$0xff] }
 0x86f   : > { %v2894_v46 = vld [vmem:[#allocation17 + $0xab0] sm:$0xff]  ;;  %v8437_v8 = vpack.c.bf16 %v2892_v18, %v2876_v59  ;;  %v8443_v59 = vpack.c.bf16 %v2957_v56, %v2941_v37  ;;  %v8571_v18 = vpack.c.bf16 %v2959_v13, %v2943_v45  ;;  %v3007_v37 = vld [vmem:[#allocation17 + $0xe38] sm:$0xff] }
 0x870   : > { %v8565_v7 = vpack.c.bf16 %v2894_v46, %v2878_v3  ;;  %v2973_v3 = vld [vmem:[#allocation17 + $0xd28] sm:$0xff]  ;;  %v3023_v56 = vld [vmem:[#allocation17 + $0xeb8] sm:$0xff] }
 0x871   : > { %8430 = vmatpush1.bf16.msra.mxu0 %v8429_v28  ;;  %8558 = vmatpush1.bf16.msra.mxu1 %v8557_v42  ;;  %v2908_v28 = vld [vmem:[#allocation17 + $0xb20] sm:$0xff]  ;;  %v2989_v46 = vld [vmem:[#allocation17 + $0xda8] sm:$0xff] }
 0x872   : > { %8432 = vmatprep.subr.bf16.mxu0 %v8431_v29  ;;  %8560 = vmatprep.subr.bf16.mxu1 %v8559_v43  ;;  %v2924_v42 = vld [vmem:[#allocation17 + $0xba0] sm:$0xff]  ;;  %v2910_v29 = vld [vmem:[#allocation17 + $0xb30] sm:$0xff] }
 0x873   : > { %v2926_v43 = vld [vmem:[#allocation17 + $0xbb0] sm:$0xff]  ;;  %v8441_v62 = vpack.c.bf16 %v2924_v42, %v2908_v28  ;;  %v8447_v28 = vpack.c.bf16 %v2989_v46, %v2973_v3  ;;  %v8575_v42 = vpack.c.bf16 %v2991_v48, %v2975_v6  ;;  %v3039_v3 = vld [vmem:[#allocation17 + $0xf38] sm:$0xff] }
 0x874   : > { %v8569_v9 = vpack.c.bf16 %v2926_v43, %v2910_v29  ;;  %v3005_v29 = vld [vmem:[#allocation17 + $0xe28] sm:$0xff]  ;;  %v3055_v46 = vld [vmem:[#allocation17 + $0xfb8] sm:$0xff] }
 0x875   : > { %8434 = vmatpush1.bf16.msra.mxu0 %v8433_v33  ;;  %8562 = vmatpush1.bf16.msra.mxu1 %v8561_v54  ;;  %v2940_v33 = vld [vmem:[#allocation17 + $0xc20] sm:$0xff]  ;;  %v3021_v43 = vld [vmem:[#allocation17 + $0xea8] sm:$0xff] }
 0x876   : > { %8436 = vmatprep.subr.bf16.mxu0 %v8435_v5  ;;  %8564 = vmatprep.subr.bf16.mxu1 %v8563_v44  ;;  %v2956_v54 = vld [vmem:[#allocation17 + $0xca0] sm:$0xff]  ;;  %v2942_v5 = vld [vmem:[#allocation17 + $0xc30] sm:$0xff] }
 0x877   : > { %v2958_v44 = vld [vmem:[#allocation17 + $0xcb0] sm:$0xff]  ;;  %v8445_v11 = vpack.c.bf16 %v2956_v54, %v2940_v33  ;;  %v8451_v33 = vpack.c.bf16 %v3021_v43, %v3005_v29  ;;  %v8579_v54 = vpack.c.bf16 %v3023_v56, %v3007_v37  ;;  %v3071_v29 = vld [vmem:[#allocation17 + $0x1038] sm:$0xff] }
 0x878   : > { %v8573_v26 = vpack.c.bf16 %v2958_v44, %v2942_v5  ;;  %v3037_v5 = vld [vmem:[#allocation17 + $0xf28] sm:$0xff]  ;;  %v3087_v43 = vld [vmem:[#allocation17 + $0x10b8] sm:$0xff] }
 0x879   : > { %8438 = vmatpush1.bf16.msra.mxu0 %v8437_v8  ;;  %8566 = vmatpush1.bf16.msra.mxu1 %v8565_v7  ;;  %v2972_v8 = vld [vmem:[#allocation17 + $0xd20] sm:$0xff]  ;;  %v3053_v44 = vld [vmem:[#allocation17 + $0xfa8] sm:$0xff] }
 0x87a   : > { %8440 = vmatprep.subr.bf16.mxu0 %v8439_v22  ;;  %8568 = vmatprep.subr.bf16.mxu1 %v8567_v21  ;;  %v2988_v7 = vld [vmem:[#allocation17 + $0xda0] sm:$0xff]  ;;  %v2974_v22 = vld [vmem:[#allocation17 + $0xd30] sm:$0xff] }
 0x87b   : > { %v2990_v21 = vld [vmem:[#allocation17 + $0xdb0] sm:$0xff]  ;;  %v8449_v45 = vpack.c.bf16 %v2988_v7, %v2972_v8  ;;  %v8455_v8 = vpack.c.bf16 %v3053_v44, %v3037_v5  ;;  %v8583_v7 = vpack.c.bf16 %v3055_v46, %v3039_v3  ;;  %v3103_v5 = vld [vmem:[#allocation17 + $0x1138] sm:$0xff] }
 0x87c   : > { %v8577_v13 = vpack.c.bf16 %v2990_v21, %v2974_v22  ;;  %v3069_v22 = vld [vmem:[#allocation17 + $0x1028] sm:$0xff]  ;;  %v3119_v44 = vld [vmem:[#allocation17 + $0x11b8] sm:$0xff] }
 0x87d   : > { %8442 = vmatpush1.bf16.msra.mxu0 %v8441_v62  ;;  %8570 = vmatpush1.bf16.msra.mxu1 %v8569_v9  ;;  %v3004_v62 = vld [vmem:[#allocation17 + $0xe20] sm:$0xff]  ;;  %v3085_v21 = vld [vmem:[#allocation17 + $0x10a8] sm:$0xff] }
 0x87e   : > { %8444 = vmatprep.subr.bf16.mxu0 %v8443_v59  ;;  %8572 = vmatprep.subr.bf16.mxu1 %v8571_v18  ;;  %v3020_v9 = vld [vmem:[#allocation17 + $0xea0] sm:$0xff]  ;;  %v3006_v59 = vld [vmem:[#allocation17 + $0xe30] sm:$0xff] }
 0x87f   : > { %v3022_v18 = vld [vmem:[#allocation17 + $0xeb0] sm:$0xff]  ;;  %v8453_v6 = vpack.c.bf16 %v3020_v9, %v3004_v62  ;;  %v3068_v62 = vld [vmem:[#allocation17 + $0x1020] sm:$0xff] }
 0x880   : > { %v8581_v48 = vpack.c.bf16 %v3022_v18, %v3006_v59  ;;  %v3084_v9 = vld [vmem:[#allocation17 + $0x10a0] sm:$0xff]  ;;  %v3101_v59 = vld [vmem:[#allocation17 + $0x1128] sm:$0xff] }
 0x881   : > { %8446 = vmatpush1.bf16.msra.mxu0 %v8445_v11  ;;  %8574 = vmatpush1.bf16.msra.mxu1 %v8573_v26  ;;  %v3036_v11 = vld [vmem:[#allocation17 + $0xf20] sm:$0xff]  ;;  %v3117_v18 = vld [vmem:[#allocation17 + $0x11a8] sm:$0xff]  ;;  %v8461_v3 = vpack.c.bf16 %v3084_v9, %v3068_v62  ;;  %v3134_v62 = vld [vmem:[#allocation17 + $0x1230] sm:$0xff] }
 0x882   : > { %8448 = vmatprep.subr.bf16.mxu0 %v8447_v28  ;;  %8576 = vmatprep.subr.bf16.mxu1 %v8575_v42  ;;  %v3052_v26 = vld [vmem:[#allocation17 + $0xfa0] sm:$0xff]  ;;  %v3038_v28 = vld [vmem:[#allocation17 + $0xf30] sm:$0xff] }
 0x883   : > { %v3054_v42 = vld [vmem:[#allocation17 + $0xfb0] sm:$0xff]  ;;  %v8457_v37 = vpack.c.bf16 %v3052_v26, %v3036_v11  ;;  %v8463_v11 = vpack.c.bf16 %v3117_v18, %v3101_v59  ;;  %v8591_v26 = vpack.c.bf16 %v3119_v44, %v3103_v5  ;;  %v3167_v59 = vld [vmem:[#allocation17 + $0x1338] sm:$0xff] }
 0x884   : > { %v8585_v56 = vpack.c.bf16 %v3054_v42, %v3038_v28  ;;  %v3133_v28 = vld [vmem:[#allocation17 + $0x1228] sm:$0xff]  ;;  %v3150_v9 = vld [vmem:[#allocation17 + $0x12b0] sm:$0xff]  ;;  %v3183_v18 = vld [vmem:[#allocation17 + $0x13b8] sm:$0xff] }
 0x885   : > { %8450 = vmatpush1.bf16.msra.mxu0 %v8449_v45  ;;  %8578 = vmatpush1.bf16.msra.mxu1 %v8577_v13  ;;  %v8459_v45 = vpack.c.bf16 %v3085_v21, %v3069_v22  ;;  %v8587_v13 = vpack.c.bf16 %v3087_v43, %v3071_v29  ;;  %v3149_v42 = vld [vmem:[#allocation17 + $0x12a8] sm:$0xff]  ;;  %v3135_v22 = vld [vmem:[#allocation17 + $0x1238] sm:$0xff]  ;;  %v8597_v44 = vpack.c.bf16 %v3150_v9, %v3134_v62 }
 0x886   : > { %8452 = vmatprep.subr.bf16.mxu0 %v8451_v33  ;;  %8580 = vmatprep.subr.bf16.mxu1 %v8579_v54  ;;  %v3070_v33 = vld [vmem:[#allocation17 + $0x1030] sm:$0xff]  ;;  %v3151_v21 = vld [vmem:[#allocation17 + $0x12b8] sm:$0xff]  ;;  %v3229_v62 = vld [vmem:[#allocation17 + $0x1528] sm:$0xff] }
 0x887   : > { %v3086_v54 = vld [vmem:[#allocation17 + $0x10b0] sm:$0xff]  ;;  %v3245_v9 = vld [vmem:[#allocation17 + $0x15a8] sm:$0xff] }
 0x888   : > { %v8589_v46 = vpack.c.bf16 %v3086_v54, %v3070_v33  ;;  %v3165_v33 = vld [vmem:[#allocation17 + $0x1328] sm:$0xff] }
 0x889   : > { %8454 = vmatpush1.bf16.msra.mxu0 %v8453_v6  ;;  %8582 = vmatpush1.bf16.msra.mxu1 %v8581_v48  ;;  %v3100_v6 = vld [vmem:[#allocation17 + $0x1120] sm:$0xff]  ;;  %v3181_v54 = vld [vmem:[#allocation17 + $0x13a8] sm:$0xff] }
 0x88a   : > { %8456 = vmatprep.subr.bf16.mxu0 %v8455_v8  ;;  %8584 = vmatprep.subr.bf16.mxu1 %v8583_v7  ;;  %v3116_v48 = vld [vmem:[#allocation17 + $0x11a0] sm:$0xff]  ;;  %v3102_v8 = vld [vmem:[#allocation17 + $0x1130] sm:$0xff] }
 0x88b   : > { %v3118_v7 = vld [vmem:[#allocation17 + $0x11b0] sm:$0xff]  ;;  %v8465_v29 = vpack.c.bf16 %v3116_v48, %v3100_v6  ;;  %v8471_v6 = vpack.c.bf16 %v3181_v54, %v3165_v33  ;;  %v8599_v48 = vpack.c.bf16 %v3183_v18, %v3167_v59  ;;  %v3231_v33 = vld [vmem:[#allocation17 + $0x1538] sm:$0xff] }
 0x88c   : > { %v8593_v43 = vpack.c.bf16 %v3118_v7, %v3102_v8  ;;  %v3197_v8 = vld [vmem:[#allocation17 + $0x1428] sm:$0xff]  ;;  %v3247_v54 = vld [vmem:[#allocation17 + $0x15b8] sm:$0xff] }
 0x88d   : > { %8458 = vmatpush1.bf16.msra.mxu0 %v8457_v37  ;;  %8586 = vmatpush1.bf16.msra.mxu1 %v8585_v56  ;;  %v3132_v37 = vld [vmem:[#allocation17 + $0x1220] sm:$0xff]  ;;  %v3213_v7 = vld [vmem:[#allocation17 + $0x14a8] sm:$0xff] }
 0x88e   : > { %8460 = vmatprep.subr.bf16.mxu0 %v8459_v45  ;;  %8588 = vmatprep.subr.bf16.mxu1 %v8587_v13  ;;  %v3148_v56 = vld [vmem:[#allocation17 + $0x12a0] sm:$0xff]  ;;  %v8467_v45 = vpack.c.bf16 %v3149_v42, %v3133_v28  ;;  %v8595_v13 = vpack.c.bf16 %v3151_v21, %v3135_v22  ;;  %v3199_v28 = vld [vmem:[#allocation17 + $0x1438] sm:$0xff] }
 0x88f   : > { %v8469_v5 = vpack.c.bf16 %v3148_v56, %v3132_v37  ;;  %v3215_v42 = vld [vmem:[#allocation17 + $0x14b8] sm:$0xff]  ;;  %v8475_v37 = vpack.c.bf16 %v3213_v7, %v3197_v8 }
 0x890   : > { %4093 = vmatmul.mubr.f32.vlgmr.msra.gmra.mrb[16].mxu0 %v12407_v17  ;;  %4319 = vmatmul.mubr.f32.vlgmr.msra.gmra.mrb[16].mxu1 %v12407_v17  ;;  %v8603_v56 = vpack.c.bf16 %v3215_v42, %v3199_v28  ;;  %v3263_v8 = vld [vmem:[#allocation17 + $0x1638] sm:$0xff] }
 0x891   : > { %4098 = vmatprep.mubr.f32.mxu0 %v12429_v50  ;;  %8462 = vmatpush1.bf16.msra.mxu0 %v8461_v3  ;;  %v3164_v3 = vld [vmem:[#allocation17 + $0x1320] sm:$0xff]  ;;  %v3279_v7 = vld [vmem:[#allocation17 + $0x16b8] sm:$0xff] }
 0x892   : > { %4324 = vmatprep.mubr.f32.mxu1 %v12429_v50  ;;  %8590 = vmatpush1.bf16.msra.mxu1 %v8589_v46  ;;  %v3180_v46 = vld [vmem:[#allocation17 + $0x13a0] sm:$0xff] }
 0x893   : > { %8464 = vmatprep.subr.bf16.mxu0 %v8463_v11  ;;  %8592 = vmatprep.subr.bf16.mxu1 %v8591_v26  ;;  %v3166_v11 = vld [vmem:[#allocation17 + $0x1330] sm:$0xff]  ;;  %v8473_v22 = vpack.c.bf16 %v3180_v46, %v3164_v3  ;;  %v8479_v3 = vpack.c.bf16 %v3245_v9, %v3229_v62  ;;  %v8607_v46 = vpack.c.bf16 %v3247_v54, %v3231_v33  ;;  %v3295_v62 = vld [vmem:[#allocation17 + $0x1738] sm:$0xff] }
 0x894   : > { %4099 = vmatmul.mubr.f32.gmra.mrb[18].mxu0 %v12432_v2  ;;  %4325 = vmatmul.mubr.f32.gmra.mrb[18].mxu1 %v12432_v2  ;;  %v3182_v26 = vld [vmem:[#allocation17 + $0x13b0] sm:$0xff]  ;;  %v3311_v9 = vld [vmem:[#allocation17 + $0x17b8] sm:$0xff] }
 0x895   : > { %4104 = vmatprep.mubr.f32.mxu0 %v12437_v61  ;;  %8466 = vmatpush1.bf16.msra.mxu0 %v8465_v29  ;;  %v8601_v21 = vpack.c.bf16 %v3182_v26, %v3166_v11  ;;  %v3196_v29 = vld [vmem:[#allocation17 + $0x1420] sm:$0xff]  ;;  %v3261_v11 = vld [vmem:[#allocation17 + $0x1628] sm:$0xff] }
 0x896   : > { %4330 = vmatprep.mubr.f32.mxu1 %v12437_v61  ;;  %8594 = vmatpush1.bf16.msra.mxu1 %v8593_v43  ;;  %v3212_v43 = vld [vmem:[#allocation17 + $0x14a0] sm:$0xff]  ;;  %v3277_v26 = vld [vmem:[#allocation17 + $0x16a8] sm:$0xff] }
 0x897   : > { %8468 = vmatprep.subr.bf16.mxu0 %v8467_v45  ;;  %8596 = vmatprep.subr.bf16.mxu1 %v8595_v13  ;;  %v3198_v45 = vld [vmem:[#allocation17 + $0x1430] sm:$0xff]  ;;  %v8477_v59 = vpack.c.bf16 %v3212_v43, %v3196_v29  ;;  %v8483_v29 = vpack.c.bf16 %v3277_v26, %v3261_v11  ;;  %v8611_v43 = vpack.c.bf16 %v3279_v7, %v3263_v8  ;;  %v3327_v11 = vld [vmem:[#allocation17 + $0x1838] sm:$0xff] }
 0x898   : > { %4105 = vmatmul.mubr.f32.gmra.mrb[20].mxu0 %v12444_v14  ;;  %4331 = vmatmul.mubr.f32.gmra.mrb[20].mxu1 %v12444_v14  ;;  %v3214_v13 = vld [vmem:[#allocation17 + $0x14b0] sm:$0xff]  ;;  %v3343_v26 = vld [vmem:[#allocation17 + $0x18b8] sm:$0xff] }
 0x899   : > { %4110 = vmatprep.mubr.f32.mxu0 %v12461_v36  ;;  %8470 = vmatpush1.bf16.msra.mxu0 %v8469_v5  ;;  %v8605_v18 = vpack.c.bf16 %v3214_v13, %v3198_v45  ;;  %v3228_v5 = vld [vmem:[#allocation17 + $0x1520] sm:$0xff]  ;;  %v3293_v45 = vld [vmem:[#allocation17 + $0x1728] sm:$0xff] }
 0x89a   : > { %4336 = vmatprep.mubr.f32.mxu1 %v12461_v36  ;;  %8598 = vmatpush1.bf16.msra.mxu1 %v8597_v44  ;;  %v3244_v44 = vld [vmem:[#allocation17 + $0x15a0] sm:$0xff]  ;;  %v3309_v13 = vld [vmem:[#allocation17 + $0x17a8] sm:$0xff] }
 0x89b   : > { %8472 = vmatprep.subr.bf16.mxu0 %v8471_v6  ;;  %8600 = vmatprep.subr.bf16.mxu1 %v8599_v48  ;;  %v3230_v6 = vld [vmem:[#allocation17 + $0x1530] sm:$0xff]  ;;  %v8481_v28 = vpack.c.bf16 %v3244_v44, %v3228_v5  ;;  %v8487_v5 = vpack.c.bf16 %v3309_v13, %v3293_v45  ;;  %v8615_v44 = vpack.c.bf16 %v3311_v9, %v3295_v62  ;;  %v3359_v45 = vld [vmem:[#allocation17 + $0x1938] sm:$0xff] }
 0x89c   : > { %4111 = vmatmul.mubr.f32.gmra.mrb[22].mxu0 %v12478_v47  ;;  %4337 = vmatmul.mubr.f32.gmra.mrb[22].mxu1 %v12478_v47  ;;  %v3246_v48 = vld [vmem:[#allocation17 + $0x15b0] sm:$0xff]  ;;  %v3375_v13 = vld [vmem:[#allocation17 + $0x19b8] sm:$0xff] }
 0x89d   : > { %4116 = vmatprep.mubr.f32.mxu0 %v12487_v23  ;;  %8474 = vmatpush1.bf16.msra.mxu0 %v8473_v22  ;;  %v8609_v42 = vpack.c.bf16 %v3246_v48, %v3230_v6  ;;  %v3260_v22 = vld [vmem:[#allocation17 + $0x1620] sm:$0xff]  ;;  %v3325_v6 = vld [vmem:[#allocation17 + $0x1828] sm:$0xff] }
 0x89e   : > { %4342 = vmatprep.mubr.f32.mxu1 %v12487_v23  ;;  %8602 = vmatpush1.bf16.msra.mxu1 %v8601_v21  ;;  %v3276_v21 = vld [vmem:[#allocation17 + $0x16a0] sm:$0xff]  ;;  %v3341_v48 = vld [vmem:[#allocation17 + $0x18a8] sm:$0xff] }
 0x89f   : > { %8476 = vmatprep.subr.bf16.mxu0 %v8475_v37  ;;  %8604 = vmatprep.subr.bf16.mxu1 %v8603_v56  ;;  %v3262_v37 = vld [vmem:[#allocation17 + $0x1630] sm:$0xff]  ;;  %v8485_v33 = vpack.c.bf16 %v3276_v21, %v3260_v22  ;;  %v8491_v21 = vpack.c.bf16 %v3341_v48, %v3325_v6  ;;  %v3391_v6 = vld [vmem:[#allocation17 + $0x1a38] sm:$0xff] }
 0x8a0   : > { %4117 = vmatmul.mubr.f32.gmra.mrb[24].mxu0 %v12495_v40  ;;  %4343 = vmatmul.mubr.f32.gmra.mrb[24].mxu1 %v12495_v40  ;;  %v3278_v56 = vld [vmem:[#allocation17 + $0x16b0] sm:$0xff]  ;;  %v3407_v48 = vld [vmem:[#allocation17 + $0x1ab8] sm:$0xff] }
 0x8a1   : > { %4122 = vmatprep.mubr.f32.mxu0 %v12508_v19  ;;  %8478 = vmatpush1.bf16.msra.mxu0 %v8477_v59  ;;  %v8613_v54 = vpack.c.bf16 %v3278_v56, %v3262_v37  ;;  %v3292_v59 = vld [vmem:[#allocation17 + $0x1720] sm:$0xff]  ;;  %v3326_v22 = vld [vmem:[#allocation17 + $0x1830] sm:$0xff]  ;;  %v3357_v37 = vld [vmem:[#allocation17 + $0x1928] sm:$0xff] }
 0x8a2   : > { %4348 = vmatprep.mubr.f32.mxu1 %v12508_v19  ;;  %8606 = vmatpush1.bf16.msra.mxu1 %v8605_v18  ;;  %v3308_v18 = vld [vmem:[#allocation17 + $0x17a0] sm:$0xff]  ;;  %v3373_v56 = vld [vmem:[#allocation17 + $0x19a8] sm:$0xff] }
 0x8a3   : > { %8480 = vmatprep.subr.bf16.mxu0 %v8479_v3  ;;  %8608 = vmatprep.subr.bf16.mxu1 %v8607_v46  ;;  %v3294_v3 = vld [vmem:[#allocation17 + $0x1730] sm:$0xff]  ;;  %v8489_v8 = vpack.c.bf16 %v3308_v18, %v3292_v59  ;;  %v3372_v59 = vld [vmem:[#allocation17 + $0x19a0] sm:$0xff] }
 0x8a4   : > { %4123 = vmatmul.mubr.f32.gmra.mrb[26].mxu0 %v12523_v30  ;;  %4349 = vmatmul.mubr.f32.gmra.mrb[26].mxu1 %v12523_v30  ;;  %v3310_v46 = vld [vmem:[#allocation17 + $0x17b0] sm:$0xff] }
 0x8a5   : > { %4128 = vmatprep.mubr.f32.mxu0 %v12534_v4  ;;  %8482 = vmatpush1.bf16.msra.mxu0 %v8481_v28  ;;  %v8617_v7 = vpack.c.bf16 %v3310_v46, %v3294_v3  ;;  %v3324_v28 = vld [vmem:[#allocation17 + $0x1820] sm:$0xff]  ;;  %v3358_v18 = vld [vmem:[#allocation17 + $0x1930] sm:$0xff]  ;;  %v3389_v3 = vld [vmem:[#allocation17 + $0x1a28] sm:$0xff] }
 0x8a6   : > { %4354 = vmatprep.mubr.f32.mxu1 %v12534_v4  ;;  %8610 = vmatpush1.bf16.msra.mxu1 %v8609_v42  ;;  %v3340_v42 = vld [vmem:[#allocation17 + $0x18a0] sm:$0xff]  ;;  %v3405_v46 = vld [vmem:[#allocation17 + $0x1aa8] sm:$0xff] }
 0x8a7   : > { %8484 = vmatprep.subr.bf16.mxu0 %v8483_v29  ;;  %8612 = vmatprep.subr.bf16.mxu1 %v8611_v43  ;;  %v8619_v29 = vpack.c.bf16 %v3343_v26, %v3327_v11  ;;  %v3342_v43 = vld [vmem:[#allocation17 + $0x18b0] sm:$0xff]  ;;  %v8493_v62 = vpack.c.bf16 %v3340_v42, %v3324_v28  ;;  %v3404_v28 = vld [vmem:[#allocation17 + $0x1aa0] sm:$0xff] }
 0x8a8   : > { %4129 = vmatmul.mubr.f32.gmra.mrb[28].mxu0 %v12545_v58  ;;  %4355 = vmatmul.mubr.f32.gmra.mrb[28].mxu1 %v12545_v58  ;;  %v8621_v9 = vpack.c.bf16 %v3342_v43, %v3326_v22  ;;  %v3390_v42 = vld [vmem:[#allocation17 + $0x1a30] sm:$0xff]  ;;  %v8627_v22 = vpack.c.bf16 %v3407_v48, %v3391_v6 }
 0x8a9   : > { %4134 = vmatprep.mubr.f32.mxu0 %v12551_v15  ;;  %8486 = vmatpush1.bf16.msra.mxu0 %v8485_v33  ;;  %v8495_v33 = vpack.c.bf16 %v3373_v56, %v3357_v37  ;;  %v3406_v43 = vld [vmem:[#allocation17 + $0x1ab0] sm:$0xff]  ;;  %v3423_v37 = vld [vmem:[#allocation17 + $0x1b38] sm:$0xff] }
 0x8aa   : > { %4360 = vmatprep.mubr.f32.mxu1 %v12551_v15  ;;  %8614 = vmatpush1.bf16.msra.mxu1 %v8613_v54  ;;  %v3356_v54 = vld [vmem:[#allocation17 + $0x1920] sm:$0xff]  ;;  %v3439_v56 = vld [vmem:[#allocation17 + $0x1bb8] sm:$0xff] }
 0x8ab   : > { %8488 = vmatprep.subr.bf16.mxu0 %v8487_v5  ;;  %8616 = vmatprep.subr.bf16.mxu1 %v8615_v44  ;;  %v8623_v5 = vpack.c.bf16 %v3375_v13, %v3359_v45  ;;  %v3374_v44 = vld [vmem:[#allocation17 + $0x19b0] sm:$0xff]  ;;  %v8497_v11 = vpack.c.bf16 %v3372_v59, %v3356_v54  ;;  %v8629_v13 = vpack.c.bf16 %v3406_v43, %v3390_v42  ;;  %v3485_v43 = vld [vmem:[#allocation17 + $0x1d28] sm:$0xff] }
 0x8ac   : > { %4135 = vmatmul.mubr.f32.gmra.mrb[30].mxu0 %v12557_v52  ;;  %4361 = vmatmul.mubr.f32.gmra.mrb[30].mxu1 %v12557_v52  ;;  %v8625_v26 = vpack.c.bf16 %v3374_v44, %v3358_v18  ;;  %v3422_v54 = vld [vmem:[#allocation17 + $0x1b30] sm:$0xff]  ;;  %v8631_v59 = vpack.c.bf16 %v3439_v56, %v3423_v37  ;;  %v3453_v44 = vld [vmem:[#allocation17 + $0x1c28] sm:$0xff] }
 0x8ad   : > { %8490 = vmatpush1.bf16.msra.mxu0 %v8489_v8  ;;  %4205 = vmatprep.mubr.f32.mxu0 %v12571_v57  ;;  %v8499_v8 = vpack.c.bf16 %v3405_v46, %v3389_v3  ;;  %v3438_v18 = vld [vmem:[#allocation17 + $0x1bb0] sm:$0xff]  ;;  %v3455_v3 = vld [vmem:[#allocation17 + $0x1c38] sm:$0xff] }
 0x8ae   : > { %8618 = vmatpush1.bf16.msra.mxu1 %v8617_v7  ;;  %4431 = vmatprep.mubr.f32.mxu1 %v12571_v57  ;;  %v3388_v7 = vld [vmem:[#allocation17 + $0x1a20] sm:$0xff]  ;;  %v3471_v46 = vld [vmem:[#allocation17 + $0x1cb8] sm:$0xff]  ;;  %v8633_v48 = vpack.c.bf16 %v3438_v18, %v3422_v54  ;;  %v3470_v42 = vld [vmem:[#allocation17 + $0x1cb0] sm:$0xff] }
 0x8af   : > { %8492 = vmatprep.subr.bf16.mxu0 %v8491_v21  ;;  %8620 = vmatprep.subr.bf16.mxu1 %v8619_v29  ;;  %v3421_v21 = vld [vmem:[#allocation17 + $0x1b28] sm:$0xff]  ;;  %v8501_v45 = vpack.c.bf16 %v3404_v28, %v3388_v7  ;;  %v3454_v7 = vld [vmem:[#allocation17 + $0x1c30] sm:$0xff]  ;;  %v8635_v28 = vpack.c.bf16 %v3471_v46, %v3455_v3 }
 0x8b0   : > { %v3437_v29 = vld [vmem:[#allocation17 + $0x1ba8] sm:$0xff]  ;;  %v8637_v56 = vpack.c.bf16 %v3470_v42, %v3454_v7  ;;  %v3502_v54 = vld [vmem:[#allocation17 + $0x1db0] sm:$0xff] }
 0x8b1   : > { %8494 = vmatpush1.bf16.msra.mxu0 %v8493_v62  ;;  %v8503_v62 = vpack.c.bf16 %v3437_v29, %v3421_v21  ;;  %v3487_v21 = vld [vmem:[#allocation17 + $0x1d38] sm:$0xff]  ;;  %v3517_v18 = vld [vmem:[#allocation17 + $0x1e28] sm:$0xff]  ;;  %v3534_v7 = vld [vmem:[#allocation17 + $0x1eb0] sm:$0xff] }
 0x8b2   : > { %8622 = vmatpush1.bf16.msra.mxu1 %v8621_v9  ;;  %8496 = vmatprep.subr.bf16.mxu0 %v8495_v33  ;;  %v3420_v9 = vld [vmem:[#allocation17 + $0x1b20] sm:$0xff]  ;;  %v3503_v29 = vld [vmem:[#allocation17 + $0x1db8] sm:$0xff]  ;;  %v3549_v42 = vld [vmem:[#allocation17 + $0x1f28] sm:$0xff] }
 0x8b3   : > { %8624 = vmatprep.subr.bf16.mxu1 %v8623_v5  ;;  %v3436_v33 = vld [vmem:[#allocation17 + $0x1ba0] sm:$0xff]  ;;  %v3469_v5 = vld [vmem:[#allocation17 + $0x1ca8] sm:$0xff] }
 0x8b4   : > { %v8505_v6 = vpack.c.bf16 %v3436_v33, %v3420_v9  ;;  %v3486_v9 = vld [vmem:[#allocation17 + $0x1d30] sm:$0xff]  ;;  %v8639_v33 = vpack.c.bf16 %v3503_v29, %v3487_v21 }
 0x8b5   : > { %8498 = vmatpush1.bf16.msra.mxu0 %v8497_v11  ;;  %v8507_v11 = vpack.c.bf16 %v3469_v5, %v3453_v44  ;;  %v3519_v44 = vld [vmem:[#allocation17 + $0x1e38] sm:$0xff]  ;;  %v8641_v46 = vpack.c.bf16 %v3502_v54, %v3486_v9  ;;  %v3566_v9 = vld [vmem:[#allocation17 + $0x1fb0] sm:$0xff]  ;;  %v2561_v54 = vld [vmem:[#allocation17 + $0x48] sm:$0xff] }
 0x8b6   : > { %8626 = vmatpush1.bf16.msra.mxu1 %v8625_v26  ;;  %8500 = vmatprep.subr.bf16.mxu0 %v8499_v8  ;;  %v3452_v26 = vld [vmem:[#allocation17 + $0x1c20] sm:$0xff]  ;;  %v3535_v5 = vld [vmem:[#allocation17 + $0x1eb8] sm:$0xff] }
 0x8b7   : > { %8628 = vmatprep.subr.bf16.mxu1 %v8627_v22  ;;  %v3468_v8 = vld [vmem:[#allocation17 + $0x1ca0] sm:$0xff]  ;;  %v3501_v22 = vld [vmem:[#allocation17 + $0x1da8] sm:$0xff] }
 0x8b8   : > { %v8509_v37 = vpack.c.bf16 %v3468_v8, %v3452_v26  ;;  %v3518_v26 = vld [vmem:[#allocation17 + $0x1e30] sm:$0xff]  ;;  %v8643_v8 = vpack.c.bf16 %v3535_v5, %v3519_v44 }
 0x8b9   : > { %8502 = vmatpush1.bf16.msra.mxu0 %v8501_v45  ;;  %v8511_v45 = vpack.c.bf16 %v3501_v22, %v3485_v43  ;;  %v3551_v43 = vld [vmem:[#allocation17 + $0x1f38] sm:$0xff]  ;;  %v8645_v29 = vpack.c.bf16 %v3534_v7, %v3518_v26  ;;  %v2578_v26 = vld [vmem:[#allocation17 + $0xd0] sm:$0xff]  ;;  %v2593_v7 = vld [vmem:[#allocation17 + $0x148] sm:$0xff] }
 0x8ba   : > { %8630 = vmatpush1.bf16.msra.mxu1 %v8629_v13  ;;  %8504 = vmatprep.subr.bf16.mxu0 %v8503_v62  ;;  %v3484_v13 = vld [vmem:[#allocation17 + $0x1d20] sm:$0xff]  ;;  %v3567_v22 = vld [vmem:[#allocation17 + $0x1fb8] sm:$0xff] }
 0x8bb   : > { %8632 = vmatprep.subr.bf16.mxu1 %v8631_v59  ;;  %v3500_v62 = vld [vmem:[#allocation17 + $0x1da0] sm:$0xff]  ;;  %v3533_v59 = vld [vmem:[#allocation17 + $0x1ea8] sm:$0xff] }
 0x8bc   : > { %v8513_v3 = vpack.c.bf16 %v3500_v62, %v3484_v13  ;;  %v3550_v13 = vld [vmem:[#allocation17 + $0x1f30] sm:$0xff]  ;;  %v8647_v62 = vpack.c.bf16 %v3567_v22, %v3551_v43 }
 0x8bd   : > { %8506 = vmatpush1.bf16.msra.mxu0 %v8505_v6  ;;  %v8515_v6 = vpack.c.bf16 %v3533_v59, %v3517_v18  ;;  %v2563_v18 = vld [vmem:[#allocation17 + $0x58] sm:$0xff]  ;;  %v8649_v5 = vpack.c.bf16 %v3566_v9, %v3550_v13  ;;  %v2610_v13 = vld [vmem:[#allocation17 + $0x1d0] sm:$0xff]  ;;  %v2641_v9 = vld [vmem:[#allocation17 + $0x2c8] sm:$0xff] }
 0x8be   : > { %8634 = vmatpush1.bf16.msra.mxu1 %v8633_v48  ;;  %8508 = vmatprep.subr.bf16.mxu0 %v8507_v11  ;;  %v3516_v48 = vld [vmem:[#allocation17 + $0x1e20] sm:$0xff]  ;;  %v2579_v59 = vld [vmem:[#allocation17 + $0xd8] sm:$0xff] }
 0x8bf   : > { %8636 = vmatprep.subr.bf16.mxu1 %v8635_v28  ;;  %v3532_v11 = vld [vmem:[#allocation17 + $0x1ea0] sm:$0xff]  ;;  %v3565_v28 = vld [vmem:[#allocation17 + $0x1fa8] sm:$0xff] }
 0x8c0   : > { %v8517_v21 = vpack.c.bf16 %v3532_v11, %v3516_v48  ;;  %v2576_v48 = vld [vmem:[#allocation17 + $0xc0] sm:$0xff]  ;;  %v2562_v11 = vld [vmem:[#allocation17 + $0x50] sm:$0xff] }
 0x8c1   : > { %8510 = vmatpush1.bf16.msra.mxu0 %v8509_v37  ;;  %v8519_v37 = vpack.c.bf16 %v3565_v28, %v3549_v42  ;;  %v2595_v42 = vld [vmem:[#allocation17 + $0x158] sm:$0xff]  ;;  %v8781_v22 = vpack.c.bf16 %v2578_v26, %v2562_v11  ;;  %v2657_v11 = vld [vmem:[#allocation17 + $0x348] sm:$0xff] }
 0x8c2   : > { %8638 = vmatpush1.bf16.msra.mxu1 %v8637_v56  ;;  %8512 = vmatprep.subr.bf16.mxu0 %v8511_v45  ;;  %v3548_v56 = vld [vmem:[#allocation17 + $0x1f20] sm:$0xff]  ;;  %v2611_v28 = vld [vmem:[#allocation17 + $0x1d8] sm:$0xff]  ;;  %v2673_v26 = vld [vmem:[#allocation17 + $0x3c8] sm:$0xff] }
 0x8c3   : > { %8640 = vmatprep.subr.bf16.mxu1 %v8639_v33  ;;  %v3564_v45 = vld [vmem:[#allocation17 + $0x1fa0] sm:$0xff]  ;;  %v2577_v33 = vld [vmem:[#allocation17 + $0xc8] sm:$0xff] }
 0x8c4   : > { %v8521_v44 = vpack.c.bf16 %v3564_v45, %v3548_v56  ;;  %v2594_v56 = vld [vmem:[#allocation17 + $0x150] sm:$0xff]  ;;  %v8783_v45 = vpack.c.bf16 %v2611_v28, %v2595_v42 }
 0x8c5   : > { %8514 = vmatpush1.bf16.msra.mxu0 %v8513_v3  ;;  %v8651_v3 = vpack.c.bf16 %v2577_v33, %v2561_v54  ;;  %v2627_v54 = vld [vmem:[#allocation17 + $0x258] sm:$0xff] }
 0x8c6   : > { %8642 = vmatpush1.bf16.msra.mxu1 %v8641_v46  ;;  %8516 = vmatprep.subr.bf16.mxu0 %v8515_v6  ;;  %v8779_v46 = vpack.c.bf16 %v2579_v59, %v2563_v18  ;;  %v2560_v6 = vld [vmem:[#allocation17 + $0x40] sm:$0xff]  ;;  %v2643_v33 = vld [vmem:[#allocation17 + $0x2d8] sm:$0xff]  ;;  %v8785_v59 = vpack.c.bf16 %v2610_v13, %v2594_v56  ;;  %v2674_v56 = vld [vmem:[#allocation17 + $0x3d0] sm:$0xff] }
 0x8c7   : > { %8644 = vmatprep.subr.bf16.mxu1 %v8643_v8  ;;  %v2609_v8 = vld [vmem:[#allocation17 + $0x1c8] sm:$0xff]  ;;  %v8653_v43 = vpack.c.bf16 %v2576_v48, %v2560_v6  ;;  %v8787_v6 = vpack.c.bf16 %v2643_v33, %v2627_v54  ;;  %v2642_v48 = vld [vmem:[#allocation17 + $0x2d0] sm:$0xff] }
 0x8c8   : > { %v2705_v13 = vld [vmem:[#allocation17 + $0x4c8] sm:$0xff] }
 0x8c9   : > { %8518 = vmatpush1.bf16.msra.mxu0 %v8517_v21  ;;  %v8655_v21 = vpack.c.bf16 %v2609_v8, %v2593_v7  ;;  %v2659_v7 = vld [vmem:[#allocation17 + $0x358] sm:$0xff] }
 0x8ca   : > { %8646 = vmatpush1.bf16.msra.mxu1 %v8645_v29  ;;  %8520 = vmatprep.subr.bf16.mxu0 %v8519_v37  ;;  %v2592_v29 = vld [vmem:[#allocation17 + $0x140] sm:$0xff]  ;;  %v2675_v8 = vld [vmem:[#allocation17 + $0x3d8] sm:$0xff] }
 0x8cb   : > { %8648 = vmatprep.subr.bf16.mxu1 %v8647_v62  ;;  %v2608_v37 = vld [vmem:[#allocation17 + $0x1c0] sm:$0xff]  ;;  %v2625_v62 = vld [vmem:[#allocation17 + $0x248] sm:$0xff] }
 0x8cc   : > { %v8657_v18 = vpack.c.bf16 %v2608_v37, %v2592_v29  ;;  %v2658_v29 = vld [vmem:[#allocation17 + $0x350] sm:$0xff]  ;;  %v8791_v37 = vpack.c.bf16 %v2675_v8, %v2659_v7 }
 0x8cd   : > { %8522 = vmatpush1.bf16.msra.mxu0 %v8521_v44  ;;  %v8659_v44 = vpack.c.bf16 %v2641_v9, %v2625_v62  ;;  %v2691_v62 = vld [vmem:[#allocation17 + $0x458] sm:$0xff]  ;;  %v8793_v33 = vpack.c.bf16 %v2674_v56, %v2658_v29  ;;  %v2738_v29 = vld [vmem:[#allocation17 + $0x5d0] sm:$0xff]  ;;  %v2769_v56 = vld [vmem:[#allocation17 + $0x6c8] sm:$0xff] }
 0x8ce   : > { %8650 = vmatpush1.bf16.msra.mxu1 %v8649_v5  ;;  %8652 = vmatprep.subr.bf16.mxu0 %v8651_v3  ;;  %v2624_v5 = vld [vmem:[#allocation17 + $0x240] sm:$0xff]  ;;  %v2707_v9 = vld [vmem:[#allocation17 + $0x4d8] sm:$0xff] }
 0x8cf   : > { %8780 = vmatprep.subr.bf16.mxu1 %v8779_v46  ;;  %v2640_v3 = vld [vmem:[#allocation17 + $0x2c0] sm:$0xff]  ;;  %v2626_v46 = vld [vmem:[#allocation17 + $0x250] sm:$0xff] }
 0x8d0   : > { %4206 = vmatmul.mubr.f32.vlgmr.msra.gmra.mrb[16].mxu0 %v12412_v25  ;;  %v8661_v42 = vpack.c.bf16 %v2640_v3, %v2624_v5  ;;  %v8789_v28 = vpack.c.bf16 %v2642_v48, %v2626_v46  ;;  %v2690_v5 = vld [vmem:[#allocation17 + $0x450] sm:$0xff]  ;;  %v8795_v3 = vpack.c.bf16 %v2707_v9, %v2691_v62  ;;  %v2737_v48 = vld [vmem:[#allocation17 + $0x5c8] sm:$0xff] }
 0x8d1   : > { %4432 = vmatmul.mubr.f32.vlgmr.msra.gmra.mrb[16].mxu1 %v12412_v25  ;;  %4211 = vmatprep.mubr.f32.mxu0 %v12578_v1  ;;  %v2706_v46 = vld [vmem:[#allocation17 + $0x4d0] sm:$0xff] }
 0x8d2   : > { %4437 = vmatprep.mubr.f32.mxu1 %v12578_v1  ;;  %8654 = vmatpush1.bf16.msra.mxu0 %v8653_v43  ;;  %v8663_v43 = vpack.c.bf16 %v2673_v26, %v2657_v11  ;;  %v2723_v11 = vld [vmem:[#allocation17 + $0x558] sm:$0xff]  ;;  %v8797_v8 = vpack.c.bf16 %v2706_v46, %v2690_v5  ;;  %v2770_v5 = vld [vmem:[#allocation17 + $0x6d0] sm:$0xff]  ;;  %v2801_v46 = vld [vmem:[#allocation17 + $0x7c8] sm:$0xff] }
 0x8d3   : > { %8782 = vmatpush1.bf16.msra.mxu1 %v8781_v22  ;;  %8656 = vmatprep.subr.bf16.mxu0 %v8655_v21  ;;  %v2656_v22 = vld [vmem:[#allocation17 + $0x340] sm:$0xff]  ;;  %v2739_v26 = vld [vmem:[#allocation17 + $0x5d8] sm:$0xff] }
 0x8d4   : > { %4212 = vmatmul.mubr.f32.gmra.mrb[18].mxu0 %v12455_v63  ;;  %8784 = vmatprep.subr.bf16.mxu1 %v8783_v45  ;;  %v2672_v21 = vld [vmem:[#allocation17 + $0x3c0] sm:$0xff]  ;;  %v2689_v45 = vld [vmem:[#allocation17 + $0x448] sm:$0xff] }
 0x8d5   : > { %4438 = vmatmul.mubr.f32.gmra.mrb[18].mxu1 %v12455_v63  ;;  %4217 = vmatprep.mubr.f32.mxu0 %v12587_v39  ;;  %v8665_v54 = vpack.c.bf16 %v2672_v21, %v2656_v22  ;;  %v2722_v22 = vld [vmem:[#allocation17 + $0x550] sm:$0xff]  ;;  %v8799_v21 = vpack.c.bf16 %v2739_v26, %v2723_v11 }
 0x8d6   : > { %4443 = vmatprep.mubr.f32.mxu1 %v12587_v39  ;;  %8658 = vmatpush1.bf16.msra.mxu0 %v8657_v18  ;;  %v8667_v18 = vpack.c.bf16 %v2705_v13, %v2689_v45  ;;  %v2755_v45 = vld [vmem:[#allocation17 + $0x658] sm:$0xff]  ;;  %v8801_v9 = vpack.c.bf16 %v2738_v29, %v2722_v22  ;;  %v2802_v22 = vld [vmem:[#allocation17 + $0x7d0] sm:$0xff]  ;;  %v2833_v29 = vld [vmem:[#allocation17 + $0x8c8] sm:$0xff] }
 0x8d7   : > { %8786 = vmatpush1.bf16.msra.mxu1 %v8785_v59  ;;  %8660 = vmatprep.subr.bf16.mxu0 %v8659_v44  ;;  %v2688_v59 = vld [vmem:[#allocation17 + $0x440] sm:$0xff]  ;;  %v2771_v13 = vld [vmem:[#allocation17 + $0x6d8] sm:$0xff] }
 0x8d8   : > { %4218 = vmatmul.mubr.f32.gmra.mrb[20].mxu0 %v12466_v16  ;;  %8788 = vmatprep.subr.bf16.mxu1 %v8787_v6  ;;  %v2704_v44 = vld [vmem:[#allocation17 + $0x4c0] sm:$0xff]  ;;  %v2721_v6 = vld [vmem:[#allocation17 + $0x548] sm:$0xff] }
 0x8d9   : > { %4444 = vmatmul.mubr.f32.gmra.mrb[20].mxu1 %v12466_v16  ;;  %4223 = vmatprep.mubr.f32.mxu0 %v12596_v12  ;;  %v8669_v7 = vpack.c.bf16 %v2704_v44, %v2688_v59  ;;  %v2754_v59 = vld [vmem:[#allocation17 + $0x650] sm:$0xff]  ;;  %v8803_v44 = vpack.c.bf16 %v2771_v13, %v2755_v45 }
 0x8da   : > { %4449 = vmatprep.mubr.f32.mxu1 %v12596_v12  ;;  %8662 = vmatpush1.bf16.msra.mxu0 %v8661_v42  ;;  %v8671_v42 = vpack.c.bf16 %v2737_v48, %v2721_v6  ;;  %v2787_v6 = vld [vmem:[#allocation17 + $0x758] sm:$0xff]  ;;  %v8805_v26 = vpack.c.bf16 %v2770_v5, %v2754_v59  ;;  %v2834_v59 = vld [vmem:[#allocation17 + $0x8d0] sm:$0xff]  ;;  %v2865_v5 = vld [vmem:[#allocation17 + $0x9c8] sm:$0xff] }
 0x8db   : > { %8790 = vmatpush1.bf16.msra.mxu1 %v8789_v28  ;;  %8664 = vmatprep.subr.bf16.mxu0 %v8663_v43  ;;  %v2720_v28 = vld [vmem:[#allocation17 + $0x540] sm:$0xff]  ;;  %v2803_v48 = vld [vmem:[#allocation17 + $0x7d8] sm:$0xff] }
 0x8dc   : > { %4224 = vmatmul.mubr.f32.gmra.mrb[22].mxu0 %v12481_v24  ;;  %8792 = vmatprep.subr.bf16.mxu1 %v8791_v37  ;;  %v2736_v43 = vld [vmem:[#allocation17 + $0x5c0] sm:$0xff]  ;;  %v2753_v37 = vld [vmem:[#allocation17 + $0x648] sm:$0xff] }
 0x8dd   : > { %4450 = vmatmul.mubr.f32.gmra.mrb[22].mxu1 %v12481_v24  ;;  %4229 = vmatprep.mubr.f32.mxu0 %v12605_v38  ;;  %v8673_v62 = vpack.c.bf16 %v2736_v43, %v2720_v28  ;;  %v2786_v28 = vld [vmem:[#allocation17 + $0x750] sm:$0xff]  ;;  %v8807_v43 = vpack.c.bf16 %v2803_v48, %v2787_v6 }
 0x8de   : > { %4455 = vmatprep.mubr.f32.mxu1 %v12605_v38  ;;  %8666 = vmatpush1.bf16.msra.mxu0 %v8665_v54  ;;  %v8675_v54 = vpack.c.bf16 %v2769_v56, %v2753_v37  ;;  %v2819_v37 = vld [vmem:[#allocation17 + $0x858] sm:$0xff]  ;;  %v8809_v13 = vpack.c.bf16 %v2802_v22, %v2786_v28  ;;  %v2866_v28 = vld [vmem:[#allocation17 + $0x9d0] sm:$0xff]  ;;  %v2897_v22 = vld [vmem:[#allocation17 + $0xac8] sm:$0xff] }
 0x8df   : > { %8794 = vmatpush1.bf16.msra.mxu1 %v8793_v33  ;;  %8668 = vmatprep.subr.bf16.mxu0 %v8667_v18  ;;  %v2752_v33 = vld [vmem:[#allocation17 + $0x640] sm:$0xff]  ;;  %v2835_v56 = vld [vmem:[#allocation17 + $0x8d8] sm:$0xff] }
 0x8e0   : > { %4230 = vmatmul.mubr.f32.gmra.mrb[24].mxu0 %v12502_v60  ;;  %8796 = vmatprep.subr.bf16.mxu1 %v8795_v3  ;;  %v2768_v18 = vld [vmem:[#allocation17 + $0x6c0] sm:$0xff]  ;;  %v2785_v3 = vld [vmem:[#allocation17 + $0x748] sm:$0xff] }
 0x8e1   : > { %4456 = vmatmul.mubr.f32.gmra.mrb[24].mxu1 %v12502_v60  ;;  %4235 = vmatprep.mubr.f32.mxu0 %v12614_v0  ;;  %v8677_v11 = vpack.c.bf16 %v2768_v18, %v2752_v33  ;;  %v2818_v33 = vld [vmem:[#allocation17 + $0x850] sm:$0xff]  ;;  %v8811_v18 = vpack.c.bf16 %v2835_v56, %v2819_v37 }
 0x8e2   : > { %4461 = vmatprep.mubr.f32.mxu1 %v12614_v0  ;;  %8670 = vmatpush1.bf16.msra.mxu0 %v8669_v7  ;;  %v8679_v7 = vpack.c.bf16 %v2801_v46, %v2785_v3  ;;  %v2851_v3 = vld [vmem:[#allocation17 + $0x958] sm:$0xff]  ;;  %v8813_v48 = vpack.c.bf16 %v2834_v59, %v2818_v33  ;;  %v2898_v33 = vld [vmem:[#allocation17 + $0xad0] sm:$0xff]  ;;  %v2913_v59 = vld [vmem:[#allocation17 + $0xb48] sm:$0xff] }
 0x8e3   : > { %8798 = vmatpush1.bf16.msra.mxu1 %v8797_v8  ;;  %8672 = vmatprep.subr.bf16.mxu0 %v8671_v42  ;;  %v2784_v8 = vld [vmem:[#allocation17 + $0x740] sm:$0xff]  ;;  %v2867_v46 = vld [vmem:[#allocation17 + $0x9d8] sm:$0xff] }
 0x8e4   : > { %4236 = vmatmul.mubr.f32.gmra.mrb[26].mxu0 %v12513_v32  ;;  %8800 = vmatprep.subr.bf16.mxu1 %v8799_v21  ;;  %v2800_v42 = vld [vmem:[#allocation17 + $0x7c0] sm:$0xff]  ;;  %v2817_v21 = vld [vmem:[#allocation17 + $0x848] sm:$0xff] }
 0x8e5   : > { %4462 = vmatmul.mubr.f32.gmra.mrb[26].mxu1 %v12513_v32  ;;  %4241 = vmatprep.mubr.f32.mxu0 %v12623_v51  ;;  %v8681_v45 = vpack.c.bf16 %v2800_v42, %v2784_v8  ;;  %v2850_v8 = vld [vmem:[#allocation17 + $0x950] sm:$0xff]  ;;  %v8815_v42 = vpack.c.bf16 %v2867_v46, %v2851_v3 }
 0x8e6   : > { %4467 = vmatprep.mubr.f32.mxu1 %v12623_v51  ;;  %8674 = vmatpush1.bf16.msra.mxu0 %v8673_v62  ;;  %v8683_v62 = vpack.c.bf16 %v2833_v29, %v2817_v21  ;;  %v2883_v21 = vld [vmem:[#allocation17 + $0xa58] sm:$0xff]  ;;  %v8817_v56 = vpack.c.bf16 %v2866_v28, %v2850_v8  ;;  %v2930_v8 = vld [vmem:[#allocation17 + $0xbd0] sm:$0xff]  ;;  %v2945_v28 = vld [vmem:[#allocation17 + $0xc48] sm:$0xff] }
 0x8e7   : > { %8802 = vmatpush1.bf16.msra.mxu1 %v8801_v9  ;;  %8676 = vmatprep.subr.bf16.mxu0 %v8675_v54  ;;  %v2816_v9 = vld [vmem:[#allocation17 + $0x840] sm:$0xff]  ;;  %v2899_v29 = vld [vmem:[#allocation17 + $0xad8] sm:$0xff] }
 0x8e8   : > { %4242 = vmatmul.mubr.f32.gmra.mrb[28].mxu0 %v12530_v34  ;;  %8804 = vmatprep.subr.bf16.mxu1 %v8803_v44  ;;  %v2832_v54 = vld [vmem:[#allocation17 + $0x8c0] sm:$0xff]  ;;  %v2849_v44 = vld [vmem:[#allocation17 + $0x948] sm:$0xff] }
 0x8e9   : > { %4468 = vmatmul.mubr.f32.gmra.mrb[28].mxu1 %v12530_v34  ;;  %4247 = vmatprep.mubr.f32.mxu0 %v12632_v35  ;;  %v8685_v6 = vpack.c.bf16 %v2832_v54, %v2816_v9  ;;  %v2882_v9 = vld [vmem:[#allocation17 + $0xa50] sm:$0xff]  ;;  %v8819_v54 = vpack.c.bf16 %v2899_v29, %v2883_v21 }
 0x8ea   : > { %4473 = vmatprep.mubr.f32.mxu1 %v12632_v35  ;;  %8678 = vmatpush1.bf16.msra.mxu0 %v8677_v11  ;;  %v8687_v11 = vpack.c.bf16 %v2865_v5, %v2849_v44  ;;  %v2915_v44 = vld [vmem:[#allocation17 + $0xb58] sm:$0xff]  ;;  %v8821_v46 = vpack.c.bf16 %v2898_v33, %v2882_v9  ;;  %v2962_v9 = vld [vmem:[#allocation17 + $0xcd0] sm:$0xff]  ;;  %v2977_v33 = vld [vmem:[#allocation17 + $0xd48] sm:$0xff] }
 0x8eb   : > { %8806 = vmatpush1.bf16.msra.mxu1 %v8805_v26  ;;  %8680 = vmatprep.subr.bf16.mxu0 %v8679_v7  ;;  %v2848_v26 = vld [vmem:[#allocation17 + $0x940] sm:$0xff]  ;;  %v2931_v5 = vld [vmem:[#allocation17 + $0xbd8] sm:$0xff] }
 0x8ec   : > { %4248 = vmatmul.mubr.f32.gmra.mrb[30].mxu0 %v12539_v55  ;;  %8808 = vmatprep.subr.bf16.mxu1 %v8807_v43  ;;  %v2864_v7 = vld [vmem:[#allocation17 + $0x9c0] sm:$0xff]  ;;  %v2881_v43 = vld [vmem:[#allocation17 + $0xa48] sm:$0xff] }
 0x8ed   : > { %4474 = vmatmul.mubr.f32.gmra.mrb[30].mxu1 %v12539_v55  ;;  %4544 = vmatprep.mubr.f32.mxu0 %v12404_v53  ;;  %v8689_v37 = vpack.c.bf16 %v2864_v7, %v2848_v26  ;;  %v2914_v26 = vld [vmem:[#allocation17 + $0xb50] sm:$0xff]  ;;  %v8823_v7 = vpack.c.bf16 %v2931_v5, %v2915_v44 }
 0x8ee   : > { %8682 = vmatpush1.bf16.msra.mxu0 %v8681_v45  ;;  %4770 = vmatprep.mubr.f32.mxu1 %v12404_v53  ;;  %v8691_v45 = vpack.c.bf16 %v2897_v22, %v2881_v43  ;;  %v2947_v43 = vld [vmem:[#allocation17 + $0xc58] sm:$0xff]  ;;  %v8825_v29 = vpack.c.bf16 %v2930_v8, %v2914_v26  ;;  %v2994_v26 = vld [vmem:[#allocation17 + $0xdd0] sm:$0xff]  ;;  %v3009_v8 = vld [vmem:[#allocation17 + $0xe48] sm:$0xff] }
 0x8ef   : > { %8810 = vmatpush1.bf16.msra.mxu1 %v8809_v13  ;;  %8684 = vmatprep.subr.bf16.mxu0 %v8683_v62  ;;  %v2880_v13 = vld [vmem:[#allocation17 + $0xa40] sm:$0xff]  ;;  %v2963_v22 = vld [vmem:[#allocation17 + $0xcd8] sm:$0xff] }
 0x8f0   : > { %8812 = vmatprep.subr.bf16.mxu1 %v8811_v18  ;;  %v2896_v62 = vld [vmem:[#allocation17 + $0xac0] sm:$0xff]  ;;  %v2929_v18 = vld [vmem:[#allocation17 + $0xbc8] sm:$0xff] }
 0x8f1   : > { %v8693_v3 = vpack.c.bf16 %v2896_v62, %v2880_v13  ;;  %v2946_v13 = vld [vmem:[#allocation17 + $0xc50] sm:$0xff]  ;;  %v8827_v62 = vpack.c.bf16 %v2963_v22, %v2947_v43 }
 0x8f2   : > { %8686 = vmatpush1.bf16.msra.mxu0 %v8685_v6  ;;  %v8695_v6 = vpack.c.bf16 %v2929_v18, %v2913_v59  ;;  %v2979_v59 = vld [vmem:[#allocation17 + $0xd58] sm:$0xff]  ;;  %v8829_v5 = vpack.c.bf16 %v2962_v9, %v2946_v13  ;;  %v3026_v13 = vld [vmem:[#allocation17 + $0xed0] sm:$0xff]  ;;  %v3041_v9 = vld [vmem:[#allocation17 + $0xf48] sm:$0xff] }
 0x8f3   : > { %8814 = vmatpush1.bf16.msra.mxu1 %v8813_v48  ;;  %8688 = vmatprep.subr.bf16.mxu0 %v8687_v11  ;;  %v2912_v48 = vld [vmem:[#allocation17 + $0xb40] sm:$0xff]  ;;  %v2995_v18 = vld [vmem:[#allocation17 + $0xdd8] sm:$0xff] }
 0x8f4   : > { %8816 = vmatprep.subr.bf16.mxu1 %v8815_v42  ;;  %v2928_v11 = vld [vmem:[#allocation17 + $0xbc0] sm:$0xff]  ;;  %v2961_v42 = vld [vmem:[#allocation17 + $0xcc8] sm:$0xff] }
 0x8f5   : > { %v8697_v21 = vpack.c.bf16 %v2928_v11, %v2912_v48  ;;  %v2978_v48 = vld [vmem:[#allocation17 + $0xd50] sm:$0xff]  ;;  %v8831_v11 = vpack.c.bf16 %v2995_v18, %v2979_v59 }
 0x8f6   : > { %8690 = vmatpush1.bf16.msra.mxu0 %v8689_v37  ;;  %v8699_v37 = vpack.c.bf16 %v2961_v42, %v2945_v28  ;;  %v3011_v28 = vld [vmem:[#allocation17 + $0xe58] sm:$0xff]  ;;  %v8833_v22 = vpack.c.bf16 %v2994_v26, %v2978_v48  ;;  %v3058_v48 = vld [vmem:[#allocation17 + $0xfd0] sm:$0xff]  ;;  %v3073_v26 = vld [vmem:[#allocation17 + $0x1048] sm:$0xff] }
 0x8f7   : > { %8818 = vmatpush1.bf16.msra.mxu1 %v8817_v56  ;;  %8692 = vmatprep.subr.bf16.mxu0 %v8691_v45  ;;  %v2944_v56 = vld [vmem:[#allocation17 + $0xc40] sm:$0xff]  ;;  %v3027_v42 = vld [vmem:[#allocation17 + $0xed8] sm:$0xff] }
 0x8f8   : > { %8820 = vmatprep.subr.bf16.mxu1 %v8819_v54  ;;  %v2960_v45 = vld [vmem:[#allocation17 + $0xcc0] sm:$0xff]  ;;  %v2993_v54 = vld [vmem:[#allocation17 + $0xdc8] sm:$0xff] }
 0x8f9   : > { %v8701_v44 = vpack.c.bf16 %v2960_v45, %v2944_v56  ;;  %v3010_v56 = vld [vmem:[#allocation17 + $0xe50] sm:$0xff]  ;;  %v8835_v45 = vpack.c.bf16 %v3027_v42, %v3011_v28 }
 0x8fa   : > { %8694 = vmatpush1.bf16.msra.mxu0 %v8693_v3  ;;  %v8703_v3 = vpack.c.bf16 %v2993_v54, %v2977_v33  ;;  %v3043_v33 = vld [vmem:[#allocation17 + $0xf58] sm:$0xff]  ;;  %v8837_v18 = vpack.c.bf16 %v3026_v13, %v3010_v56  ;;  %v3090_v56 = vld [vmem:[#allocation17 + $0x10d0] sm:$0xff]  ;;  %v3105_v13 = vld [vmem:[#allocation17 + $0x1148] sm:$0xff] }
 0x8fb   : > { %8822 = vmatpush1.bf16.msra.mxu1 %v8821_v46  ;;  %8696 = vmatprep.subr.bf16.mxu0 %v8695_v6  ;;  %v2976_v46 = vld [vmem:[#allocation17 + $0xd40] sm:$0xff]  ;;  %v3059_v54 = vld [vmem:[#allocation17 + $0xfd8] sm:$0xff] }
 0x8fc   : > { %8824 = vmatprep.subr.bf16.mxu1 %v8823_v7  ;;  %v2992_v6 = vld [vmem:[#allocation17 + $0xdc0] sm:$0xff]  ;;  %v3025_v7 = vld [vmem:[#allocation17 + $0xec8] sm:$0xff] }
 0x8fd   : > { %v8705_v43 = vpack.c.bf16 %v2992_v6, %v2976_v46  ;;  %v3042_v46 = vld [vmem:[#allocation17 + $0xf50] sm:$0xff]  ;;  %v8839_v6 = vpack.c.bf16 %v3059_v54, %v3043_v33 }
 0x8fe   : > { %8698 = vmatpush1.bf16.msra.mxu0 %v8697_v21  ;;  %v8707_v21 = vpack.c.bf16 %v3025_v7, %v3009_v8  ;;  %v3075_v8 = vld [vmem:[#allocation17 + $0x1058] sm:$0xff]  ;;  %v8841_v42 = vpack.c.bf16 %v3058_v48, %v3042_v46  ;;  %v3122_v46 = vld [vmem:[#allocation17 + $0x11d0] sm:$0xff]  ;;  %v3153_v48 = vld [vmem:[#allocation17 + $0x12c8] sm:$0xff] }
 0x8ff   : > { %8826 = vmatpush1.bf16.msra.mxu1 %v8825_v29  ;;  %8700 = vmatprep.subr.bf16.mxu0 %v8699_v37  ;;  %v3008_v29 = vld [vmem:[#allocation17 + $0xe40] sm:$0xff]  ;;  %v3091_v7 = vld [vmem:[#allocation17 + $0x10d8] sm:$0xff] }
 0x900   : > { %8828 = vmatprep.subr.bf16.mxu1 %v8827_v62  ;;  %v3024_v37 = vld [vmem:[#allocation17 + $0xec0] sm:$0xff]  ;;  %v3057_v62 = vld [vmem:[#allocation17 + $0xfc8] sm:$0xff] }
 0x901   : > { %v8709_v59 = vpack.c.bf16 %v3024_v37, %v3008_v29  ;;  %v3088_v29 = vld [vmem:[#allocation17 + $0x10c0] sm:$0xff]  ;;  %v3074_v37 = vld [vmem:[#allocation17 + $0x1050] sm:$0xff] }
 0x902   : > { %8702 = vmatpush1.bf16.msra.mxu0 %v8701_v44  ;;  %v8711_v44 = vpack.c.bf16 %v3057_v62, %v3041_v9  ;;  %v3107_v9 = vld [vmem:[#allocation17 + $0x1158] sm:$0xff]  ;;  %v8845_v54 = vpack.c.bf16 %v3090_v56, %v3074_v37  ;;  %v3169_v37 = vld [vmem:[#allocation17 + $0x1348] sm:$0xff] }
 0x903   : > { %8830 = vmatpush1.bf16.msra.mxu1 %v8829_v5  ;;  %8704 = vmatprep.subr.bf16.mxu0 %v8703_v3  ;;  %v3040_v5 = vld [vmem:[#allocation17 + $0xf40] sm:$0xff]  ;;  %v3123_v62 = vld [vmem:[#allocation17 + $0x11d8] sm:$0xff]  ;;  %v3185_v56 = vld [vmem:[#allocation17 + $0x13c8] sm:$0xff] }
 0x904   : > { %8832 = vmatprep.subr.bf16.mxu1 %v8831_v11  ;;  %v3056_v3 = vld [vmem:[#allocation17 + $0xfc0] sm:$0xff]  ;;  %v3089_v11 = vld [vmem:[#allocation17 + $0x10c8] sm:$0xff] }
 0x905   : > { %v8713_v28 = vpack.c.bf16 %v3056_v3, %v3040_v5  ;;  %v3106_v5 = vld [vmem:[#allocation17 + $0x1150] sm:$0xff]  ;;  %v8847_v3 = vpack.c.bf16 %v3123_v62, %v3107_v9 }
 0x906   : > { %8706 = vmatpush1.bf16.msra.mxu0 %v8705_v43  ;;  %v8715_v43 = vpack.c.bf16 %v3089_v11, %v3073_v26  ;;  %v3139_v26 = vld [vmem:[#allocation17 + $0x1258] sm:$0xff] }
 0x907   : > { %8834 = vmatpush1.bf16.msra.mxu1 %v8833_v22  ;;  %8708 = vmatprep.subr.bf16.mxu0 %v8707_v21  ;;  %v8843_v22 = vpack.c.bf16 %v3091_v7, %v3075_v8  ;;  %v3072_v21 = vld [vmem:[#allocation17 + $0x1040] sm:$0xff]  ;;  %v3155_v11 = vld [vmem:[#allocation17 + $0x12d8] sm:$0xff]  ;;  %v8849_v7 = vpack.c.bf16 %v3122_v46, %v3106_v5  ;;  %v3186_v5 = vld [vmem:[#allocation17 + $0x13d0] sm:$0xff] }
 0x908   : > { %8836 = vmatprep.subr.bf16.mxu1 %v8835_v45  ;;  %v3121_v45 = vld [vmem:[#allocation17 + $0x11c8] sm:$0xff]  ;;  %v8717_v33 = vpack.c.bf16 %v3088_v29, %v3072_v21  ;;  %v8851_v21 = vpack.c.bf16 %v3155_v11, %v3139_v26  ;;  %v3154_v29 = vld [vmem:[#allocation17 + $0x12d0] sm:$0xff] }
 0x909   : > { %v3217_v46 = vld [vmem:[#allocation17 + $0x14c8] sm:$0xff] }
 0x90a   : > { %8710 = vmatpush1.bf16.msra.mxu0 %v8709_v59  ;;  %v8719_v59 = vpack.c.bf16 %v3121_v45, %v3105_v13  ;;  %v3171_v13 = vld [vmem:[#allocation17 + $0x1358] sm:$0xff] }
 0x90b   : > { %8838 = vmatpush1.bf16.msra.mxu1 %v8837_v18  ;;  %8712 = vmatprep.subr.bf16.mxu0 %v8711_v44  ;;  %v3104_v18 = vld [vmem:[#allocation17 + $0x1140] sm:$0xff]  ;;  %v3187_v45 = vld [vmem:[#allocation17 + $0x13d8] sm:$0xff] }
 0x90c   : > { %8840 = vmatprep.subr.bf16.mxu1 %v8839_v6  ;;  %v3120_v44 = vld [vmem:[#allocation17 + $0x11c0] sm:$0xff]  ;;  %v3137_v6 = vld [vmem:[#allocation17 + $0x1248] sm:$0xff] }
 0x90d   : > { %v8721_v8 = vpack.c.bf16 %v3120_v44, %v3104_v18  ;;  %v3170_v18 = vld [vmem:[#allocation17 + $0x1350] sm:$0xff]  ;;  %v8855_v44 = vpack.c.bf16 %v3187_v45, %v3171_v13 }
 0x90e   : > { %8714 = vmatpush1.bf16.msra.mxu0 %v8713_v28  ;;  %v8723_v28 = vpack.c.bf16 %v3153_v48, %v3137_v6  ;;  %v3203_v6 = vld [vmem:[#allocation17 + $0x1458] sm:$0xff]  ;;  %v8857_v11 = vpack.c.bf16 %v3186_v5, %v3170_v18  ;;  %v3250_v18 = vld [vmem:[#allocation17 + $0x15d0] sm:$0xff]  ;;  %v3281_v5 = vld [vmem:[#allocation17 + $0x16c8] sm:$0xff] }
 0x90f   : > { %8842 = vmatpush1.bf16.msra.mxu1 %v8841_v42  ;;  %8716 = vmatprep.subr.bf16.mxu0 %v8715_v43  ;;  %v3136_v42 = vld [vmem:[#allocation17 + $0x1240] sm:$0xff]  ;;  %v3219_v48 = vld [vmem:[#allocation17 + $0x14d8] sm:$0xff] }
 0x910   : > { %8844 = vmatprep.subr.bf16.mxu1 %v8843_v22  ;;  %v3152_v43 = vld [vmem:[#allocation17 + $0x12c0] sm:$0xff]  ;;  %v3138_v22 = vld [vmem:[#allocation17 + $0x1250] sm:$0xff] }
 0x911   : > { %4545 = vmatmul.mubr.f32.vlgmr.msra.gmra.mrb[32].mxu0 %v12407_v17  ;;  %v8725_v9 = vpack.c.bf16 %v3152_v43, %v3136_v42  ;;  %v8853_v62 = vpack.c.bf16 %v3154_v29, %v3138_v22  ;;  %v3202_v42 = vld [vmem:[#allocation17 + $0x1450] sm:$0xff]  ;;  %v8859_v43 = vpack.c.bf16 %v3219_v48, %v3203_v6  ;;  %v3249_v29 = vld [vmem:[#allocation17 + $0x15c8] sm:$0xff]  ;;  %v3267_v6 = vld [vmem:[#allocation17 + $0x1658] sm:$0xff] }
 0x912   : > { %4771 = vmatmul.mubr.f32.vlgmr.msra.gmra.mrb[32].mxu1 %v12407_v17  ;;  %4550 = vmatprep.mubr.f32.mxu0 %v12429_v50  ;;  %v3218_v22 = vld [vmem:[#allocation17 + $0x14d0] sm:$0xff]  ;;  %v3283_v48 = vld [vmem:[#allocation17 + $0x16d8] sm:$0xff] }
 0x913   : > { %8718 = vmatpush1.bf16.msra.mxu0 %v8717_v33  ;;  %4776 = vmatprep.mubr.f32.mxu1 %v12429_v50  ;;  %v8727_v33 = vpack.c.bf16 %v3185_v56, %v3169_v37  ;;  %v3235_v37 = vld [vmem:[#allocation17 + $0x1558] sm:$0xff]  ;;  %v8861_v45 = vpack.c.bf16 %v3218_v22, %v3202_v42  ;;  %v3264_v42 = vld [vmem:[#allocation17 + $0x1640] sm:$0xff]  ;;  %v3266_v22 = vld [vmem:[#allocation17 + $0x1650] sm:$0xff] }
 0x914   : > { %8846 = vmatpush1.bf16.msra.mxu1 %v8845_v54  ;;  %8720 = vmatprep.subr.bf16.mxu0 %v8719_v59  ;;  %v3168_v54 = vld [vmem:[#allocation17 + $0x1340] sm:$0xff]  ;;  %v3251_v56 = vld [vmem:[#allocation17 + $0x15d8] sm:$0xff] }
 0x915   : > { %4551 = vmatmul.mubr.f32.gmra.mrb[34].mxu0 %v12432_v2  ;;  %8848 = vmatprep.subr.bf16.mxu1 %v8847_v3  ;;  %v3184_v59 = vld [vmem:[#allocation17 + $0x13c0] sm:$0xff]  ;;  %v3201_v3 = vld [vmem:[#allocation17 + $0x1448] sm:$0xff] }
 0x916   : > { %4777 = vmatmul.mubr.f32.gmra.mrb[34].mxu1 %v12432_v2  ;;  %4556 = vmatprep.mubr.f32.mxu0 %v12437_v61  ;;  %v8729_v26 = vpack.c.bf16 %v3184_v59, %v3168_v54  ;;  %v3234_v54 = vld [vmem:[#allocation17 + $0x1550] sm:$0xff]  ;;  %v8863_v59 = vpack.c.bf16 %v3251_v56, %v3235_v37  ;;  %v3297_v37 = vld [vmem:[#allocation17 + $0x1748] sm:$0xff] }
 0x917   : > { %8722 = vmatpush1.bf16.msra.mxu0 %v8721_v8  ;;  %4782 = vmatprep.mubr.f32.mxu1 %v12437_v61  ;;  %v8731_v8 = vpack.c.bf16 %v3217_v46, %v3201_v3  ;;  %v3313_v56 = vld [vmem:[#allocation17 + $0x17c8] sm:$0xff] }
 0x918   : > { %8850 = vmatpush1.bf16.msra.mxu1 %v8849_v7  ;;  %8724 = vmatprep.subr.bf16.mxu0 %v8723_v28  ;;  %v3200_v7 = vld [vmem:[#allocation17 + $0x1440] sm:$0xff] }
 0x919   : > { %4557 = vmatmul.mubr.f32.gmra.mrb[36].mxu0 %v12444_v14  ;;  %8852 = vmatprep.subr.bf16.mxu1 %v8851_v21  ;;  %v3216_v28 = vld [vmem:[#allocation17 + $0x14c0] sm:$0xff]  ;;  %v3233_v21 = vld [vmem:[#allocation17 + $0x1548] sm:$0xff] }
 0x91a   : > { %4783 = vmatmul.mubr.f32.gmra.mrb[36].mxu1 %v12444_v14  ;;  %4562 = vmatprep.mubr.f32.mxu0 %v12461_v36  ;;  %v8733_v13 = vpack.c.bf16 %v3216_v28, %v3200_v7  ;;  %v8865_v7 = vpack.c.bf16 %v3250_v18, %v3234_v54 }
 0x91b   : > { %8726 = vmatpush1.bf16.msra.mxu0 %v8725_v9  ;;  %4788 = vmatprep.mubr.f32.mxu1 %v12461_v36  ;;  %v8735_v9 = vpack.c.bf16 %v3249_v29, %v3233_v21  ;;  %v8867_v21 = vpack.c.bf16 %v3283_v48, %v3267_v6  ;;  %v3282_v29 = vld [vmem:[#allocation17 + $0x16d0] sm:$0xff]  ;;  %v3312_v6 = vld [vmem:[#allocation17 + $0x17c0] sm:$0xff] }
 0x91c   : > { %8854 = vmatpush1.bf16.msra.mxu1 %v8853_v62  ;;  %8728 = vmatprep.subr.bf16.mxu0 %v8727_v33  ;;  %v3232_v62 = vld [vmem:[#allocation17 + $0x1540] sm:$0xff]  ;;  %v8869_v18 = vpack.c.bf16 %v3282_v29, %v3266_v22  ;;  %v3298_v48 = vld [vmem:[#allocation17 + $0x1750] sm:$0xff] }
 0x91d   : > { %4563 = vmatmul.mubr.f32.gmra.mrb[38].mxu0 %v12478_v47  ;;  %8856 = vmatprep.subr.bf16.mxu1 %v8855_v44  ;;  %v3248_v33 = vld [vmem:[#allocation17 + $0x15c0] sm:$0xff]  ;;  %v3265_v44 = vld [vmem:[#allocation17 + $0x1648] sm:$0xff]  ;;  %v8873_v29 = vpack.c.bf16 %v3314_v27, %v3298_v48  ;;  %v3363_v27 = vld [vmem:[#allocation17 + $0x1958] sm:$0xff] }
 0x91e   : > { %4789 = vmatmul.mubr.f32.gmra.mrb[38].mxu1 %v12478_v47  ;;  %4568 = vmatprep.mubr.f32.mxu0 %v12487_v23  ;;  %v8739_v28 = vpack.c.bf16 %v3281_v5, %v3265_v44  ;;  %v8743_v44 = vpack.c.bf16 %v3313_v56, %v3297_v37  ;;  %v3296_v5 = vld [vmem:[#allocation17 + $0x1740] sm:$0xff] }
 0x91f   : > { %8730 = vmatpush1.bf16.msra.mxu0 %v8729_v26  ;;  %4794 = vmatprep.mubr.f32.mxu1 %v12487_v23  ;;  %v3328_v56 = vld [vmem:[#allocation17 + $0x1840] sm:$0xff] }
 0x920   : > { %8858 = vmatpush1.bf16.msra.mxu1 %v8857_v11  ;;  %8732 = vmatprep.subr.bf16.mxu0 %v8731_v8  ;;  %v8737_v8 = vpack.c.bf16 %v3248_v33, %v3232_v62  ;;  %v3315_v62 = vld [vmem:[#allocation17 + $0x17d8] sm:$0xff] }
 0x921   : > { %4569 = vmatmul.mubr.f32.gmra.mrb[40].mxu0 %v12495_v40  ;;  %8860 = vmatprep.subr.bf16.mxu1 %v8859_v43  ;;  %v3280_v43 = vld [vmem:[#allocation17 + $0x16c0] sm:$0xff] }
 0x922   : > { %4795 = vmatmul.mubr.f32.gmra.mrb[40].mxu1 %v12495_v40  ;;  %4574 = vmatprep.mubr.f32.mxu0 %v12508_v19  ;;  %v12725_v3 = vpop.f32.mrb[0].mxu0  ;;  %v12727_v46 = vpop.f32.mrb[0].mxu1 }
 0x923   : > { %8734 = vmatpush1.bf16.msra.mxu0 %v8733_v13  ;;  %4800 = vmatprep.mubr.f32.mxu1 %v12508_v19  ;;  %v12730_v26 = vpop.f32.mrb[1].mxu0  ;;  %v12732_v11 = vpop.f32.mrb[1].mxu1 }
 0x924   : > { %8862 = vmatpush1.bf16.msra.mxu1 %v8861_v45  ;;  %8736 = vmatprep.subr.bf16.mxu0 %v8735_v9  ;;  %v3299_v9 = vld [vmem:[#allocation17 + $0x1758] sm:$0xff] }
 0x925   : > { %4575 = vmatmul.mubr.f32.gmra.mrb[42].mxu0 %v12523_v30  ;;  %8864 = vmatprep.subr.bf16.mxu1 %v8863_v59  ;;  %v8741_v59 = vpack.c.bf16 %v3280_v43, %v3264_v42  ;;  %v8871_v31 = vpack.c.bf16 %v3315_v62, %v3299_v9  ;;  %v3347_v42 = vld [vmem:[#allocation17 + $0x18d8] sm:$0xff]  ;;  %v3344_v9 = vld [vmem:[#allocation17 + $0x18c0] sm:$0xff]  ;;  %v3330_v62 = vld [vmem:[#allocation17 + $0x1850] sm:$0xff] }
 0x926   : > { %4801 = vmatmul.mubr.f32.gmra.mrb[42].mxu1 %v12523_v30  ;;  %4580 = vmatprep.mubr.f32.mxu0 %v12534_v4  ;;  %v12737_v13 = vpop.f32.mrb[2].mxu0  ;;  %v12739_v45 = vpop.f32.mrb[2].mxu1 }
 0x927   : > { %8738 = vmatpush1.bf16.msra.mxu0 %v8737_v8  ;;  %4806 = vmatprep.mubr.f32.mxu1 %v12534_v4  ;;  %v12742_v33 = vpop.f32.mrb[3].mxu0  ;;  %v12744_v54 = vpop.f32.mrb[3].mxu1  ;;  %v3329_v8 = vld [vmem:[#allocation17 + $0x1848] sm:$0xff] }
 0x928   : > { %14071 = vst [vmem:[#allocation97_spill] sm:$0xff] %v12742_v33  ;;  %14072 = vst [vmem:[#allocation98_spill] sm:$0xff] %v12744_v54  ;;  %8866 = vmatpush1.bf16.msra.mxu1 %v8865_v7  ;;  %8740 = vmatprep.subr.bf16.mxu0 %v8739_v28  ;;  %v3331_v28 = vld [vmem:[#allocation17 + $0x1858] sm:$0xff]  ;;  %v8747_v37 = vpack.c.bf16 %v3345_v41, %v3329_v8  ;;  %v3360_v8 = vld [vmem:[#allocation17 + $0x1940] sm:$0xff] }
 0x929   : > { %4581 = vmatmul.mubr.f32.gmra.mrb[44].mxu0 %v12545_v58  ;;  %8868 = vmatprep.subr.bf16.mxu1 %v8867_v21  ;;  %v8745_v21 = vpack.c.bf16 %v3312_v6, %v3296_v5  ;;  %v8875_v49 = vpack.c.bf16 %v3347_v42, %v3331_v28  ;;  %v3379_v41 = vld [vmem:[#allocation17 + $0x19d8] sm:$0xff]  ;;  %v8749_v5 = vpack.c.bf16 %v3344_v9, %v3328_v56  ;;  %v3376_v28 = vld [vmem:[#allocation17 + $0x19c0] sm:$0xff]  ;;  %v3362_v42 = vld [vmem:[#allocation17 + $0x1950] sm:$0xff] }
 0x92a   : > { %4807 = vmatmul.mubr.f32.gmra.mrb[44].mxu1 %v12545_v58  ;;  %4586 = vmatprep.mubr.f32.mxu0 %v12551_v15  ;;  %v12749_v10 = vpop.f32.mrb[4].mxu0  ;;  %v12751_v7 = vpop.f32.mrb[4].mxu1  ;;  %v8877_v6 = vpack.c.bf16 %v3346_v20, %v3330_v62  ;;  %v3395_v54 = vld [vmem:[#allocation17 + $0x1a58] sm:$0xff]  ;;  %v3408_v9 = vld [vmem:[#allocation17 + $0x1ac0] sm:$0xff]  ;;  %v3394_v62 = vld [vmem:[#allocation17 + $0x1a50] sm:$0xff] }
 0x92b   : > { %14073 = vst [vmem:[#allocation99_spill] sm:$0xff] %v12749_v10  ;;  %14074 = vst [vmem:[#allocation100_spill] sm:$0xff] %v12751_v7  ;;  %8742 = vmatpush1.bf16.msra.mxu0 %v8741_v59  ;;  %4812 = vmatprep.mubr.f32.mxu1 %v12551_v15  ;;  %v12754_v43 = vpop.f32.mrb[5].mxu0  ;;  %v12756_v22 = vpop.f32.mrb[5].mxu1  ;;  %v3361_v59 = vld [vmem:[#allocation17 + $0x1948] sm:$0xff]  ;;  %v3411_v33 = vld [vmem:[#allocation17 + $0x1ad8] sm:$0xff] }
 0x92c   : > { %14075 = vst [vmem:[#allocation101_spill] sm:$0xff] %v12754_v43  ;;  %14076 = vst [vmem:[#allocation102_spill] sm:$0xff] %v12756_v22  ;;  %8870 = vmatpush1.bf16.msra.mxu1 %v8869_v18  ;;  %8744 = vmatprep.subr.bf16.mxu0 %v8743_v44  ;;  %v3377_v7 = vld [vmem:[#allocation17 + $0x19c8] sm:$0xff] }
 0x92d   : > { %4587 = vmatmul.mubr.f32.gmra.mrb[46].mxu0 %v12557_v52  ;;  %8872 = vmatprep.subr.bf16.mxu1 %v8871_v31  ;;  %v8751_v48 = vpack.c.bf16 %v3377_v7, %v3361_v59  ;;  %v3393_v43 = vld [vmem:[#allocation17 + $0x1a48] sm:$0xff]  ;;  %v8883_v59 = vpack.c.bf16 %v3411_v33, %v3395_v54  ;;  %v3424_v33 = vld [vmem:[#allocation17 + $0x1b40] sm:$0xff] }
 0x92e   : > { %4813 = vmatmul.mubr.f32.gmra.mrb[46].mxu1 %v12557_v52  ;;  %4657 = vmatprep.mubr.f32.mxu0 %v12571_v57  ;;  %v12761_v22 = vpop.f32.mrb[6].mxu0  ;;  %v12763_v18 = vpop.f32.mrb[6].mxu1  ;;  %v3409_v10 = vld [vmem:[#allocation17 + $0x1ac8] sm:$0xff]  ;;  %v3440_v54 = vld [vmem:[#allocation17 + $0x1bc0] sm:$0xff] }
 0x92f   : > { %14077 = vst [vmem:[#allocation63_spill] sm:$0xff] %v12761_v22  ;;  %14078 = vst [vmem:[#allocation64_spill] sm:$0xff] %v12763_v18  ;;  %8746 = vmatpush1.bf16.msra.mxu0 %v8745_v21  ;;  %4883 = vmatprep.mubr.f32.mxu1 %v12571_v57  ;;  %v12766_v44 = vpop.f32.mrb[7].mxu0  ;;  %v12768_v31 = vpop.f32.mrb[7].mxu1  ;;  %v8879_v22 = vpack.c.bf16 %v3379_v41, %v3363_v27  ;;  %v3378_v18 = vld [vmem:[#allocation17 + $0x19d0] sm:$0xff]  ;;  %v3425_v41 = vld [vmem:[#allocation17 + $0x1b48] sm:$0xff] }
 0x930   : > { %14079 = vst [vmem:[#allocation65_spill] sm:$0xff] %v12766_v44  ;;  %14080 = vst [vmem:[#allocation55_spill] sm:$0xff] %v12768_v31  ;;  %8874 = vmatpush1.bf16.msra.mxu1 %v8873_v29  ;;  %8748 = vmatprep.subr.bf16.mxu0 %v8747_v37  ;;  %v8753_v29 = vpack.c.bf16 %v3376_v28, %v3360_v8  ;;  %v8881_v7 = vpack.c.bf16 %v3378_v18, %v3362_v42  ;;  %v3392_v37 = vld [vmem:[#allocation17 + $0x1a40] sm:$0xff]  ;;  %v3410_v27 = vld [vmem:[#allocation17 + $0x1ad0] sm:$0xff] }
 0x931   : > { %8876 = vmatprep.subr.bf16.mxu1 %v8875_v49  ;;  %v8755_v49 = vpack.c.bf16 %v3409_v10, %v3393_v43  ;;  %v3443_v31 = vld [vmem:[#allocation17 + $0x1bd8] sm:$0xff]  ;;  %v8885_v43 = vpack.c.bf16 %v3410_v27, %v3394_v62  ;;  %v3426_v18 = vld [vmem:[#allocation17 + $0x1b50] sm:$0xff] }
 0x932   : > { %v12770_v21 = vpop.f32.mrb[8].mxu0  ;;  %v12772_v44 = vpop.f32.mrb[8].mxu1  ;;  %v3442_v42 = vld [vmem:[#allocation17 + $0x1bd0] sm:$0xff] }
 0x933   : > { %14081 = vst [vmem:[#allocation56_spill] sm:$0xff] %v12770_v21  ;;  %8750 = vmatpush1.bf16.msra.mxu0 %v8749_v5  ;;  %14082 = vst [vmem:[#allocation57_spill] sm:$0xff] %v12772_v44  ;;  %v12774_v56 = vpop.f32.mrb[9].mxu0  ;;  %v12776_v20 = vpop.f32.mrb[9].mxu1  ;;  %v3441_v21 = vld [vmem:[#allocation17 + $0x1bc8] sm:$0xff]  ;;  %v3427_v44 = vld [vmem:[#allocation17 + $0x1b58] sm:$0xff] }
 0x934   : > { %14083 = vst [vmem:[#allocation58_spill] sm:$0xff] %v12774_v56  ;;  %8878 = vmatpush1.bf16.msra.mxu1 %v8877_v6  ;;  %14084 = vst [vmem:[#allocation59_spill] sm:$0xff] %v12776_v20  ;;  %8752 = vmatprep.subr.bf16.mxu0 %v8751_v48  ;;  %v8757_v48 = vpack.c.bf16 %v3408_v9, %v3392_v37  ;;  %v8887_v28 = vpack.c.bf16 %v3443_v31, %v3427_v44  ;;  %v3473_v20 = vld [vmem:[#allocation17 + $0x1cc8] sm:$0xff]  ;;  %v3475_v56 = vld [vmem:[#allocation17 + $0x1cd8] sm:$0xff] }
 0x935   : > { %8880 = vmatprep.subr.bf16.mxu1 %v8879_v22  ;;  %v8759_v22 = vpack.c.bf16 %v3441_v21, %v3425_v41  ;;  %v8889_v9 = vpack.c.bf16 %v3442_v42, %v3426_v18  ;;  %v3456_v44 = vld [vmem:[#allocation17 + $0x1c40] sm:$0xff]  ;;  %v3474_v41 = vld [vmem:[#allocation17 + $0x1cd0] sm:$0xff] }
 0x936   : > { %v12778_v5 = vpop.f32.mrb[10].mxu0  ;;  %v12780_v8 = vpop.f32.mrb[10].mxu1  ;;  %v3472_v31 = vld [vmem:[#allocation17 + $0x1cc0] sm:$0xff]  ;;  %v3490_v18 = vld [vmem:[#allocation17 + $0x1d50] sm:$0xff] }
 0x937   : > { %14085 = vst [vmem:[#allocation60_spill] sm:$0xff] %v12778_v5  ;;  %8754 = vmatpush1.bf16.msra.mxu0 %v8753_v29  ;;  %14086 = vst [vmem:[#allocation61_spill] sm:$0xff] %v12780_v8  ;;  %v12782_v6 = vpop.f32.mrb[11].mxu0  ;;  %v12784_v10 = vpop.f32.mrb[11].mxu1  ;;  %v3457_v5 = vld [vmem:[#allocation17 + $0x1c48] sm:$0xff]  ;;  %v3459_v8 = vld [vmem:[#allocation17 + $0x1c58] sm:$0xff] }
 0x938   : > { %14087 = vst [vmem:[#allocation62_spill] sm:$0xff] %v12782_v6  ;;  %8882 = vmatpush1.bf16.msra.mxu1 %v8881_v7  ;;  %14088 = vst [vmem:[#allocation70_spill] sm:$0xff] %v12784_v10  ;;  %8756 = vmatprep.subr.bf16.mxu0 %v8755_v49  ;;  %v8761_v49 = vpack.c.bf16 %v3440_v54, %v3424_v33  ;;  %v8763_v62 = vpack.c.bf16 %v3473_v20, %v3457_v5  ;;  %v3505_v10 = vld [vmem:[#allocation17 + $0x1dc8] sm:$0xff]  ;;  %v3507_v6 = vld [vmem:[#allocation17 + $0x1dd8] sm:$0xff] }
 0x939   : > { %8884 = vmatprep.subr.bf16.mxu1 %v8883_v59  ;;  %v3458_v59 = vld [vmem:[#allocation17 + $0x1c50] sm:$0xff]  ;;  %v8891_v27 = vpack.c.bf16 %v3475_v56, %v3459_v8  ;;  %v3488_v56 = vld [vmem:[#allocation17 + $0x1d40] sm:$0xff] }
 0x93a   : > { %v12786_v29 = vpop.f32.mrb[12].mxu0  ;;  %v12788_v37 = vpop.f32.mrb[12].mxu1  ;;  %v8893_v5 = vpack.c.bf16 %v3474_v41, %v3458_v59  ;;  %v3504_v8 = vld [vmem:[#allocation17 + $0x1dc0] sm:$0xff]  ;;  %v3506_v42 = vld [vmem:[#allocation17 + $0x1dd0] sm:$0xff]  ;;  %v3553_v41 = vld [vmem:[#allocation17 + $0x1f48] sm:$0xff] }
 0x93b   : > { %14089 = vst [vmem:[#allocation71_spill] sm:$0xff] %v12786_v29  ;;  %8758 = vmatpush1.bf16.msra.mxu0 %v8757_v48  ;;  %14090 = vst [vmem:[#allocation72_spill] sm:$0xff] %v12788_v37  ;;  %v12790_v7 = vpop.f32.mrb[13].mxu0  ;;  %v12792_v21 = vpop.f32.mrb[13].mxu1  ;;  %v3489_v29 = vld [vmem:[#allocation17 + $0x1d48] sm:$0xff]  ;;  %v3491_v37 = vld [vmem:[#allocation17 + $0x1d58] sm:$0xff] }
 0x93c   : > { %14091 = vst [vmem:[#allocation73_spill] sm:$0xff] %v12790_v7  ;;  %8886 = vmatpush1.bf16.msra.mxu1 %v8885_v43  ;;  %14092 = vst [vmem:[#allocation66_spill] sm:$0xff] %v12792_v21  ;;  %8760 = vmatprep.subr.bf16.mxu0 %v8759_v22  ;;  %v8765_v22 = vpack.c.bf16 %v3472_v31, %v3456_v44  ;;  %v8767_v54 = vpack.c.bf16 %v3505_v10, %v3489_v29  ;;  %v3537_v21 = vld [vmem:[#allocation17 + $0x1ec8] sm:$0xff]  ;;  %v3539_v7 = vld [vmem:[#allocation17 + $0x1ed8] sm:$0xff] }
 0x93d   : > { %8888 = vmatprep.subr.bf16.mxu1 %v8887_v28  ;;  %v8895_v28 = vpack.c.bf16 %v3507_v6, %v3491_v37  ;;  %v3520_v31 = vld [vmem:[#allocation17 + $0x1e40] sm:$0xff]  ;;  %v3522_v59 = vld [vmem:[#allocation17 + $0x1e50] sm:$0xff]  ;;  %v3555_v6 = vld [vmem:[#allocation17 + $0x1f58] sm:$0xff] }
 0x93e   : > { %v12794_v48 = vpop.f32.mrb[14].mxu0  ;;  %v12796_v33 = vpop.f32.mrb[14].mxu1  ;;  %v3538_v29 = vld [vmem:[#allocation17 + $0x1ed0] sm:$0xff]  ;;  %v3571_v37 = vld [vmem:[#allocation17 + $0x1fd8] sm:$0xff] }
 0x93f   : > { %14093 = vst [vmem:[#allocation67_spill] sm:$0xff] %v12794_v48  ;;  %8762 = vmatpush1.bf16.msra.mxu0 %v8761_v49  ;;  %14094 = vst [vmem:[#allocation68_spill] sm:$0xff] %v12796_v33  ;;  %v12798_v43 = vpop.f32.mrb[15].mxu0  ;;  %v12800_v20 = vpop.f32.mrb[15].mxu1  ;;  %v3521_v48 = vld [vmem:[#allocation17 + $0x1e48] sm:$0xff]  ;;  %v3523_v49 = vld [vmem:[#allocation17 + $0x1e58] sm:$0xff]  ;;  %v8769_v33 = vpack.c.bf16 %v3504_v8, %v3488_v56 }
 0x940   : > { %14095 = vst [vmem:[#allocation69_spill] sm:$0xff] %v12798_v43  ;;  %8890 = vmatpush1.bf16.msra.mxu1 %v8889_v9  ;;  %14096 = vst [vmem:[#allocation77_spill] sm:$0xff] %v12800_v20  ;;  %8764 = vmatprep.subr.bf16.mxu0 %v8763_v62  ;;  %v8897_v9 = vpack.c.bf16 %v3506_v42, %v3490_v18  ;;  %v8771_v44 = vpack.c.bf16 %v3537_v21, %v3521_v48  ;;  %v3536_v62 = vld [vmem:[#allocation17 + $0x1ec0] sm:$0xff]  ;;  %v3554_v8 = vld [vmem:[#allocation17 + $0x1f50] sm:$0xff] }
 0x941   : > { %8892 = vmatprep.subr.bf16.mxu1 %v8891_v27  ;;  %v8899_v10 = vpack.c.bf16 %v3539_v7, %v3523_v49  ;;  %v3569_v27 = vld [vmem:[#allocation17 + $0x1fc8] sm:$0xff]  ;;  %v8773_v20 = vpack.c.bf16 %v3536_v62, %v3520_v31  ;;  %v8903_v21 = vpack.c.bf16 %v3571_v37, %v3555_v6  ;;  %v3570_v48 = vld [vmem:[#allocation17 + $0x1fd0] sm:$0xff]  ;;  %v2567_v7 = vld [vmem:[#allocation17 + $0x78] sm:$0xff] }
 0x942   : > { %v8775_v56 = vpack.c.bf16 %v3569_v27, %v3553_v41  ;;  %v2565_v18 = vld [vmem:[#allocation17 + $0x68] sm:$0xff]  ;;  %v2583_v42 = vld [vmem:[#allocation17 + $0xf8] sm:$0xff]  ;;  %v2580_v62 = vld [vmem:[#allocation17 + $0xe0] sm:$0xff] }
 0x943   : > { %8766 = vmatpush1.bf16.msra.mxu0 %v8765_v22  ;;  %v8901_v22 = vpack.c.bf16 %v3538_v29, %v3522_v59  ;;  %v2566_v59 = vld [vmem:[#allocation17 + $0x70] sm:$0xff]  ;;  %v2597_v41 = vld [vmem:[#allocation17 + $0x168] sm:$0xff]  ;;  %v2599_v27 = vld [vmem:[#allocation17 + $0x178] sm:$0xff] }
 0x944   : > { %8894 = vmatpush1.bf16.msra.mxu1 %v8893_v5  ;;  %8768 = vmatprep.subr.bf16.mxu0 %v8767_v54  ;;  %v3552_v5 = vld [vmem:[#allocation17 + $0x1f40] sm:$0xff]  ;;  %v2582_v29 = vld [vmem:[#allocation17 + $0xf0] sm:$0xff]  ;;  %v2615_v6 = vld [vmem:[#allocation17 + $0x1f8] sm:$0xff] }
 0x945   : > { %8896 = vmatprep.subr.bf16.mxu1 %v8895_v28  ;;  %v3568_v54 = vld [vmem:[#allocation17 + $0x1fc0] sm:$0xff]  ;;  %v2581_v28 = vld [vmem:[#allocation17 + $0xe8] sm:$0xff] }
 0x946   : > { %v8777_v49 = vpack.c.bf16 %v3568_v54, %v3552_v5  ;;  %v8907_v31 = vpack.c.bf16 %v2581_v28, %v2565_v18  ;;  %v2612_v5 = vld [vmem:[#allocation17 + $0x1e0] sm:$0xff]  ;;  %v2598_v54 = vld [vmem:[#allocation17 + $0x170] sm:$0xff]  ;;  %v2645_v18 = vld [vmem:[#allocation17 + $0x2e8] sm:$0xff] }
 0x947   : > { %8770 = vmatpush1.bf16.msra.mxu0 %v8769_v33  ;;  %v8905_v33 = vpack.c.bf16 %v3570_v48, %v3554_v8  ;;  %v9039_v8 = vpack.c.bf16 %v2615_v6, %v2599_v27  ;;  %v2629_v48 = vld [vmem:[#allocation17 + $0x268] sm:$0xff]  ;;  %v2631_v28 = vld [vmem:[#allocation17 + $0x278] sm:$0xff] }
 0x948   : > { %8898 = vmatpush1.bf16.msra.mxu1 %v8897_v9  ;;  %8772 = vmatprep.subr.bf16.mxu0 %v8771_v44  ;;  %v9035_v9 = vpack.c.bf16 %v2583_v42, %v2567_v7  ;;  %v2564_v44 = vld [vmem:[#allocation17 + $0x60] sm:$0xff]  ;;  %v2647_v7 = vld [vmem:[#allocation17 + $0x2f8] sm:$0xff] }
 0x949   : > { %8900 = vmatprep.subr.bf16.mxu1 %v8899_v10  ;;  %v2613_v10 = vld [vmem:[#allocation17 + $0x1e8] sm:$0xff]  ;;  %v8909_v37 = vpack.c.bf16 %v2580_v62, %v2564_v44  ;;  %v2630_v44 = vld [vmem:[#allocation17 + $0x270] sm:$0xff]  ;;  %v9043_v62 = vpack.c.bf16 %v2647_v7, %v2631_v28  ;;  %v2679_v27 = vld [vmem:[#allocation17 + $0x3f8] sm:$0xff] }
 0x94a   : > { %v2711_v28 = vld [vmem:[#allocation17 + $0x4f8] sm:$0xff] }
 0x94b   : > { %8774 = vmatpush1.bf16.msra.mxu0 %v8773_v20  ;;  %v9037_v20 = vpack.c.bf16 %v2582_v29, %v2566_v59  ;;  %v2646_v59 = vld [vmem:[#allocation17 + $0x2f0] sm:$0xff]  ;;  %v2661_v29 = vld [vmem:[#allocation17 + $0x368] sm:$0xff] }
 0x94c   : > { %8902 = vmatpush1.bf16.msra.mxu1 %v8901_v22  ;;  %8776 = vmatprep.subr.bf16.mxu0 %v8775_v56  ;;  %v8911_v22 = vpack.c.bf16 %v2613_v10, %v2597_v41  ;;  %v2596_v56 = vld [vmem:[#allocation17 + $0x160] sm:$0xff]  ;;  %v2677_v41 = vld [vmem:[#allocation17 + $0x3e8] sm:$0xff]  ;;  %v2663_v10 = vld [vmem:[#allocation17 + $0x378] sm:$0xff] }
 0x94d   : > { %8904 = vmatprep.subr.bf16.mxu1 %v8903_v21  ;;  %v2614_v21 = vld [vmem:[#allocation17 + $0x1f0] sm:$0xff]  ;;  %v8913_v42 = vpack.c.bf16 %v2612_v5, %v2596_v56  ;;  %v2676_v56 = vld [vmem:[#allocation17 + $0x3e0] sm:$0xff] }
 0x94e   : > { %v2662_v5 = vld [vmem:[#allocation17 + $0x370] sm:$0xff] }
 0x94f   : > { %8778 = vmatpush1.bf16.msra.mxu0 %v8777_v49  ;;  %v9041_v49 = vpack.c.bf16 %v2614_v21, %v2598_v54  ;;  %v9047_v54 = vpack.c.bf16 %v2679_v27, %v2663_v10  ;;  %v2693_v21 = vld [vmem:[#allocation17 + $0x468] sm:$0xff]  ;;  %v2743_v10 = vld [vmem:[#allocation17 + $0x5f8] sm:$0xff] }
 0x950   : > { %8906 = vmatpush1.bf16.msra.mxu1 %v8905_v33  ;;  %8908 = vmatprep.subr.bf16.mxu0 %v8907_v31  ;;  %v8915_v33 = vpack.c.bf16 %v2645_v18, %v2629_v48  ;;  %v2628_v31 = vld [vmem:[#allocation17 + $0x260] sm:$0xff]  ;;  %v2709_v48 = vld [vmem:[#allocation17 + $0x4e8] sm:$0xff]  ;;  %v2695_v18 = vld [vmem:[#allocation17 + $0x478] sm:$0xff] }
 0x951   : > { %9036 = vmatprep.subr.bf16.mxu1 %v9035_v9  ;;  %v2644_v9 = vld [vmem:[#allocation17 + $0x2e0] sm:$0xff] }
 0x952   : > { %4658 = vmatmul.mubr.f32.vlgmr.msra.gmra.mrb[32].mxu0 %v12412_v25  ;;  %v8917_v6 = vpack.c.bf16 %v2644_v9, %v2628_v31  ;;  %v2708_v31 = vld [vmem:[#allocation17 + $0x4e0] sm:$0xff]  ;;  %v2694_v9 = vld [vmem:[#allocation17 + $0x470] sm:$0xff] }
 0x953   : > { %4884 = vmatmul.mubr.f32.vlgmr.msra.gmra.mrb[32].mxu1 %v12412_v25  ;;  %4663 = vmatprep.mubr.f32.mxu0 %v12578_v1 }
 0x954   : > { %4889 = vmatprep.mubr.f32.mxu1 %v12578_v1  ;;  %8910 = vmatpush1.bf16.msra.mxu0 %v8909_v37  ;;  %v9045_v37 = vpack.c.bf16 %v2646_v59, %v2630_v44  ;;  %v9051_v44 = vpack.c.bf16 %v2711_v28, %v2695_v18  ;;  %v2725_v59 = vld [vmem:[#allocation17 + $0x568] sm:$0xff]  ;;  %v2775_v18 = vld [vmem:[#allocation17 + $0x6f8] sm:$0xff] }
 0x955   : > { %9038 = vmatpush1.bf16.msra.mxu1 %v9037_v20  ;;  %8912 = vmatprep.subr.bf16.mxu0 %v8911_v22  ;;  %v8919_v20 = vpack.c.bf16 %v2677_v41, %v2661_v29  ;;  %v2660_v22 = vld [vmem:[#allocation17 + $0x360] sm:$0xff]  ;;  %v2741_v29 = vld [vmem:[#allocation17 + $0x5e8] sm:$0xff]  ;;  %v2727_v41 = vld [vmem:[#allocation17 + $0x578] sm:$0xff] }
 0x956   : > { %4664 = vmatmul.mubr.f32.gmra.mrb[34].mxu0 %v12455_v63  ;;  %9040 = vmatprep.subr.bf16.mxu1 %v9039_v8  ;;  %v2678_v8 = vld [vmem:[#allocation17 + $0x3f0] sm:$0xff]  ;;  %v8921_v7 = vpack.c.bf16 %v2676_v56, %v2660_v22  ;;  %v2740_v22 = vld [vmem:[#allocation17 + $0x5e0] sm:$0xff] }
 0x957   : > { %4890 = vmatmul.mubr.f32.gmra.mrb[34].mxu1 %v12455_v63  ;;  %4669 = vmatprep.mubr.f32.mxu0 %v12587_v39  ;;  %v2726_v56 = vld [vmem:[#allocation17 + $0x570] sm:$0xff] }
 0x958   : > { %4895 = vmatprep.mubr.f32.mxu1 %v12587_v39  ;;  %8914 = vmatpush1.bf16.msra.mxu0 %v8913_v42  ;;  %v9049_v42 = vpack.c.bf16 %v2678_v8, %v2662_v5  ;;  %v9055_v5 = vpack.c.bf16 %v2743_v10, %v2727_v41  ;;  %v2757_v8 = vld [vmem:[#allocation17 + $0x668] sm:$0xff]  ;;  %v2807_v41 = vld [vmem:[#allocation17 + $0x7f8] sm:$0xff] }
 0x959   : > { %9042 = vmatpush1.bf16.msra.mxu1 %v9041_v49  ;;  %8916 = vmatprep.subr.bf16.mxu0 %v8915_v33  ;;  %v8923_v49 = vpack.c.bf16 %v2709_v48, %v2693_v21  ;;  %v2692_v33 = vld [vmem:[#allocation17 + $0x460] sm:$0xff]  ;;  %v2773_v21 = vld [vmem:[#allocation17 + $0x6e8] sm:$0xff]  ;;  %v2759_v48 = vld [vmem:[#allocation17 + $0x678] sm:$0xff] }
 0x95a   : > { %4670 = vmatmul.mubr.f32.gmra.mrb[36].mxu0 %v12466_v16  ;;  %9044 = vmatprep.subr.bf16.mxu1 %v9043_v62  ;;  %v2710_v62 = vld [vmem:[#allocation17 + $0x4f0] sm:$0xff]  ;;  %v8925_v27 = vpack.c.bf16 %v2708_v31, %v2692_v33  ;;  %v2772_v33 = vld [vmem:[#allocation17 + $0x6e0] sm:$0xff] }
 0x95b   : > { %4896 = vmatmul.mubr.f32.gmra.mrb[36].mxu1 %v12466_v16  ;;  %4675 = vmatprep.mubr.f32.mxu0 %v12596_v12  ;;  %v2758_v31 = vld [vmem:[#allocation17 + $0x670] sm:$0xff] }
 0x95c   : > { %4901 = vmatprep.mubr.f32.mxu1 %v12596_v12  ;;  %8918 = vmatpush1.bf16.msra.mxu0 %v8917_v6  ;;  %v9053_v6 = vpack.c.bf16 %v2710_v62, %v2694_v9  ;;  %v9059_v9 = vpack.c.bf16 %v2775_v18, %v2759_v48  ;;  %v2789_v62 = vld [vmem:[#allocation17 + $0x768] sm:$0xff]  ;;  %v2839_v48 = vld [vmem:[#allocation17 + $0x8f8] sm:$0xff] }
 0x95d   : > { %9046 = vmatpush1.bf16.msra.mxu1 %v9045_v37  ;;  %8920 = vmatprep.subr.bf16.mxu0 %v8919_v20  ;;  %v8927_v37 = vpack.c.bf16 %v2741_v29, %v2725_v59  ;;  %v2724_v20 = vld [vmem:[#allocation17 + $0x560] sm:$0xff]  ;;  %v2805_v59 = vld [vmem:[#allocation17 + $0x7e8] sm:$0xff]  ;;  %v2791_v29 = vld [vmem:[#allocation17 + $0x778] sm:$0xff] }
 0x95e   : > { %4676 = vmatmul.mubr.f32.gmra.mrb[38].mxu0 %v12481_v24  ;;  %9048 = vmatprep.subr.bf16.mxu1 %v9047_v54  ;;  %v2742_v54 = vld [vmem:[#allocation17 + $0x5f0] sm:$0xff]  ;;  %v8929_v28 = vpack.c.bf16 %v2740_v22, %v2724_v20  ;;  %v2804_v20 = vld [vmem:[#allocation17 + $0x7e0] sm:$0xff] }
 0x95f   : > { %4902 = vmatmul.mubr.f32.gmra.mrb[38].mxu1 %v12481_v24  ;;  %4681 = vmatprep.mubr.f32.mxu0 %v12605_v38  ;;  %v2790_v22 = vld [vmem:[#allocation17 + $0x770] sm:$0xff] }
 0x960   : > { %4907 = vmatprep.mubr.f32.mxu1 %v12605_v38  ;;  %8922 = vmatpush1.bf16.msra.mxu0 %v8921_v7  ;;  %v9057_v7 = vpack.c.bf16 %v2742_v54, %v2726_v56  ;;  %v9063_v56 = vpack.c.bf16 %v2807_v41, %v2791_v29  ;;  %v2821_v54 = vld [vmem:[#allocation17 + $0x868] sm:$0xff]  ;;  %v2871_v29 = vld [vmem:[#allocation17 + $0x9f8] sm:$0xff] }
 0x961   : > { %9050 = vmatpush1.bf16.msra.mxu1 %v9049_v42  ;;  %8924 = vmatprep.subr.bf16.mxu0 %v8923_v49  ;;  %v8931_v42 = vpack.c.bf16 %v2773_v21, %v2757_v8  ;;  %v2756_v49 = vld [vmem:[#allocation17 + $0x660] sm:$0xff]  ;;  %v2837_v8 = vld [vmem:[#allocation17 + $0x8e8] sm:$0xff]  ;;  %v2823_v21 = vld [vmem:[#allocation17 + $0x878] sm:$0xff] }
 0x962   : > { %4682 = vmatmul.mubr.f32.gmra.mrb[40].mxu0 %v12502_v60  ;;  %9052 = vmatprep.subr.bf16.mxu1 %v9051_v44  ;;  %v2774_v44 = vld [vmem:[#allocation17 + $0x6f0] sm:$0xff]  ;;  %v8933_v10 = vpack.c.bf16 %v2772_v33, %v2756_v49  ;;  %v2836_v49 = vld [vmem:[#allocation17 + $0x8e0] sm:$0xff] }
 0x963   : > { %4908 = vmatmul.mubr.f32.gmra.mrb[40].mxu1 %v12502_v60  ;;  %4687 = vmatprep.mubr.f32.mxu0 %v12614_v0  ;;  %v2822_v33 = vld [vmem:[#allocation17 + $0x870] sm:$0xff] }
 0x964   : > { %4913 = vmatprep.mubr.f32.mxu1 %v12614_v0  ;;  %8926 = vmatpush1.bf16.msra.mxu0 %v8925_v27  ;;  %v9061_v27 = vpack.c.bf16 %v2774_v44, %v2758_v31  ;;  %v9067_v31 = vpack.c.bf16 %v2839_v48, %v2823_v21  ;;  %v2853_v44 = vld [vmem:[#allocation17 + $0x968] sm:$0xff]  ;;  %v2903_v21 = vld [vmem:[#allocation17 + $0xaf8] sm:$0xff] }
 0x965   : > { %9054 = vmatpush1.bf16.msra.mxu1 %v9053_v6  ;;  %8928 = vmatprep.subr.bf16.mxu0 %v8927_v37  ;;  %v8935_v6 = vpack.c.bf16 %v2805_v59, %v2789_v62  ;;  %v2788_v37 = vld [vmem:[#allocation17 + $0x760] sm:$0xff]  ;;  %v2869_v62 = vld [vmem:[#allocation17 + $0x9e8] sm:$0xff]  ;;  %v2855_v59 = vld [vmem:[#allocation17 + $0x978] sm:$0xff] }
 0x966   : > { %4688 = vmatmul.mubr.f32.gmra.mrb[42].mxu0 %v12513_v32  ;;  %9056 = vmatprep.subr.bf16.mxu1 %v9055_v5  ;;  %v2806_v5 = vld [vmem:[#allocation17 + $0x7f0] sm:$0xff]  ;;  %v8937_v18 = vpack.c.bf16 %v2804_v20, %v2788_v37  ;;  %v2868_v37 = vld [vmem:[#allocation17 + $0x9e0] sm:$0xff] }
 0x967   : > { %4914 = vmatmul.mubr.f32.gmra.mrb[42].mxu1 %v12513_v32  ;;  %4693 = vmatprep.mubr.f32.mxu0 %v12623_v51  ;;  %v2854_v20 = vld [vmem:[#allocation17 + $0x970] sm:$0xff] }
 0x968   : > { %4919 = vmatprep.mubr.f32.mxu1 %v12623_v51  ;;  %8930 = vmatpush1.bf16.msra.mxu0 %v8929_v28  ;;  %v9065_v28 = vpack.c.bf16 %v2806_v5, %v2790_v22  ;;  %v9071_v22 = vpack.c.bf16 %v2871_v29, %v2855_v59  ;;  %v2885_v5 = vld [vmem:[#allocation17 + $0xa68] sm:$0xff] }
 0x969   : > { %9058 = vmatpush1.bf16.msra.mxu1 %v9057_v7  ;;  %8932 = vmatprep.subr.bf16.mxu0 %v8931_v42  ;;  %v8939_v7 = vpack.c.bf16 %v2837_v8, %v2821_v54  ;;  %v2820_v42 = vld [vmem:[#allocation17 + $0x860] sm:$0xff]  ;;  %v2901_v54 = vld [vmem:[#allocation17 + $0xae8] sm:$0xff]  ;;  %v2887_v8 = vld [vmem:[#allocation17 + $0xa78] sm:$0xff] }
 0x96a   : > { %4694 = vmatmul.mubr.f32.gmra.mrb[44].mxu0 %v12530_v34  ;;  %9060 = vmatprep.subr.bf16.mxu1 %v9059_v9  ;;  %v2838_v9 = vld [vmem:[#allocation17 + $0x8f0] sm:$0xff]  ;;  %v8941_v41 = vpack.c.bf16 %v2836_v49, %v2820_v42  ;;  %v9075_v49 = vpack.c.bf16 %v2903_v21, %v2887_v8 }
 0x96b   : > { %4920 = vmatmul.mubr.f32.gmra.mrb[44].mxu1 %v12530_v34  ;;  %4699 = vmatprep.mubr.f32.mxu0 %v12632_v35  ;;  %v2886_v42 = vld [vmem:[#allocation17 + $0xa70] sm:$0xff] }
 0x96c   : > { %4925 = vmatprep.mubr.f32.mxu1 %v12632_v35  ;;  %8934 = vmatpush1.bf16.msra.mxu0 %v8933_v10  ;;  %v9069_v10 = vpack.c.bf16 %v2838_v9, %v2822_v33  ;;  %v2902_v33 = vld [vmem:[#allocation17 + $0xaf0] sm:$0xff]  ;;  %v2917_v9 = vld [vmem:[#allocation17 + $0xb68] sm:$0xff] }
 0x96d   : > { %9062 = vmatpush1.bf16.msra.mxu1 %v9061_v27  ;;  %8936 = vmatprep.subr.bf16.mxu0 %v8935_v6  ;;  %v8943_v27 = vpack.c.bf16 %v2869_v62, %v2853_v44  ;;  %v2852_v6 = vld [vmem:[#allocation17 + $0x960] sm:$0xff]  ;;  %v2919_v44 = vld [vmem:[#allocation17 + $0xb78] sm:$0xff]  ;;  %v9077_v29 = vpack.c.bf16 %v2902_v33, %v2886_v42  ;;  %v2966_v42 = vld [vmem:[#allocation17 + $0xcf0] sm:$0xff] }
 0x96e   : > { %4700 = vmatmul.mubr.f32.gmra.mrb[46].mxu0 %v12539_v55  ;;  %9064 = vmatprep.subr.bf16.mxu1 %v9063_v56  ;;  %v2870_v56 = vld [vmem:[#allocation17 + $0x9f0] sm:$0xff]  ;;  %v8945_v48 = vpack.c.bf16 %v2868_v37, %v2852_v6  ;;  %v2935_v62 = vld [vmem:[#allocation17 + $0xbf8] sm:$0xff]  ;;  %v2981_v33 = vld [vmem:[#allocation17 + $0xd68] sm:$0xff] }
 0x96f   : > { %4926 = vmatmul.mubr.f32.gmra.mrb[46].mxu1 %v12539_v55  ;;  %4996 = vmatprep.mubr.f32.mxu0 %v12404_v53  ;;  %v2918_v6 = vld [vmem:[#allocation17 + $0xb70] sm:$0xff]  ;;  %v9079_v37 = vpack.c.bf16 %v2935_v62, %v2919_v44 }
 0x970   : > { %8938 = vmatpush1.bf16.msra.mxu0 %v8937_v18  ;;  %5222 = vmatprep.mubr.f32.mxu1 %v12404_v53  ;;  %v9073_v53 = vpack.c.bf16 %v2870_v56, %v2854_v20  ;;  %v8947_v18 = vpack.c.bf16 %v2901_v54, %v2885_v5  ;;  %v2934_v20 = vld [vmem:[#allocation17 + $0xbf0] sm:$0xff]  ;;  %v2949_v56 = vld [vmem:[#allocation17 + $0xc68] sm:$0xff]  ;;  %v2951_v5 = vld [vmem:[#allocation17 + $0xc78] sm:$0xff] }
 0x971   : > { %9066 = vmatpush1.bf16.msra.mxu1 %v9065_v28  ;;  %8940 = vmatprep.subr.bf16.mxu0 %v8939_v7  ;;  %v2884_v28 = vld [vmem:[#allocation17 + $0xa60] sm:$0xff]  ;;  %v2967_v54 = vld [vmem:[#allocation17 + $0xcf8] sm:$0xff]  ;;  %v9081_v21 = vpack.c.bf16 %v2934_v20, %v2918_v6  ;;  %v2998_v6 = vld [vmem:[#allocation17 + $0xdf0] sm:$0xff] }
 0x972   : > { %9068 = vmatprep.subr.bf16.mxu1 %v9067_v31  ;;  %v2900_v7 = vld [vmem:[#allocation17 + $0xae0] sm:$0xff]  ;;  %v2933_v31 = vld [vmem:[#allocation17 + $0xbe8] sm:$0xff] }
 0x973   : > { %v8949_v59 = vpack.c.bf16 %v2900_v7, %v2884_v28  ;;  %v2950_v28 = vld [vmem:[#allocation17 + $0xc70] sm:$0xff]  ;;  %v9083_v7 = vpack.c.bf16 %v2967_v54, %v2951_v5  ;;  %v3013_v20 = vld [vmem:[#allocation17 + $0xe68] sm:$0xff] }
 0x974   : > { %8942 = vmatpush1.bf16.msra.mxu0 %v8941_v41  ;;  %v8951_v41 = vpack.c.bf16 %v2933_v31, %v2917_v9  ;;  %v2983_v9 = vld [vmem:[#allocation17 + $0xd78] sm:$0xff]  ;;  %v9085_v62 = vpack.c.bf16 %v2966_v42, %v2950_v28  ;;  %v3030_v28 = vld [vmem:[#allocation17 + $0xef0] sm:$0xff]  ;;  %v3045_v42 = vld [vmem:[#allocation17 + $0xf68] sm:$0xff] }
 0x975   : > { %9070 = vmatpush1.bf16.msra.mxu1 %v9069_v10  ;;  %8944 = vmatprep.subr.bf16.mxu0 %v8943_v27  ;;  %v2916_v10 = vld [vmem:[#allocation17 + $0xb60] sm:$0xff]  ;;  %v2999_v31 = vld [vmem:[#allocation17 + $0xdf8] sm:$0xff] }
 0x976   : > { %9072 = vmatprep.subr.bf16.mxu1 %v9071_v22  ;;  %v2932_v27 = vld [vmem:[#allocation17 + $0xbe0] sm:$0xff]  ;;  %v2965_v22 = vld [vmem:[#allocation17 + $0xce8] sm:$0xff] }
 0x977   : > { %v8953_v8 = vpack.c.bf16 %v2932_v27, %v2916_v10  ;;  %v2982_v10 = vld [vmem:[#allocation17 + $0xd70] sm:$0xff]  ;;  %v9087_v27 = vpack.c.bf16 %v2999_v31, %v2983_v9 }
 0x978   : > { %8946 = vmatpush1.bf16.msra.mxu0 %v8945_v48  ;;  %v8955_v48 = vpack.c.bf16 %v2965_v22, %v2949_v56  ;;  %v3015_v56 = vld [vmem:[#allocation17 + $0xe78] sm:$0xff]  ;;  %v9089_v54 = vpack.c.bf16 %v2998_v6, %v2982_v10  ;;  %v3062_v10 = vld [vmem:[#allocation17 + $0xff0] sm:$0xff]  ;;  %v3077_v6 = vld [vmem:[#allocation17 + $0x1068] sm:$0xff] }
 0x979   : > { %9074 = vmatpush1.bf16.msra.mxu1 %v9073_v53  ;;  %8948 = vmatprep.subr.bf16.mxu0 %v8947_v18  ;;  %v2948_v53 = vld [vmem:[#allocation17 + $0xc60] sm:$0xff]  ;;  %v3031_v22 = vld [vmem:[#allocation17 + $0xef8] sm:$0xff] }
 0x97a   : > { %9076 = vmatprep.subr.bf16.mxu1 %v9075_v49  ;;  %v2964_v18 = vld [vmem:[#allocation17 + $0xce0] sm:$0xff]  ;;  %v2997_v49 = vld [vmem:[#allocation17 + $0xde8] sm:$0xff] }
 0x97b   : > { %v8957_v44 = vpack.c.bf16 %v2964_v18, %v2948_v53  ;;  %v3014_v53 = vld [vmem:[#allocation17 + $0xe70] sm:$0xff]  ;;  %v9091_v18 = vpack.c.bf16 %v3031_v22, %v3015_v56 }
 0x97c   : > { %8950 = vmatpush1.bf16.msra.mxu0 %v8949_v59  ;;  %v8959_v59 = vpack.c.bf16 %v2997_v49, %v2981_v33  ;;  %v3047_v33 = vld [vmem:[#allocation17 + $0xf78] sm:$0xff]  ;;  %v9093_v31 = vpack.c.bf16 %v3030_v28, %v3014_v53  ;;  %v3094_v53 = vld [vmem:[#allocation17 + $0x10f0] sm:$0xff]  ;;  %v3109_v28 = vld [vmem:[#allocation17 + $0x1168] sm:$0xff] }
 0x97d   : > { %9078 = vmatpush1.bf16.msra.mxu1 %v9077_v29  ;;  %8952 = vmatprep.subr.bf16.mxu0 %v8951_v41  ;;  %v2980_v29 = vld [vmem:[#allocation17 + $0xd60] sm:$0xff]  ;;  %v3063_v49 = vld [vmem:[#allocation17 + $0xff8] sm:$0xff] }
 0x97e   : > { %9080 = vmatprep.subr.bf16.mxu1 %v9079_v37  ;;  %v2996_v41 = vld [vmem:[#allocation17 + $0xde0] sm:$0xff]  ;;  %v3029_v37 = vld [vmem:[#allocation17 + $0xee8] sm:$0xff] }
 0x97f   : > { %v8961_v5 = vpack.c.bf16 %v2996_v41, %v2980_v29  ;;  %v3046_v29 = vld [vmem:[#allocation17 + $0xf70] sm:$0xff]  ;;  %v9095_v41 = vpack.c.bf16 %v3063_v49, %v3047_v33 }
 0x980   : > { %8954 = vmatpush1.bf16.msra.mxu0 %v8953_v8  ;;  %v8963_v8 = vpack.c.bf16 %v3029_v37, %v3013_v20  ;;  %v3079_v20 = vld [vmem:[#allocation17 + $0x1078] sm:$0xff]  ;;  %v9097_v22 = vpack.c.bf16 %v3062_v10, %v3046_v29  ;;  %v3126_v29 = vld [vmem:[#allocation17 + $0x11f0] sm:$0xff]  ;;  %v3157_v10 = vld [vmem:[#allocation17 + $0x12e8] sm:$0xff] }
 0x981   : > { %9082 = vmatpush1.bf16.msra.mxu1 %v9081_v21  ;;  %8956 = vmatprep.subr.bf16.mxu0 %v8955_v48  ;;  %v3012_v21 = vld [vmem:[#allocation17 + $0xe60] sm:$0xff]  ;;  %v3095_v37 = vld [vmem:[#allocation17 + $0x10f8] sm:$0xff] }
 0x982   : > { %9084 = vmatprep.subr.bf16.mxu1 %v9083_v7  ;;  %v3028_v48 = vld [vmem:[#allocation17 + $0xee0] sm:$0xff]  ;;  %v3061_v7 = vld [vmem:[#allocation17 + $0xfe8] sm:$0xff] }
 0x983   : > { %v8965_v9 = vpack.c.bf16 %v3028_v48, %v3012_v21  ;;  %v3092_v21 = vld [vmem:[#allocation17 + $0x10e0] sm:$0xff]  ;;  %v3078_v48 = vld [vmem:[#allocation17 + $0x1070] sm:$0xff] }
 0x984   : > { %8958 = vmatpush1.bf16.msra.mxu0 %v8957_v44  ;;  %v8967_v44 = vpack.c.bf16 %v3061_v7, %v3045_v42  ;;  %v3111_v42 = vld [vmem:[#allocation17 + $0x1178] sm:$0xff]  ;;  %v9101_v49 = vpack.c.bf16 %v3094_v53, %v3078_v48  ;;  %v3189_v48 = vld [vmem:[#allocation17 + $0x13e8] sm:$0xff] }
 0x985   : > { %9086 = vmatpush1.bf16.msra.mxu1 %v9085_v62  ;;  %8960 = vmatprep.subr.bf16.mxu0 %v8959_v59  ;;  %v3044_v62 = vld [vmem:[#allocation17 + $0xf60] sm:$0xff]  ;;  %v3127_v7 = vld [vmem:[#allocation17 + $0x11f8] sm:$0xff] }
 0x986   : > { %9088 = vmatprep.subr.bf16.mxu1 %v9087_v27  ;;  %v3060_v59 = vld [vmem:[#allocation17 + $0xfe0] sm:$0xff]  ;;  %v3093_v27 = vld [vmem:[#allocation17 + $0x10e8] sm:$0xff]  ;;  %v3191_v53 = vld [vmem:[#allocation17 + $0x13f8] sm:$0xff] }
 0x987   : > { %v8969_v56 = vpack.c.bf16 %v3060_v59, %v3044_v62  ;;  %v3110_v62 = vld [vmem:[#allocation17 + $0x1170] sm:$0xff]  ;;  %v9103_v59 = vpack.c.bf16 %v3127_v7, %v3111_v42  ;;  %v3172_v7 = vld [vmem:[#allocation17 + $0x1360] sm:$0xff] }
 0x988   : > { %8962 = vmatpush1.bf16.msra.mxu0 %v8961_v5  ;;  %v8971_v5 = vpack.c.bf16 %v3093_v27, %v3077_v6  ;;  %v3143_v6 = vld [vmem:[#allocation17 + $0x1278] sm:$0xff] }
 0x989   : > { %9090 = vmatpush1.bf16.msra.mxu1 %v9089_v54  ;;  %8964 = vmatprep.subr.bf16.mxu0 %v8963_v8  ;;  %v9099_v54 = vpack.c.bf16 %v3095_v37, %v3079_v20  ;;  %v3076_v8 = vld [vmem:[#allocation17 + $0x1060] sm:$0xff]  ;;  %v3159_v27 = vld [vmem:[#allocation17 + $0x12f8] sm:$0xff]  ;;  %v9105_v37 = vpack.c.bf16 %v3126_v29, %v3110_v62 }
 0x98a   : > { %9092 = vmatprep.subr.bf16.mxu1 %v9091_v18  ;;  %v3125_v18 = vld [vmem:[#allocation17 + $0x11e8] sm:$0xff]  ;;  %v8973_v33 = vpack.c.bf16 %v3092_v21, %v3076_v8  ;;  %v9107_v8 = vpack.c.bf16 %v3159_v27, %v3143_v6  ;;  %v3223_v62 = vld [vmem:[#allocation17 + $0x14f8] sm:$0xff]  ;;  %v3220_v6 = vld [vmem:[#allocation17 + $0x14e0] sm:$0xff] }
 0x98b   : > { %v3173_v21 = vld [vmem:[#allocation17 + $0x1368] sm:$0xff]  ;;  %v3206_v27 = vld [vmem:[#allocation17 + $0x1470] sm:$0xff] }
 0x98c   : > { %8966 = vmatpush1.bf16.msra.mxu0 %v8965_v9  ;;  %v8975_v9 = vpack.c.bf16 %v3125_v18, %v3109_v28  ;;  %v8983_v42 = vpack.c.bf16 %v3189_v48, %v3173_v21  ;;  %v3252_v21 = vld [vmem:[#allocation17 + $0x15e0] sm:$0xff]  ;;  %v3238_v48 = vld [vmem:[#allocation17 + $0x1570] sm:$0xff] }
 0x98d   : > { %9094 = vmatpush1.bf16.msra.mxu1 %v9093_v31  ;;  %8968 = vmatprep.subr.bf16.mxu0 %v8967_v44  ;;  %v3108_v31 = vld [vmem:[#allocation17 + $0x1160] sm:$0xff] }
 0x98e   : > { %9096 = vmatprep.subr.bf16.mxu1 %v9095_v41  ;;  %v3124_v44 = vld [vmem:[#allocation17 + $0x11e0] sm:$0xff]  ;;  %v3141_v41 = vld [vmem:[#allocation17 + $0x1268] sm:$0xff] }
 0x98f   : > { %v8977_v20 = vpack.c.bf16 %v3124_v44, %v3108_v31  ;;  %v3205_v31 = vld [vmem:[#allocation17 + $0x1468] sm:$0xff] }
 0x990   : > { %8970 = vmatpush1.bf16.msra.mxu0 %v8969_v56  ;;  %v8979_v56 = vpack.c.bf16 %v3157_v10, %v3141_v41  ;;  %v3221_v44 = vld [vmem:[#allocation17 + $0x14e8] sm:$0xff]  ;;  %v3204_v10 = vld [vmem:[#allocation17 + $0x1460] sm:$0xff] }
 0x991   : > { %9098 = vmatpush1.bf16.msra.mxu1 %v9097_v22  ;;  %8972 = vmatprep.subr.bf16.mxu0 %v8971_v5  ;;  %v3140_v22 = vld [vmem:[#allocation17 + $0x1260] sm:$0xff]  ;;  %v8987_v41 = vpack.c.bf16 %v3221_v44, %v3205_v31 }
 0x992   : > { %9100 = vmatprep.subr.bf16.mxu1 %v9099_v54  ;;  %v3156_v5 = vld [vmem:[#allocation17 + $0x12e0] sm:$0xff]  ;;  %v3142_v54 = vld [vmem:[#allocation17 + $0x1270] sm:$0xff] }
 0x993   : > { %4997 = vmatmul.mubr.f32.vlgmr.msra.gmra.mrb[48].mxu0 %v12407_v17  ;;  %v8981_v28 = vpack.c.bf16 %v3156_v5, %v3140_v22  ;;  %v3255_v22 = vld [vmem:[#allocation17 + $0x15f8] sm:$0xff]  ;;  %v8989_v5 = vpack.c.bf16 %v3220_v6, %v3204_v10  ;;  %v3268_v44 = vld [vmem:[#allocation17 + $0x1660] sm:$0xff]  ;;  %v3317_v10 = vld [vmem:[#allocation17 + $0x17e8] sm:$0xff] }
 0x994   : > { %5223 = vmatmul.mubr.f32.vlgmr.msra.gmra.mrb[48].mxu1 %v12407_v17  ;;  %5002 = vmatprep.mubr.f32.mxu0 %v12429_v50  ;;  %v3158_v17 = vld [vmem:[#allocation17 + $0x12f0] sm:$0xff] }
 0x995   : > { %8974 = vmatpush1.bf16.msra.mxu0 %v8973_v33  ;;  %5228 = vmatprep.mubr.f32.mxu1 %v12429_v50  ;;  %v3175_v50 = vld [vmem:[#allocation17 + $0x1378] sm:$0xff]  ;;  %v9109_v18 = vpack.c.bf16 %v3158_v17, %v3142_v54  ;;  %v3188_v33 = vld [vmem:[#allocation17 + $0x13e0] sm:$0xff] }
 0x996   : > { %9102 = vmatpush1.bf16.msra.mxu1 %v9101_v49  ;;  %8976 = vmatprep.subr.bf16.mxu0 %v8975_v9  ;;  %v3174_v49 = vld [vmem:[#allocation17 + $0x1370] sm:$0xff]  ;;  %v9111_v9 = vpack.c.bf16 %v3191_v53, %v3175_v50  ;;  %v3236_v17 = vld [vmem:[#allocation17 + $0x1560] sm:$0xff] }
 0x997   : > { %5003 = vmatmul.mubr.f32.gmra.mrb[50].mxu0 %v12432_v2  ;;  %9104 = vmatprep.subr.bf16.mxu1 %v9103_v59  ;;  %v8985_v59 = vpack.c.bf16 %v3188_v33, %v3172_v7  ;;  %v3254_v53 = vld [vmem:[#allocation17 + $0x15f0] sm:$0xff]  ;;  %v3271_v7 = vld [vmem:[#allocation17 + $0x1678] sm:$0xff] }
 0x998   : > { %5229 = vmatmul.mubr.f32.gmra.mrb[50].mxu1 %v12432_v2  ;;  %5008 = vmatprep.mubr.f32.mxu0 %v12437_v61  ;;  %v3190_v2 = vld [vmem:[#allocation17 + $0x13f0] sm:$0xff]  ;;  %v3287_v33 = vld [vmem:[#allocation17 + $0x16f8] sm:$0xff] }
 0x999   : > { %8978 = vmatpush1.bf16.msra.mxu0 %v8977_v20  ;;  %5234 = vmatprep.mubr.f32.mxu1 %v12437_v61  ;;  %v3207_v61 = vld [vmem:[#allocation17 + $0x1478] sm:$0xff]  ;;  %v9113_v29 = vpack.c.bf16 %v3190_v2, %v3174_v49  ;;  %v9121_v2 = vpack.c.bf16 %v3254_v53, %v3238_v48  ;;  %v3349_v48 = vld [vmem:[#allocation17 + $0x18e8] sm:$0xff] }
 0x99a   : > { %9106 = vmatpush1.bf16.msra.mxu1 %v9105_v37  ;;  %8980 = vmatprep.subr.bf16.mxu0 %v8979_v56  ;;  %v9115_v20 = vpack.c.bf16 %v3223_v62, %v3207_v61  ;;  %v3237_v37 = vld [vmem:[#allocation17 + $0x1568] sm:$0xff]  ;;  %v3270_v61 = vld [vmem:[#allocation17 + $0x1670] sm:$0xff]  ;;  %v3335_v53 = vld [vmem:[#allocation17 + $0x1878] sm:$0xff] }
 0x99b   : > { %5009 = vmatmul.mubr.f32.gmra.mrb[52].mxu0 %v12444_v14  ;;  %9108 = vmatprep.subr.bf16.mxu1 %v9107_v8  ;;  %v3253_v56 = vld [vmem:[#allocation17 + $0x15e8] sm:$0xff] }
 0x99c   : > { %5235 = vmatmul.mubr.f32.gmra.mrb[52].mxu1 %v12444_v14  ;;  %5014 = vmatprep.mubr.f32.mxu0 %v12461_v36  ;;  %v3222_v14 = vld [vmem:[#allocation17 + $0x14f0] sm:$0xff]  ;;  %v8991_v8 = vpack.c.bf16 %v3253_v56, %v3237_v37 }
 0x99d   : > { %8982 = vmatpush1.bf16.msra.mxu0 %v8981_v28  ;;  %5240 = vmatprep.mubr.f32.mxu1 %v12461_v36  ;;  %v3239_v36 = vld [vmem:[#allocation17 + $0x1578] sm:$0xff]  ;;  %v9117_v54 = vpack.c.bf16 %v3222_v14, %v3206_v27  ;;  %v3269_v28 = vld [vmem:[#allocation17 + $0x1668] sm:$0xff] }
 0x99e   : > { %9110 = vmatpush1.bf16.msra.mxu1 %v9109_v18  ;;  %8984 = vmatprep.subr.bf16.mxu0 %v8983_v42  ;;  %v3285_v18 = vld [vmem:[#allocation17 + $0x16e8] sm:$0xff]  ;;  %v3303_v27 = vld [vmem:[#allocation17 + $0x1778] sm:$0xff] }
 0x99f   : > { %5015 = vmatmul.mubr.f32.gmra.mrb[54].mxu0 %v12478_v47  ;;  %9112 = vmatprep.subr.bf16.mxu1 %v9111_v9  ;;  %v8993_v9 = vpack.c.bf16 %v3252_v21, %v3236_v17  ;;  %v8995_v31 = vpack.c.bf16 %v3285_v18, %v3269_v28  ;;  %v3318_v17 = vld [vmem:[#allocation17 + $0x17f0] sm:$0xff]  ;;  %v3333_v21 = vld [vmem:[#allocation17 + $0x1868] sm:$0xff]  ;;  %v3351_v28 = vld [vmem:[#allocation17 + $0x18f8] sm:$0xff] }
 0x9a0   : > { %5241 = vmatmul.mubr.f32.gmra.mrb[54].mxu1 %v12478_v47  ;;  %5020 = vmatprep.mubr.f32.mxu0 %v12487_v23  ;;  %v9119_v47 = vpack.c.bf16 %v3255_v22, %v3239_v36  ;;  %v3300_v22 = vld [vmem:[#allocation17 + $0x1760] sm:$0xff] }
 0x9a1   : > { %8986 = vmatpush1.bf16.msra.mxu0 %v8985_v59  ;;  %5246 = vmatprep.mubr.f32.mxu1 %v12487_v23  ;;  %v9123_v59 = vpack.c.bf16 %v3287_v33, %v3271_v7 }
 0x9a2   : > { %9114 = vmatpush1.bf16.msra.mxu1 %v9113_v29  ;;  %8988 = vmatprep.subr.bf16.mxu0 %v8987_v41  ;;  %v3286_v29 = vld [vmem:[#allocation17 + $0x16f0] sm:$0xff]  ;;  %v3301_v41 = vld [vmem:[#allocation17 + $0x1768] sm:$0xff] }
 0x9a3   : > { %5021 = vmatmul.mubr.f32.gmra.mrb[56].mxu0 %v12495_v40  ;;  %9116 = vmatprep.subr.bf16.mxu1 %v9115_v20  ;;  %v12851_v50 = vpop.f32.mrb[16].mxu0  ;;  %v3319_v20 = vld [vmem:[#allocation17 + $0x17f8] sm:$0xff]  ;;  %v9125_v56 = vpack.c.bf16 %v3286_v29, %v3270_v61  ;;  %v8999_v36 = vpack.c.bf16 %v3317_v10, %v3301_v41  ;;  %v3350_v61 = vld [vmem:[#allocation17 + $0x18f0] sm:$0xff]  ;;  %v3381_v29 = vld [vmem:[#allocation17 + $0x19e8] sm:$0xff] }
 0x9a4   : > { %14097 = vst [vmem:[#allocation78_spill] sm:$0xff] %v12851_v50  ;;  %5247 = vmatmul.mubr.f32.gmra.mrb[56].mxu1 %v12495_v40  ;;  %5026 = vmatprep.mubr.f32.mxu0 %v12508_v19  ;;  %v12855_v23 = vpop.f32.mrb[16].mxu1  ;;  %v12857_v42 = vpop.f32.mrb[17].mxu0  ;;  %v3284_v40 = vld [vmem:[#allocation17 + $0x16e0] sm:$0xff]  ;;  %v3367_v10 = vld [vmem:[#allocation17 + $0x1978] sm:$0xff] }
 0x9a5   : > { %14098 = vst [vmem:[#allocation80_spill] sm:$0xff] %v12855_v23  ;;  %14099 = vst [vmem:[#allocation81_spill] sm:$0xff] %v12857_v42  ;;  %8990 = vmatpush1.bf16.msra.mxu0 %v8989_v5  ;;  %5252 = vmatprep.mubr.f32.mxu1 %v12508_v19  ;;  %v12860_v49 = vpop.f32.mrb[17].mxu1  ;;  %v8997_v37 = vpack.c.bf16 %v3284_v40, %v3268_v44  ;;  %v3302_v5 = vld [vmem:[#allocation17 + $0x1770] sm:$0xff]  ;;  %v9131_v40 = vpack.c.bf16 %v3351_v28, %v3335_v53  ;;  %v3399_v28 = vld [vmem:[#allocation17 + $0x1a78] sm:$0xff] }
 0x9a6   : > { %14100 = vst [vmem:[#allocation74_spill] sm:$0xff] %v12860_v49  ;;  %9118 = vmatpush1.bf16.msra.mxu1 %v9117_v54  ;;  %8992 = vmatprep.subr.bf16.mxu0 %v8991_v8  ;;  %v9127_v8 = vpack.c.bf16 %v3319_v20, %v3303_v27  ;;  %v9129_v33 = vpack.c.bf16 %v3318_v17, %v3302_v5  ;;  %v3383_v27 = vld [vmem:[#allocation17 + $0x19f8] sm:$0xff]  ;;  %v3382_v17 = vld [vmem:[#allocation17 + $0x19f0] sm:$0xff] }
 0x9a7   : > { %5027 = vmatmul.mubr.f32.gmra.mrb[58].mxu0 %v12523_v30  ;;  %9120 = vmatprep.subr.bf16.mxu1 %v9119_v47  ;;  %v12863_v62 = vpop.f32.mrb[18].mxu0 }
 0x9a8   : > { %14101 = vst [vmem:[#allocation75_spill] sm:$0xff] %v12863_v62  ;;  %5253 = vmatmul.mubr.f32.gmra.mrb[58].mxu1 %v12523_v30  ;;  %5032 = vmatprep.mubr.f32.mxu0 %v12534_v4  ;;  %v12867_v19 = vpop.f32.mrb[18].mxu1  ;;  %v12869_v6 = vpop.f32.mrb[19].mxu0  ;;  %v3316_v30 = vld [vmem:[#allocation17 + $0x17e0] sm:$0xff]  ;;  %v6029_v62 = vld [vmem:[#allocation18 + $0x428] sm:$0xff] }
 0x9a9   : > { %14102 = vst [vmem:[#allocation76_spill] sm:$0xff] %v12867_v19  ;;  %14103 = vst [vmem:[#allocation79_spill] sm:$0xff] %v12869_v6  ;;  %8994 = vmatpush1.bf16.msra.mxu0 %v8993_v9  ;;  %5258 = vmatprep.mubr.f32.mxu1 %v12534_v4  ;;  %v12872_v14 = vpop.f32.mrb[19].mxu1  ;;  %v9001_v7 = vpack.c.bf16 %v3316_v30, %v3300_v22  ;;  %v9003_v9 = vpack.c.bf16 %v3349_v48, %v3333_v21  ;;  %v3364_v22 = vld [vmem:[#allocation17 + $0x1960] sm:$0xff]  ;;  %v3366_v30 = vld [vmem:[#allocation17 + $0x1970] sm:$0xff] }
 0x9aa   : > { %14104 = vst [vmem:[#allocation82_spill] sm:$0xff] %v12872_v14  ;;  %9122 = vmatpush1.bf16.msra.mxu1 %v9121_v2  ;;  %8996 = vmatprep.subr.bf16.mxu0 %v8995_v31  ;;  %v3332_v2 = vld [vmem:[#allocation17 + $0x1860] sm:$0xff]  ;;  %v3334_v31 = vld [vmem:[#allocation17 + $0x1870] sm:$0xff]  ;;  %v3397_v21 = vld [vmem:[#allocation17 + $0x1a68] sm:$0xff] }
 0x9ab   : > { %5033 = vmatmul.mubr.f32.gmra.mrb[60].mxu0 %v12545_v58  ;;  %9124 = vmatprep.subr.bf16.mxu1 %v9123_v59  ;;  %v12875_v54 = vpop.f32.mrb[20].mxu0  ;;  %v3365_v59 = vld [vmem:[#allocation17 + $0x1968] sm:$0xff]  ;;  %v6018_v14 = vld [vmem:[#allocation18 + $0x3d0] sm:$0xff] }
 0x9ac   : > { %14105 = vst [vmem:[#allocation103_spill] sm:$0xff] %v12875_v54  ;;  %5259 = vmatmul.mubr.f32.gmra.mrb[60].mxu1 %v12545_v58  ;;  %5038 = vmatprep.mubr.f32.mxu0 %v12551_v15  ;;  %v12879_v4 = vpop.f32.mrb[20].mxu1  ;;  %v12881_v47 = vpop.f32.mrb[21].mxu0  ;;  %v3348_v58 = vld [vmem:[#allocation17 + $0x18e0] sm:$0xff]  ;;  %v3413_v48 = vld [vmem:[#allocation17 + $0x1ae8] sm:$0xff] }
 0x9ad   : > { %14106 = vst [vmem:[#allocation104_spill] sm:$0xff] %v12879_v4  ;;  %14107 = vst [vmem:[#allocation105_spill] sm:$0xff] %v12881_v47  ;;  %8998 = vmatpush1.bf16.msra.mxu0 %v8997_v37  ;;  %5264 = vmatprep.mubr.f32.mxu1 %v12551_v15  ;;  %v12884_v18 = vpop.f32.mrb[21].mxu1  ;;  %v9005_v37 = vpack.c.bf16 %v3348_v58, %v3332_v2  ;;  %v9137_v2 = vpack.c.bf16 %v3382_v17, %v3366_v30  ;;  %v3444_v17 = vld [vmem:[#allocation17 + $0x1be0] sm:$0xff] }
 0x9ae   : > { %14108 = vst [vmem:[#allocation106_spill] sm:$0xff] %v12884_v18  ;;  %9126 = vmatpush1.bf16.msra.mxu1 %v9125_v56  ;;  %9000 = vmatprep.subr.bf16.mxu0 %v8999_v36  ;;  %v9133_v56 = vpack.c.bf16 %v3350_v61, %v3334_v31  ;;  %v9007_v36 = vpack.c.bf16 %v3381_v29, %v3365_v59  ;;  %v3396_v31 = vld [vmem:[#allocation17 + $0x1a60] sm:$0xff]  ;;  %v3398_v61 = vld [vmem:[#allocation17 + $0x1a70] sm:$0xff] }
 0x9af   : > { %5039 = vmatmul.mubr.f32.gmra.mrb[62].mxu0 %v12557_v52  ;;  %9128 = vmatprep.subr.bf16.mxu1 %v9127_v8  ;;  %v12887_v44 = vpop.f32.mrb[22].mxu0  ;;  %v9135_v8 = vpack.c.bf16 %v3383_v27, %v3367_v10  ;;  %v9011_v58 = vpack.c.bf16 %v3413_v48, %v3397_v21  ;;  %v3414_v10 = vld [vmem:[#allocation17 + $0x1af0] sm:$0xff]  ;;  %v3429_v27 = vld [vmem:[#allocation17 + $0x1b68] sm:$0xff]  ;;  %v6016_v4 = vld [vmem:[#allocation18 + $0x3c0] sm:$0xff] }
 0x9b0   : > { %14109 = vst [vmem:[#allocation107_spill] sm:$0xff] %v12887_v44  ;;  %5265 = vmatmul.mubr.f32.gmra.mrb[62].mxu1 %v12557_v52  ;;  %5109 = vmatprep.mubr.f32.mxu0 %v12571_v57  ;;  %v12891_v15 = vpop.f32.mrb[22].mxu1  ;;  %v12893_v41 = vpop.f32.mrb[23].mxu0  ;;  %v3380_v52 = vld [vmem:[#allocation17 + $0x19e0] sm:$0xff]  ;;  %v3430_v21 = vld [vmem:[#allocation17 + $0x1b70] sm:$0xff] }
 0x9b1   : > { %14110 = vst [vmem:[#allocation108_spill] sm:$0xff] %v12891_v15  ;;  %14111 = vst [vmem:[#allocation109_spill] sm:$0xff] %v12893_v41  ;;  %9002 = vmatpush1.bf16.msra.mxu0 %v9001_v7  ;;  %5335 = vmatprep.mubr.f32.mxu1 %v12571_v57  ;;  %v12896_v20 = vpop.f32.mrb[23].mxu1  ;;  %v3415_v7 = vld [vmem:[#allocation17 + $0x1af8] sm:$0xff]  ;;  %v6013_v15 = vld [vmem:[#allocation18 + $0x3a8] sm:$0xff] }
 0x9b2   : > { %14112 = vst [vmem:[#allocation110_spill] sm:$0xff] %v12896_v20  ;;  %9130 = vmatpush1.bf16.msra.mxu1 %v9129_v33  ;;  %9004 = vmatprep.subr.bf16.mxu0 %v9003_v9  ;;  %v9009_v9 = vpack.c.bf16 %v3380_v52, %v3364_v22  ;;  %v9139_v29 = vpack.c.bf16 %v3415_v7, %v3399_v28  ;;  %v3447_v22 = vld [vmem:[#allocation17 + $0x1bf8] sm:$0xff]  ;;  %v3446_v7 = vld [vmem:[#allocation17 + $0x1bf0] sm:$0xff]  ;;  %v6001_v20 = vld [vmem:[#allocation18 + $0x348] sm:$0xff] }
 0x9b3   : > { %9132 = vmatprep.subr.bf16.mxu1 %v9131_v40  ;;  %v12898_v5 = vpop.f32.mrb[24].mxu0  ;;  %v3412_v40 = vld [vmem:[#allocation17 + $0x1ae0] sm:$0xff]  ;;  %v9141_v52 = vpack.c.bf16 %v3414_v10, %v3398_v61 }
 0x9b4   : > { %14113 = vst [vmem:[#allocation111_spill] sm:$0xff] %v12898_v5  ;;  %v12900_v53 = vpop.f32.mrb[24].mxu1  ;;  %v12902_v57 = vpop.f32.mrb[25].mxu0  ;;  %v3460_v61 = vld [vmem:[#allocation17 + $0x1c60] sm:$0xff] }
 0x9b5   : > { %14114 = vst [vmem:[#allocation112_spill] sm:$0xff] %v12900_v53  ;;  %14115 = vst [vmem:[#allocation113_spill] sm:$0xff] %v12902_v57  ;;  %9006 = vmatpush1.bf16.msra.mxu0 %v9005_v37  ;;  %v12904_v33 = vpop.f32.mrb[25].mxu1  ;;  %v3445_v57 = vld [vmem:[#allocation17 + $0x1be8] sm:$0xff]  ;;  %v6020_v54 = vld [vmem:[#allocation18 + $0x3e0] sm:$0xff] }
 0x9b6   : > { %14116 = vst [vmem:[#allocation114_spill] sm:$0xff] %v12904_v33  ;;  %9134 = vmatpush1.bf16.msra.mxu1 %v9133_v56  ;;  %9008 = vmatprep.subr.bf16.mxu0 %v9007_v36  ;;  %v3431_v33 = vld [vmem:[#allocation17 + $0x1b78] sm:$0xff]  ;;  %v9013_v36 = vpack.c.bf16 %v3412_v40, %v3396_v31  ;;  %v9015_v30 = vpack.c.bf16 %v3445_v57, %v3429_v27 }
 0x9b7   : > { %9136 = vmatprep.subr.bf16.mxu1 %v9135_v8  ;;  %v12906_v59 = vpop.f32.mrb[26].mxu0  ;;  %v3428_v8 = vld [vmem:[#allocation17 + $0x1b60] sm:$0xff]  ;;  %v9143_v28 = vpack.c.bf16 %v3447_v22, %v3431_v33  ;;  %v3479_v31 = vld [vmem:[#allocation17 + $0x1cf8] sm:$0xff]  ;;  %v3462_v33 = vld [vmem:[#allocation17 + $0x1c70] sm:$0xff] }
 0x9b8   : > { %14117 = vst [vmem:[#allocation115_spill] sm:$0xff] %v12906_v59  ;;  %v12908_v53 = vpop.f32.mrb[26].mxu1  ;;  %v12910_v37 = vpop.f32.mrb[27].mxu0  ;;  %v9017_v57 = vpack.c.bf16 %v3444_v17, %v3428_v8  ;;  %v3478_v22 = vld [vmem:[#allocation17 + $0x1cf0] sm:$0xff]  ;;  %v3511_v8 = vld [vmem:[#allocation17 + $0x1df8] sm:$0xff]  ;;  %v3492_v17 = vld [vmem:[#allocation17 + $0x1d60] sm:$0xff] }
 0x9b9   : > { %14118 = vst [vmem:[#allocation116_spill] sm:$0xff] %v12908_v53  ;;  %14119 = vst [vmem:[#allocation117_spill] sm:$0xff] %v12910_v37  ;;  %9010 = vmatpush1.bf16.msra.mxu0 %v9009_v9  ;;  %v12912_v56 = vpop.f32.mrb[27].mxu1  ;;  %v3461_v53 = vld [vmem:[#allocation17 + $0x1c68] sm:$0xff] }
 0x9ba   : > { %14120 = vst [vmem:[#allocation118_spill] sm:$0xff] %v12912_v56  ;;  %9138 = vmatpush1.bf16.msra.mxu1 %v9137_v2  ;;  %9012 = vmatprep.subr.bf16.mxu0 %v9011_v58  ;;  %v3477_v37 = vld [vmem:[#allocation17 + $0x1ce8] sm:$0xff]  ;;  %v3463_v56 = vld [vmem:[#allocation17 + $0x1c78] sm:$0xff]  ;;  %v9145_v58 = vpack.c.bf16 %v3446_v7, %v3430_v21  ;;  %v3508_v21 = vld [vmem:[#allocation17 + $0x1de0] sm:$0xff] }
 0x9bb   : > { %9140 = vmatprep.subr.bf16.mxu1 %v9139_v29  ;;  %v12914_v48 = vpop.f32.mrb[28].mxu0  ;;  %v9019_v40 = vpack.c.bf16 %v3477_v37, %v3461_v53  ;;  %v3476_v29 = vld [vmem:[#allocation17 + $0x1ce0] sm:$0xff]  ;;  %v9147_v27 = vpack.c.bf16 %v3479_v31, %v3463_v56  ;;  %v9149_v37 = vpack.c.bf16 %v3478_v22, %v3462_v33  ;;  %v3494_v56 = vld [vmem:[#allocation17 + $0x1d70] sm:$0xff]  ;;  %v3525_v31 = vld [vmem:[#allocation17 + $0x1e68] sm:$0xff]  ;;  %v9025_v5 = vpack.c.bf16 %v3508_v21, %v3492_v17 }
 0x9bc   : > { %14121 = vst [vmem:[#allocation119_spill] sm:$0xff] %v12914_v48  ;;  %v12916_v59 = vpop.f32.mrb[28].mxu1  ;;  %v12918_v9 = vpop.f32.mrb[29].mxu0  ;;  %v9021_v53 = vpack.c.bf16 %v3476_v29, %v3460_v61  ;;  %v3510_v7 = vld [vmem:[#allocation17 + $0x1df0] sm:$0xff]  ;;  %v3557_v33 = vld [vmem:[#allocation17 + $0x1f68] sm:$0xff]  ;;  %v3575_v22 = vld [vmem:[#allocation17 + $0x1ff8] sm:$0xff] }
 0x9bd   : > { %14122 = vst [vmem:[#allocation120_spill] sm:$0xff] %v12916_v59  ;;  %14123 = vst [vmem:[#allocation121_spill] sm:$0xff] %v12918_v9  ;;  %9014 = vmatpush1.bf16.msra.mxu0 %v9013_v36  ;;  %v12920_v2 = vpop.f32.mrb[29].mxu1  ;;  %v3493_v59 = vld [vmem:[#allocation17 + $0x1d68] sm:$0xff]  ;;  %v3526_v29 = vld [vmem:[#allocation17 + $0x1e70] sm:$0xff] }
 0x9be   : > { %14124 = vst [vmem:[#allocation122_spill] sm:$0xff] %v12920_v2  ;;  %9142 = vmatpush1.bf16.msra.mxu1 %v9141_v52  ;;  %9016 = vmatprep.subr.bf16.mxu0 %v9015_v30  ;;  %v3509_v9 = vld [vmem:[#allocation17 + $0x1de8] sm:$0xff]  ;;  %v3495_v2 = vld [vmem:[#allocation17 + $0x1d78] sm:$0xff]  ;;  %v3558_v21 = vld [vmem:[#allocation17 + $0x1f70] sm:$0xff] }
 0x9bf   : > { %9144 = vmatprep.subr.bf16.mxu1 %v9143_v28  ;;  %v12922_v10 = vpop.f32.mrb[30].mxu0  ;;  %v9023_v30 = vpack.c.bf16 %v3509_v9, %v3493_v59  ;;  %v9151_v28 = vpack.c.bf16 %v3511_v8, %v3495_v2  ;;  %v3542_v9 = vld [vmem:[#allocation17 + $0x1ef0] sm:$0xff]  ;;  %v3559_v2 = vld [vmem:[#allocation17 + $0x1f78] sm:$0xff] }
 0x9c0   : > { %14125 = vst [vmem:[#allocation123_spill] sm:$0xff] %v12922_v10  ;;  %v12924_v48 = vpop.f32.mrb[30].mxu1  ;;  %v12926_v36 = vpop.f32.mrb[31].mxu0  ;;  %v3527_v10 = vld [vmem:[#allocation17 + $0x1e78] sm:$0xff] }
 0x9c1   : > { %14126 = vst [vmem:[#allocation124_spill] sm:$0xff] %v12924_v48  ;;  %14127 = vst [vmem:[#allocation125_spill] sm:$0xff] %v12926_v36  ;;  %9018 = vmatpush1.bf16.msra.mxu0 %v9017_v57  ;;  %v12928_v52 = vpop.f32.mrb[31].mxu1  ;;  %v3541_v48 = vld [vmem:[#allocation17 + $0x1ee8] sm:$0xff]  ;;  %v3543_v36 = vld [vmem:[#allocation17 + $0x1ef8] sm:$0xff]  ;;  %v9153_v57 = vpack.c.bf16 %v3510_v7, %v3494_v56 }
 0x9c2   : > { %14128 = vst [vmem:[#allocation126_spill] sm:$0xff] %v12928_v52  ;;  %9146 = vmatpush1.bf16.msra.mxu1 %v9145_v58  ;;  %9020 = vmatprep.subr.bf16.mxu0 %v9019_v40  ;;  %v9027_v61 = vpack.c.bf16 %v3541_v48, %v3525_v31  ;;  %v3524_v58 = vld [vmem:[#allocation17 + $0x1e60] sm:$0xff]  ;;  %v9155_v59 = vpack.c.bf16 %v3543_v36, %v3527_v10  ;;  %v3574_v56 = vld [vmem:[#allocation17 + $0x1ff0] sm:$0xff]  ;;  %v5897_v7 = vld [vmem:[#allocation18 + $0x8] sm:$0xff] }
 0x9c3   : > { %9148 = vmatprep.subr.bf16.mxu1 %v9147_v27  ;;  %v3540_v40 = vld [vmem:[#allocation17 + $0x1ee0] sm:$0xff]  ;;  %v3573_v27 = vld [vmem:[#allocation17 + $0x1fe8] sm:$0xff]  ;;  %v9159_v48 = vpack.c.bf16 %v3575_v22, %v3559_v2  ;;  %v5899_v10 = vld [vmem:[#allocation18 + $0x18] sm:$0xff] }
 0x9c4   : > { %v9029_v8 = vpack.c.bf16 %v3540_v40, %v3524_v58  ;;  %v9031_v17 = vpack.c.bf16 %v3573_v27, %v3557_v33  ;;  %v5903_v36 = vld [vmem:[#allocation18 + $0x38] sm:$0xff]  ;;  %v5900_v40 = vld [vmem:[#allocation18 + $0x20] sm:$0xff]  ;;  %v5905_v33 = vld [vmem:[#allocation18 + $0x48] sm:$0xff] }
 0x9c5   : > { %9022 = vmatpush1.bf16.msra.mxu0 %v9021_v53  ;;  %v9157_v53 = vpack.c.bf16 %v3542_v9, %v3526_v29  ;;  %v5898_v29 = vld [vmem:[#allocation18 + $0x10] sm:$0xff]  ;;  %v5907_v27 = vld [vmem:[#allocation18 + $0x58] sm:$0xff] }
 0x9c6   : > { %9150 = vmatpush1.bf16.msra.mxu1 %v9149_v37  ;;  %9024 = vmatprep.subr.bf16.mxu0 %v9023_v30  ;;  %v3556_v37 = vld [vmem:[#allocation17 + $0x1f60] sm:$0xff]  ;;  %v5902_v9 = vld [vmem:[#allocation18 + $0x30] sm:$0xff]  ;;  %v5911_v2 = vld [vmem:[#allocation18 + $0x78] sm:$0xff] }
 0x9c7   : > { %9152 = vmatprep.subr.bf16.mxu1 %v9151_v28  ;;  %v3572_v30 = vld [vmem:[#allocation17 + $0x1fe0] sm:$0xff]  ;;  %v5901_v28 = vld [vmem:[#allocation18 + $0x28] sm:$0xff] }
 0x9c8   : > { %v9033_v31 = vpack.c.bf16 %v3572_v30, %v3556_v37  ;;  %v9163_v58 = vpack.c.bf16 %v5901_v28, %v5897_v7  ;;  %v5908_v37 = vld [vmem:[#allocation18 + $0x60] sm:$0xff]  ;;  %v5906_v30 = vld [vmem:[#allocation18 + $0x50] sm:$0xff]  ;;  %v5917_v7 = vld [vmem:[#allocation18 + $0xa8] sm:$0xff] }
 0x9c9   : > { %9026 = vmatpush1.bf16.msra.mxu0 %v9025_v5  ;;  %v9161_v5 = vpack.c.bf16 %v3574_v56, %v3558_v21  ;;  %v9423_v21 = vpack.c.bf16 %v5911_v2, %v5907_v27  ;;  %v5913_v56 = vld [vmem:[#allocation18 + $0x88] sm:$0xff]  ;;  %v5915_v28 = vld [vmem:[#allocation18 + $0x98] sm:$0xff] }
 0x9ca   : > { %9154 = vmatpush1.bf16.msra.mxu1 %v9153_v57  ;;  %9028 = vmatprep.subr.bf16.mxu0 %v9027_v61  ;;  %v9419_v57 = vpack.c.bf16 %v5903_v36, %v5899_v10  ;;  %v5896_v61 = vld [vmem:[#allocation18] sm:$0xff]  ;;  %v5919_v10 = vld [vmem:[#allocation18 + $0xb8] sm:$0xff] }
 0x9cb   : > { %9156 = vmatprep.subr.bf16.mxu1 %v9155_v59  ;;  %v5909_v59 = vld [vmem:[#allocation18 + $0x68] sm:$0xff]  ;;  %v9165_v22 = vpack.c.bf16 %v5900_v40, %v5896_v61  ;;  %v5914_v61 = vld [vmem:[#allocation18 + $0x90] sm:$0xff]  ;;  %v9427_v40 = vpack.c.bf16 %v5919_v10, %v5915_v28  ;;  %v5928_v28 = vld [vmem:[#allocation18 + $0x100] sm:$0xff] }
 0x9cc   : > { %v5932_v10 = vld [vmem:[#allocation18 + $0x120] sm:$0xff] }
 0x9cd   : > { %9030 = vmatpush1.bf16.msra.mxu0 %v9029_v8  ;;  %v9421_v8 = vpack.c.bf16 %v5902_v9, %v5898_v29  ;;  %v5921_v29 = vld [vmem:[#allocation18 + $0xc8] sm:$0xff] }
 0x9ce   : > { %9158 = vmatpush1.bf16.msra.mxu1 %v9157_v53  ;;  %9032 = vmatprep.subr.bf16.mxu0 %v9031_v17  ;;  %v9167_v53 = vpack.c.bf16 %v5909_v59, %v5905_v33  ;;  %v5904_v17 = vld [vmem:[#allocation18 + $0x40] sm:$0xff]  ;;  %v5925_v9 = vld [vmem:[#allocation18 + $0xe8] sm:$0xff]  ;;  %v5927_v33 = vld [vmem:[#allocation18 + $0xf8] sm:$0xff] }
 0x9cf   : > { %9160 = vmatprep.subr.bf16.mxu1 %v9159_v48  ;;  %v5910_v48 = vld [vmem:[#allocation18 + $0x70] sm:$0xff]  ;;  %v9169_v36 = vpack.c.bf16 %v5908_v37, %v5904_v17  ;;  %v9175_v2 = vpack.c.bf16 %v5925_v9, %v5921_v29  ;;  %v5929_v37 = vld [vmem:[#allocation18 + $0x108] sm:$0xff]  ;;  %v5936_v29 = vld [vmem:[#allocation18 + $0x140] sm:$0xff] }
 0x9d0   : > { %v5940_v9 = vld [vmem:[#allocation18 + $0x160] sm:$0xff] }
 0x9d1   : > { %9034 = vmatpush1.bf16.msra.mxu0 %v9033_v31  ;;  %v9425_v31 = vpack.c.bf16 %v5910_v48, %v5906_v30  ;;  %v5933_v30 = vld [vmem:[#allocation18 + $0x128] sm:$0xff] }
 0x9d2   : > { %9162 = vmatpush1.bf16.msra.mxu1 %v9161_v5  ;;  %9164 = vmatprep.subr.bf16.mxu0 %v9163_v58  ;;  %v9171_v5 = vpack.c.bf16 %v5917_v7, %v5913_v56  ;;  %v5912_v58 = vld [vmem:[#allocation18 + $0x80] sm:$0xff]  ;;  %v9179_v7 = vpack.c.bf16 %v5933_v30, %v5929_v37 }
 0x9d3   : > { %9420 = vmatprep.subr.bf16.mxu1 %v9419_v57  ;;  %v5916_v57 = vld [vmem:[#allocation18 + $0xa0] sm:$0xff] }
 0x9d4   : > { %5110 = vmatmul.mubr.f32.vlgmr.msra.gmra.mrb[48].mxu0 %v12412_v25  ;;  %v9173_v59 = vpack.c.bf16 %v5916_v57, %v5912_v58  ;;  %v5941_v58 = vld [vmem:[#allocation18 + $0x168] sm:$0xff]  ;;  %v5943_v57 = vld [vmem:[#allocation18 + $0x178] sm:$0xff]  ;;  %v5944_v30 = vld [vmem:[#allocation18 + $0x180] sm:$0xff] }
 0x9d5   : > { %5336 = vmatmul.mubr.f32.vlgmr.msra.gmra.mrb[48].mxu1 %v12412_v25  ;;  %5115 = vmatprep.mubr.f32.mxu0 %v12578_v1  ;;  %v5918_v25 = vld [vmem:[#allocation18 + $0xb0] sm:$0xff] }
 0x9d6   : > { %5341 = vmatprep.mubr.f32.mxu1 %v12578_v1  ;;  %9166 = vmatpush1.bf16.msra.mxu0 %v9165_v22  ;;  %v5923_v1 = vld [vmem:[#allocation18 + $0xd8] sm:$0xff]  ;;  %v9429_v27 = vpack.c.bf16 %v5918_v25, %v5914_v61  ;;  %v5920_v22 = vld [vmem:[#allocation18 + $0xc0] sm:$0xff]  ;;  %v9181_v61 = vpack.c.bf16 %v5932_v10, %v5928_v28  ;;  %v5392_v10 = vsub.f32 0.0, %v12737_v13 }
 0x9d7   : > { %9422 = vmatpush1.bf16.msra.mxu1 %v9421_v8  ;;  %9168 = vmatprep.subr.bf16.mxu0 %v9167_v53  ;;  %v5924_v8 = vld [vmem:[#allocation18 + $0xe0] sm:$0xff]  ;;  %v5922_v53 = vld [vmem:[#allocation18 + $0xd0] sm:$0xff]  ;;  %v9431_v17 = vpack.c.bf16 %v5927_v33, %v5923_v1 }
 0x9d8   : > { %5116 = vmatmul.mubr.f32.gmra.mrb[50].mxu0 %v12455_v63  ;;  %9424 = vmatprep.subr.bf16.mxu1 %v9423_v21  ;;  %v5935_v21 = vld [vmem:[#allocation18 + $0x138] sm:$0xff]  ;;  %v9177_v48 = vpack.c.bf16 %v5924_v8, %v5920_v22  ;;  %v5938_v1 = vld [vmem:[#allocation18 + $0x150] sm:$0xff]  ;;  %v5386_v8 = vsub.f32 0.0, %v12727_v46 }
 0x9d9   : > { %5342 = vmatmul.mubr.f32.gmra.mrb[50].mxu1 %v12455_v63  ;;  %5121 = vmatprep.mubr.f32.mxu0 %v12587_v39  ;;  %v5926_v63 = vld [vmem:[#allocation18 + $0xf0] sm:$0xff]  ;;  %v5951_v22 = vld [vmem:[#allocation18 + $0x1b8] sm:$0xff] }
 0x9da   : > { %5347 = vmatprep.mubr.f32.mxu1 %v12587_v39  ;;  %9170 = vmatpush1.bf16.msra.mxu0 %v9169_v36  ;;  %v5931_v39 = vld [vmem:[#allocation18 + $0x118] sm:$0xff]  ;;  %v9433_v56 = vpack.c.bf16 %v5926_v63, %v5922_v53  ;;  %v5930_v36 = vld [vmem:[#allocation18 + $0x110] sm:$0xff]  ;;  %v9185_v53 = vpack.c.bf16 %v5940_v9, %v5936_v29  ;;  %v5952_v29 = vld [vmem:[#allocation18 + $0x1c0] sm:$0xff] }
 0x9db   : > { %9426 = vmatpush1.bf16.msra.mxu1 %v9425_v31  ;;  %9172 = vmatprep.subr.bf16.mxu0 %v9171_v5  ;;  %v9435_v31 = vpack.c.bf16 %v5935_v21, %v5931_v39  ;;  %v5937_v5 = vld [vmem:[#allocation18 + $0x148] sm:$0xff]  ;;  %v5948_v39 = vld [vmem:[#allocation18 + $0x1a0] sm:$0xff]  ;;  %v5946_v21 = vld [vmem:[#allocation18 + $0x190] sm:$0xff] }
 0x9dc   : > { %5122 = vmatmul.mubr.f32.gmra.mrb[52].mxu0 %v12466_v16  ;;  %9428 = vmatprep.subr.bf16.mxu1 %v9427_v40  ;;  %v9183_v25 = vpack.c.bf16 %v5941_v58, %v5937_v5  ;;  %v5394_v5 = vsub.f32 0.0, %v12739_v45  ;;  %v9189_v58 = vpack.c.bf16 %v5948_v39, %v5944_v30  ;;  %v5954_v9 = vld [vmem:[#allocation18 + $0x1d0] sm:$0xff] }
 0x9dd   : > { %5348 = vmatmul.mubr.f32.gmra.mrb[52].mxu1 %v12466_v16  ;;  %5127 = vmatprep.mubr.f32.mxu0 %v12596_v12  ;;  %v5934_v16 = vld [vmem:[#allocation18 + $0x130] sm:$0xff] }
 0x9de   : > { %5353 = vmatprep.mubr.f32.mxu1 %v12596_v12  ;;  %9174 = vmatpush1.bf16.msra.mxu0 %v9173_v59  ;;  %v5939_v12 = vld [vmem:[#allocation18 + $0x158] sm:$0xff]  ;;  %v9437_v40 = vpack.c.bf16 %v5934_v16, %v5930_v36  ;;  %v5945_v59 = vld [vmem:[#allocation18 + $0x188] sm:$0xff]  ;;  %v5452_v16 = vmul.f32 1.442695, %v5386_v8 }
 0x9df   : > { %9430 = vmatpush1.bf16.msra.mxu1 %v9429_v27  ;;  %9176 = vmatprep.subr.bf16.mxu0 %v9175_v2  ;;  %v9439_v33 = vpack.c.bf16 %v5943_v57, %v5939_v12  ;;  %v5949_v27 = vld [vmem:[#allocation18 + $0x1a8] sm:$0xff]  ;;  %v5384_v2 = vsub.f32 0.0, %v12725_v3  ;;  %v5955_v36 = vld [vmem:[#allocation18 + $0x1d8] sm:$0xff]  ;;  %v14129_v57 = vld [vmem:[#allocation97_spill] sm:$0xff] }
 0x9e0   : > { %5128 = vmatmul.mubr.f32.gmra.mrb[54].mxu0 %v12481_v24  ;;  %9432 = vmatprep.subr.bf16.mxu1 %v9431_v17  ;;  %v5385_v17 = vsub.f32 0.0, %v12730_v26  ;;  %v9187_v37 = vpack.c.bf16 %v5949_v27, %v5945_v59  ;;  %v5961_v27 = vld [vmem:[#allocation18 + $0x208] sm:$0xff] }
 0x9e1   : > { %5354 = vmatmul.mubr.f32.gmra.mrb[54].mxu1 %v12481_v24  ;;  %5133 = vmatprep.mubr.f32.mxu0 %v12605_v38  ;;  %v5942_v24 = vld [vmem:[#allocation18 + $0x170] sm:$0xff]  ;;  %v5448_v28 = vmul.f32 1.442695, %v5384_v2  ;;  %v5965_v2 = vld [vmem:[#allocation18 + $0x228] sm:$0xff] }
 0x9e2   : > { %5359 = vmatprep.mubr.f32.mxu1 %v12605_v38  ;;  %9178 = vmatpush1.bf16.msra.mxu0 %v9177_v48  ;;  %v5947_v38 = vld [vmem:[#allocation18 + $0x198] sm:$0xff]  ;;  %v9441_v63 = vpack.c.bf16 %v5942_v24, %v5938_v1  ;;  %v5450_v12 = vmul.f32 1.442695, %v5385_v17 }
 0x9e3   : > { %9434 = vmatpush1.bf16.msra.mxu1 %v9433_v56  ;;  %9180 = vmatprep.subr.bf16.mxu0 %v9179_v7  ;;  %v9443_v48 = vpack.c.bf16 %v5951_v22, %v5947_v38  ;;  %v5950_v56 = vld [vmem:[#allocation18 + $0x1b0] sm:$0xff]  ;;  %v5953_v7 = vld [vmem:[#allocation18 + $0x1c8] sm:$0xff]  ;;  %10138 = vpow2.f32 %v5448_v28  ;;  %v5464_v38 = vmul.f32 1.442695, %v5392_v10  ;;  %v5967_v17 = vld [vmem:[#allocation18 + $0x238] sm:$0xff] }
 0x9e4   : > { %5134 = vmatmul.mubr.f32.gmra.mrb[56].mxu0 %v12502_v60  ;;  %9436 = vmatprep.subr.bf16.mxu1 %v9435_v31  ;;  %v5959_v31 = vld [vmem:[#allocation18 + $0x1f8] sm:$0xff]  ;;  %v14131_v22 = vld [vmem:[#allocation99_spill] sm:$0xff]  ;;  %10140 = vpow2.f32 %v5452_v16  ;;  %v5969_v28 = vld [vmem:[#allocation18 + $0x248] sm:$0xff] }
 0x9e5   : > { %5360 = vmatmul.mubr.f32.gmra.mrb[56].mxu1 %v12502_v60  ;;  %5139 = vmatprep.mubr.f32.mxu0 %v12614_v0  ;;  %v5387_v60 = vsub.f32 0.0, %v12732_v11  ;;  %v9447_v59 = vpack.c.bf16 %v5959_v31, %v5955_v36  ;;  %v5400_v8 = vsub.f32 0.0, %v14131_v22  ;;  %10142 = vpow2.f32 %v5450_v12  ;;  %v5971_v36 = vld [vmem:[#allocation18 + $0x258] sm:$0xff]  ;;  %v14133_v12 = vld [vmem:[#allocation101_spill] sm:$0xff] }
 0x9e6   : > { %5365 = vmatprep.mubr.f32.mxu1 %v12614_v0  ;;  %9182 = vmatpush1.bf16.msra.mxu0 %v9181_v61  ;;  %v5957_v0 = vld [vmem:[#allocation18 + $0x1e8] sm:$0xff]  ;;  %v5393_v61 = vsub.f32 0.0, %v14129_v57  ;;  %v5975_v31 = vld [vmem:[#allocation18 + $0x278] sm:$0xff] }
 0x9e7   : > { %9438 = vmatpush1.bf16.msra.mxu1 %v9437_v40  ;;  %9184 = vmatprep.subr.bf16.mxu0 %v9183_v25  ;;  %v9445_v40 = vpack.c.bf16 %v5950_v56, %v5946_v21  ;;  %v9191_v25 = vpack.c.bf16 %v5957_v0, %v5953_v7  ;;  %v5454_v1 = vmul.f32 1.442695, %v5387_v60  ;;  %v9195_v21 = vpack.c.bf16 %v5965_v2, %v5961_v27  ;;  %v5960_v60 = vld [vmem:[#allocation18 + $0x200] sm:$0xff]  ;;  %v5962_v56 = vld [vmem:[#allocation18 + $0x210] sm:$0xff]  ;;  %v14132_v16 = vld [vmem:[#allocation100_spill] sm:$0xff] }
 0x9e8   : > { %5140 = vmatmul.mubr.f32.gmra.mrb[58].mxu0 %v12513_v32  ;;  %9440 = vmatprep.subr.bf16.mxu1 %v9439_v33  ;;  %v14130_v33 = vld [vmem:[#allocation98_spill] sm:$0xff]  ;;  %v5466_v30 = vmul.f32 1.442695, %v5393_v61  ;;  %v5966_v0 = vld [vmem:[#allocation18 + $0x230] sm:$0xff]  ;;  %v5480_v10 = vmul.f32 1.442695, %v5400_v8 }
 0x9e9   : > { %5366 = vmatmul.mubr.f32.gmra.mrb[58].mxu1 %v12513_v32  ;;  %5145 = vmatprep.mubr.f32.mxu0 %v12623_v51  ;;  %v5956_v32 = vld [vmem:[#allocation18 + $0x1e0] sm:$0xff]  ;;  %v5395_v24 = vsub.f32 0.0, %v14130_v33  ;;  %10144 = vpow2.f32 %v5454_v1  ;;  %v5401_v61 = vsub.f32 0.0, %v14133_v12  ;;  %v14134_v1 = vld [vmem:[#allocation102_spill] sm:$0xff]  ;;  %v14135_v2 = vld [vmem:[#allocation63_spill] sm:$0xff] }
 0x9ea   : > { %5371 = vmatprep.mubr.f32.mxu1 %v12623_v51  ;;  %9186 = vmatpush1.bf16.msra.mxu0 %v9185_v53  ;;  %v5958_v51 = vld [vmem:[#allocation18 + $0x1f0] sm:$0xff]  ;;  %v5963_v53 = vld [vmem:[#allocation18 + $0x218] sm:$0xff]  ;;  %10146 = vpow2.f32 %v5464_v38  ;;  %v5981_v27 = vld [vmem:[#allocation18 + $0x2a8] sm:$0xff]  ;;  %v5408_v38 = vsub.f32 0.0, %v14135_v2 }
 0x9eb   : > { %9442 = vmatpush1.bf16.msra.mxu1 %v9441_v63  ;;  %9188 = vmatprep.subr.bf16.mxu0 %v9187_v37  ;;  %v5468_v63 = vmul.f32 1.442695, %v5394_v5  ;;  %v9193_v37 = vpack.c.bf16 %v5956_v32, %v5952_v29  ;;  %v9449_v39 = vpack.c.bf16 %v5958_v51, %v5954_v9  ;;  %v9451_v7 = vpack.c.bf16 %v5967_v17, %v5963_v53  ;;  %v5968_v29 = vld [vmem:[#allocation18 + $0x240] sm:$0xff]  ;;  %v5970_v9 = vld [vmem:[#allocation18 + $0x250] sm:$0xff]  ;;  %v5977_v51 = vld [vmem:[#allocation18 + $0x288] sm:$0xff] }
 0x9ec   : > { %5146 = vmatmul.mubr.f32.gmra.mrb[60].mxu0 %v12530_v34  ;;  %9444 = vmatprep.subr.bf16.mxu1 %v9443_v48  ;;  %v5964_v48 = vld [vmem:[#allocation18 + $0x220] sm:$0xff]  ;;  %v5402_v5 = vsub.f32 0.0, %v14132_v16  ;;  %v5979_v8 = vld [vmem:[#allocation18 + $0x298] sm:$0xff] }
 0x9ed   : > { %5372 = vmatmul.mubr.f32.gmra.mrb[60].mxu1 %v12530_v34  ;;  %5151 = vmatprep.mubr.f32.mxu0 %v12632_v35  ;;  %v5470_v34 = vmul.f32 1.442695, %v5395_v24  ;;  %10148 = vpow2.f32 %v5468_v63  ;;  %v5972_v32 = vld [vmem:[#allocation18 + $0x260] sm:$0xff]  ;;  %v9455_v24 = vpack.c.bf16 %v5975_v31, %v5971_v36  ;;  %v5983_v53 = vld [vmem:[#allocation18 + $0x2b8] sm:$0xff]  ;;  %v5496_v31 = vmul.f32 1.442695, %v5408_v38 }
 0x9ee   : > { %5377 = vmatprep.mubr.f32.mxu1 %v12632_v35  ;;  %9190 = vmatpush1.bf16.msra.mxu0 %v9189_v58  ;;  %v5973_v35 = vld [vmem:[#allocation18 + $0x268] sm:$0xff]  ;;  %v9197_v58 = vpack.c.bf16 %v5964_v48, %v5960_v60  ;;  %10150 = vpow2.f32 %v5466_v30  ;;  %v5484_v17 = vmul.f32 1.442695, %v5402_v5  ;;  %v9201_v63 = vpack.c.bf16 %v5972_v32, %v5968_v29  ;;  %v5976_v60 = vld [vmem:[#allocation18 + $0x280] sm:$0xff]  ;;  %v5987_v5 = vld [vmem:[#allocation18 + $0x2d8] sm:$0xff] }
 0x9ef   : > { %9446 = vmatpush1.bf16.msra.mxu1 %v9445_v40  ;;  %9192 = vmatprep.subr.bf16.mxu0 %v9191_v25  ;;  %v9453_v40 = vpack.c.bf16 %v5966_v0, %v5962_v56  ;;  %v9199_v25 = vpack.c.bf16 %v5973_v35, %v5969_v28  ;;  %10152 = vpow2.f32 %v5470_v34  ;;  %v5482_v30 = vmul.f32 1.442695, %v5401_v61  ;;  %v5980_v48 = vld [vmem:[#allocation18 + $0x2a0] sm:$0xff]  ;;  %v5978_v56 = vld [vmem:[#allocation18 + $0x290] sm:$0xff]  ;;  %v5985_v35 = vld [vmem:[#allocation18 + $0x2c8] sm:$0xff] }
 0x9f0   : > { %5152 = vmatmul.mubr.f32.gmra.mrb[62].mxu0 %v12539_v55  ;;  %9448 = vmatprep.subr.bf16.mxu1 %v9447_v59  ;;  %v5974_v59 = vld [vmem:[#allocation18 + $0x270] sm:$0xff]  ;;  %10154 = vpow2.f32 %v5480_v10  ;;  %v9459_v0 = vpack.c.bf16 %v5983_v53, %v5979_v8  ;;  %v5989_v10 = vld [vmem:[#allocation18 + $0x2e8] sm:$0xff] }
 0x9f1   : > { %5378 = vmatmul.mubr.f32.gmra.mrb[62].mxu1 %v12539_v55  ;;  %v5403_v55 = vsub.f32 0.0, %v14134_v1  ;;  %v5982_v28 = vld [vmem:[#allocation18 + $0x2b0] sm:$0xff]  ;;  %10156 = vpow2.f32 %v5484_v17  ;;  %v5997_v17 = vld [vmem:[#allocation18 + $0x328] sm:$0xff] }
 0x9f2   : > { %9194 = vmatpush1.bf16.msra.mxu0 %v9193_v37  ;;  %v10139_v37 = vpop.eup %10138  ;;  %10158 = vpow2.f32 %v5482_v30  ;;  %v5990_v53 = vld [vmem:[#allocation18 + $0x2f0] sm:$0xff]  ;;  %v5999_v30 = vld [vmem:[#allocation18 + $0x338] sm:$0xff] }
 0x9f3   : > { %9450 = vmatpush1.bf16.msra.mxu1 %v9449_v39  ;;  %9196 = vmatprep.subr.bf16.mxu0 %v9195_v21  ;;  %v9457_v39 = vpack.c.bf16 %v5974_v59, %v5970_v9  ;;  %v9203_v21 = vpack.c.bf16 %v5981_v27, %v5977_v51  ;;  %v10141_v34 = vpop.eup %10140  ;;  %v5576_v61 = vadd.f32 1.0, %v10139_v37  ;;  %v9461_v9 = vpack.c.bf16 %v5982_v28, %v5978_v56  ;;  %v5988_v59 = vld [vmem:[#allocation18 + $0x2e0] sm:$0xff]  ;;  %v5986_v51 = vld [vmem:[#allocation18 + $0x2d0] sm:$0xff]  ;;  %v5993_v37 = vld [vmem:[#allocation18 + $0x308] sm:$0xff] }
 0x9f4   : > { %9452 = vmatprep.subr.bf16.mxu1 %v9451_v7  ;;  %v5486_v7 = vmul.f32 1.442695, %v5403_v55  ;;  %v10143_v36 = vpop.eup %10142  ;;  %v5578_v32 = vadd.f32 1.0, %v10141_v34  ;;  %v9207_v55 = vpack.c.bf16 %v5989_v10, %v5985_v35  ;;  %v14136_v56 = vld [vmem:[#allocation64_spill] sm:$0xff]  ;;  %v9211_v10 = vpack.c.bf16 %v5997_v17, %v5993_v37 }
 0x9f5   : > { %v10145_v29 = vpop.eup %10144  ;;  %v5577_v8 = vadd.f32 1.0, %v10143_v36  ;;  %v5410_v34 = vsub.f32 0.0, %v14136_v56  ;;  %v5992_v36 = vld [vmem:[#allocation18 + $0x300] sm:$0xff] }
 0x9f6   : > { %9198 = vmatpush1.bf16.msra.mxu0 %v9197_v58  ;;  %v5991_v58 = vld [vmem:[#allocation18 + $0x2f8] sm:$0xff]  ;;  %10160 = vpow2.f32 %v5486_v7 }
 0x9f7   : > { %9454 = vmatpush1.bf16.msra.mxu1 %v9453_v40  ;;  %9200 = vmatprep.subr.bf16.mxu0 %v9199_v25  ;;  %v9205_v40 = vpack.c.bf16 %v5980_v48, %v5976_v60  ;;  %v10147_v25 = vpop.eup %10146  ;;  %v9463_v38 = vpack.c.bf16 %v5991_v58, %v5987_v5  ;;  %v5579_v60 = vadd.f32 1.0, %v10145_v29  ;;  %10162 = vpow2.f32 %v5496_v31  ;;  %v5995_v48 = vld [vmem:[#allocation18 + $0x318] sm:$0xff]  ;;  %v5996_v5 = vld [vmem:[#allocation18 + $0x320] sm:$0xff]  ;;  %v5994_v58 = vld [vmem:[#allocation18 + $0x310] sm:$0xff] }
 0x9f8   : > { %9456 = vmatprep.subr.bf16.mxu1 %v9455_v24  ;;  %v5984_v24 = vld [vmem:[#allocation18 + $0x2c0] sm:$0xff]  ;;  %v10149_v27 = vpop.eup %10148  ;;  %10164 = vrcp.f32 %v5576_v61  ;;  %v9467_v61 = vpack.c.bf16 %v5999_v30, %v5995_v48  ;;  %v5500_v37 = vmul.f32 1.442695, %v5410_v34 }
 0x9f9   : > { %v9209_v28 = vpack.c.bf16 %v5988_v59, %v5984_v24  ;;  %10166 = vrcp.f32 %v5578_v32  ;;  %v5586_v7 = vadd.f32 1.0, %v10149_v27  ;;  %v14137_v29 = vld [vmem:[#allocation65_spill] sm:$0xff]  ;;  %v14138_v32 = vld [vmem:[#allocation55_spill] sm:$0xff]  ;;  %v14139_v27 = vld [vmem:[#allocation56_spill] sm:$0xff] }
 0x9fa   : > { %9202 = vmatpush1.bf16.msra.mxu0 %v9201_v63  ;;  %v10151_v63 = vpop.eup %10150  ;;  %10168 = vrcp.f32 %v5577_v8  ;;  %v5409_v52 = vsub.f32 0.0, %v14137_v29  ;;  %v5411_v59 = vsub.f32 0.0, %v14138_v32  ;;  %v9213_v8 = vpack.c.bf16 %v5996_v5, %v5992_v36  ;;  %v6004_v48 = vld [vmem:[#allocation18 + $0x360] sm:$0xff]  ;;  %v14141_v5 = vld [vmem:[#allocation58_spill] sm:$0xff] }
 0x9fb   : > { %9458 = vmatpush1.bf16.msra.mxu1 %v9457_v39  ;;  %9204 = vmatprep.subr.bf16.mxu0 %v9203_v21  ;;  %v10153_v39 = vpop.eup %10152  ;;  %v5584_v21 = vadd.f32 1.0, %v10147_v25  ;;  %v5585_v31 = vadd.f32 1.0, %v10151_v63  ;;  %v5998_v25 = vld [vmem:[#allocation18 + $0x330] sm:$0xff]  ;;  %10170 = vrcp.f32 %v5579_v60  ;;  %v6000_v63 = vld [vmem:[#allocation18 + $0x340] sm:$0xff] }
 0x9fc   : > { %9460 = vmatprep.subr.bf16.mxu1 %v9459_v0  ;;  %v10155_v35 = vpop.eup %10154  ;;  %v9465_v0 = vpack.c.bf16 %v5990_v53, %v5986_v51  ;;  %v5587_v24 = vadd.f32 1.0, %v10153_v39  ;;  %v5416_v53 = vsub.f32 0.0, %v14139_v27  ;;  %v6002_v60 = vld [vmem:[#allocation18 + $0x350] sm:$0xff]  ;;  %v5498_v39 = vmul.f32 1.442695, %v5409_v52 }
 0x9fd   : > { %10172 = vrcp.f32 %v5584_v21  ;;  %v5592_v51 = vadd.f32 1.0, %v10155_v35  ;;  %v10157_v30 = vpop.eup %10156  ;;  %v6006_v21 = vld [vmem:[#allocation18 + $0x370] sm:$0xff]  ;;  %v6009_v35 = vld [vmem:[#allocation18 + $0x388] sm:$0xff] }
 0x9fe   : > { %9206 = vmatpush1.bf16.msra.mxu0 %v9205_v40  ;;  %v6005_v40 = vld [vmem:[#allocation18 + $0x368] sm:$0xff]  ;;  %10174 = vrcp.f32 %v5586_v7  ;;  %v10159_v44 = vpop.eup %10158  ;;  %v14140_v7 = vld [vmem:[#allocation57_spill] sm:$0xff] }
 0x9ff   : > { %9462 = vmatpush1.bf16.msra.mxu1 %v9461_v9  ;;  %9208 = vmatprep.subr.bf16.mxu0 %v9207_v55  ;;  %v6003_v9 = vld [vmem:[#allocation18 + $0x358] sm:$0xff]  ;;  %v9215_v17 = vpack.c.bf16 %v6005_v40, %v6001_v20  ;;  %10176 = vrcp.f32 %v5585_v31  ;;  %v5418_v34 = vsub.f32 0.0, %v14140_v7  ;;  %v5512_v20 = vmul.f32 1.442695, %v5416_v53 }
 0xa00   : > { %9464 = vmatprep.subr.bf16.mxu1 %v9463_v38  ;;  %v6007_v55 = vld [vmem:[#allocation18 + $0x378] sm:$0xff]  ;;  %v9469_v38 = vpack.c.bf16 %v5998_v25, %v5994_v58  ;;  %10178 = vrcp.f32 %v5587_v24  ;;  %v10161_v36 = vpop.eup %10160  ;;  %v5417_v58 = vsub.f32 0.0, %v14141_v5  ;;  %v9217_v31 = vpack.c.bf16 %v6004_v48, %v6000_v63  ;;  %v6008_v24 = vld [vmem:[#allocation18 + $0x380] sm:$0xff]  ;;  %v6017_v63 = vld [vmem:[#allocation18 + $0x3c8] sm:$0xff] }
 0xa01   : > { %v9471_v41 = vpack.c.bf16 %v6007_v55, %v6003_v9  ;;  %10180 = vrcp.f32 %v5592_v51  ;;  %v10163_v52 = vpop.eup %10162  ;;  %v9473_v25 = vpack.c.bf16 %v6006_v21, %v6002_v60  ;;  %v9219_v40 = vpack.c.bf16 %v6013_v15, %v6009_v35  ;;  %v6010_v9 = vld [vmem:[#allocation18 + $0x390] sm:$0xff]  ;;  %v6021_v48 = vld [vmem:[#allocation18 + $0x3e8] sm:$0xff]  ;;  %v6023_v60 = vld [vmem:[#allocation18 + $0x3f8] sm:$0xff] }
 0xa02   : > { %9210 = vmatpush1.bf16.msra.mxu0 %v9209_v28  ;;  %v5502_v28 = vmul.f32 1.442695, %v5411_v59  ;;  %10182 = vpow2.f32 %v5500_v37  ;;  %v6012_v59 = vld [vmem:[#allocation18 + $0x3a0] sm:$0xff]  ;;  %v12979_v55 = vpop.eup %10164  ;;  %v5593_v18 = vadd.f32 1.0, %v10159_v44  ;;  %v14142_v51 = vld [vmem:[#allocation59_spill] sm:$0xff] }
 0xa03   : > { %9466 = vmatpush1.bf16.msra.mxu1 %v9465_v0  ;;  %9212 = vmatprep.subr.bf16.mxu0 %v9211_v10  ;;  %v6011_v0 = vld [vmem:[#allocation18 + $0x398] sm:$0xff]  ;;  %10184 = vpow2.f32 %v5498_v39  ;;  %v5419_v53 = vsub.f32 0.0, %v14142_v51  ;;  %v5516_v37 = vmul.f32 1.442695, %v5418_v34  ;;  %v5514_v44 = vmul.f32 1.442695, %v5417_v58 }
 0xa04   : > { %9468 = vmatprep.subr.bf16.mxu1 %v9467_v61  ;;  %v6015_v10 = vld [vmem:[#allocation18 + $0x3b8] sm:$0xff]  ;;  %v5594_v61 = vadd.f32 1.0, %v10157_v30  ;;  %v12982_v30 = vpop.eup %10166  ;;  %10186 = vpow2.f32 %v5502_v28  ;;  %v14144_v39 = vld [vmem:[#allocation61_spill] sm:$0xff]  ;;  %v9223_v34 = vpack.c.bf16 %v6021_v48, %v6017_v63  ;;  %v14145_v58 = vld [vmem:[#allocation62_spill] sm:$0xff] }
 0xa05   : > { %v9475_v47 = vpack.c.bf16 %v6015_v10, %v6011_v0  ;;  %v12985_v21 = vpop.eup %10168  ;;  %10188 = vpow2.f32 %v5512_v20  ;;  %v5426_v35 = vsub.f32 0.0, %v14144_v39  ;;  %v5595_v10 = vadd.f32 1.0, %v10161_v36  ;;  %v6031_v63 = vld [vmem:[#allocation18 + $0x438] sm:$0xff] }
 0xa06   : > { %9214 = vmatpush1.bf16.msra.mxu0 %v9213_v8  ;;  %v6014_v8 = vld [vmem:[#allocation18 + $0x3b0] sm:$0xff]  ;;  %v12988_v0 = vpop.eup %10170  ;;  %10190 = vrcp.f32 %v5594_v61  ;;  %v5518_v20 = vmul.f32 1.442695, %v5419_v53  ;;  %v5425_v19 = vsub.f32 0.0, %v14145_v58  ;;  %v5600_v36 = vadd.f32 1.0, %v10163_v52 }
 0xa07   : > { %9470 = vmatpush1.bf16.msra.mxu1 %v9469_v38  ;;  %9216 = vmatprep.subr.bf16.mxu0 %v9215_v17  ;;  %v14143_v38 = vld [vmem:[#allocation60_spill] sm:$0xff]  ;;  %v9477_v28 = vpack.c.bf16 %v6014_v8, %v6010_v9  ;;  %v12990_v6 = vpop.eup %10172  ;;  %10192 = vrcp.f32 %v5593_v18  ;;  %v5532_v18 = vmul.f32 1.442695, %v5426_v35  ;;  %v14147_v53 = vld [vmem:[#allocation71_spill] sm:$0xff] }
 0xa08   : > { %9472 = vmatprep.subr.bf16.mxu1 %v9471_v41  ;;  %v5424_v15 = vsub.f32 0.0, %v14143_v38  ;;  %v6019_v17 = vld [vmem:[#allocation18 + $0x3d8] sm:$0xff]  ;;  %v9221_v41 = vpack.c.bf16 %v6012_v59, %v6008_v24  ;;  %v6022_v24 = vld [vmem:[#allocation18 + $0x3f0] sm:$0xff]  ;;  %v6025_v59 = vld [vmem:[#allocation18 + $0x408] sm:$0xff]  ;;  %v12993_v61 = vpop.eup %10174  ;;  %10194 = vpow2.f32 %v5516_v37  ;;  %v5432_v49 = vsub.f32 0.0, %v14147_v53 }
 0xa09   : > { %v6027_v8 = vld [vmem:[#allocation18 + $0x418] sm:$0xff]  ;;  %v12996_v48 = vpop.eup %10176  ;;  %10196 = vpow2.f32 %v5514_v44  ;;  %v9481_v52 = vpack.c.bf16 %v6022_v24, %v6018_v14  ;;  %v9227_v37 = vpack.c.bf16 %v6029_v62, %v6025_v59  ;;  %v5530_v23 = vmul.f32 1.442695, %v5425_v19 }
 0xa0a   : > { %9218 = vmatpush1.bf16.msra.mxu0 %v9217_v31  ;;  %v9479_v31 = vpack.c.bf16 %v6023_v60, %v6019_v17  ;;  %v12999_v17 = vpop.eup %10178  ;;  %10198 = vrcp.f32 %v5595_v10  ;;  %v14148_v60 = vld [vmem:[#allocation72_spill] sm:$0xff]  ;;  %v9483_v44 = vpack.c.bf16 %v6031_v63, %v6027_v8 }
 0xa0b   : > { %9474 = vmatpush1.bf16.msra.mxu1 %v9473_v25  ;;  %9220 = vmatprep.subr.bf16.mxu0 %v9219_v40  ;;  %v5528_v25 = vmul.f32 1.442695, %v5424_v15  ;;  %v14146_v40 = vld [vmem:[#allocation70_spill] sm:$0xff]  ;;  %v5434_v42 = vsub.f32 0.0, %v14148_v60  ;;  %v13002_v15 = vpop.eup %10180  ;;  %10200 = vpow2.f32 %v5518_v20 }
 0xa0c   : > { %9476 = vmatprep.subr.bf16.mxu1 %v9475_v47  ;;  %v5427_v9 = vsub.f32 0.0, %v14146_v40  ;;  %v9225_v47 = vpack.c.bf16 %v6020_v54, %v6016_v4  ;;  %v10183_v35 = vpop.eup %10182  ;;  %10202 = vrcp.f32 %v5600_v36  ;;  %v5544_v54 = vmul.f32 1.442695, %v5432_v49 }
 0xa0d   : > { %10204 = vpow2.f32 %v5528_v25  ;;  %v5548_v10 = vmul.f32 1.442695, %v5434_v42  ;;  %v5602_v62 = vadd.f32 1.0, %v10183_v35 }
 0xa0e   : > { %9222 = vmatpush1.bf16.msra.mxu0 %v9221_v41  ;;  %v5534_v50 = vmul.f32 1.442695, %v5427_v9  ;;  %v10185_v41 = vpop.eup %10184  ;;  %10206 = vpow2.f32 %v5532_v18 }
 0xa0f   : > { %9478 = vmatpush1.bf16.msra.mxu1 %v9477_v28  ;;  %9224 = vmatprep.subr.bf16.mxu0 %v9223_v34  ;;  %v10187_v4 = vpop.eup %10186  ;;  %10208 = vpow2.f32 %v5530_v23  ;;  %v14149_v28 = vld [vmem:[#allocation73_spill] sm:$0xff]  ;;  %v5601_v20 = vadd.f32 1.0, %v10185_v41  ;;  %v14151_v23 = vld [vmem:[#allocation67_spill] sm:$0xff]  ;;  %v5441_v41 = vsub.f32 0.0, %v12798_v43 }
 0xa10   : > { %9480 = vmatprep.subr.bf16.mxu1 %v9479_v31  ;;  %v10189_v14 = vpop.eup %10188  ;;  %v5433_v34 = vsub.f32 0.0, %v14149_v28  ;;  %10210 = vpow2.f32 %v5534_v50  ;;  %v14150_v31 = vld [vmem:[#allocation66_spill] sm:$0xff]  ;;  %v5603_v49 = vadd.f32 1.0, %v10187_v4  ;;  %v5440_v8 = vsub.f32 0.0, %v14151_v23 }
 0xa11   : > { %v13005_v19 = vpop.eup %10190  ;;  %v5435_v24 = vsub.f32 0.0, %v14150_v31  ;;  %10212 = vpow2.f32 %v5544_v54  ;;  %v5608_v42 = vadd.f32 1.0, %v10189_v14 }
 0xa12   : > { %9226 = vmatpush1.bf16.msra.mxu0 %v9225_v47  ;;  %v13008_v59 = vpop.eup %10192  ;;  %10214 = vpow2.f32 %v5548_v10  ;;  %v5546_v9 = vmul.f32 1.442695, %v5433_v34  ;;  %v5560_v4 = vmul.f32 1.442695, %v5440_v8  ;;  %v14153_v10 = vld [vmem:[#allocation77_spill] sm:$0xff] }
 0xa13   : > { %9482 = vmatpush1.bf16.msra.mxu1 %v9481_v52  ;;  %9228 = vmatprep.subr.bf16.mxu0 %v9227_v37  ;;  %v10195_v36 = vpop.eup %10194  ;;  %10216 = vrcp.f32 %v5602_v62  ;;  %v5550_v18 = vmul.f32 1.442695, %v5435_v24  ;;  %v14152_v52 = vld [vmem:[#allocation68_spill] sm:$0xff]  ;;  %v5443_v14 = vsub.f32 0.0, %v14153_v10 }
 0xa14   : > { %9484 = vmatprep.subr.bf16.mxu1 %v9483_v44  ;;  %v10197_v25 = vpop.eup %10196  ;;  %10218 = vrcp.f32 %v5601_v20  ;;  %v5610_v50 = vadd.f32 1.0, %v10195_v36  ;;  %v5442_v37 = vsub.f32 0.0, %v14152_v52  ;;  %v5562_v36 = vmul.f32 1.442695, %v5441_v41  ;;  %v13032_v41 = vld [vmem:[#allocation18 + $0x420] sm:$0xff] }
 0xa15   : > { %v13011_v63 = vpop.eup %10198  ;;  %10220 = vrcp.f32 %v5603_v49  ;;  %v5609_v35 = vadd.f32 1.0, %v10197_v25 }
 0xa16   : > { %v10201_v47 = vpop.eup %10200  ;;  %10222 = vrcp.f32 %v5608_v42  ;;  %v5564_v24 = vmul.f32 1.442695, %v5442_v37  ;;  %v5566_v42 = vmul.f32 1.442695, %v5443_v14  ;;  %v5771_v37 = vmul.f32 %v12988_v0, %v12732_v11  ;;  %v13042_v11 = vld [vmem:[#allocation18 + $0x448] sm:$0xff] }
 0xa17   : > { %v13014_v44 = vpop.eup %10202  ;;  %10224 = vpow2.f32 %v5546_v9  ;;  %v5611_v34 = vadd.f32 1.0, %v10201_v47  ;;  %v5768_v9 = vmul.f32 %v12979_v55, %v12725_v3  ;;  %v5770_v47 = vmul.f32 %v12982_v30, %v12727_v46  ;;  %v6030_v30 = vld [vmem:[#allocation18 + $0x430] sm:$0xff] }
 0xa18   : > { %v10205_v54 = vpop.eup %10204  ;;  %10226 = vpow2.f32 %v5550_v18  ;;  %v5776_v3 = vmul.f32 %v12990_v6, %v12737_v13  ;;  %v5778_v55 = vmul.f32 %v12993_v61, %v12739_v45  ;;  %v5777_v46 = vmul.f32 %v12996_v48, %v14129_v57  ;;  %v6037_v61 = vld [vmem:[#allocation18 + $0x468] sm:$0xff]  ;;  %v6035_v57 = vld [vmem:[#allocation18 + $0x458] sm:$0xff] }
 0xa19   : > { %v10207_v62 = vpop.eup %10206  ;;  %10228 = vrcp.f32 %v5610_v50  ;;  %v5616_v43 = vadd.f32 1.0, %v10205_v54  ;;  %v5769_v50 = vmul.f32 %v12985_v21, %v12730_v26  ;;  %v6026_v26 = vld [vmem:[#allocation18 + $0x410] sm:$0xff]  ;;  %v13048_v0 = vmul.f32 %v12999_v17, %v14130_v33  ;;  %v6039_v48 = vld [vmem:[#allocation18 + $0x478] sm:$0xff] }
 0xa1a   : > { %v10209_v20 = vpop.eup %10208  ;;  %10230 = vrcp.f32 %v5609_v35  ;;  %v5618_v8 = vadd.f32 1.0, %v10207_v62  ;;  %v13030_v35 = vld [vmem:[#allocation18 + $0x400] sm:$0xff]  ;;  %v13052_v13 = vmul.f32 %v13002_v15, %v14131_v22  ;;  %v9485_v22 = vpack.c.bf16 %v6030_v30, %v6026_v26  ;;  %v13081_v30 = vld [vmem:[#allocation18 + $0x498] sm:$0xff] }
 0xa1b   : > { %v10211_v49 = vpop.eup %10210  ;;  %10232 = vpow2.f32 %v5560_v4  ;;  %v5617_v45 = vadd.f32 1.0, %v10209_v20  ;;  %v13058_v15 = vld [vmem:[#allocation18 + $0x440] sm:$0xff]  ;;  %v5785_v26 = vmul.f32 %v13008_v59, %v14133_v12 }
 0xa1c   : > { %v10213_v52 = vpop.eup %10212  ;;  %10234 = vrcp.f32 %v5611_v34  ;;  %v5619_v14 = vadd.f32 1.0, %v10211_v49  ;;  %v13060_v20 = vld [vmem:[#allocation18 + $0x460] sm:$0xff] }
 0xa1d   : > { %v10215_v25 = vpop.eup %10214  ;;  %10236 = vpow2.f32 %v5564_v24  ;;  %v5624_v62 = vadd.f32 1.0, %v10213_v52  ;;  %v9233_v12 = vpack.c.bf16 %v13060_v20, %v13058_v15  ;;  %v5787_v15 = vmul.f32 %v13011_v63, %v14134_v1 }
 0xa1e   : > { %v13018_v23 = vpop.eup %10216  ;;  %10238 = vpow2.f32 %v5562_v36  ;;  %v5626_v49 = vadd.f32 1.0, %v10215_v25 }
 0xa1f   : > { %v13022_v18 = vpop.eup %10218  ;;  %10240 = vpow2.f32 %v5566_v42 }
 0xa20   : > { %v13034_v54 = vpop.eup %10220  ;;  %10242 = vrcp.f32 %v5616_v43  ;;  %v9229_v43 = vpack.c.bf16 %v13032_v41, %v13030_v35  ;;  %v5786_v41 = vmul.f32 %v13005_v19, %v14132_v16 }
 0xa21   : > { %v13044_v21 = vpop.eup %10222  ;;  %10244 = vrcp.f32 %v5618_v8  ;;  %v9487_v8 = vpack.c.bf16 %v6039_v48, %v6035_v57 }
 0xa22   : > { %v10225_v4 = vpop.eup %10224  ;;  %10246 = vrcp.f32 %v5617_v45 }
 0xa23   : > { %v10227_v42 = vpop.eup %10226  ;;  %10248 = vrcp.f32 %v5619_v14 }
 0xa24   : > { %v13062_v31 = vpop.eup %10228  ;;  %v5627_v57 = vadd.f32 1.0, %v10227_v42  ;;  %10250 = vrcp.f32 %v5624_v62  ;;  %v13104_v62 = vld [vmem:[#allocation18 + $0x490] sm:$0xff] }
 0xa25   : > { %v4659_v6 = vpop.f32.mrb[32].mxu0  ;;  %v13073_v35 = vpop.eup %10230  ;;  %10252 = vrcp.f32 %v5626_v49 }
 0xa26   : > { %v5832_v34 = vmul.f32 %v5768_v9, %v4659_v6  ;;  %v4885_v24 = vpop.f32.mrb[32].mxu1  ;;  %v4661_v36 = vpop.f32.mrb[33].mxu0  ;;  %v9231_v9 = vpack.c.bf16 %v6037_v61, %v13042_v11  ;;  %v13071_v6 = vld [vmem:[#allocation18 + $0x488] sm:$0xff]  ;;  %v13083_v11 = vld [vmem:[#allocation18 + $0x4b8] sm:$0xff] }
 0xa27   : > { %v13054_v33 = vmul.f32 %v5770_v47, %v4885_v24  ;;  %v5833_v17 = vmul.f32 %v5769_v50, %v4661_v36  ;;  %v4887_v10 = vpop.f32.mrb[33].mxu1  ;;  %v13067_v47 = vld [vmem:[#allocation18 + $0x450] sm:$0xff]  ;;  %v10233_v61 = vpop.eup %10232  ;;  %v13095_v36 = vld [vmem:[#allocation18 + $0x4a0] sm:$0xff] }
 0xa28   : > { %v13064_v52 = vmul.f32 %v5771_v37, %v4887_v10  ;;  %v13069_v50 = vld [vmem:[#allocation18 + $0x470] sm:$0xff]  ;;  %v5625_v10 = vadd.f32 1.0, %v10225_v4  ;;  %v13079_v37 = vld [vmem:[#allocation18 + $0x4a8] sm:$0xff]  ;;  %v13087_v19 = vpop.eup %10234  ;;  %v5632_v20 = vadd.f32 1.0, %v10233_v61 }
 0xa29   : > { %v4665_v25 = vpop.f32.mrb[34].mxu0  ;;  %6472 = vmatprep.mubr.f32.mxu0 %v5833_v17  ;;  %6924 = vmatprep.mubr.f32.mxu1 %v5833_v17  ;;  %v9489_v14 = vpack.c.bf16 %v13069_v50, %v13067_v47  ;;  %v13106_v17 = vld [vmem:[#allocation18 + $0x4b0] sm:$0xff]  ;;  %v6055_v47 = vld [vmem:[#allocation18 + $0x4f8] sm:$0xff] }
 0xa2a   : > { %v5840_v48 = vmul.f32 %v5776_v3, %v4665_v25  ;;  %v4891_v24 = vpop.f32.mrb[34].mxu1  ;;  %v4667_v16 = vpop.f32.mrb[35].mxu0  ;;  %6473 = vmatmul.mubr.f32.vlgmr.msra.gmra.mrb[64].mxu0 %v5832_v34  ;;  %6925 = vmatmul.mubr.f32.vlgmr.msra.gmra.mrb[64].mxu1 %v5832_v34  ;;  %v13093_v3 = vld [vmem:[#allocation18 + $0x480] sm:$0xff]  ;;  %10254 = vrcp.f32 %v5625_v10 }
 0xa2b   : > { %v13089_v59 = vmul.f32 %v5778_v55, %v4891_v24  ;;  %v5841_v45 = vmul.f32 %v5777_v46, %v4667_v16  ;;  %v4893_v4 = vpop.f32.mrb[35].mxu1  ;;  %9230 = vmatpush1.bf16.msra.mxu0 %v9229_v43  ;;  %9486 = vmatpush1.bf16.msra.mxu1 %v9485_v22  ;;  %v10237_v34 = vpop.eup %10236  ;;  %v9235_v55 = vpack.c.bf16 %v13079_v37, %v13071_v6  ;;  %v13108_v43 = vld [vmem:[#allocation18 + $0x4c8] sm:$0xff]  ;;  %10256 = vrcp.f32 %v5627_v57  ;;  %v13134_v24 = vld [vmem:[#allocation18 + $0x4d0] sm:$0xff] }
 0xa2c   : > { %v13098_v42 = vmul.f32 %v13048_v0, %v4893_v4  ;;  %9232 = vmatprep.subr.bf16.mxu0 %v9231_v9  ;;  %9488 = vmatprep.subr.bf16.mxu1 %v9487_v8  ;;  %v9491_v46 = vpack.c.bf16 %v13083_v11, %v13081_v30  ;;  %v10239_v22 = vpop.eup %10238  ;;  %v5792_v0 = vmul.f32 %v13014_v44, %v14135_v2  ;;  %v6053_v9 = vld [vmem:[#allocation18 + $0x4e8] sm:$0xff]  ;;  %v6051_v8 = vld [vmem:[#allocation18 + $0x4d8] sm:$0xff]  ;;  %v5634_v44 = vadd.f32 1.0, %v10237_v34  ;;  %v13136_v16 = vld [vmem:[#allocation18 + $0x4f0] sm:$0xff] }
 0xa2d   : > { %v4671_v49 = vpop.f32.mrb[36].mxu0  ;;  %6478 = vmatprep.mubr.f32.mxu0 %v5841_v45  ;;  %6930 = vmatprep.mubr.f32.mxu1 %v5841_v45  ;;  %v10241_v50 = vpop.eup %10240  ;;  %v5794_v6 = vmul.f32 %v13018_v23, %v14136_v56  ;;  %v9237_v2 = vpack.c.bf16 %v13095_v36, %v13093_v3  ;;  %v9493_v56 = vpack.c.bf16 %v13106_v17, %v13104_v62  ;;  %v13125_v23 = vld [vmem:[#allocation18 + $0x4c0] sm:$0xff]  ;;  %v5633_v57 = vadd.f32 1.0, %v10239_v22  ;;  %v6061_v36 = vld [vmem:[#allocation18 + $0x528] sm:$0xff]  ;;  %v6059_v34 = vld [vmem:[#allocation18 + $0x518] sm:$0xff] }
 0xa2e   : > { %v5848_v25 = vmul.f32 %v13052_v13, %v4671_v49  ;;  %v4897_v37 = vpop.f32.mrb[36].mxu1  ;;  %v4673_v1 = vpop.f32.mrb[37].mxu0  ;;  %6479 = vmatmul.mubr.f32.gmra.mrb[66].mxu0 %v5840_v48  ;;  %6931 = vmatmul.mubr.f32.gmra.mrb[66].mxu1 %v5840_v48  ;;  %v13127_v13 = vld [vmem:[#allocation18 + $0x4e0] sm:$0xff]  ;;  %v5793_v45 = vmul.f32 %v13022_v18, %v14137_v29  ;;  %v5795_v4 = vmul.f32 %v13034_v54, %v14138_v32  ;;  %10258 = vrcp.f32 %v5632_v20 }
 0xa2f   : > { %v13119_v63 = vpop.eup %10242  ;;  %v13121_v10 = vmul.f32 %v5786_v41, %v4897_v37  ;;  %v5849_v30 = vmul.f32 %v5785_v26, %v4673_v1  ;;  %v4899_v11 = vpop.f32.mrb[37].mxu1  ;;  %9234 = vmatpush1.bf16.msra.mxu0 %v9233_v12  ;;  %9490 = vmatpush1.bf16.msra.mxu1 %v9489_v14  ;;  %v9239_v41 = vpack.c.bf16 %v6053_v9, %v13108_v43  ;;  %v13138_v12 = vld [vmem:[#allocation18 + $0x508] sm:$0xff]  ;;  %v5635_v14 = vadd.f32 1.0, %v10241_v50 }
 0xa30   : > { %v13129_v61 = vpop.eup %10244  ;;  %v13131_v48 = vmul.f32 %v5787_v15, %v4899_v11  ;;  %9236 = vmatprep.subr.bf16.mxu0 %v9235_v55  ;;  %9492 = vmatprep.subr.bf16.mxu1 %v9491_v46  ;;  %v9495_v26 = vpack.c.bf16 %v6055_v47, %v6051_v8  ;;  %v6063_v55 = vld [vmem:[#allocation18 + $0x538] sm:$0xff]  ;;  %v5800_v46 = vmul.f32 %v13044_v21, %v14139_v27  ;;  %10260 = vrcp.f32 %v5634_v44  ;;  %v13152_v27 = vld [vmem:[#allocation18 + $0x500] sm:$0xff]  ;;  %v6058_v8 = vld [vmem:[#allocation18 + $0x510] sm:$0xff] }
 0xa31   : > { %v4677_v3 = vpop.f32.mrb[38].mxu0  ;;  %6484 = vmatprep.mubr.f32.mxu0 %v5849_v30  ;;  %6936 = vmatprep.mubr.f32.mxu1 %v5849_v30  ;;  %v9241_v29 = vpack.c.bf16 %v13127_v13, %v13125_v23  ;;  %v10247_v32 = vpop.eup %10246  ;;  %v9497_v15 = vpack.c.bf16 %v13136_v16, %v13134_v24  ;;  %v13154_v21 = vld [vmem:[#allocation18 + $0x520] sm:$0xff]  ;;  %10262 = vrcp.f32 %v5633_v57  ;;  %v9243_v49 = vpack.c.bf16 %v6061_v36, %v13138_v12  ;;  %v6062_v47 = vld [vmem:[#allocation18 + $0x530] sm:$0xff]  ;;  %v13159_v50 = vld [vmem:[#allocation18 + $0x548] sm:$0xff] }
 0xa32   : > { %v5856_v62 = vmul.f32 %v5792_v0, %v4677_v3  ;;  %v4903_v17 = vpop.f32.mrb[38].mxu1  ;;  %v4679_v43 = vpop.f32.mrb[39].mxu0  ;;  %6485 = vmatmul.mubr.f32.gmra.mrb[68].mxu0 %v5848_v25  ;;  %6937 = vmatmul.mubr.f32.gmra.mrb[68].mxu1 %v5848_v25  ;;  %v9499_v9 = vpack.c.bf16 %v6063_v55, %v6059_v34  ;;  %v5802_v25 = vmul.f32 %v13062_v31, %v14140_v7  ;;  %10264 = vrcp.f32 %v5635_v14  ;;  %v6069_v44 = vld [vmem:[#allocation18 + $0x568] sm:$0xff]  ;;  %v6067_v30 = vld [vmem:[#allocation18 + $0x558] sm:$0xff]  ;;  %v13175_v24 = vld [vmem:[#allocation18 + $0x560] sm:$0xff] }
 0xa33   : > { %v13148_v18 = vmul.f32 %v5794_v6, %v4903_v17  ;;  %v5857_v54 = vmul.f32 %v5793_v45, %v4679_v43  ;;  %v4905_v22 = vpop.f32.mrb[39].mxu1  ;;  %9238 = vmatpush1.bf16.msra.mxu0 %v9237_v2  ;;  %9494 = vmatpush1.bf16.msra.mxu1 %v9493_v56  ;;  %v10249_v0 = vpop.eup %10248  ;;  %v5801_v37 = vmul.f32 %v13073_v35, %v14141_v5  ;;  %v6071_v11 = vld [vmem:[#allocation18 + $0x578] sm:$0xff]  ;;  %v6066_v45 = vld [vmem:[#allocation18 + $0x550] sm:$0xff]  ;;  %v6073_v14 = vld [vmem:[#allocation18 + $0x588] sm:$0xff] }
 0xa34   : > { %v13156_v20 = vmul.f32 %v5795_v4, %v4905_v22  ;;  %9240 = vmatprep.subr.bf16.mxu0 %v9239_v41  ;;  %9496 = vmatprep.subr.bf16.mxu1 %v9495_v26  ;;  %v10251_v6 = vpop.eup %10250  ;;  %v5803_v1 = vmul.f32 %v13087_v19, %v14142_v51  ;;  %v5808_v23 = vmul.f32 %v13119_v63, %v14143_v38  ;;  %v13173_v26 = vld [vmem:[#allocation18 + $0x540] sm:$0xff]  ;;  %v6070_v4 = vld [vmem:[#allocation18 + $0x570] sm:$0xff]  ;;  %v6079_v17 = vld [vmem:[#allocation18 + $0x5b8] sm:$0xff] }
 0xa35   : > { %v4683_v2 = vpop.f32.mrb[40].mxu0  ;;  %6490 = vmatprep.mubr.f32.mxu0 %v5857_v54  ;;  %6942 = vmatprep.mubr.f32.mxu1 %v5857_v54  ;;  %v10253_v56 = vpop.eup %10252  ;;  %v9245_v5 = vpack.c.bf16 %v13154_v21, %v13152_v27  ;;  %v9501_v41 = vpack.c.bf16 %v6062_v47, %v6058_v8  ;;  %v9247_v16 = vpack.c.bf16 %v6069_v44, %v13159_v50  ;;  %v13189_v27 = vld [vmem:[#allocation18 + $0x580] sm:$0xff]  ;;  %v6078_v8 = vld [vmem:[#allocation18 + $0x5b0] sm:$0xff]  ;;  %v6081_v47 = vld [vmem:[#allocation18 + $0x5c8] sm:$0xff] }
 0xa36   : > { %v5864_v13 = vmul.f32 %v5800_v46, %v4683_v2  ;;  %v4909_v57 = vpop.f32.mrb[40].mxu1  ;;  %v4685_v7 = vpop.f32.mrb[41].mxu0  ;;  %6491 = vmatmul.mubr.f32.gmra.mrb[70].mxu0 %v5856_v62  ;;  %6943 = vmatmul.mubr.f32.gmra.mrb[70].mxu1 %v5856_v62  ;;  %v9503_v12 = vpack.c.bf16 %v6071_v11, %v6067_v30  ;;  %v5810_v3 = vmul.f32 %v13129_v61, %v14144_v39  ;;  %v6077_v46 = vld [vmem:[#allocation18 + $0x5a8] sm:$0xff]  ;;  %v6075_v62 = vld [vmem:[#allocation18 + $0x598] sm:$0xff]  ;;  %v6076_v21 = vld [vmem:[#allocation18 + $0x5a0] sm:$0xff] }
 0xa37   : > { %v10255_v51 = vpop.eup %10254  ;;  %v13171_v31 = vmul.f32 %v5802_v25, %v4909_v57  ;;  %v5865_v35 = vmul.f32 %v5801_v37, %v4685_v7  ;;  %v4911_v19 = vpop.f32.mrb[41].mxu1  ;;  %9242 = vmatpush1.bf16.msra.mxu0 %v9241_v29  ;;  %9498 = vmatpush1.bf16.msra.mxu1 %v9497_v15  ;;  %v5809_v36 = vmul.f32 %v10247_v32, %v14145_v58  ;;  %v14154_v37 = vld [vmem:[#allocation66_spill] sm:$0xff]  ;;  %v6083_v30 = vld [vmem:[#allocation18 + $0x5d8] sm:$0xff] }
 0xa38   : > { %v10257_v38 = vpop.eup %10256  ;;  %v13177_v63 = vmul.f32 %v5803_v1, %v4911_v19  ;;  %9244 = vmatprep.subr.bf16.mxu0 %v9243_v49  ;;  %9500 = vmatprep.subr.bf16.mxu1 %v9499_v9  ;;  %v5811_v34 = vmul.f32 %v10249_v0, %v14146_v40  ;;  %v5816_v43 = vmul.f32 %v10251_v6, %v14147_v53  ;;  %v6074_v9 = vld [vmem:[#allocation18 + $0x590] sm:$0xff]  ;;  %v6085_v44 = vld [vmem:[#allocation18 + $0x5e8] sm:$0xff]  ;;  %v6087_v11 = vld [vmem:[#allocation18 + $0x5f8] sm:$0xff] }
 0xa39   : > { %v4689_v55 = vpop.f32.mrb[42].mxu0  ;;  %6496 = vmatprep.mubr.f32.mxu0 %v5865_v35  ;;  %6948 = vmatprep.mubr.f32.mxu1 %v5865_v35  ;;  %v9249_v39 = vpack.c.bf16 %v13175_v24, %v13173_v26  ;;  %v10259_v61 = vpop.eup %10258  ;;  %v9505_v15 = vpack.c.bf16 %v6070_v4, %v6066_v45  ;;  %v9251_v0 = vpack.c.bf16 %v6077_v46, %v6073_v14  ;;  %v6080_v26 = vld [vmem:[#allocation18 + $0x5c0] sm:$0xff]  ;;  %v6082_v45 = vld [vmem:[#allocation18 + $0x5d0] sm:$0xff]  ;;  %v14156_v14 = vld [vmem:[#allocation68_spill] sm:$0xff] }
 0xa3a   : > { %v5872_v29 = vmul.f32 %v5808_v23, %v4689_v55  ;;  %v4915_v54 = vpop.f32.mrb[42].mxu1  ;;  %v4691_v22 = vpop.f32.mrb[43].mxu0  ;;  %6497 = vmatmul.mubr.f32.gmra.mrb[72].mxu0 %v5864_v13  ;;  %6949 = vmatmul.mubr.f32.gmra.mrb[72].mxu1 %v5864_v13  ;;  %v9507_v49 = vpack.c.bf16 %v6079_v17, %v6075_v62  ;;  %v5818_v6 = vmul.f32 %v10253_v56, %v14148_v60  ;;  %v14155_v13 = vld [vmem:[#allocation67_spill] sm:$0xff]  ;;  %v6084_v24 = vld [vmem:[#allocation18 + $0x5e0] sm:$0xff]  ;;  %v6089_v46 = vld [vmem:[#allocation18 + $0x608] sm:$0xff] }
 0xa3b   : > { %v13187_v58 = vmul.f32 %v5810_v3, %v4915_v54  ;;  %v5873_v40 = vmul.f32 %v5809_v36, %v4691_v22  ;;  %v4917_v32 = vpop.f32.mrb[43].mxu1  ;;  %9246 = vmatpush1.bf16.msra.mxu0 %v9245_v5  ;;  %9502 = vmatpush1.bf16.msra.mxu1 %v9501_v41  ;;  %v10261_v50 = vpop.eup %10260  ;;  %v5817_v25 = vmul.f32 %v10255_v51, %v14149_v28  ;;  %v6086_v4 = vld [vmem:[#allocation18 + $0x5f0] sm:$0xff]  ;;  %v14157_v36 = vld [vmem:[#allocation69_spill] sm:$0xff] }
 0xa3c   : > { %v13191_v53 = vmul.f32 %v5811_v34, %v4917_v32  ;;  %9248 = vmatprep.subr.bf16.mxu0 %v9247_v16  ;;  %9504 = vmatprep.subr.bf16.mxu1 %v9503_v12  ;;  %v5819_v1 = vmul.f32 %v10257_v38, %v14154_v37  ;;  %v10263_v23 = vpop.eup %10262  ;;  %v5824_v57 = vmul.f32 %v10259_v61, %v14155_v13  ;;  %v14158_v62 = vld [vmem:[#allocation77_spill] sm:$0xff]  ;;  %v6091_v61 = vld [vmem:[#allocation18 + $0x618] sm:$0xff]  ;;  %v6101_v37 = vld [vmem:[#allocation18 + $0x668] sm:$0xff] }
 0xa3d   : > { %v4695_v2 = vpop.f32.mrb[44].mxu0  ;;  %6502 = vmatprep.mubr.f32.mxu0 %v5873_v40  ;;  %6954 = vmatprep.mubr.f32.mxu1 %v5873_v40  ;;  %v9253_v60 = vpack.c.bf16 %v6076_v21, %v13189_v27  ;;  %v10265_v56 = vpop.eup %10264  ;;  %v9509_v41 = vpack.c.bf16 %v6078_v8, %v6074_v9  ;;  %v9255_v16 = vpack.c.bf16 %v6085_v44, %v6081_v47  ;;  %v6095_v40 = vld [vmem:[#allocation18 + $0x638] sm:$0xff]  ;;  %v6090_v8 = vld [vmem:[#allocation18 + $0x610] sm:$0xff] }
 0xa3e   : > { %v5880_v7 = vmul.f32 %v5816_v43, %v4695_v2  ;;  %v4921_v5 = vpop.f32.mrb[44].mxu1  ;;  %v4697_v35 = vpop.f32.mrb[45].mxu0  ;;  %6503 = vmatmul.mubr.f32.gmra.mrb[74].mxu0 %v5872_v29  ;;  %6955 = vmatmul.mubr.f32.gmra.mrb[74].mxu1 %v5872_v29  ;;  %v9511_v12 = vpack.c.bf16 %v6087_v11, %v6083_v30  ;;  %v5826_v3 = vmul.f32 %v10261_v50, %v14156_v14  ;;  %v6094_v47 = vld [vmem:[#allocation18 + $0x630] sm:$0xff]  ;;  %v6097_v50 = vld [vmem:[#allocation18 + $0x648] sm:$0xff]  ;;  %v6103_v2 = vld [vmem:[#allocation18 + $0x678] sm:$0xff] }
 0xa3f   : > { %v13198_v28 = vmul.f32 %v5818_v6, %v4921_v5  ;;  %v5881_v51 = vmul.f32 %v5817_v25, %v4697_v35  ;;  %v4923_v19 = vpop.f32.mrb[45].mxu1  ;;  %9250 = vmatpush1.bf16.msra.mxu0 %v9249_v39  ;;  %9506 = vmatpush1.bf16.msra.mxu1 %v9505_v15  ;;  %v5825_v34 = vmul.f32 %v10263_v23, %v14157_v36  ;;  %v6093_v39 = vld [vmem:[#allocation18 + $0x628] sm:$0xff]  ;;  %v6096_v11 = vld [vmem:[#allocation18 + $0x640] sm:$0xff]  ;;  %v6102_v5 = vld [vmem:[#allocation18 + $0x670] sm:$0xff] }
 0xa40   : > { %v13200_v38 = vmul.f32 %v5819_v1, %v4923_v19  ;;  %9252 = vmatprep.subr.bf16.mxu0 %v9251_v0  ;;  %9508 = vmatprep.subr.bf16.mxu1 %v9507_v49  ;;  %v5827_v17 = vmul.f32 %v10265_v56, %v14158_v62  ;;  %v9257_v22 = vpack.c.bf16 %v6084_v24, %v6080_v26  ;;  %v6088_v0 = vld [vmem:[#allocation18 + $0x600] sm:$0xff]  ;;  %v6099_v1 = vld [vmem:[#allocation18 + $0x658] sm:$0xff]  ;;  %v6105_v35 = vld [vmem:[#allocation18 + $0x688] sm:$0xff] }
 0xa41   : > { %v4701_v55 = vpop.f32.mrb[46].mxu0  ;;  %6508 = vmatprep.mubr.f32.mxu0 %v5881_v51  ;;  %6960 = vmatprep.mubr.f32.mxu1 %v5881_v51  ;;  %v9513_v21 = vpack.c.bf16 %v6086_v4, %v6082_v45  ;;  %v6092_v49 = vld [vmem:[#allocation18 + $0x620] sm:$0xff]  ;;  %v9259_v6 = vpack.c.bf16 %v6093_v39, %v6089_v46  ;;  %v9515_v25 = vpack.c.bf16 %v6095_v40, %v6091_v61  ;;  %v6107_v56 = vld [vmem:[#allocation18 + $0x698] sm:$0xff]  ;;  %v6110_v45 = vld [vmem:[#allocation18 + $0x6b0] sm:$0xff] }
 0xa42   : > { %v5888_v43 = vmul.f32 %v5824_v57, %v4701_v55  ;;  %v4927_v29 = vpop.f32.mrb[46].mxu1  ;;  %v4703_v54 = vpop.f32.mrb[47].mxu0  ;;  %6509 = vmatmul.mubr.f32.gmra.mrb[76].mxu0 %v5880_v7  ;;  %6961 = vmatmul.mubr.f32.gmra.mrb[76].mxu1 %v5880_v7  ;;  %v9261_v44 = vpack.c.bf16 %v6092_v49, %v6088_v0  ;;  %v9517_v30 = vpack.c.bf16 %v6094_v47, %v6090_v8  ;;  %v6100_v23 = vld [vmem:[#allocation18 + $0x660] sm:$0xff]  ;;  %v6098_v7 = vld [vmem:[#allocation18 + $0x650] sm:$0xff]  ;;  %v6111_v51 = vld [vmem:[#allocation18 + $0x6b8] sm:$0xff] }
 0xa43   : > { %v13205_v32 = vmul.f32 %v5826_v3, %v4927_v29  ;;  %v5889_v15 = vmul.f32 %v5825_v34, %v4703_v54  ;;  %v4929_v27 = vpop.f32.mrb[47].mxu1  ;;  %9254 = vmatpush1.bf16.msra.mxu0 %v9253_v60  ;;  %9510 = vmatpush1.bf16.msra.mxu1 %v9509_v41  ;;  %v9263_v13 = vpack.c.bf16 %v6101_v37, %v6097_v50  ;;  %v6109_v60 = vld [vmem:[#allocation18 + $0x6a8] sm:$0xff]  ;;  %v6104_v26 = vld [vmem:[#allocation18 + $0x680] sm:$0xff]  ;;  %v6115_v3 = vld [vmem:[#allocation18 + $0x6d8] sm:$0xff] }
 0xa44   : > { %v13207_v9 = vmul.f32 %v5827_v17, %v4929_v27  ;;  %9256 = vmatprep.subr.bf16.mxu0 %v9255_v16  ;;  %9512 = vmatprep.subr.bf16.mxu1 %v9511_v12  ;;  %v9519_v57 = vpack.c.bf16 %v6103_v2, %v6099_v1  ;;  %v9265_v19 = vpack.c.bf16 %v6100_v23, %v6096_v11  ;;  %v6108_v24 = vld [vmem:[#allocation18 + $0x6a0] sm:$0xff]  ;;  %v6106_v12 = vld [vmem:[#allocation18 + $0x690] sm:$0xff]  ;;  %v6113_v4 = vld [vmem:[#allocation18 + $0x6c8] sm:$0xff] }
 0xa45   : > { %6514 = vmatprep.mubr.f32.mxu0 %v5889_v15  ;;  %6966 = vmatprep.mubr.f32.mxu1 %v5889_v15  ;;  %v9521_v41 = vpack.c.bf16 %v6102_v5, %v6098_v7  ;;  %v9267_v16 = vpack.c.bf16 %v6109_v60, %v6105_v35  ;;  %v6117_v14 = vld [vmem:[#allocation18 + $0x6e8] sm:$0xff]  ;;  %v6119_v36 = vld [vmem:[#allocation18 + $0x6f8] sm:$0xff]  ;;  %v9269_v34 = vpack.c.bf16 %v6108_v24, %v6104_v26  ;;  %v6112_v46 = vld [vmem:[#allocation18 + $0x6c0] sm:$0xff] }
 0xa46   : > { %6515 = vmatmul.mubr.f32.gmra.mrb[78].mxu0 %v5888_v43  ;;  %6967 = vmatmul.mubr.f32.gmra.mrb[78].mxu1 %v5888_v43  ;;  %v9525_v55 = vpack.c.bf16 %v6110_v45, %v6106_v12  ;;  %v6116_v62 = vld [vmem:[#allocation18 + $0x6e0] sm:$0xff]  ;;  %v9271_v17 = vpack.c.bf16 %v6117_v14, %v6113_v4  ;;  %v9527_v43 = vpack.c.bf16 %v6119_v36, %v6115_v3  ;;  %v6114_v29 = vld [vmem:[#allocation18 + $0x6d0] sm:$0xff]  ;;  %v6125_v39 = vld [vmem:[#allocation18 + $0x728] sm:$0xff] }
 0xa47   : > { %9258 = vmatpush1.bf16.msra.mxu0 %v9257_v22  ;;  %9514 = vmatpush1.bf16.msra.mxu1 %v9513_v21  ;;  %v6118_v54 = vld [vmem:[#allocation18 + $0x6f0] sm:$0xff]  ;;  %v6121_v22 = vld [vmem:[#allocation18 + $0x708] sm:$0xff]  ;;  %v6123_v61 = vld [vmem:[#allocation18 + $0x718] sm:$0xff]  ;;  %v9273_v15 = vpack.c.bf16 %v6116_v62, %v6112_v46 }
 0xa48   : > { %6585 = vmatprep.mubr.f32.mxu0 %v13064_v52  ;;  %7037 = vmatprep.mubr.f32.mxu1 %v13064_v52  ;;  %v9523_v52 = vpack.c.bf16 %v6111_v51, %v6107_v56  ;;  %v6127_v40 = vld [vmem:[#allocation18 + $0x738] sm:$0xff]  ;;  %v9529_v27 = vpack.c.bf16 %v6118_v54, %v6114_v29  ;;  %v6120_v21 = vld [vmem:[#allocation18 + $0x700] sm:$0xff]  ;;  %v9275_v49 = vpack.c.bf16 %v6125_v39, %v6121_v22  ;;  %v6122_v47 = vld [vmem:[#allocation18 + $0x710] sm:$0xff] }
 0xa49   : > { %9260 = vmatprep.subr.bf16.mxu0 %v9259_v6  ;;  %9516 = vmatprep.subr.bf16.mxu1 %v9515_v25  ;;  %v6124_v0 = vld [vmem:[#allocation18 + $0x720] sm:$0xff]  ;;  %v9531_v8 = vpack.c.bf16 %v6127_v40, %v6123_v61  ;;  %v6126_v50 = vld [vmem:[#allocation18 + $0x730] sm:$0xff]  ;;  %v6129_v6 = vld [vmem:[#allocation18 + $0x748] sm:$0xff] }
 0xa4a   : > { %v6133_v25 = vld [vmem:[#allocation18 + $0x768] sm:$0xff]  ;;  %v6131_v37 = vld [vmem:[#allocation18 + $0x758] sm:$0xff]  ;;  %v9277_v2 = vpack.c.bf16 %v6124_v0, %v6120_v21  ;;  %v6132_v11 = vld [vmem:[#allocation18 + $0x760] sm:$0xff] }
 0xa4b   : > { %9262 = vmatpush1.bf16.msra.mxu0 %v9261_v44  ;;  %9518 = vmatpush1.bf16.msra.mxu1 %v9517_v30  ;;  %v6135_v1 = vld [vmem:[#allocation18 + $0x778] sm:$0xff]  ;;  %v9533_v44 = vpack.c.bf16 %v6126_v50, %v6122_v47  ;;  %v6128_v30 = vld [vmem:[#allocation18 + $0x740] sm:$0xff]  ;;  %v9279_v23 = vpack.c.bf16 %v6133_v25, %v6129_v6  ;;  %v6134_v7 = vld [vmem:[#allocation18 + $0x770] sm:$0xff] }
 0xa4c   : > { %9264 = vmatprep.subr.bf16.mxu0 %v9263_v13  ;;  %9520 = vmatprep.subr.bf16.mxu1 %v9519_v57  ;;  %v9535_v13 = vpack.c.bf16 %v6135_v1, %v6131_v37  ;;  %v6130_v57 = vld [vmem:[#allocation18 + $0x750] sm:$0xff]  ;;  %v6137_v5 = vld [vmem:[#allocation18 + $0x788] sm:$0xff]  ;;  %v6139_v60 = vld [vmem:[#allocation18 + $0x798] sm:$0xff]  ;;  %v9281_v51 = vpack.c.bf16 %v6132_v11, %v6128_v30 }
 0xa4d   : > { %v6141_v35 = vld [vmem:[#allocation18 + $0x7a8] sm:$0xff]  ;;  %v6143_v56 = vld [vmem:[#allocation18 + $0x7b8] sm:$0xff]  ;;  %v6140_v26 = vld [vmem:[#allocation18 + $0x7a0] sm:$0xff] }
 0xa4e   : > { %v9283_v24 = vpack.c.bf16 %v6141_v35, %v6137_v5  ;;  %v6142_v12 = vld [vmem:[#allocation18 + $0x7b0] sm:$0xff]  ;;  %v6145_v45 = vld [vmem:[#allocation18 + $0x7c8] sm:$0xff]  ;;  %v6147_v14 = vld [vmem:[#allocation18 + $0x7d8] sm:$0xff] }
 0xa4f   : > { %9266 = vmatpush1.bf16.msra.mxu0 %v9265_v19  ;;  %9522 = vmatpush1.bf16.msra.mxu1 %v9521_v41  ;;  %v9537_v19 = vpack.c.bf16 %v6134_v7, %v6130_v57  ;;  %v6136_v41 = vld [vmem:[#allocation18 + $0x780] sm:$0xff]  ;;  %v6149_v4 = vld [vmem:[#allocation18 + $0x7e8] sm:$0xff]  ;;  %v6151_v3 = vld [vmem:[#allocation18 + $0x7f8] sm:$0xff] }
 0xa50   : > { %9268 = vmatprep.subr.bf16.mxu0 %v9267_v16  ;;  %9524 = vmatprep.subr.bf16.mxu1 %v9523_v52  ;;  %v9539_v16 = vpack.c.bf16 %v6143_v56, %v6139_v60  ;;  %v6138_v52 = vld [vmem:[#allocation18 + $0x790] sm:$0xff]  ;;  %v9285_v36 = vpack.c.bf16 %v6140_v26, %v6136_v41  ;;  %v6148_v46 = vld [vmem:[#allocation18 + $0x7e0] sm:$0xff]  ;;  %v9287_v62 = vpack.c.bf16 %v6149_v4, %v6145_v45  ;;  %v6153_v54 = vld [vmem:[#allocation18 + $0x808] sm:$0xff] }
 0xa51   : > { %v6150_v29 = vld [vmem:[#allocation18 + $0x7f0] sm:$0xff]  ;;  %v6157_v22 = vld [vmem:[#allocation18 + $0x828] sm:$0xff]  ;;  %v6155_v39 = vld [vmem:[#allocation18 + $0x818] sm:$0xff] }
 0xa52   : > { %v6159_v61 = vld [vmem:[#allocation18 + $0x838] sm:$0xff]  ;;  %v6152_v0 = vld [vmem:[#allocation18 + $0x800] sm:$0xff]  ;;  %v6158_v47 = vld [vmem:[#allocation18 + $0x830] sm:$0xff] }
 0xa53   : > { %9270 = vmatpush1.bf16.msra.mxu0 %v9269_v34  ;;  %9526 = vmatpush1.bf16.msra.mxu1 %v9525_v55  ;;  %v9541_v34 = vpack.c.bf16 %v6142_v12, %v6138_v52  ;;  %v6144_v55 = vld [vmem:[#allocation18 + $0x7c0] sm:$0xff]  ;;  %v9547_v21 = vpack.c.bf16 %v6159_v61, %v6155_v39  ;;  %v6161_v50 = vld [vmem:[#allocation18 + $0x848] sm:$0xff]  ;;  %v6163_v25 = vld [vmem:[#allocation18 + $0x858] sm:$0xff] }
 0xa54   : > { %9272 = vmatprep.subr.bf16.mxu0 %v9271_v17  ;;  %9528 = vmatprep.subr.bf16.mxu1 %v9527_v43  ;;  %v9543_v17 = vpack.c.bf16 %v6151_v3, %v6147_v14  ;;  %v6146_v43 = vld [vmem:[#allocation18 + $0x7d0] sm:$0xff]  ;;  %v9289_v40 = vpack.c.bf16 %v6148_v46, %v6144_v55  ;;  %v6165_v6 = vld [vmem:[#allocation18 + $0x868] sm:$0xff]  ;;  %v6167_v37 = vld [vmem:[#allocation18 + $0x878] sm:$0xff] }
 0xa55   : > { %v14159_v1 = vld [vmem:[#allocation78_spill] sm:$0xff]  ;;  %v14160_v30 = vld [vmem:[#allocation80_spill] sm:$0xff]  ;;  %v6164_v57 = vld [vmem:[#allocation18 + $0x860] sm:$0xff]  ;;  %v9295_v35 = vpack.c.bf16 %v6165_v6, %v6161_v50  ;;  %v9551_v60 = vpack.c.bf16 %v6167_v37, %v6163_v25 }
 0xa56   : > { %v5390_v11 = vsub.f32 0.0, %v14160_v30  ;;  %v14161_v7 = vld [vmem:[#allocation81_spill] sm:$0xff]  ;;  %v6162_v56 = vld [vmem:[#allocation18 + $0x850] sm:$0xff]  ;;  %v14162_v41 = vld [vmem:[#allocation74_spill] sm:$0xff] }
 0xa57   : > { %9274 = vmatpush1.bf16.msra.mxu0 %v9273_v15  ;;  %9530 = vmatpush1.bf16.msra.mxu1 %v9529_v27  ;;  %v9545_v15 = vpack.c.bf16 %v6150_v29, %v6146_v43  ;;  %v9291_v27 = vpack.c.bf16 %v6157_v22, %v6153_v54  ;;  %v5389_v5 = vsub.f32 0.0, %v14161_v7  ;;  %v5391_v26 = vsub.f32 0.0, %v14162_v41  ;;  %v6175_v52 = vld [vmem:[#allocation18 + $0x8b8] sm:$0xff]  ;;  %v14163_v45 = vld [vmem:[#allocation75_spill] sm:$0xff]  ;;  %v6168_v46 = vld [vmem:[#allocation18 + $0x880] sm:$0xff] }
 0xa58   : > { %9276 = vmatprep.subr.bf16.mxu0 %v9275_v49  ;;  %9532 = vmatprep.subr.bf16.mxu1 %v9531_v8  ;;  %v6156_v49 = vld [vmem:[#allocation18 + $0x820] sm:$0xff]  ;;  %v6154_v8 = vld [vmem:[#allocation18 + $0x810] sm:$0xff]  ;;  %v5396_v4 = vsub.f32 0.0, %v14163_v45  ;;  %v5460_v3 = vmul.f32 1.442695, %v5390_v11  ;;  %v6177_v61 = vld [vmem:[#allocation18 + $0x8c8] sm:$0xff] }
 0xa59   : > { %v6170_v22 = vld [vmem:[#allocation18 + $0x890] sm:$0xff]  ;;  %v6176_v37 = vld [vmem:[#allocation18 + $0x8c0] sm:$0xff] }
 0xa5a   : > { %v6174_v39 = vld [vmem:[#allocation18 + $0x8b0] sm:$0xff] }
 0xa5b   : > { %9278 = vmatpush1.bf16.msra.mxu0 %v9277_v2  ;;  %9534 = vmatpush1.bf16.msra.mxu1 %v9533_v44  ;;  %v5388_v2 = vsub.f32 0.0, %v14159_v1  ;;  %v9293_v44 = vpack.c.bf16 %v6156_v49, %v6152_v0  ;;  %v6183_v0 = vld [vmem:[#allocation18 + $0x8f8] sm:$0xff]  ;;  %v5472_v49 = vmul.f32 1.442695, %v5396_v4  ;;  %v9557_v25 = vpack.c.bf16 %v6174_v39, %v6170_v22 }
 0xa5c   : > { %9280 = vmatprep.subr.bf16.mxu0 %v9279_v23  ;;  %9536 = vmatprep.subr.bf16.mxu1 %v9535_v13  ;;  %v9549_v23 = vpack.c.bf16 %v6158_v47, %v6154_v8  ;;  %v6160_v13 = vld [vmem:[#allocation18 + $0x840] sm:$0xff]  ;;  %v14167_v8 = vld [vmem:[#allocation103_spill] sm:$0xff] }
 0xa5d   : > { %v5456_v12 = vmul.f32 1.442695, %v5388_v2  ;;  %v9297_v14 = vpack.c.bf16 %v6164_v57, %v6160_v13  ;;  %v5404_v47 = vsub.f32 0.0, %v14167_v8  ;;  %v6180_v2 = vld [vmem:[#allocation18 + $0x8e0] sm:$0xff]  ;;  %v6182_v13 = vld [vmem:[#allocation18 + $0x8f0] sm:$0xff]  ;;  %v6185_v57 = vld [vmem:[#allocation18 + $0x908] sm:$0xff] }
 0xa5f   : > { %9282 = vmatpush1.bf16.msra.mxu0 %v9281_v51  ;;  %9538 = vmatpush1.bf16.msra.mxu1 %v9537_v19  ;;  %v6166_v51 = vld [vmem:[#allocation18 + $0x870] sm:$0xff]  ;;  %v6169_v19 = vld [vmem:[#allocation18 + $0x888] sm:$0xff]  ;;  %10266 = vpow2.f32 %v5456_v12 }
 0xa60   : > { %9284 = vmatprep.subr.bf16.mxu0 %v9283_v24  ;;  %9540 = vmatprep.subr.bf16.mxu1 %v9539_v16  ;;  %v6173_v24 = vld [vmem:[#allocation18 + $0x8a8] sm:$0xff]  ;;  %v6171_v16 = vld [vmem:[#allocation18 + $0x898] sm:$0xff]  ;;  %v9553_v55 = vpack.c.bf16 %v6166_v51, %v6162_v56  ;;  %10268 = vpow2.f32 %v5460_v3  ;;  %v5488_v56 = vmul.f32 1.442695, %v5404_v47  ;;  %v9305_v51 = vpack.c.bf16 %v6180_v2, %v6176_v37  ;;  %v6186_v3 = vld [vmem:[#allocation18 + $0x910] sm:$0xff] }
 0xa61   : > { %v9299_v29 = vpack.c.bf16 %v6173_v24, %v6169_v19  ;;  %v9555_v54 = vpack.c.bf16 %v6175_v52, %v6171_v16  ;;  %v14168_v19 = vld [vmem:[#allocation104_spill] sm:$0xff]  ;;  %v6184_v16 = vld [vmem:[#allocation18 + $0x900] sm:$0xff]  ;;  %v6198_v47 = vld [vmem:[#allocation18 + $0x970] sm:$0xff] }
 0xa62   : > { %v6188_v52 = vld [vmem:[#allocation18 + $0x920] sm:$0xff]  ;;  %v6203_v37 = vld [vmem:[#allocation18 + $0x998] sm:$0xff] }
 0xa63   : > { %9286 = vmatpush1.bf16.msra.mxu0 %v9285_v36  ;;  %9542 = vmatpush1.bf16.msra.mxu1 %v9541_v34  ;;  %v14164_v36 = vld [vmem:[#allocation76_spill] sm:$0xff]  ;;  %v9309_v22 = vpack.c.bf16 %v6188_v52, %v6184_v16 }
 0xa64   : > { %9288 = vmatprep.subr.bf16.mxu0 %v9287_v62  ;;  %9544 = vmatprep.subr.bf16.mxu1 %v9543_v17  ;;  %v5398_v34 = vsub.f32 0.0, %v14164_v36  ;;  %v6172_v62 = vld [vmem:[#allocation18 + $0x8a0] sm:$0xff]  ;;  %v14165_v17 = vld [vmem:[#allocation79_spill] sm:$0xff]  ;;  %v6207_v2 = vld [vmem:[#allocation18 + $0x9b8] sm:$0xff] }
 0xa65   : > { %v5397_v43 = vsub.f32 0.0, %v14165_v17  ;;  %v9301_v50 = vpack.c.bf16 %v6172_v62, %v6168_v46  ;;  %v14170_v46 = vld [vmem:[#allocation106_spill] sm:$0xff] }
 0xa66   : > { %v5476_v6 = vmul.f32 1.442695, %v5398_v34  ;;  %v6190_v34 = vld [vmem:[#allocation18 + $0x930] sm:$0xff]  ;;  %v5407_v62 = vsub.f32 0.0, %v14170_v46 }
 0xa67   : > { %9290 = vmatpush1.bf16.msra.mxu0 %v9289_v40  ;;  %9546 = vmatpush1.bf16.msra.mxu1 %v9545_v15  ;;  %v5462_v40 = vmul.f32 1.442695, %v5391_v26  ;;  %v14166_v15 = vld [vmem:[#allocation82_spill] sm:$0xff]  ;;  %v5406_v26 = vsub.f32 0.0, %v14168_v19 }
 0xa68   : > { %9292 = vmatprep.subr.bf16.mxu0 %v9291_v27  ;;  %9548 = vmatprep.subr.bf16.mxu1 %v9547_v21  ;;  %v5399_v27 = vsub.f32 0.0, %v14166_v15  ;;  %v6179_v21 = vld [vmem:[#allocation18 + $0x8d8] sm:$0xff] }
 0xa69   : > { %v9559_v11 = vpack.c.bf16 %v6183_v0, %v6179_v21  ;;  %v5492_v39 = vmul.f32 1.442695, %v5406_v26  ;;  %v6206_v26 = vld [vmem:[#allocation18 + $0x9b0] sm:$0xff] }
 0xa6a   : > { %6586 = vmatmul.mubr.f32.vlgmr.msra.gmra.mrb[64].mxu0 %v13054_v33  ;;  %7038 = vmatmul.mubr.f32.vlgmr.msra.gmra.mrb[64].mxu1 %v13054_v33  ;;  %v5458_v33 = vmul.f32 1.442695, %v5389_v5  ;;  %v5478_v5 = vmul.f32 1.442695, %v5399_v27  ;;  %v6196_v27 = vld [vmem:[#allocation18 + $0x960] sm:$0xff] }
 0xa6b   : > { %6591 = vmatprep.mubr.f32.mxu0 %v13098_v42  ;;  %9294 = vmatpush1.bf16.msra.mxu0 %v9293_v44 }
 0xa6c   : > { %7043 = vmatprep.mubr.f32.mxu1 %v13098_v42  ;;  %9550 = vmatpush1.bf16.msra.mxu1 %v9549_v23  ;;  %v6181_v42 = vld [vmem:[#allocation18 + $0x8e8] sm:$0xff]  ;;  %10270 = vpow2.f32 %v5458_v33  ;;  %v6178_v23 = vld [vmem:[#allocation18 + $0x8d0] sm:$0xff]  ;;  %v6195_v33 = vld [vmem:[#allocation18 + $0x958] sm:$0xff] }
 0xa6d   : > { %9296 = vmatprep.subr.bf16.mxu0 %v9295_v35  ;;  %9552 = vmatprep.subr.bf16.mxu1 %v9551_v60  ;;  %v9303_v44 = vpack.c.bf16 %v6181_v42, %v6177_v61  ;;  %10272 = vpow2.f32 %v5462_v40  ;;  %v6187_v35 = vld [vmem:[#allocation18 + $0x918] sm:$0xff]  ;;  %v9561_v24 = vpack.c.bf16 %v6182_v13, %v6178_v23  ;;  %v9565_v61 = vpack.c.bf16 %v6190_v34, %v6186_v3  ;;  %v6192_v40 = vld [vmem:[#allocation18 + $0x940] sm:$0xff]  ;;  %v10267_v42 = vpop.eup %10266 }
 0xa6e   : > { %6592 = vmatmul.mubr.f32.gmra.mrb[66].mxu0 %v13089_v59  ;;  %7044 = vmatmul.mubr.f32.gmra.mrb[66].mxu1 %v13089_v59  ;;  %v5474_v59 = vmul.f32 1.442695, %v5397_v43  ;;  %v6191_v60 = vld [vmem:[#allocation18 + $0x938] sm:$0xff]  ;;  %10274 = vpow2.f32 %v5472_v49  ;;  %v6194_v49 = vld [vmem:[#allocation18 + $0x950] sm:$0xff]  ;;  %v5580_v13 = vadd.f32 1.0, %v10267_v42 }
 0xa6f   : > { %6597 = vmatprep.mubr.f32.mxu0 %v13131_v48  ;;  %9298 = vmatpush1.bf16.msra.mxu0 %v9297_v14  ;;  %10276 = vpow2.f32 %v5476_v6  ;;  %v9563_v14 = vpack.c.bf16 %v6191_v60, %v6187_v35  ;;  %v6199_v43 = vld [vmem:[#allocation18 + $0x978] sm:$0xff]  ;;  %v10269_v6 = vpop.eup %10268 }
 0xa70   : > { %7049 = vmatprep.mubr.f32.mxu1 %v13131_v48  ;;  %9554 = vmatpush1.bf16.msra.mxu1 %v9553_v55  ;;  %v6189_v48 = vld [vmem:[#allocation18 + $0x928] sm:$0xff]  ;;  %10278 = vpow2.f32 %v5474_v59  ;;  %v9567_v0 = vpack.c.bf16 %v6199_v43, %v6195_v33  ;;  %v6215_v3 = vld [vmem:[#allocation18 + $0x9f8] sm:$0xff]  ;;  %v14173_v43 = vld [vmem:[#allocation109_spill] sm:$0xff] }
 0xa71   : > { %9300 = vmatprep.subr.bf16.mxu0 %v9299_v29  ;;  %9556 = vmatprep.subr.bf16.mxu1 %v9555_v54  ;;  %v9307_v4 = vpack.c.bf16 %v6189_v48, %v6185_v57  ;;  %v6193_v55 = vld [vmem:[#allocation18 + $0x948] sm:$0xff]  ;;  %10280 = vpow2.f32 %v5478_v5  ;;  %v14171_v29 = vld [vmem:[#allocation107_spill] sm:$0xff]  ;;  %v9569_v57 = vpack.c.bf16 %v6198_v47, %v6194_v49  ;;  %v6200_v5 = vld [vmem:[#allocation18 + $0x980] sm:$0xff] }
 0xa72   : > { %6598 = vmatmul.mubr.f32.gmra.mrb[68].mxu0 %v13121_v10  ;;  %7050 = vmatmul.mubr.f32.gmra.mrb[68].mxu1 %v13121_v10  ;;  %v14169_v10 = vld [vmem:[#allocation105_spill] sm:$0xff]  ;;  %10282 = vpow2.f32 %v5488_v56  ;;  %v5412_v54 = vsub.f32 0.0, %v14171_v29  ;;  %v9571_v56 = vpack.c.bf16 %v6207_v2, %v6203_v37  ;;  %v6221_v49 = vld [vmem:[#allocation18 + $0xa28] sm:$0xff]  ;;  %v14175_v2 = vld [vmem:[#allocation111_spill] sm:$0xff] }
 0xa73   : > { %6603 = vmatprep.mubr.f32.mxu0 %v13156_v20  ;;  %9302 = vmatpush1.bf16.msra.mxu0 %v9301_v50  ;;  %v5405_v12 = vsub.f32 0.0, %v14169_v10  ;;  %v6201_v50 = vld [vmem:[#allocation18 + $0x988] sm:$0xff]  ;;  %10284 = vpow2.f32 %v5492_v39  ;;  %v6204_v48 = vld [vmem:[#allocation18 + $0x9a0] sm:$0xff] }
 0xa74   : > { %7055 = vmatprep.mubr.f32.mxu1 %v13156_v20  ;;  %9558 = vmatpush1.bf16.msra.mxu1 %v9557_v25  ;;  %v6197_v20 = vld [vmem:[#allocation18 + $0x968] sm:$0xff]  ;;  %v5494_v25 = vmul.f32 1.442695, %v5407_v62  ;;  %v9317_v62 = vpack.c.bf16 %v6204_v48, %v6200_v5  ;;  %v6212_v39 = vld [vmem:[#allocation18 + $0x9e0] sm:$0xff] }
 0xa75   : > { %9304 = vmatprep.subr.bf16.mxu0 %v9303_v44  ;;  %9560 = vmatprep.subr.bf16.mxu1 %v9559_v11  ;;  %v5490_v21 = vmul.f32 1.442695, %v5405_v12  ;;  %v5504_v44 = vmul.f32 1.442695, %v5412_v54  ;;  %v9313_v11 = vpack.c.bf16 %v6196_v27, %v6192_v40  ;;  %v14172_v12 = vld [vmem:[#allocation108_spill] sm:$0xff]  ;;  %v5413_v54 = vsub.f32 0.0, %v14173_v43 }
 0xa76   : > { %6604 = vmatmul.mubr.f32.gmra.mrb[70].mxu0 %v13148_v18  ;;  %7056 = vmatmul.mubr.f32.gmra.mrb[70].mxu1 %v13148_v18  ;;  %v9311_v18 = vpack.c.bf16 %v6197_v20, %v6193_v55  ;;  %v10271_v59 = vpop.eup %10270  ;;  %v6220_v5 = vld [vmem:[#allocation18 + $0xa20] sm:$0xff] }
 0xa77   : > { %6609 = vmatprep.mubr.f32.mxu0 %v13177_v63  ;;  %9306 = vmatpush1.bf16.msra.mxu0 %v9305_v51  ;;  %v10273_v23 = vpop.eup %10272  ;;  %10286 = vpow2.f32 %v5490_v21  ;;  %v6202_v51 = vld [vmem:[#allocation18 + $0x990] sm:$0xff]  ;;  %v5581_v52 = vadd.f32 1.0, %v10271_v59  ;;  %v5420_v59 = vsub.f32 0.0, %v14175_v2  ;;  %v5506_v48 = vmul.f32 1.442695, %v5413_v54 }
 0xa78   : > { %7061 = vmatprep.mubr.f32.mxu1 %v13177_v63  ;;  %9562 = vmatpush1.bf16.msra.mxu1 %v9561_v24  ;;  %v6205_v63 = vld [vmem:[#allocation18 + $0x9a8] sm:$0xff]  ;;  %v10275_v35 = vpop.eup %10274  ;;  %10288 = vpow2.f32 %v5494_v25  ;;  %v5583_v55 = vadd.f32 1.0, %v10273_v23  ;;  %v6219_v25 = vld [vmem:[#allocation18 + $0xa18] sm:$0xff]  ;;  %v6278_v2 = vld [vmem:[#allocation18 + $0xbf0] sm:$0xff] }
 0xa79   : > { %9308 = vmatprep.subr.bf16.mxu0 %v9307_v4  ;;  %9564 = vmatprep.subr.bf16.mxu1 %v9563_v14  ;;  %v9315_v60 = vpack.c.bf16 %v6205_v63, %v6201_v50  ;;  %v6209_v24 = vld [vmem:[#allocation18 + $0x9c8] sm:$0xff]  ;;  %v10277_v16 = vpop.eup %10276  ;;  %v5414_v4 = vsub.f32 0.0, %v14172_v12  ;;  %v6211_v14 = vld [vmem:[#allocation18 + $0x9d8] sm:$0xff]  ;;  %10290 = vpow2.f32 %v5504_v44  ;;  %v5588_v33 = vadd.f32 1.0, %v10275_v35 }
 0xa7a   : > { %6610 = vmatmul.mubr.f32.gmra.mrb[72].mxu0 %v13171_v31  ;;  %7062 = vmatmul.mubr.f32.gmra.mrb[72].mxu1 %v13171_v31  ;;  %v5582_v31 = vadd.f32 1.0, %v10269_v6  ;;  %v10279_v34 = vpop.eup %10278  ;;  %10292 = vrcp.f32 %v5580_v13  ;;  %v5590_v27 = vadd.f32 1.0, %v10277_v16  ;;  %v9575_v21 = vpack.c.bf16 %v6215_v3, %v6211_v14  ;;  %v14174_v6 = vld [vmem:[#allocation110_spill] sm:$0xff]  ;;  %v6223_v63 = vld [vmem:[#allocation18 + $0xa38] sm:$0xff]  ;;  %v14177_v14 = vld [vmem:[#allocation113_spill] sm:$0xff] }
 0xa7b   : > { %6615 = vmatprep.mubr.f32.mxu0 %v13191_v53  ;;  %9310 = vmatpush1.bf16.msra.mxu0 %v9309_v22  ;;  %v10281_v20 = vpop.eup %10280  ;;  %v9573_v22 = vpack.c.bf16 %v6206_v26, %v6202_v51  ;;  %v5589_v47 = vadd.f32 1.0, %v10279_v34  ;;  %v5508_v50 = vmul.f32 1.442695, %v5414_v4  ;;  %v9579_v35 = vpack.c.bf16 %v6223_v63, %v6219_v25  ;;  %v6239_v25 = vld [vmem:[#allocation18 + $0xab8] sm:$0xff] }
 0xa7c   : > { %7067 = vmatprep.mubr.f32.mxu1 %v13191_v53  ;;  %9566 = vmatpush1.bf16.msra.mxu1 %v9565_v61  ;;  %v6213_v53 = vld [vmem:[#allocation18 + $0x9e8] sm:$0xff]  ;;  %v6210_v61 = vld [vmem:[#allocation18 + $0x9d0] sm:$0xff]  ;;  %v10283_v40 = vpop.eup %10282  ;;  %10294 = vrcp.f32 %v5582_v31  ;;  %v5591_v37 = vadd.f32 1.0, %v10281_v20  ;;  %v5421_v3 = vsub.f32 0.0, %v14177_v14  ;;  %v6276_v14 = vld [vmem:[#allocation18 + $0xbe0] sm:$0xff] }
 0xa7d   : > { %9312 = vmatprep.subr.bf16.mxu0 %v9311_v18  ;;  %9568 = vmatprep.subr.bf16.mxu1 %v9567_v0  ;;  %v9319_v42 = vpack.c.bf16 %v6213_v53, %v6209_v24  ;;  %v6214_v18 = vld [vmem:[#allocation18 + $0x9f0] sm:$0xff]  ;;  %v6217_v0 = vld [vmem:[#allocation18 + $0xa08] sm:$0xff]  ;;  %10296 = vrcp.f32 %v5581_v52  ;;  %v10285_v51 = vpop.eup %10284  ;;  %v14176_v24 = vld [vmem:[#allocation112_spill] sm:$0xff]  ;;  %v5520_v53 = vmul.f32 1.442695, %v5420_v59 }
 0xa7e   : > { %6616 = vmatmul.mubr.f32.gmra.mrb[74].mxu0 %v13187_v58  ;;  %7068 = vmatmul.mubr.f32.gmra.mrb[74].mxu1 %v13187_v58  ;;  %v6208_v58 = vld [vmem:[#allocation18 + $0x9c0] sm:$0xff]  ;;  %10298 = vrcp.f32 %v5583_v55  ;;  %v9577_v23 = vpack.c.bf16 %v6214_v18, %v6210_v61  ;;  %v9323_v13 = vpack.c.bf16 %v6221_v49, %v6217_v0  ;;  %v6222_v31 = vld [vmem:[#allocation18 + $0xa30] sm:$0xff]  ;;  %v5422_v16 = vsub.f32 0.0, %v14176_v24  ;;  %v6231_v52 = vld [vmem:[#allocation18 + $0xa78] sm:$0xff] }
 0xa7f   : > { %6621 = vmatprep.mubr.f32.mxu0 %v13200_v38  ;;  %9314 = vmatpush1.bf16.msra.mxu0 %v9313_v11  ;;  %v9321_v44 = vpack.c.bf16 %v6212_v39, %v6208_v58  ;;  %10300 = vrcp.f32 %v5588_v33  ;;  %v5596_v11 = vadd.f32 1.0, %v10283_v40  ;;  %v6228_v58 = vld [vmem:[#allocation18 + $0xa60] sm:$0xff]  ;;  %v5598_v61 = vadd.f32 1.0, %v10285_v51  ;;  %v14179_v49 = vld [vmem:[#allocation115_spill] sm:$0xff] }
 0xa80   : > { %7073 = vmatprep.mubr.f32.mxu1 %v13200_v38  ;;  %9570 = vmatpush1.bf16.msra.mxu1 %v9569_v57  ;;  %v5415_v38 = vsub.f32 0.0, %v14174_v6  ;;  %v6216_v57 = vld [vmem:[#allocation18 + $0xa00] sm:$0xff]  ;;  %10302 = vrcp.f32 %v5590_v27  ;;  %v6230_v27 = vld [vmem:[#allocation18 + $0xa70] sm:$0xff]  ;;  %v5522_v59 = vmul.f32 1.442695, %v5421_v3  ;;  %v6243_v3 = vld [vmem:[#allocation18 + $0xad8] sm:$0xff] }
 0xa81   : > { %9316 = vmatprep.subr.bf16.mxu0 %v9315_v60  ;;  %9572 = vmatprep.subr.bf16.mxu1 %v9571_v56  ;;  %v6225_v60 = vld [vmem:[#allocation18 + $0xa48] sm:$0xff]  ;;  %10304 = vrcp.f32 %v5589_v47  ;;  %v10287_v4 = vpop.eup %10286  ;;  %v9325_v34 = vpack.c.bf16 %v6220_v5, %v6216_v57  ;;  %v5428_v47 = vsub.f32 0.0, %v14179_v49  ;;  %v6232_v57 = vld [vmem:[#allocation18 + $0xa80] sm:$0xff]  ;;  %v6238_v51 = vld [vmem:[#allocation18 + $0xab0] sm:$0xff] }
 0xa82   : > { %6622 = vmatmul.mubr.f32.gmra.mrb[76].mxu0 %v13198_v28  ;;  %7074 = vmatmul.mubr.f32.gmra.mrb[76].mxu1 %v13198_v28  ;;  %v6218_v28 = vld [vmem:[#allocation18 + $0xa10] sm:$0xff]  ;;  %v6229_v56 = vld [vmem:[#allocation18 + $0xa68] sm:$0xff]  ;;  %v5510_v26 = vmul.f32 1.442695, %v5415_v38  ;;  %10306 = vrcp.f32 %v5591_v37  ;;  %v10289_v55 = vpop.eup %10288  ;;  %v5597_v0 = vadd.f32 1.0, %v10287_v4  ;;  %v6235_v38 = vld [vmem:[#allocation18 + $0xa98] sm:$0xff] }
 0xa83   : > { %6627 = vmatprep.mubr.f32.mxu0 %v13207_v9  ;;  %9318 = vmatpush1.bf16.msra.mxu0 %v9317_v62  ;;  %10308 = vrcp.f32 %v5596_v11  ;;  %v14178_v62 = vld [vmem:[#allocation114_spill] sm:$0xff]  ;;  %v9581_v33 = vpack.c.bf16 %v6222_v31, %v6218_v28  ;;  %v9327_v54 = vpack.c.bf16 %v6229_v56, %v6225_v60  ;;  %v10291_v39 = vpop.eup %10290  ;;  %v5524_v37 = vmul.f32 1.442695, %v5422_v16  ;;  %v6236_v5 = vld [vmem:[#allocation18 + $0xaa0] sm:$0xff]  ;;  %v6234_v28 = vld [vmem:[#allocation18 + $0xa90] sm:$0xff] }
 0xa84   : > { %7079 = vmatprep.mubr.f32.mxu1 %v13207_v9  ;;  %9574 = vmatpush1.bf16.msra.mxu1 %v9573_v22  ;;  %v6227_v9 = vld [vmem:[#allocation18 + $0xa58] sm:$0xff]  ;;  %v5423_v20 = vsub.f32 0.0, %v14178_v62  ;;  %v6224_v22 = vld [vmem:[#allocation18 + $0xa40] sm:$0xff]  ;;  %10310 = vpow2.f32 %v5508_v50  ;;  %v13261_v18 = vpop.eup %10292  ;;  %v9587_v56 = vpack.c.bf16 %v6239_v25, %v6235_v38  ;;  %v6245_v16 = vld [vmem:[#allocation18 + $0xae8] sm:$0xff] }
 0xa85   : > { %9320 = vmatprep.subr.bf16.mxu0 %v9319_v42  ;;  %9576 = vmatprep.subr.bf16.mxu1 %v9575_v21  ;;  %v9583_v40 = vpack.c.bf16 %v6231_v52, %v6227_v9  ;;  %v6233_v42 = vld [vmem:[#allocation18 + $0xa88] sm:$0xff]  ;;  %10312 = vpow2.f32 %v5506_v48  ;;  %v9329_v50 = vpack.c.bf16 %v6228_v58, %v6224_v22  ;;  %v14180_v31 = vld [vmem:[#allocation116_spill] sm:$0xff]  ;;  %v5536_v52 = vmul.f32 1.442695, %v5428_v47  ;;  %v14181_v4 = vld [vmem:[#allocation117_spill] sm:$0xff] }
 0xa86   : > { %6628 = vmatmul.mubr.f32.gmra.mrb[78].mxu0 %v13205_v32  ;;  %7080 = vmatmul.mubr.f32.gmra.mrb[78].mxu1 %v13205_v32  ;;  %v6226_v32 = vld [vmem:[#allocation18 + $0xa50] sm:$0xff]  ;;  %v6237_v21 = vld [vmem:[#allocation18 + $0xaa8] sm:$0xff]  ;;  %v13264_v63 = vpop.eup %10294  ;;  %10314 = vpow2.f32 %v5510_v26  ;;  %v5526_v11 = vmul.f32 1.442695, %v5423_v20  ;;  %v5430_v60 = vsub.f32 0.0, %v14180_v31  ;;  %v9333_v22 = vpack.c.bf16 %v6236_v5, %v6232_v57  ;;  %v14184_v38 = vld [vmem:[#allocation120_spill] sm:$0xff] }
 0xa87   : > { %9322 = vmatpush1.bf16.msra.mxu0 %v9321_v44  ;;  %v13266_v44 = vpop.eup %10296  ;;  %10316 = vpow2.f32 %v5520_v53  ;;  %v6241_v26 = vld [vmem:[#allocation18 + $0xac8] sm:$0xff]  ;;  %v5429_v53 = vsub.f32 0.0, %v14181_v4  ;;  %v5438_v25 = vsub.f32 0.0, %v14184_v38  ;;  %v6252_v38 = vld [vmem:[#allocation18 + $0xb20] sm:$0xff]  ;;  %v6254_v4 = vld [vmem:[#allocation18 + $0xb30] sm:$0xff] }
 0xa88   : > { %9578 = vmatpush1.bf16.msra.mxu1 %v9577_v23  ;;  %9324 = vmatprep.subr.bf16.mxu0 %v9323_v13  ;;  %v9585_v23 = vpack.c.bf16 %v6230_v27, %v6226_v32  ;;  %v9331_v13 = vpack.c.bf16 %v6237_v21, %v6233_v42  ;;  %v13268_v48 = vpop.eup %10298  ;;  %10318 = vrcp.f32 %v5598_v61  ;;  %v14183_v32 = vld [vmem:[#allocation119_spill] sm:$0xff]  ;;  %v9335_v27 = vpack.c.bf16 %v6245_v16, %v6241_v26  ;;  %v6240_v42 = vld [vmem:[#allocation18 + $0xac0] sm:$0xff]  ;;  %v6249_v57 = vld [vmem:[#allocation18 + $0xb08] sm:$0xff] }
 0xa89   : > { %9580 = vmatprep.subr.bf16.mxu1 %v9579_v35  ;;  %v5599_v35 = vadd.f32 1.0, %v10289_v55  ;;  %v13271_v9 = vpop.eup %10300  ;;  %10320 = vrcp.f32 %v5597_v0  ;;  %v14182_v55 = vld [vmem:[#allocation118_spill] sm:$0xff]  ;;  %v5436_v61 = vsub.f32 0.0, %v14183_v32  ;;  %v6244_v21 = vld [vmem:[#allocation18 + $0xae0] sm:$0xff]  ;;  %v6242_v0 = vld [vmem:[#allocation18 + $0xad0] sm:$0xff] }
 0xa8a   : > { %v13274_v20 = vpop.eup %10302  ;;  %10322 = vpow2.f32 %v5524_v37  ;;  %v9337_v16 = vpack.c.bf16 %v6244_v21, %v6240_v42  ;;  %v6250_v32 = vld [vmem:[#allocation18 + $0xb10] sm:$0xff] }
 0xa8b   : > { %9326 = vmatpush1.bf16.msra.mxu0 %v9325_v34  ;;  %v6247_v34 = vld [vmem:[#allocation18 + $0xaf8] sm:$0xff]  ;;  %v13277_v58 = vpop.eup %10304  ;;  %10324 = vpow2.f32 %v5522_v59  ;;  %v6253_v59 = vld [vmem:[#allocation18 + $0xb28] sm:$0xff] }
 0xa8c   : > { %9582 = vmatpush1.bf16.msra.mxu1 %v9581_v33  ;;  %9328 = vmatprep.subr.bf16.mxu0 %v9327_v54  ;;  %v5604_v33 = vadd.f32 1.0, %v10291_v39  ;;  %v5431_v54 = vsub.f32 0.0, %v14182_v55  ;;  %v13280_v47 = vpop.eup %10306  ;;  %10326 = vrcp.f32 %v5599_v35  ;;  %v5540_v39 = vmul.f32 1.442695, %v5430_v60 }
 0xa8d   : > { %9584 = vmatprep.subr.bf16.mxu1 %v9583_v40  ;;  %v9589_v40 = vpack.c.bf16 %v6238_v51, %v6234_v28  ;;  %v9591_v37 = vpack.c.bf16 %v6247_v34, %v6243_v3  ;;  %v13283_v5 = vpop.eup %10308  ;;  %10328 = vpow2.f32 %v5526_v11  ;;  %v6255_v28 = vld [vmem:[#allocation18 + $0xb38] sm:$0xff]  ;;  %v5552_v60 = vmul.f32 1.442695, %v5436_v61  ;;  %v6248_v34 = vld [vmem:[#allocation18 + $0xb00] sm:$0xff] }
 0xa8e   : > { %v10311_v51 = vpop.eup %10310  ;;  %10330 = vrcp.f32 %v5604_v33  ;;  %v5542_v26 = vmul.f32 1.442695, %v5431_v54  ;;  %v9339_v3 = vpack.c.bf16 %v6253_v59, %v6249_v57  ;;  %v5556_v11 = vmul.f32 1.442695, %v5438_v25  ;;  %v6257_v33 = vld [vmem:[#allocation18 + $0xb48] sm:$0xff] }
 0xa8f   : > { %9330 = vmatpush1.bf16.msra.mxu0 %v9329_v50  ;;  %v6246_v50 = vld [vmem:[#allocation18 + $0xaf0] sm:$0xff]  ;;  %v10313_v35 = vpop.eup %10312  ;;  %10332 = vpow2.f32 %v5536_v52  ;;  %v6261_v54 = vld [vmem:[#allocation18 + $0xb68] sm:$0xff]  ;;  %v5606_v42 = vadd.f32 1.0, %v10311_v51  ;;  %v14185_v52 = vld [vmem:[#allocation121_spill] sm:$0xff]  ;;  %v9597_v59 = vpack.c.bf16 %v6254_v4, %v6250_v32 }
 0xa90   : > { %9586 = vmatpush1.bf16.msra.mxu1 %v9585_v23  ;;  %9332 = vmatprep.subr.bf16.mxu0 %v9331_v13  ;;  %v5538_v23 = vmul.f32 1.442695, %v5429_v53  ;;  %v6251_v13 = vld [vmem:[#allocation18 + $0xb18] sm:$0xff]  ;;  %v10315_v55 = vpop.eup %10314  ;;  %10334 = vpow2.f32 %v5540_v39  ;;  %v5437_v61 = vsub.f32 0.0, %v14185_v52  ;;  %v9341_v39 = vpack.c.bf16 %v6252_v38, %v6248_v34  ;;  %v6258_v51 = vld [vmem:[#allocation18 + $0xb50] sm:$0xff] }
 0xa91   : > { %9588 = vmatprep.subr.bf16.mxu1 %v9587_v56  ;;  %v9593_v56 = vpack.c.bf16 %v6246_v50, %v6242_v0  ;;  %v9595_v53 = vpack.c.bf16 %v6255_v28, %v6251_v13  ;;  %v5605_v0 = vadd.f32 1.0, %v10313_v35  ;;  %v14186_v50 = vld [vmem:[#allocation122_spill] sm:$0xff]  ;;  %v6256_v13 = vld [vmem:[#allocation18 + $0xb40] sm:$0xff]  ;;  %v6262_v35 = vld [vmem:[#allocation18 + $0xb70] sm:$0xff] }
 0xa92   : > { %10336 = vpow2.f32 %v5538_v23  ;;  %v5439_v57 = vsub.f32 0.0, %v14186_v50  ;;  %v9343_v23 = vpack.c.bf16 %v6261_v54, %v6257_v33  ;;  %v6260_v28 = vld [vmem:[#allocation18 + $0xb60] sm:$0xff]  ;;  %v6265_v50 = vld [vmem:[#allocation18 + $0xb88] sm:$0xff]  ;;  %v5554_v34 = vmul.f32 1.442695, %v5437_v61  ;;  %v14188_v33 = vld [vmem:[#allocation124_spill] sm:$0xff] }
 0xa93   : > { %9334 = vmatpush1.bf16.msra.mxu0 %v9333_v22  ;;  %v10317_v22 = vpop.eup %10316  ;;  %10338 = vpow2.f32 %v5542_v26  ;;  %v5446_v54 = vsub.f32 0.0, %v14188_v33  ;;  %v6264_v61 = vld [vmem:[#allocation18 + $0xb80] sm:$0xff] }
 0xa94   : > { %9590 = vmatpush1.bf16.msra.mxu1 %v9589_v40  ;;  %9336 = vmatprep.subr.bf16.mxu0 %v9335_v27  ;;  %v6259_v40 = vld [vmem:[#allocation18 + $0xb58] sm:$0xff]  ;;  %v13286_v21 = vpop.eup %10318  ;;  %10340 = vpow2.f32 %v5552_v60  ;;  %v5612_v31 = vadd.f32 1.0, %v10317_v22  ;;  %v5558_v32 = vmul.f32 1.442695, %v5439_v57 }
 0xa95   : > { %9592 = vmatprep.subr.bf16.mxu1 %v9591_v37  ;;  %v6263_v27 = vld [vmem:[#allocation18 + $0xb78] sm:$0xff]  ;;  %v13289_v25 = vpop.eup %10320  ;;  %v5607_v37 = vadd.f32 1.0, %v10315_v55  ;;  %10342 = vpow2.f32 %v5556_v11  ;;  %v14187_v55 = vld [vmem:[#allocation123_spill] sm:$0xff]  ;;  %v9345_v11 = vpack.c.bf16 %v6260_v28, %v6256_v13  ;;  %v6273_v13 = vld [vmem:[#allocation18 + $0xbc8] sm:$0xff] }
 0xa96   : > { %v10323_v52 = vpop.eup %10322  ;;  %v9599_v26 = vpack.c.bf16 %v6263_v27, %v6259_v40  ;;  %10344 = vrcp.f32 %v5606_v42  ;;  %v5444_v60 = vsub.f32 0.0, %v14187_v55  ;;  %v9601_v40 = vpack.c.bf16 %v6262_v35, %v6258_v51  ;;  %v6268_v27 = vld [vmem:[#allocation18 + $0xba0] sm:$0xff]  ;;  %v6266_v55 = vld [vmem:[#allocation18 + $0xb90] sm:$0xff]  ;;  %v6277_v28 = vld [vmem:[#allocation18 + $0xbe8] sm:$0xff] }
 0xa97   : > { %9338 = vmatpush1.bf16.msra.mxu0 %v9337_v16  ;;  %v6269_v16 = vld [vmem:[#allocation18 + $0xba8] sm:$0xff]  ;;  %v10325_v38 = vpop.eup %10324  ;;  %10346 = vrcp.f32 %v5605_v0  ;;  %v5614_v22 = vadd.f32 1.0, %v10323_v52  ;;  %v14189_v0 = vld [vmem:[#allocation125_spill] sm:$0xff]  ;;  %v6279_v51 = vld [vmem:[#allocation18 + $0xbf8] sm:$0xff] }
 0xa98   : > { %9594 = vmatpush1.bf16.msra.mxu1 %v9593_v56  ;;  %9340 = vmatprep.subr.bf16.mxu0 %v9339_v3  ;;  %v6267_v56 = vld [vmem:[#allocation18 + $0xb98] sm:$0xff]  ;;  %v13292_v4 = vpop.eup %10326  ;;  %10348 = vrcp.f32 %v5607_v37  ;;  %v9347_v42 = vpack.c.bf16 %v6269_v16, %v6265_v50  ;;  %v5613_v62 = vadd.f32 1.0, %v10325_v38  ;;  %v5445_v57 = vsub.f32 0.0, %v14189_v0 }
 0xa99   : > { %9596 = vmatprep.subr.bf16.mxu1 %v9595_v53  ;;  %v6271_v3 = vld [vmem:[#allocation18 + $0xbb8] sm:$0xff]  ;;  %v10329_v53 = vpop.eup %10328  ;;  %10350 = vrcp.f32 %v5612_v31  ;;  %v5568_v52 = vmul.f32 1.442695, %v5444_v60  ;;  %v9349_v31 = vpack.c.bf16 %v6268_v27, %v6264_v61  ;;  %v5572_v0 = vmul.f32 1.442695, %v5446_v54 }
 0xa9a   : > { %v13295_v49 = vpop.eup %10330  ;;  %v9603_v33 = vpack.c.bf16 %v6271_v3, %v6267_v56  ;;  %10352 = vpow2.f32 %v5554_v34  ;;  %v6275_v50 = vld [vmem:[#allocation18 + $0xbd8] sm:$0xff]  ;;  %v5615_v16 = vadd.f32 1.0, %v10329_v53  ;;  %v9351_v56 = vpack.c.bf16 %v6277_v28, %v6273_v13  ;;  %v6272_v3 = vld [vmem:[#allocation18 + $0xbc0] sm:$0xff]  ;;  %v6274_v34 = vld [vmem:[#allocation18 + $0xbd0] sm:$0xff] }
 0xa9b   : > { %9342 = vmatpush1.bf16.msra.mxu0 %v9341_v39  ;;  %v6270_v39 = vld [vmem:[#allocation18 + $0xbb0] sm:$0xff]  ;;  %v10333_v37 = vpop.eup %10332  ;;  %10354 = vpow2.f32 %v5558_v32  ;;  %v9607_v24 = vpack.c.bf16 %v6279_v51, %v6275_v50  ;;  %v6281_v53 = vld [vmem:[#allocation18 + $0xc08] sm:$0xff]  ;;  %v5774_v61 = vmul.f32 %v13264_v63, %v14160_v30  ;;  %v5773_v13 = vmul.f32 %v13266_v44, %v14161_v7  ;;  %v13313_v28 = vld [vmem:[#allocation18 + $0xc20] sm:$0xff] }
 0xa9c   : > { %9598 = vmatpush1.bf16.msra.mxu1 %v9597_v59  ;;  %9344 = vmatprep.subr.bf16.mxu0 %v9343_v23  ;;  %v14190_v59 = vld [vmem:[#allocation126_spill] sm:$0xff]  ;;  %v10335_v35 = vpop.eup %10334  ;;  %10356 = vrcp.f32 %v5614_v22  ;;  %v5772_v22 = vmul.f32 %v13261_v18, %v14159_v1  ;;  %v5775_v30 = vmul.f32 %v13268_v48, %v14162_v41  ;;  %v13325_v7 = vmul.f32 %v13277_v58, %v14165_v17  ;;  %v13327_v41 = vld [vmem:[#allocation18 + $0xc10] sm:$0xff]  ;;  %v6291_v58 = vld [vmem:[#allocation18 + $0xc58] sm:$0xff] }
 0xa9d   : > { %9600 = vmatprep.subr.bf16.mxu1 %v9599_v26  ;;  %v5447_v23 = vsub.f32 0.0, %v14190_v59  ;;  %v10337_v38 = vpop.eup %10336  ;;  %v9605_v26 = vpack.c.bf16 %v6270_v39, %v6266_v55  ;;  %10358 = vrcp.f32 %v5613_v62  ;;  %v5570_v59 = vmul.f32 1.442695, %v5445_v57  ;;  %v6285_v32 = vld [vmem:[#allocation18 + $0xc28] sm:$0xff]  ;;  %v6287_v55 = vld [vmem:[#allocation18 + $0xc38] sm:$0xff] }
 0xa9e   : > { %v10339_v60 = vpop.eup %10338  ;;  %10360 = vpow2.f32 %v5568_v52  ;;  %v5620_v62 = vadd.f32 1.0, %v10333_v37  ;;  %v5622_v57 = vadd.f32 1.0, %v10335_v35  ;;  %v9609_v39 = vpack.c.bf16 %v6278_v2, %v6274_v34  ;;  %v13331_v44 = vld [vmem:[#allocation18 + $0xc48] sm:$0xff]  ;;  %v6295_v52 = vld [vmem:[#allocation18 + $0xc78] sm:$0xff] }
 0xa9f   : > { %9346 = vmatpush1.bf16.msra.mxu0 %v9345_v11  ;;  %v10341_v11 = vpop.eup %10340  ;;  %v5574_v54 = vmul.f32 1.442695, %v5447_v23  ;;  %10362 = vrcp.f32 %v5615_v16  ;;  %v9355_v1 = vpack.c.bf16 %v6285_v32, %v6281_v53  ;;  %v5780_v2 = vmul.f32 %v13271_v9, %v14163_v45 }
 0xaa0   : > { %9602 = vmatpush1.bf16.msra.mxu1 %v9601_v40  ;;  %9348 = vmatprep.subr.bf16.mxu0 %v9347_v42  ;;  %v6283_v40 = vld [vmem:[#allocation18 + $0xc18] sm:$0xff]  ;;  %v10343_v42 = vpop.eup %10342  ;;  %10364 = vpow2.f32 %v5572_v0  ;;  %v13321_v37 = vmul.f32 %v13274_v20, %v14164_v36  ;;  %v13337_v45 = vmul.f32 %v13280_v47, %v14166_v15  ;;  %v13341_v36 = vmul.f32 %v13283_v5, %v14167_v8  ;;  %v6293_v20 = vld [vmem:[#allocation18 + $0xc68] sm:$0xff] }
 0xaa1   : > { %9604 = vmatprep.subr.bf16.mxu1 %v9603_v33  ;;  %v9353_v33 = vpack.c.bf16 %v6276_v14, %v6272_v3  ;;  %v13303_v27 = vpop.eup %10344  ;;  %10366 = vpow2.f32 %v5570_v59  ;;  %v9611_v63 = vpack.c.bf16 %v6287_v55, %v6283_v40  ;;  %v13311_v14 = vld [vmem:[#allocation18 + $0xc00] sm:$0xff]  ;;  %v5621_v17 = vadd.f32 1.0, %v10337_v38 }
 0xaa2   : > { %v13305_v18 = vpop.eup %10346  ;;  %10368 = vpow2.f32 %v5574_v54  ;;  %v5623_v23 = vadd.f32 1.0, %v10339_v60  ;;  %v5628_v50 = vadd.f32 1.0, %v10341_v11  ;;  %v5630_v34 = vadd.f32 1.0, %v10343_v42  ;;  %v13358_v11 = vld [vmem:[#allocation18 + $0xc50] sm:$0xff]  ;;  %v13362_v54 = vld [vmem:[#allocation18 + $0xc88] sm:$0xff] }
 0xaa3   : > { %9350 = vmatpush1.bf16.msra.mxu0 %v9349_v31  ;;  %v13315_v0 = vpop.eup %10348  ;;  %10370 = vrcp.f32 %v5620_v62  ;;  %v9357_v31 = vpack.c.bf16 %v13313_v28, %v13311_v14  ;;  %v9359_v53 = vpack.c.bf16 %v6293_v20, %v13331_v44  ;;  %v9615_v32 = vpack.c.bf16 %v6295_v52, %v6291_v58  ;;  %v13399_v20 = vld [vmem:[#allocation18 + $0xcb0] sm:$0xff]  ;;  %v13401_v58 = vld [vmem:[#allocation18 + $0xcc8] sm:$0xff] }
 0xaa4   : > { %9606 = vmatpush1.bf16.msra.mxu1 %v9605_v26  ;;  %9352 = vmatprep.subr.bf16.mxu0 %v9351_v56  ;;  %v13333_v48 = vpop.eup %10350  ;;  %10372 = vrcp.f32 %v5622_v57  ;;  %v13349_v26 = vld [vmem:[#allocation18 + $0xc40] sm:$0xff]  ;;  %v5790_v55 = vmul.f32 %v13286_v21, %v14168_v19  ;;  %v13372_v57 = vld [vmem:[#allocation18 + $0xc98] sm:$0xff] }
 0xaa5   : > { %9608 = vmatprep.subr.bf16.mxu1 %v9607_v24  ;;  %v13329_v24 = vld [vmem:[#allocation18 + $0xc30] sm:$0xff]  ;;  %v10353_v59 = vpop.eup %10352  ;;  %v13351_v56 = vld [vmem:[#allocation18 + $0xc60] sm:$0xff]  ;;  %10374 = vrcp.f32 %v5621_v17 }
 0xaa6   : > { %v10355_v15 = vpop.eup %10354  ;;  %v9613_v38 = vpack.c.bf16 %v13329_v24, %v13327_v41  ;;  %v5629_v42 = vadd.f32 1.0, %v10353_v59  ;;  %10376 = vrcp.f32 %v5623_v23  ;;  %v13386_v41 = vld [vmem:[#allocation18 + $0xc80] sm:$0xff]  ;;  %v5791_v59 = vmul.f32 %v13292_v4, %v14170_v46 }
 0xaa7   : > { %v5111_v9 = vpop.f32.mrb[48].mxu0  ;;  %9354 = vmatpush1.bf16.msra.mxu0 %v9353_v33  ;;  %v13353_v3 = vpop.eup %10356  ;;  %v13370_v33 = vld [vmem:[#allocation18 + $0xca8] sm:$0xff]  ;;  %10378 = vrcp.f32 %v5628_v50  ;;  %v13388_v24 = vld [vmem:[#allocation18 + $0xca0] sm:$0xff] }
 0xaa8   : > { %v5836_v51 = vmul.f32 %v5772_v22, %v5111_v9  ;;  %v5337_v35 = vpop.f32.mrb[48].mxu1  ;;  %v5113_v16 = vpop.f32.mrb[49].mxu0  ;;  %9610 = vmatpush1.bf16.msra.mxu1 %v9609_v39  ;;  %9356 = vmatprep.subr.bf16.mxu0 %v9355_v1  ;;  %v13360_v22 = vld [vmem:[#allocation18 + $0xc70] sm:$0xff]  ;;  %v13374_v39 = vld [vmem:[#allocation18 + $0xcb8] sm:$0xff]  ;;  %10380 = vrcp.f32 %v5630_v34 }
 0xaa9   : > { %v13343_v47 = vmul.f32 %v5774_v61, %v5337_v35  ;;  %v5837_v8 = vmul.f32 %v5773_v13, %v5113_v16  ;;  %v5339_v5 = vpop.f32.mrb[49].mxu1  ;;  %9612 = vmatprep.subr.bf16.mxu1 %v9611_v63  ;;  %v13364_v40 = vpop.eup %10358  ;;  %v5789_v61 = vmul.f32 %v13289_v25, %v14169_v10  ;;  %v5631_v13 = vadd.f32 1.0, %v10355_v15  ;;  %v13397_v9 = vld [vmem:[#allocation18 + $0xc90] sm:$0xff]  ;;  %v6307_v35 = vld [vmem:[#allocation18 + $0xcd8] sm:$0xff] }
 0xaaa   : > { %v13355_v60 = vmul.f32 %v5775_v30, %v5339_v5  ;;  %v10361_v1 = vpop.eup %10360  ;;  %v9361_v10 = vpack.c.bf16 %v13351_v56, %v13349_v26  ;;  %10382 = vrcp.f32 %v5629_v42  ;;  %v6311_v16 = vld [vmem:[#allocation18 + $0xcf8] sm:$0xff]  ;;  %v5797_v42 = vmul.f32 %v13305_v18, %v14173_v43 }
 0xaab   : > { %v5117_v62 = vpop.f32.mrb[50].mxu0  ;;  %6698 = vmatprep.mubr.f32.mxu0 %v5837_v8  ;;  %7150 = vmatprep.mubr.f32.mxu1 %v5837_v8  ;;  %v13378_v21 = vpop.eup %10362  ;;  %v5636_v23 = vadd.f32 1.0, %v10361_v1  ;;  %v5798_v8 = vmul.f32 %v13303_v27, %v14172_v12  ;;  %10384 = vrcp.f32 %v5631_v13  ;;  %v9621_v12 = vpack.c.bf16 %v13399_v20, %v13397_v9  ;;  %v13418_v27 = vld [vmem:[#allocation18 + $0xcc0] sm:$0xff]  ;;  %v6315_v1 = vld [vmem:[#allocation18 + $0xd18] sm:$0xff]  ;;  %v6314_v9 = vld [vmem:[#allocation18 + $0xd10] sm:$0xff] }
 0xaac   : > { %v5844_v30 = vmul.f32 %v5780_v2, %v5117_v62  ;;  %v5343_v63 = vpop.f32.mrb[50].mxu1  ;;  %v5119_v19 = vpop.f32.mrb[51].mxu0  ;;  %6699 = vmatmul.mubr.f32.vlgmr.msra.gmra.mrb[64].mxu0 %v5836_v51  ;;  %7151 = vmatmul.mubr.f32.vlgmr.msra.gmra.mrb[64].mxu1 %v5836_v51  ;;  %v9617_v2 = vpack.c.bf16 %v13360_v22, %v13358_v11  ;;  %v6309_v51 = vld [vmem:[#allocation18 + $0xce8] sm:$0xff]  ;;  %v9623_v22 = vpack.c.bf16 %v6311_v16, %v6307_v35  ;;  %v6319_v13 = vld [vmem:[#allocation18 + $0xd38] sm:$0xff]  ;;  %v6318_v20 = vld [vmem:[#allocation18 + $0xd30] sm:$0xff] }
 0xaad   : > { %v13381_v25 = vmul.f32 %v13321_v37, %v5343_v63  ;;  %v5845_v14 = vmul.f32 %v13325_v7, %v5119_v19  ;;  %v5345_v28 = vpop.f32.mrb[51].mxu1  ;;  %9358 = vmatpush1.bf16.msra.mxu0 %v9357_v31  ;;  %9614 = vmatpush1.bf16.msra.mxu1 %v9613_v38  ;;  %v10365_v44 = vpop.eup %10364  ;;  %v9363_v37 = vpack.c.bf16 %v13370_v33, %v13362_v54  ;;  %v13427_v54 = vld [vmem:[#allocation18 + $0xcd0] sm:$0xff]  ;;  %10386 = vrcp.f32 %v5636_v23  ;;  %v14193_v23 = vld [vmem:[#allocation113_spill] sm:$0xff] }
 0xaae   : > { %v13391_v17 = vmul.f32 %v13337_v45, %v5345_v28  ;;  %9360 = vmatprep.subr.bf16.mxu0 %v9359_v53  ;;  %9616 = vmatprep.subr.bf16.mxu1 %v9615_v32  ;;  %v9619_v7 = vpack.c.bf16 %v13374_v39, %v13372_v57  ;;  %v10367_v52 = vpop.eup %10366  ;;  %v5796_v45 = vmul.f32 %v13295_v49, %v14171_v29  ;;  %v5638_v4 = vadd.f32 1.0, %v10365_v44  ;;  %v6317_v39 = vld [vmem:[#allocation18 + $0xd28] sm:$0xff] }
 0xaaf   : > { %v5123_v50 = vpop.f32.mrb[52].mxu0  ;;  %6704 = vmatprep.mubr.f32.mxu0 %v5845_v14  ;;  %7156 = vmatprep.mubr.f32.mxu1 %v5845_v14  ;;  %v10369_v15 = vpop.eup %10368  ;;  %v9365_v29 = vpack.c.bf16 %v13388_v24, %v13386_v41  ;;  %v5637_v53 = vadd.f32 1.0, %v10367_v52  ;;  %v9367_v11 = vpack.c.bf16 %v6309_v51, %v13401_v58  ;;  %v5799_v62 = vmul.f32 %v13315_v0, %v14174_v6  ;;  %v13447_v41 = vld [vmem:[#allocation18 + $0xd20] sm:$0xff]  ;;  %v13452_v58 = vld [vmem:[#allocation18 + $0xd48] sm:$0xff] }
 0xab0   : > { %v5852_v5 = vmul.f32 %v13341_v36, %v5123_v50  ;;  %v5349_v31 = vpop.f32.mrb[52].mxu1  ;;  %v5125_v46 = vpop.f32.mrb[53].mxu0  ;;  %6705 = vmatmul.mubr.f32.gmra.mrb[66].mxu0 %v5844_v30  ;;  %7157 = vmatmul.mubr.f32.gmra.mrb[66].mxu1 %v5844_v30  ;;  %v13420_v36 = vld [vmem:[#allocation18 + $0xce0] sm:$0xff]  ;;  %v5639_v33 = vadd.f32 1.0, %v10369_v15  ;;  %v14191_v30 = vld [vmem:[#allocation111_spill] sm:$0xff]  ;;  %10388 = vrcp.f32 %v5638_v4  ;;  %v5805_v50 = vmul.f32 %v13364_v40, %v14193_v23  ;;  %v14194_v51 = vld [vmem:[#allocation114_spill] sm:$0xff] }
 0xab1   : > { %v13412_v49 = vpop.eup %10370  ;;  %v13414_v38 = vmul.f32 %v5790_v55, %v5349_v31  ;;  %v5853_v26 = vmul.f32 %v5789_v61, %v5125_v46  ;;  %v5351_v56 = vpop.f32.mrb[53].mxu1  ;;  %9362 = vmatpush1.bf16.msra.mxu0 %v9361_v10  ;;  %9618 = vmatpush1.bf16.msra.mxu1 %v9617_v2  ;;  %v13429_v55 = vld [vmem:[#allocation18 + $0xcf0] sm:$0xff]  ;;  %v13431_v61 = vld [vmem:[#allocation18 + $0xd08] sm:$0xff]  ;;  %v5804_v63 = vmul.f32 %v13333_v48, %v14191_v30  ;;  %v13445_v48 = vld [vmem:[#allocation18 + $0xd00] sm:$0xff]  ;;  %10390 = vrcp.f32 %v5637_v53 }
 0xab2   : > { %v13422_v34 = vpop.eup %10372  ;;  %v13424_v32 = vmul.f32 %v5791_v59, %v5351_v56  ;;  %9364 = vmatprep.subr.bf16.mxu0 %v9363_v37  ;;  %9620 = vmatprep.subr.bf16.mxu1 %v9619_v7  ;;  %v9369_v43 = vpack.c.bf16 %v13420_v36, %v13418_v27  ;;  %v9625_v2 = vpack.c.bf16 %v13429_v55, %v13427_v54  ;;  %v14192_v59 = vld [vmem:[#allocation112_spill] sm:$0xff]  ;;  %10392 = vrcp.f32 %v5639_v33  ;;  %v6325_v15 = vld [vmem:[#allocation18 + $0xd68] sm:$0xff]  ;;  %v14195_v46 = vld [vmem:[#allocation115_spill] sm:$0xff] }
 0xab3   : > { %v5129_v57 = vpop.f32.mrb[54].mxu0  ;;  %6710 = vmatprep.mubr.f32.mxu0 %v5853_v26  ;;  %7162 = vmatprep.mubr.f32.mxu1 %v5853_v26  ;;  %v10375_v6 = vpop.eup %10374  ;;  %v9371_v37 = vpack.c.bf16 %v6317_v39, %v13431_v61  ;;  %v9627_v7 = vpack.c.bf16 %v6319_v13, %v6315_v1  ;;  %v5807_v35 = vmul.f32 %v13378_v21, %v14194_v51  ;;  %v13466_v53 = vld [vmem:[#allocation18 + $0xd40] sm:$0xff]  ;;  %v6322_v61 = vld [vmem:[#allocation18 + $0xd50] sm:$0xff]  ;;  %v14196_v33 = vld [vmem:[#allocation116_spill] sm:$0xff] }
 0xab4   : > { %v5860_v19 = vmul.f32 %v5796_v45, %v5129_v57  ;;  %v5355_v10 = vpop.f32.mrb[54].mxu1  ;;  %v5131_v14 = vpop.f32.mrb[55].mxu0  ;;  %6711 = vmatmul.mubr.f32.gmra.mrb[68].mxu0 %v5852_v5  ;;  %7163 = vmatmul.mubr.f32.gmra.mrb[68].mxu1 %v5852_v5  ;;  %v5806_v45 = vmul.f32 %v13353_v3, %v14192_v59  ;;  %v6327_v5 = vld [vmem:[#allocation18 + $0xd78] sm:$0xff]  ;;  %v9373_v40 = vpack.c.bf16 %v13447_v41, %v13445_v48  ;;  %v14197_v39 = vld [vmem:[#allocation117_spill] sm:$0xff]  ;;  %v14198_v13 = vld [vmem:[#allocation118_spill] sm:$0xff] }
 0xab5   : > { %v13441_v18 = vmul.f32 %v5798_v8, %v5355_v10  ;;  %v5861_v0 = vmul.f32 %v5797_v42, %v5131_v14  ;;  %v5357_v28 = vpop.f32.mrb[55].mxu1  ;;  %9366 = vmatpush1.bf16.msra.mxu0 %v9365_v29  ;;  %9622 = vmatpush1.bf16.msra.mxu1 %v9621_v12  ;;  %v10377_v24 = vpop.eup %10376  ;;  %v6323_v8 = vld [vmem:[#allocation18 + $0xd58] sm:$0xff]  ;;  %v5812_v29 = vmul.f32 %v13412_v49, %v14195_v46  ;;  %v6326_v42 = vld [vmem:[#allocation18 + $0xd70] sm:$0xff] }
 0xab6   : > { %v13449_v44 = vmul.f32 %v5799_v62, %v5357_v28  ;;  %9368 = vmatprep.subr.bf16.mxu0 %v9367_v11  ;;  %9624 = vmatprep.subr.bf16.mxu1 %v9623_v22  ;;  %v10379_v52 = vpop.eup %10378  ;;  %v9629_v36 = vpack.c.bf16 %v6318_v20, %v6314_v9  ;;  %v13468_v11 = vld [vmem:[#allocation18 + $0xd60] sm:$0xff]  ;;  %v9375_v54 = vpack.c.bf16 %v6325_v15, %v13452_v58  ;;  %v6329_v62 = vld [vmem:[#allocation18 + $0xd88] sm:$0xff]  ;;  %v6331_v10 = vld [vmem:[#allocation18 + $0xd98] sm:$0xff] }
 0xab7   : > { %v5135_v16 = vpop.f32.mrb[56].mxu0  ;;  %6716 = vmatprep.mubr.f32.mxu0 %v5861_v0  ;;  %7168 = vmatprep.mubr.f32.mxu1 %v5861_v0  ;;  %v10381_v31 = vpop.eup %10380  ;;  %v9631_v55 = vpack.c.bf16 %v6327_v5, %v6323_v8  ;;  %v5814_v57 = vmul.f32 %v13422_v34, %v14196_v33  ;;  %v5813_v1 = vmul.f32 %v10375_v6, %v14197_v39  ;;  %v6335_v14 = vld [vmem:[#allocation18 + $0xdb8] sm:$0xff]  ;;  %v13482_v9 = vld [vmem:[#allocation18 + $0xd80] sm:$0xff]  ;;  %v6334_v23 = vld [vmem:[#allocation18 + $0xdb0] sm:$0xff] }
 0xab8   : > { %v5868_v4 = vmul.f32 %v5804_v63, %v5135_v16  ;;  %v5361_v26 = vpop.f32.mrb[56].mxu1  ;;  %v5137_v3 = vpop.f32.mrb[57].mxu0  ;;  %6717 = vmatmul.mubr.f32.gmra.mrb[70].mxu0 %v5860_v19  ;;  %7169 = vmatmul.mubr.f32.gmra.mrb[70].mxu1 %v5860_v19  ;;  %v5815_v30 = vmul.f32 %v10377_v24, %v14198_v13  ;;  %v6333_v19 = vld [vmem:[#allocation18 + $0xda8] sm:$0xff]  ;;  %v9377_v34 = vpack.c.bf16 %v13468_v11, %v13466_v53  ;;  %v6332_v20 = vld [vmem:[#allocation18 + $0xda0] sm:$0xff]  ;;  %v6342_v13 = vld [vmem:[#allocation18 + $0xdf0] sm:$0xff] }
 0xab9   : > { %v10383_v21 = vpop.eup %10382  ;;  %v13464_v56 = vmul.f32 %v5806_v45, %v5361_v26  ;;  %v5869_v12 = vmul.f32 %v5805_v50, %v5137_v3  ;;  %v5363_v27 = vpop.f32.mrb[57].mxu1  ;;  %9370 = vmatpush1.bf16.msra.mxu0 %v9369_v43  ;;  %9626 = vmatpush1.bf16.msra.mxu1 %v9625_v2  ;;  %v14199_v43 = vld [vmem:[#allocation119_spill] sm:$0xff]  ;;  %v9635_v59 = vpack.c.bf16 %v6335_v14, %v6331_v10  ;;  %v6337_v50 = vld [vmem:[#allocation18 + $0xdc8] sm:$0xff]  ;;  %v14201_v15 = vld [vmem:[#allocation121_spill] sm:$0xff] }
 0xaba   : > { %v10385_v49 = vpop.eup %10384  ;;  %v13470_v22 = vmul.f32 %v5807_v35, %v5363_v27  ;;  %9372 = vmatprep.subr.bf16.mxu0 %v9371_v37  ;;  %9628 = vmatprep.subr.bf16.mxu1 %v9627_v7  ;;  %v5820_v0 = vmul.f32 %v10379_v52, %v14199_v43  ;;  %v9633_v7 = vpack.c.bf16 %v6326_v42, %v6322_v61  ;;  %v6330_v45 = vld [vmem:[#allocation18 + $0xd90] sm:$0xff]  ;;  %v14200_v35 = vld [vmem:[#allocation120_spill] sm:$0xff]  ;;  %v14202_v5 = vld [vmem:[#allocation122_spill] sm:$0xff] }
 0xabb   : > { %v5141_v63 = vpop.f32.mrb[58].mxu0  ;;  %6722 = vmatprep.mubr.f32.mxu0 %v5869_v12  ;;  %7174 = vmatprep.mubr.f32.mxu1 %v5869_v12  ;;  %v10387_v41 = vpop.eup %10386  ;;  %v9379_v52 = vpack.c.bf16 %v6333_v19, %v6329_v62  ;;  %v5822_v16 = vmul.f32 %v10381_v31, %v14200_v35  ;;  %v5821_v8 = vmul.f32 %v10383_v21, %v14201_v15  ;;  %v6339_v26 = vld [vmem:[#allocation18 + $0xdd8] sm:$0xff]  ;;  %v14203_v12 = vld [vmem:[#allocation123_spill] sm:$0xff]  ;;  %v6336_v42 = vld [vmem:[#allocation18 + $0xdc0] sm:$0xff] }
 0xabc   : > { %v5876_v28 = vmul.f32 %v5812_v29, %v5141_v63  ;;  %v5367_v2 = vpop.f32.mrb[58].mxu1  ;;  %v5143_v48 = vpop.f32.mrb[59].mxu0  ;;  %6723 = vmatmul.mubr.f32.gmra.mrb[72].mxu0 %v5868_v4  ;;  %7175 = vmatmul.mubr.f32.gmra.mrb[72].mxu1 %v5868_v4  ;;  %v5823_v46 = vmul.f32 %v10385_v49, %v14202_v5  ;;  %v6341_v4 = vld [vmem:[#allocation18 + $0xde8] sm:$0xff]  ;;  %v6343_v3 = vld [vmem:[#allocation18 + $0xdf8] sm:$0xff]  ;;  %v5828_v27 = vmul.f32 %v10387_v41, %v14203_v12  ;;  %v6340_v62 = vld [vmem:[#allocation18 + $0xde0] sm:$0xff] }
 0xabd   : > { %v13480_v6 = vmul.f32 %v5814_v57, %v5367_v2  ;;  %v5877_v24 = vmul.f32 %v5813_v1, %v5143_v48  ;;  %v5369_v37 = vpop.f32.mrb[59].mxu1  ;;  %9374 = vmatpush1.bf16.msra.mxu0 %v9373_v40  ;;  %9630 = vmatpush1.bf16.msra.mxu1 %v9629_v36  ;;  %v10389_v51 = vpop.eup %10388  ;;  %v9381_v31 = vpack.c.bf16 %v6332_v20, %v13482_v9  ;;  %v6338_v1 = vld [vmem:[#allocation18 + $0xdd0] sm:$0xff]  ;;  %v14205_v19 = vld [vmem:[#allocation125_spill] sm:$0xff]  ;;  %v6345_v43 = vld [vmem:[#allocation18 + $0xe08] sm:$0xff] }
 0xabe   : > { %v13484_v58 = vmul.f32 %v5815_v30, %v5369_v37  ;;  %9376 = vmatprep.subr.bf16.mxu0 %v9375_v54  ;;  %9632 = vmatprep.subr.bf16.mxu1 %v9631_v55  ;;  %v10391_v40 = vpop.eup %10390  ;;  %v9637_v61 = vpack.c.bf16 %v6334_v23, %v6330_v45  ;;  %v9383_v57 = vpack.c.bf16 %v6341_v4, %v6337_v50  ;;  %v14204_v30 = vld [vmem:[#allocation124_spill] sm:$0xff]  ;;  %v6344_v45 = vld [vmem:[#allocation18 + $0xe00] sm:$0xff]  ;;  %v6350_v35 = vld [vmem:[#allocation18 + $0xe30] sm:$0xff] }
 0xabf   : > { %v5147_v29 = vpop.f32.mrb[60].mxu0  ;;  %6728 = vmatprep.mubr.f32.mxu0 %v5877_v24  ;;  %7180 = vmatprep.mubr.f32.mxu1 %v5877_v24  ;;  %v10393_v54 = vpop.eup %10392  ;;  %v9639_v39 = vpack.c.bf16 %v6343_v3, %v6339_v26  ;;  %v5830_v63 = vmul.f32 %v10389_v51, %v14204_v30  ;;  %v5829_v10 = vmul.f32 %v10391_v40, %v14205_v19  ;;  %v6349_v24 = vld [vmem:[#allocation18 + $0xe28] sm:$0xff]  ;;  %v6347_v37 = vld [vmem:[#allocation18 + $0xe18] sm:$0xff]  ;;  %v6348_v23 = vld [vmem:[#allocation18 + $0xe20] sm:$0xff] }
 0xac0   : > { %v5884_v36 = vmul.f32 %v5820_v0, %v5147_v29  ;;  %v5373_v53 = vpop.f32.mrb[60].mxu1  ;;  %v5149_v11 = vpop.f32.mrb[61].mxu0  ;;  %6729 = vmatmul.mubr.f32.gmra.mrb[74].mxu0 %v5876_v28  ;;  %7181 = vmatmul.mubr.f32.gmra.mrb[74].mxu1 %v5876_v28  ;;  %v14206_v0 = vld [vmem:[#allocation126_spill] sm:$0xff]  ;;  %v9385_v41 = vpack.c.bf16 %v6340_v62, %v6336_v42  ;;  %v6346_v51 = vld [vmem:[#allocation18 + $0xe10] sm:$0xff]  ;;  %v9387_v15 = vpack.c.bf16 %v6349_v24, %v6345_v43  ;;  %v6359_v29 = vld [vmem:[#allocation18 + $0xe78] sm:$0xff] }
 0xac1   : > { %v13491_v21 = vmul.f32 %v5822_v16, %v5373_v53  ;;  %v5885_v49 = vmul.f32 %v5821_v8, %v5149_v11  ;;  %v5375_v55 = vpop.f32.mrb[61].mxu1  ;;  %9378 = vmatpush1.bf16.msra.mxu0 %v9377_v34  ;;  %9634 = vmatpush1.bf16.msra.mxu1 %v9633_v7  ;;  %v5831_v28 = vmul.f32 %v10393_v54, %v14206_v0  ;;  %v6351_v7 = vld [vmem:[#allocation18 + $0xe38] sm:$0xff]  ;;  %v6353_v16 = vld [vmem:[#allocation18 + $0xe48] sm:$0xff]  ;;  %v6352_v3 = vld [vmem:[#allocation18 + $0xe40] sm:$0xff] }
 0xac2   : > { %v13493_v33 = vmul.f32 %v5823_v46, %v5375_v55  ;;  %9380 = vmatprep.subr.bf16.mxu0 %v9379_v52  ;;  %9636 = vmatprep.subr.bf16.mxu1 %v9635_v59  ;;  %v9641_v59 = vpack.c.bf16 %v6342_v13, %v6338_v1  ;;  %v9643_v8 = vpack.c.bf16 %v6351_v7, %v6347_v37  ;;  %v6357_v5 = vld [vmem:[#allocation18 + $0xe68] sm:$0xff]  ;;  %v6355_v46 = vld [vmem:[#allocation18 + $0xe58] sm:$0xff]  ;;  %v6356_v40 = vld [vmem:[#allocation18 + $0xe60] sm:$0xff] }
 0xac3   : > { %v5153_v14 = vpop.f32.mrb[62].mxu0  ;;  %6734 = vmatprep.mubr.f32.mxu0 %v5885_v49  ;;  %7186 = vmatprep.mubr.f32.mxu1 %v5885_v49  ;;  %v9389_v4 = vpack.c.bf16 %v6348_v23, %v6344_v45  ;;  %v9645_v26 = vpack.c.bf16 %v6350_v35, %v6346_v51  ;;  %v9391_v12 = vpack.c.bf16 %v6357_v5, %v6353_v16  ;;  %v6358_v53 = vld [vmem:[#allocation18 + $0xe70] sm:$0xff]  ;;  %v6361_v11 = vld [vmem:[#allocation18 + $0xe88] sm:$0xff]  ;;  %v6363_v54 = vld [vmem:[#allocation18 + $0xe98] sm:$0xff] }
 0xac4   : > { %v5892_v2 = vmul.f32 %v5828_v27, %v5153_v14  ;;  %v5379_v48 = vpop.f32.mrb[62].mxu1  ;;  %v5155_v34 = vpop.f32.mrb[63].mxu0  ;;  %6735 = vmatmul.mubr.f32.gmra.mrb[76].mxu0 %v5884_v36  ;;  %7187 = vmatmul.mubr.f32.gmra.mrb[76].mxu1 %v5884_v36  ;;  %v9647_v27 = vpack.c.bf16 %v6359_v29, %v6355_v46  ;;  %v6354_v36 = vld [vmem:[#allocation18 + $0xe50] sm:$0xff]  ;;  %v6367_v49 = vld [vmem:[#allocation18 + $0xeb8] sm:$0xff]  ;;  %v9393_v55 = vpack.c.bf16 %v6356_v40, %v6352_v3  ;;  %v6360_v42 = vld [vmem:[#allocation18 + $0xe80] sm:$0xff] }
 0xac5   : > { %v13498_v9 = vmul.f32 %v5830_v63, %v5379_v48  ;;  %v5893_v20 = vmul.f32 %v5829_v10, %v5155_v34  ;;  %v5381_v52 = vpop.f32.mrb[63].mxu1  ;;  %9382 = vmatpush1.bf16.msra.mxu0 %v9381_v31  ;;  %9638 = vmatpush1.bf16.msra.mxu1 %v9637_v61  ;;  %v6365_v31 = vld [vmem:[#allocation18 + $0xea8] sm:$0xff]  ;;  %v9649_v61 = vpack.c.bf16 %v6358_v53, %v6354_v36  ;;  %v6364_v62 = vld [vmem:[#allocation18 + $0xea0] sm:$0xff]  ;;  %v6366_v1 = vld [vmem:[#allocation18 + $0xeb0] sm:$0xff] }
 0xac6   : > { %v13500_v50 = vmul.f32 %v5831_v28, %v5381_v52  ;;  %9384 = vmatprep.subr.bf16.mxu0 %v9383_v57  ;;  %9640 = vmatprep.subr.bf16.mxu1 %v9639_v39  ;;  %v9395_v57 = vpack.c.bf16 %v6365_v31, %v6361_v11  ;;  %v6362_v39 = vld [vmem:[#allocation18 + $0xe90] sm:$0xff]  ;;  %v6369_v13 = vld [vmem:[#allocation18 + $0xec8] sm:$0xff]  ;;  %v6371_v63 = vld [vmem:[#allocation18 + $0xed8] sm:$0xff]  ;;  %v9397_v10 = vpack.c.bf16 %v6364_v62, %v6360_v42 }
 0xac7   : > { %6740 = vmatprep.mubr.f32.mxu0 %v5893_v20  ;;  %7192 = vmatprep.mubr.f32.mxu1 %v5893_v20  ;;  %v6373_v30 = vld [vmem:[#allocation18 + $0xee8] sm:$0xff]  ;;  %v6375_v19 = vld [vmem:[#allocation18 + $0xef8] sm:$0xff]  ;;  %v9653_v14 = vpack.c.bf16 %v6366_v1, %v6362_v39  ;;  %v6368_v43 = vld [vmem:[#allocation18 + $0xec0] sm:$0xff] }
 0xac8   : > { %6741 = vmatmul.mubr.f32.gmra.mrb[78].mxu0 %v5892_v2  ;;  %7193 = vmatmul.mubr.f32.gmra.mrb[78].mxu1 %v5892_v2  ;;  %v6372_v0 = vld [vmem:[#allocation18 + $0xee0] sm:$0xff]  ;;  %v9399_v28 = vpack.c.bf16 %v6373_v30, %v6369_v13  ;;  %v9655_v2 = vpack.c.bf16 %v6375_v19, %v6371_v63  ;;  %v6370_v48 = vld [vmem:[#allocation18 + $0xed0] sm:$0xff]  ;;  %v6381_v24 = vld [vmem:[#allocation18 + $0xf28] sm:$0xff] }
 0xac9   : > { %9386 = vmatpush1.bf16.msra.mxu0 %v9385_v41  ;;  %9642 = vmatpush1.bf16.msra.mxu1 %v9641_v59  ;;  %v6374_v34 = vld [vmem:[#allocation18 + $0xef0] sm:$0xff]  ;;  %v6377_v41 = vld [vmem:[#allocation18 + $0xf08] sm:$0xff]  ;;  %v6379_v37 = vld [vmem:[#allocation18 + $0xf18] sm:$0xff]  ;;  %v9401_v20 = vpack.c.bf16 %v6372_v0, %v6368_v43 }
 0xaca   : > { %6811 = vmatprep.mubr.f32.mxu0 %v13355_v60  ;;  %7263 = vmatprep.mubr.f32.mxu1 %v13355_v60  ;;  %v9651_v60 = vpack.c.bf16 %v6367_v49, %v6363_v54  ;;  %v6383_v7 = vld [vmem:[#allocation18 + $0xf38] sm:$0xff]  ;;  %v9657_v52 = vpack.c.bf16 %v6374_v34, %v6370_v48  ;;  %v6376_v59 = vld [vmem:[#allocation18 + $0xf00] sm:$0xff]  ;;  %v9403_v23 = vpack.c.bf16 %v6381_v24, %v6377_v41  ;;  %v6378_v35 = vld [vmem:[#allocation18 + $0xf10] sm:$0xff] }
 0xacb   : > { %9388 = vmatprep.subr.bf16.mxu0 %v9387_v15  ;;  %9644 = vmatprep.subr.bf16.mxu1 %v9643_v8  ;;  %v6380_v45 = vld [vmem:[#allocation18 + $0xf20] sm:$0xff]  ;;  %v9659_v51 = vpack.c.bf16 %v6383_v7, %v6379_v37  ;;  %v6382_v16 = vld [vmem:[#allocation18 + $0xf30] sm:$0xff]  ;;  %v6385_v15 = vld [vmem:[#allocation18 + $0xf48] sm:$0xff] }
 0xacc   : > { %v6389_v8 = vld [vmem:[#allocation18 + $0xf68] sm:$0xff]  ;;  %v6387_v5 = vld [vmem:[#allocation18 + $0xf58] sm:$0xff]  ;;  %v9405_v29 = vpack.c.bf16 %v6380_v45, %v6376_v59  ;;  %v6388_v3 = vld [vmem:[#allocation18 + $0xf60] sm:$0xff] }
 0xacd   : > { %9390 = vmatpush1.bf16.msra.mxu0 %v9389_v4  ;;  %9646 = vmatpush1.bf16.msra.mxu1 %v9645_v26  ;;  %v6391_v46 = vld [vmem:[#allocation18 + $0xf78] sm:$0xff]  ;;  %v9661_v4 = vpack.c.bf16 %v6382_v16, %v6378_v35  ;;  %v6384_v26 = vld [vmem:[#allocation18 + $0xf40] sm:$0xff]  ;;  %v9407_v40 = vpack.c.bf16 %v6389_v8, %v6385_v15  ;;  %v6390_v36 = vld [vmem:[#allocation18 + $0xf70] sm:$0xff] }
 0xace   : > { %9392 = vmatprep.subr.bf16.mxu0 %v9391_v12  ;;  %9648 = vmatprep.subr.bf16.mxu1 %v9647_v27  ;;  %v9663_v12 = vpack.c.bf16 %v6391_v46, %v6387_v5  ;;  %v6386_v27 = vld [vmem:[#allocation18 + $0xf50] sm:$0xff]  ;;  %v6393_v53 = vld [vmem:[#allocation18 + $0xf88] sm:$0xff]  ;;  %v6395_v31 = vld [vmem:[#allocation18 + $0xf98] sm:$0xff]  ;;  %v9409_v49 = vpack.c.bf16 %v6388_v3, %v6384_v26 }
 0xacf   : > { %v6397_v11 = vld [vmem:[#allocation18 + $0xfa8] sm:$0xff]  ;;  %v6399_v54 = vld [vmem:[#allocation18 + $0xfb8] sm:$0xff]  ;;  %v6396_v42 = vld [vmem:[#allocation18 + $0xfa0] sm:$0xff] }
 0xad0   : > { %v9411_v62 = vpack.c.bf16 %v6397_v11, %v6393_v53  ;;  %v6398_v39 = vld [vmem:[#allocation18 + $0xfb0] sm:$0xff]  ;;  %v6401_v1 = vld [vmem:[#allocation18 + $0xfc8] sm:$0xff]  ;;  %v6403_v30 = vld [vmem:[#allocation18 + $0xfd8] sm:$0xff] }
 0xad1   : > { %9394 = vmatpush1.bf16.msra.mxu0 %v9393_v55  ;;  %9650 = vmatpush1.bf16.msra.mxu1 %v9649_v61  ;;  %v9665_v55 = vpack.c.bf16 %v6390_v36, %v6386_v27  ;;  %v6392_v61 = vld [vmem:[#allocation18 + $0xf80] sm:$0xff]  ;;  %v6405_v13 = vld [vmem:[#allocation18 + $0xfe8] sm:$0xff]  ;;  %v6407_v63 = vld [vmem:[#allocation18 + $0xff8] sm:$0xff] }
 0xad2   : > { %9396 = vmatprep.subr.bf16.mxu0 %v9395_v57  ;;  %9652 = vmatprep.subr.bf16.mxu1 %v9651_v60  ;;  %v9667_v57 = vpack.c.bf16 %v6399_v54, %v6395_v31  ;;  %v6394_v60 = vld [vmem:[#allocation18 + $0xf90] sm:$0xff]  ;;  %v9413_v19 = vpack.c.bf16 %v6396_v42, %v6392_v61  ;;  %v9415_v43 = vpack.c.bf16 %v6405_v13, %v6401_v1  ;;  %v14213_v59 = vld [vmem:[#allocation42_spill] sm:$0xff]  ;;  %v14215_v15 = vld [vmem:[#allocation45_spill] sm:$0xff] }
 0xad3   : > { %v9671_v0 = vpack.c.bf16 %v6407_v63, %v6403_v30  ;;  %v6406_v48 = vld [vmem:[#allocation18 + $0xff0] sm:$0xff]  ;;  %v14217_v26 = vld [vmem:[#allocation46_spill] sm:$0xff]  ;;  %v14219_v53 = vld [vmem:[#allocation49_spill] sm:$0xff] }
 0xad4   : > { %v14212_v37 = vld [vmem:[#allocation43_spill] sm:$0xff]  ;;  %v14221_v61 = vld [vmem:[#allocation50_spill] sm:$0xff]  ;;  %v14223_v1 = vld [vmem:[#allocation53_spill] sm:$0xff] }
 0xad5   : > { %9398 = vmatpush1.bf16.msra.mxu0 %v9397_v10  ;;  %9654 = vmatpush1.bf16.msra.mxu1 %v9653_v14  ;;  %v9669_v10 = vpack.c.bf16 %v6398_v39, %v6394_v60  ;;  %v6400_v14 = vld [vmem:[#allocation18 + $0xfc0] sm:$0xff]  ;;  %v14216_v5 = vld [vmem:[#allocation47_spill] sm:$0xff] }
 0xad6   : > { %9400 = vmatprep.subr.bf16.mxu0 %v9399_v28  ;;  %9656 = vmatprep.subr.bf16.mxu1 %v9655_v2  ;;  %v6404_v28 = vld [vmem:[#allocation18 + $0xfe0] sm:$0xff]  ;;  %v6402_v2 = vld [vmem:[#allocation18 + $0xfd0] sm:$0xff] }
 0xad7   : > { %v9417_v34 = vpack.c.bf16 %v6404_v28, %v6400_v14  ;;  %v9673_v41 = vpack.c.bf16 %v6406_v48, %v6402_v2  ;;  %v14220_v31 = vld [vmem:[#allocation51_spill] sm:$0xff]  ;;  %v14225_v14 = vld [vmem:[#allocation54_spill] sm:$0xff] }
 0xad8   : > { %v14224_v30 = vld [vmem:[#allocation83_spill] sm:$0xff] }
 0xad9   : > { %9402 = vmatpush1.bf16.msra.mxu0 %v9401_v20  ;;  %9658 = vmatpush1.bf16.msra.mxu1 %v9657_v52 }
 0xada   : > { %9404 = vmatprep.subr.bf16.mxu0 %v9403_v23  ;;  %9660 = vmatprep.subr.bf16.mxu1 %v9659_v51  ;;  %v14214_v23 = vld [vmem:[#allocation44_spill] sm:$0xff] }
 0xadd   : > { %9406 = vmatpush1.bf16.msra.mxu0 %v9405_v29  ;;  %9662 = vmatpush1.bf16.msra.mxu1 %v9661_v4 }
 0xade   : > { %9408 = vmatprep.subr.bf16.mxu0 %v9407_v40  ;;  %9664 = vmatprep.subr.bf16.mxu1 %v9663_v12  ;;  %v14218_v40 = vld [vmem:[#allocation48_spill] sm:$0xff] }
 0xae1   : > { %9410 = vmatpush1.bf16.msra.mxu0 %v9409_v49  ;;  %9666 = vmatpush1.bf16.msra.mxu1 %v9665_v55 }
 0xae2   : > { %9412 = vmatprep.subr.bf16.mxu0 %v9411_v62  ;;  %9668 = vmatprep.subr.bf16.mxu1 %v9667_v57  ;;  %v14222_v62 = vld [vmem:[#allocation52_spill] sm:$0xff] }
 0xae5   : > { %9414 = vmatpush1.bf16.msra.mxu0 %v9413_v19  ;;  %9670 = vmatpush1.bf16.msra.mxu1 %v9669_v10 }
 0xae6   : > { %9416 = vmatprep.subr.bf16.mxu0 %v9415_v43  ;;  %9672 = vmatprep.subr.bf16.mxu1 %v9671_v0  ;;  %v14226_v0 = vld [vmem:[#allocation84_spill] sm:$0xff] }
 0xae9   : > { %9418 = vmatpush1.bf16.msra.mxu0 %v9417_v34  ;;  %9674 = vmatpush1.bf16.msra.mxu1 %v9673_v41  ;;  %v14227_v34 = vld [vmem:[#allocation85_spill] sm:$0xff] }
 0xaec   : > { %6812 = vmatmul.mubr.f32.vlgmr.msra.gmra.mrb[64].mxu0 %v13343_v47  ;;  %7264 = vmatmul.mubr.f32.vlgmr.msra.gmra.mrb[64].mxu1 %v13343_v47 }
 0xaed   : > { %6817 = vmatprep.mubr.f32.mxu0 %v13391_v17  ;;  %7269 = vmatprep.mubr.f32.mxu1 %v13391_v17  ;;  %v14207_v17 = vld [vmem:[#allocation37_spill] sm:$0xff] }
 0xaf0   : > { %6818 = vmatmul.mubr.f32.gmra.mrb[66].mxu0 %v13381_v25  ;;  %7270 = vmatmul.mubr.f32.gmra.mrb[66].mxu1 %v13381_v25 }
 0xaf1   : > { %6823 = vmatprep.mubr.f32.mxu0 %v13424_v32  ;;  %7275 = vmatprep.mubr.f32.mxu1 %v13424_v32  ;;  %v14208_v32 = vld [vmem:[#allocation39_spill] sm:$0xff] }
 0xaf4   : > { %6824 = vmatmul.mubr.f32.gmra.mrb[68].mxu0 %v13414_v38  ;;  %7276 = vmatmul.mubr.f32.gmra.mrb[68].mxu1 %v13414_v38 }
 0xaf5   : > { %6829 = vmatprep.mubr.f32.mxu0 %v13449_v44  ;;  %7281 = vmatprep.mubr.f32.mxu1 %v13449_v44 }
 0xaf8   : > { %6830 = vmatmul.mubr.f32.gmra.mrb[70].mxu0 %v13441_v18  ;;  %7282 = vmatmul.mubr.f32.gmra.mrb[70].mxu1 %v13441_v18 }
 0xaf9   : > { %6835 = vmatprep.mubr.f32.mxu0 %v13470_v22  ;;  %7287 = vmatprep.mubr.f32.mxu1 %v13470_v22  ;;  %v14209_v22 = vld [vmem:[#allocation38_spill] sm:$0xff] }
 0xafc   : > { %6836 = vmatmul.mubr.f32.gmra.mrb[72].mxu0 %v13464_v56  ;;  %7288 = vmatmul.mubr.f32.gmra.mrb[72].mxu1 %v13464_v56 }
 0xafd   : > { %6841 = vmatprep.mubr.f32.mxu0 %v13484_v58  ;;  %7293 = vmatprep.mubr.f32.mxu1 %v13484_v58  ;;  %v14210_v58 = vld [vmem:[#allocation40_spill] sm:$0xff] }
 0xb00   : > { %6842 = vmatmul.mubr.f32.gmra.mrb[74].mxu0 %v13480_v6  ;;  %7294 = vmatmul.mubr.f32.gmra.mrb[74].mxu1 %v13480_v6 }
 0xb01   : > { %6847 = vmatprep.mubr.f32.mxu0 %v13493_v33  ;;  %7299 = vmatprep.mubr.f32.mxu1 %v13493_v33 }
 0xb04   : > { %6848 = vmatmul.mubr.f32.gmra.mrb[76].mxu0 %v13491_v21  ;;  %7300 = vmatmul.mubr.f32.gmra.mrb[76].mxu1 %v13491_v21 }
 0xb05   : > { %6853 = vmatprep.mubr.f32.mxu0 %v13500_v50  ;;  %7305 = vmatprep.mubr.f32.mxu1 %v13500_v50  ;;  %v14211_v50 = vld [vmem:[#allocation41_spill] sm:$0xff] }
 0xb08   : > { %6854 = vmatmul.mubr.f32.gmra.mrb[78].mxu0 %v13498_v9  ;;  %7306 = vmatmul.mubr.f32.gmra.mrb[78].mxu1 %v13498_v9 }
 0xbbf   : > { %v6813_v47 = vpop.f32.mrb[64].mxu0  ;;  %v7265_v25 = vpop.f32.mrb[64].mxu1 }
 0xbc0   : > { %v7312_v38 = vadd.f32 %v6813_v47, %v14207_v17  ;;  %v7314_v18 = vadd.f32 %v7265_v25, %v14208_v32  ;;  %v6815_v44 = vpop.f32.mrb[65].mxu0  ;;  %v7267_v56 = vpop.f32.mrb[65].mxu1  ;;  %v14228_v47 = vld [vmem:[#allocation87_spill] sm:$0xff]  ;;  %v14230_v32 = vld [vmem:[#allocation86_spill] sm:$0xff] }
 0xbc1   : > { %v7313_v6 = vadd.f32 %v6815_v44, %v14209_v22  ;;  %v7315_v21 = vadd.f32 %v7267_v56, %v14210_v58  ;;  %v14231_v44 = vld [vmem:[#allocation88_spill] sm:$0xff]  ;;  %v14232_v58 = vld [vmem:[#allocation89_spill] sm:$0xff] }
 0xbc2   : > { %7344 = vst [vmem:[%s11667_s13] sm:$0xff] %v7312_v38  ;;  %7346 = vst [vmem:[%s11667_s13 + $0x10] sm:$0xff] %v7314_v18 }
 0xbc3   : > { %7345 = vst [vmem:[%s11667_s13 + $0x8] sm:$0xff] %v7313_v6  ;;  %7347 = vst [vmem:[%s11667_s13 + $0x18] sm:$0xff] %v7315_v21  ;;  %v6819_v33 = vpop.f32.mrb[66].mxu0  ;;  %v7271_v9 = vpop.f32.mrb[66].mxu1 }
 0xbc4   : > { %v7316_v24 = vadd.f32 %v6819_v33, %v14211_v50  ;;  %v7318_v7 = vadd.f32 %v7271_v9, %v14212_v37  ;;  %v6821_v20 = vpop.f32.mrb[67].mxu0  ;;  %v7273_v52 = vpop.f32.mrb[67].mxu1  ;;  %v14233_v33 = vld [vmem:[#allocation91_spill] sm:$0xff]  ;;  %v14234_v37 = vld [vmem:[#allocation90_spill] sm:$0xff] }
 0xbc5   : > { %v7317_v45 = vadd.f32 %v6821_v20, %v14213_v59  ;;  %v7319_v51 = vadd.f32 %v7273_v52, %v14214_v23  ;;  %v14235_v20 = vld [vmem:[#allocation92_spill] sm:$0xff]  ;;  %v14236_v23 = vld [vmem:[#allocation93_spill] sm:$0xff] }
 0xbc6   : > { %7348 = vst [vmem:[%s11667_s13 + $0x20] sm:$0xff] %v7316_v24  ;;  %7350 = vst [vmem:[%s11667_s13 + $0x30] sm:$0xff] %v7318_v7 }
 0xbc7   : > { %7349 = vst [vmem:[%s11667_s13 + $0x28] sm:$0xff] %v7317_v45  ;;  %7351 = vst [vmem:[%s11667_s13 + $0x38] sm:$0xff] %v7319_v51  ;;  %v6825_v35 = vpop.f32.mrb[68].mxu0  ;;  %v7277_v16 = vpop.f32.mrb[68].mxu1 }
 0xbc8   : > { %v7320_v8 = vadd.f32 %v6825_v35, %v14215_v15  ;;  %v7322_v46 = vadd.f32 %v7277_v16, %v14216_v5  ;;  %v6827_v29 = vpop.f32.mrb[69].mxu0  ;;  %v7279_v4 = vpop.f32.mrb[69].mxu1  ;;  %v14238_v35 = vld [vmem:[#allocation95_spill] sm:$0xff]  ;;  %v14240_v5 = vld [vmem:[#allocation94_spill] sm:$0xff] }
 0xbc9   : > { %v7321_v3 = vadd.f32 %v6827_v29, %v14217_v26  ;;  %v7323_v12 = vadd.f32 %v7279_v4, %v14218_v40  ;;  %v14241_v29 = vld [vmem:[#allocation96_spill] sm:$0xff] }
 0xbca   : > { %7352 = vst [vmem:[%s11667_s13 + $0x40] sm:$0xff] %v7320_v8  ;;  %7354 = vst [vmem:[%s11667_s13 + $0x50] sm:$0xff] %v7322_v46 }
 0xbcb   : > { %7353 = vst [vmem:[%s11667_s13 + $0x48] sm:$0xff] %v7321_v3  ;;  %7355 = vst [vmem:[%s11667_s13 + $0x58] sm:$0xff] %v7323_v12  ;;  %v6831_v27 = vpop.f32.mrb[70].mxu0  ;;  %v7283_v36 = vpop.f32.mrb[70].mxu1 }
 0xbcc   : > { %v7324_v11 = vadd.f32 %v6831_v27, %v14219_v53  ;;  %v7326_v54 = vadd.f32 %v7283_v36, %v14220_v31  ;;  %v6833_v49 = vpop.f32.mrb[71].mxu0  ;;  %v7285_v55 = vpop.f32.mrb[71].mxu1 }
 0xbcd   : > { %v7325_v42 = vadd.f32 %v6833_v49, %v14221_v61  ;;  %v7327_v57 = vadd.f32 %v7285_v55, %v14222_v62 }
 0xbce   : > { %7356 = vst [vmem:[%s11667_s13 + $0x60] sm:$0xff] %v7324_v11  ;;  %7358 = vst [vmem:[%s11667_s13 + $0x70] sm:$0xff] %v7326_v54 }
 0xbcf   : > { %7357 = vst [vmem:[%s11667_s13 + $0x68] sm:$0xff] %v7325_v42  ;;  %7359 = vst [vmem:[%s11667_s13 + $0x78] sm:$0xff] %v7327_v57  ;;  %v6837_v60 = vpop.f32.mrb[72].mxu0  ;;  %v7289_v39 = vpop.f32.mrb[72].mxu1 }
 0xbd0   : > { %v7328_v13 = vadd.f32 %v6837_v60, %v14223_v1  ;;  %v7330_v63 = vadd.f32 %v7289_v39, %v14224_v30  ;;  %v6839_v19 = vpop.f32.mrb[73].mxu0  ;;  %v7291_v10 = vpop.f32.mrb[73].mxu1 }
 0xbd1   : > { %v7329_v43 = vadd.f32 %v6839_v19, %v14225_v14  ;;  %v7331_v28 = vadd.f32 %v7291_v10, %v14226_v0 }
 0xbd2   : > { %7360 = vst [vmem:[%s11667_s13 + $0x80] sm:$0xff] %v7328_v13  ;;  %7362 = vst [vmem:[%s11667_s13 + $0x90] sm:$0xff] %v7330_v63 }
 0xbd3   : > { %7361 = vst [vmem:[%s11667_s13 + $0x88] sm:$0xff] %v7329_v43  ;;  %7363 = vst [vmem:[%s11667_s13 + $0x98] sm:$0xff] %v7331_v28  ;;  %v6843_v2 = vpop.f32.mrb[74].mxu0  ;;  %v7295_v48 = vpop.f32.mrb[74].mxu1 }
 0xbd4   : > { %v7332_v41 = vadd.f32 %v6843_v2, %v14227_v34  ;;  %v7334_v25 = vadd.f32 %v7295_v48, %v14228_v47  ;;  %v6845_v17 = vpop.f32.mrb[75].mxu0  ;;  %v7297_v38 = vpop.f32.mrb[75].mxu1 }
 0xbd5   : > { %v7333_v18 = vadd.f32 %v6845_v17, %v14230_v32  ;;  %v7335_v56 = vadd.f32 %v7297_v38, %v14231_v44 }
 0xbd6   : > { %7364 = vst [vmem:[%s11667_s13 + $0xa0] sm:$0xff] %v7332_v41  ;;  %7366 = vst [vmem:[%s11667_s13 + $0xb0] sm:$0xff] %v7334_v25 }
 0xbd7   : > { %7365 = vst [vmem:[%s11667_s13 + $0xa8] sm:$0xff] %v7333_v18  ;;  %7367 = vst [vmem:[%s11667_s13 + $0xb8] sm:$0xff] %v7335_v56  ;;  %v6849_v22 = vpop.f32.mrb[76].mxu0  ;;  %v7301_v6 = vpop.f32.mrb[76].mxu1 }
 0xbd8   : > { %v7336_v21 = vadd.f32 %v6849_v22, %v14232_v58  ;;  %v7338_v9 = vadd.f32 %v7301_v6, %v14233_v33  ;;  %v6851_v50 = vpop.f32.mrb[77].mxu0  ;;  %v7303_v24 = vpop.f32.mrb[77].mxu1 }
 0xbd9   : > { %v7337_v7 = vadd.f32 %v6851_v50, %v14234_v37  ;;  %v7339_v52 = vadd.f32 %v7303_v24, %v14235_v20 }
 0xbda   : > { %7368 = vst [vmem:[%s11667_s13 + $0xc0] sm:$0xff] %v7336_v21  ;;  %7370 = vst [vmem:[%s11667_s13 + $0xd0] sm:$0xff] %v7338_v9 }
 0xbdb   : > { %7369 = vst [vmem:[%s11667_s13 + $0xc8] sm:$0xff] %v7337_v7  ;;  %7371 = vst [vmem:[%s11667_s13 + $0xd8] sm:$0xff] %v7339_v52  ;;  %v6855_v59 = vpop.f32.mrb[78].mxu0  ;;  %v7307_v45 = vpop.f32.mrb[78].mxu1 }
 0xbdc   : > { %v7340_v51 = vadd.f32 %v6855_v59, %v14236_v23  ;;  %v7342_v16 = vadd.f32 %v7307_v45, %v14238_v35  ;;  %v6857_v15 = vpop.f32.mrb[79].mxu0  ;;  %v7309_v8 = vpop.f32.mrb[79].mxu1 }
 0xbdd   : > { %v7341_v46 = vadd.f32 %v6857_v15, %v14240_v5  ;;  %v7343_v4 = vadd.f32 %v7309_v8, %v14241_v29 }
 0xbde   : > { %7372 = vst [vmem:[%s11667_s13 + $0xe0] sm:$0xff] %v7340_v51  ;;  %7374 = vst [vmem:[%s11667_s13 + $0xf0] sm:$0xff] %v7342_v16 }
 0xbdf   : > { %7373 = vst [vmem:[%s11667_s13 + $0xe8] sm:$0xff] %v7341_v46  ;;  %7375 = vst [vmem:[%s11667_s13 + $0xf8] sm:$0xff] %v7343_v4 }
 0xbe0   : > { %10695 = shalt.err (!%p10692_p9)
}
 0xbe1   : > { %s10696_s22 = scalar_lea.hbm %s13597_s1, 4096  ;;  %s10700_s17 = scalar_lea.hbm %s14239_s27, 8192 }
 0xbe2   : > { %p10697_p12 = scmp.ne.s32.totalorder %s13597_s1, %s10696_s22  ;;  %p10701_p0 = scmp.lt.u32.totalorder %s13597_s1, %s14239_s27 }
 0xbe3   : > { %p10702_p2 = scmp.lt.u32.totalorder %s10700_s17, %s10696_s22  ;;  %p10704_p7 = scmp.lt.u32.totalorder %s10696_s22, %s13597_s1 }
 0xbe4   : > { %p10698_p13 = pnand %p10697_p12, %p14242_p10 }
 0xbe5   : > { %p10703_p3 = por %p10702_p2, %p10701_p0 }
 0xbe6   : > { %p10699_p5 = pneg %p10698_p13 }
 0xbe7   : > { %p10705_p11 = por %p10704_p7, %p10703_p3 }
 0xbe9   : > { %p10706_p4 = pnand %p10705_p11, %p10699_p5 }
 0xbeb   : > { %10709 = shalt.err (!%p10706_p4)
}
 0xbec   : > { %s10804_s21 = smov 512   ;;  %s10805_s7 = smov 32  }
 0xbed   : > { %9963 = dma.vmem_to_hbm [thread:$0]  (%p14242_p10), %s13599_s5, 4096, %s13597_s1, %s7377_s20, %s10804_s21, %s10804_s21, %s10805_s7  }
 0xbee PF: > { %s14243_s12 = sld [smem:[#allocation29_spill]]  ;;  %s14244_s4 = sld [smem:[#allocation36_spill]] }
 0xbef   : > { %p14246_p6 = scmp.ge.s32.totalorder %s10776_s16, 2 }
 0xbf4   : > { %s7405_s23 = sand.u32 1, %s14243_s12   ;;  %p14245_p1 = scmp.ne.s32.totalorder %s14244_s4, 0 }
 0xbf5   : > { %s7406_s10 = scalar_lea.sflag [#allocation5], %s7405_s23 }
 0xbf6   : > { %p9998_p8 = pnand %p14246_p6, %p14245_p1 }
 0xbf8   : > { %10759 = dma.done.wait (!%p9998_p8), %s7406_s10, 4096  }
 0xbf9   : > { %10761 = vsyncadd (!%p9998_p8), %s7406_s10, 4294963200  ;;  %s14247_s16 = sld [smem:[#allocation32_spill]]  ;;  %s14248_s19 = sld [smem:[#allocation30_spill]] }
 0xbfa   : > { %s14249_s15 = sld [smem:[#allocation33_spill]]  ;;  %s14250_s13 = smov %s10768_s14 }
 0xbff   : > { %p32_p9 = scmp.ge.s32.totalorder %s14247_s16, 4   ;;  %s14251_s14 = smov %s14248_s19 }
 0xc01   :  { %34 = sbr.rel (!%p32_p9) target bundleno = 18 (0x12), region = 186 }
 0xc08   :  { %7411 = vsyncpa [#allocation4], 1 }
 0xc09   :  { %7413 = vsyncpa [#allocation4 + $0x1], 1 }
 0xc0a   :  { %7414 = vsyncpa [#allocation7], 1 }
 0xc0b   :  { %7416 = vsyncpa [#allocation7 + $0x1], 1 }
 0xc0c   :  { %7417 = vsyncpa [#allocation10], 1 }
 0xc0d   :  { %7419 = vsyncpa [#allocation10 + $0x1], 1 }
 0xc0e   :  { %7420 = vsyncpa [#allocation13], 1 }
 0xc0f   :  { %7421 = vsyncpa [#allocation16], 1 }
 0xc10   :  { %7422 = vsyncpa [#allocation19], 1 }
 0xc11   :  { %7423 = vsyncpa [#allocation5], 1 }
 0xc12   :  { %7425 = vsyncpa [#allocation5 + $0x1], 1 }

</bundles_post_ra>
